<compile_context>
chip_gen: v7x
topology: tpu7x:2x2x1
jax: 0.10.0
libtpu: 0.0.40
codegen_flags: <defaults>
</compile_context>

<pallas_src>
import math

import jax
import jax.numpy as jnp
from jax.experimental import pallas as pl
from jax.experimental.pallas import tpu as pltpu


# --------------------------------------------------------------------------
# Fused encoder kernel (built per static layer configuration)
# --------------------------------------------------------------------------
def _make_fused_kernel(conv_meta, flat_meta, n_lin):
    """conv_meta: conv blocks (ReLU + MaxPool1d(2)).  flat_meta: flatten conv.
    n_lin: number of Linear+Tanh layers."""
    n_conv = len(conv_meta)
    n_params = 2 * (n_conv + 1 + n_lin)

    def kernel(x_ref, *args):
        p_refs = args[:n_params]          # interleaved (weight, bias) refs
        o_ref = args[n_params]            # (bt, F_out) output

        bt = x_ref.shape[0]
        h = x_ref[...]                    # (bt, L0, C_in), f32 activations

        # ---- conv blocks: im2col (bf16, one cast/layer) + ONE matmul ----
        for li, m in enumerate(conv_meta):
            w_ref = p_refs[2 * li]        # (K*cin, cout), bf16
            b_ref = p_refs[2 * li + 1]    # (1, cout),     f32
            K, pad = m["K"], m["pad"]
            L_in, L_out = m["L_in"], m["L_out"]
            cin, cout = m["c_in"], m["c_out"]

            hb = h.astype(jnp.bfloat16)   # single cast per layer
            if pad > 0:                   # zero-pad only the edges (bf16)
                zpad = jnp.zeros((bt, pad, cin), jnp.bfloat16)
                hb = jnp.concatenate([zpad, hb, zpad], axis=1)

            # im2col slab: col[b, l, k*cin + c] = x_padded[b, l + k, c]
            cols = jnp.concatenate(
                [hb[:, k:k + L_out, :] for k in range(K)], axis=-1)

            # single MXU matmul, contraction = K*cin, f32 accumulate
            acc = jnp.dot(cols.reshape(bt * L_out, K * cin), w_ref[...],
                          preferred_element_type=jnp.float32)
            acc = jnp.maximum(acc + b_ref[...], 0.0)        # bias + ReLU (f32)
            acc3 = acc.reshape(bt, L_out, cout)

            # MaxPool1d(2): vectorized pairwise max (floor, like PyTorch)
            l_pool = L_out // 2
            if 2 * l_pool != L_out:
                acc3 = acc3[:, : 2 * l_pool, :]
            h = jnp.max(acc3.reshape(bt, l_pool, 2, cout), axis=2)

        # ---- flatten conv: only position 0 is consumed -> one matmul ----
        Kf, cinf = flat_meta["K"], flat_meta["c_in"]
        wf_ref = p_refs[2 * n_conv]       # (Kf*cinf, coutf), bf16
        bf_ref = p_refs[2 * n_conv + 1]   # (1, coutf),       f32
        zf = h[:, :Kf, :].reshape(bt, Kf * cinf).astype(jnp.bfloat16)
        z = jnp.maximum(
            jnp.dot(zf, wf_ref[...], preferred_element_type=jnp.float32)
            + bf_ref[...], 0.0)

        # ---- linear + tanh layers (tanh goes to the EUP slot) -----------
        for j in range(n_lin):
            w_ref = p_refs[2 * (n_conv + 1) + 2 * j]      # (F_in, F_out) bf16
            b_ref = p_refs[2 * (n_conv + 1) + 2 * j + 1]  # (1, F_out)    f32
            z = jnp.tanh(
                jnp.dot(z.astype(jnp.bfloat16), w_ref[...],
                        preferred_element_type=jnp.float32) + b_ref[...])

        o_ref[...] = z.astype(o_ref.dtype)

    return kernel


# --------------------------------------------------------------------------
# Parameter init (deterministic)
# --------------------------------------------------------------------------
def init_ecg_encoder_params(key, *, window, in_channels, conv_channels,
                            conv_kernels, linear_channels):
    keys = iter(jax.random.split(
        key, 4 * (len(conv_channels) + len(linear_channels)) + 8))
    params = {}

    # in_layer + conv_layers (block_type='single' -> one Conv1dBlock each)
    conv_blocks = []
    chans = (in_channels,) + tuple(conv_channels)
    for i in range(len(conv_channels)):
        cin, cout, k = chans[i], chans[i + 1], conv_kernels[i]
        scale = 1.0 / math.sqrt(cin * k)
        w = jax.random.normal(next(keys), (k, cin, cout), jnp.float32) * scale
        b = jax.random.normal(next(keys), (1, cout), jnp.float32) * scale
        conv_blocks.append((w, b, k // 2))   # padding = kernel_size // 2
    params["conv_blocks"] = conv_blocks

    # flatten_layer: kernel = window // 2^len(conv_channels), padding 0, no pool
    out_kernel = window // 2 ** len(conv_channels)
    assert out_kernel >= 1, "Encoder output kernel < 1"
    cin, cout = conv_channels[-1], linear_channels[0]
    scale = 1.0 / math.sqrt(cin * out_kernel)
    wf = jax.random.normal(next(keys), (out_kernel, cin, cout), jnp.float32) * scale
    bf = jax.random.normal(next(keys), (1, cout), jnp.float32) * scale
    params["flatten"] = (wf, bf)

    # linear_layers: Linear + Tanh per extra linear channel
    linears = []
    for i in range(1, len(linear_channels)):
        fin, fout = linear_channels[i - 1], linear_channels[i]
        scale = 1.0 / math.sqrt(fin)
        w = jax.random.normal(next(keys), (fin, fout), jnp.float32) * scale
        b = jax.random.normal(next(keys), (1, fout), jnp.float32) * scale
        linears.append((w, b))
    params["linears"] = linears
    return params


# --------------------------------------------------------------------------
# Batch-tile selection from a VMEM byte budget + pipelining-depth target
# --------------------------------------------------------------------------
def _choose_bt(B, per_batch_bytes, budget_bytes):
    # bt must divide B and be a multiple of 8 (or == B) so the (B, F_out)
    # output block keeps an (8,128)-friendly sublane extent.
    cands = sorted({d for d in range(1, B + 1)
                    if B % d == 0 and (d % 8 == 0 or d == B)})
    fit = [d for d in cands if d * per_batch_bytes <= budget_bytes]
    if not fit:
        fit = [cands[0]]
    for min_steps in (8, 4, 2):           # prefer several grid steps per core
        good = [d for d in fit if B // d >= min_steps]
        if good:
            return max(good)
    return max(fit)


# --------------------------------------------------------------------------
# Fused forward wrapper
# --------------------------------------------------------------------------
def ecg_encoder_forward(params, x_ncl):
    """x_ncl: (B, C_in, L) float32 (PyTorch NCL). Returns (B, linear_channels[-1])."""
    B, c_in0, L0 = x_ncl.shape
    x = jnp.transpose(x_ncl, (0, 2, 1)).astype(jnp.float32)   # NCL -> NLC

    # ---- static layer metadata + flat parameter list (matmul weights bf16,
    #      conv/flatten weights pre-reshaped to (K*cin, cout) on the host) ----
    conv_meta = []
    flat_inputs = []
    L_cur = L0
    for (w, b, pad) in params["conv_blocks"]:
        K, cin, cout = w.shape
        L_out = L_cur + 2 * pad - K + 1
        conv_meta.append(dict(K=K, pad=pad, c_in=cin, c_out=cout,
                              L_in=L_cur, L_out=L_out))
        flat_inputs += [w.reshape(K * cin, cout).astype(jnp.bfloat16),
                        b.astype(jnp.float32)]
        L_cur = L_out // 2                                     # MaxPool1d(2)

    wf, bf = params["flatten"]
    Kf, cinf, coutf = wf.shape
    assert L_cur >= Kf, f"flatten kernel {Kf} larger than remaining length {L_cur}"
    flat_meta = dict(K=Kf, c_in=cinf, c_out=coutf)
    flat_inputs += [wf.reshape(Kf * cinf, coutf).astype(jnp.bfloat16),
                    bf.astype(jnp.float32)]

    for (w, b) in params["linears"]:
        flat_inputs += [w.astype(jnp.bfloat16), b.astype(jnp.float32)]
    n_lin = len(params["linears"])
    f_out = params["linears"][-1][0].shape[1] if n_lin else coutf

    # ---- VMEM budget -> batch tile (safe on v5e/v6e/v7x scoped limits) ----
    VMEM_LIMIT = 32 * 1024 * 1024          # >= v5e default (16 MiB), == v6e/v7x default
    budget = VMEM_LIMIT // 2               # leave headroom for spills/regalloc
    per_b = 2 * L0 * c_in0 * 4             # double-buffered f32 input block
    for m in conv_meta:
        per_b += m["L_out"] * m["K"] * m["c_in"] * 2        # bf16 im2col slab
    act_max = max(m["L_out"] * m["c_out"] for m in conv_meta)
    per_b += 3 * act_max * 4               # f32 acc + carried activation
    bt = _choose_bt(B, per_b, budget)
    grid = (B // bt,)

    in_specs = [pl.BlockSpec((bt, L0, c_in0), lambda i: (i, 0, 0))]
    for arr in flat_inputs:
        in_specs.append(
            pl.BlockSpec(arr.shape, lambda i, _n=arr.ndim: (0,) * _n))
    out_spec = pl.BlockSpec((bt, f_out), lambda i: (i, 0))

    kernel = _make_fused_kernel(conv_meta, flat_meta, n_lin)

    return pl.pallas_call(
        kernel,
        out_shape=jax.ShapeDtypeStruct((B, f_out), jnp.float32),
        grid_spec=pltpu.PrefetchScalarGridSpec(
            num_scalar_prefetch=0,
            grid=grid,
            in_specs=in_specs,
            out_specs=out_spec,
        ),
        compiler_params=pltpu.CompilerParams(
            dimension_semantics=("parallel",),
            vmem_limit_bytes=VMEM_LIMIT),
    )(x, *flat_inputs)


# --------------------------------------------------------------------------
# Pure-JAX reference (same bf16-operand / f32-accumulate arithmetic)
# --------------------------------------------------------------------------
def reference_forward(params, x_ncl):
    h = jnp.transpose(x_ncl, (0, 2, 1)).astype(jnp.float32)
    B = h.shape[0]

    for (w, b, pad) in params["conv_blocks"]:
        K, cin, cout = w.shape
        hp = jnp.pad(h, ((0, 0), (pad, pad), (0, 0)))
        L_out = hp.shape[1] - K + 1
        cols = jnp.concatenate([hp[:, k:k + L_out, :] for k in range(K)], axis=-1)
        acc = jnp.dot(cols.astype(jnp.bfloat16).reshape(B * L_out, K * cin),
                      w.reshape(K * cin, cout).astype(jnp.bfloat16),
                      preferred_element_type=jnp.float32)
        acc = jnp.maximum(acc + b, 0.0).reshape(B, L_out, cout)
        lp = L_out // 2
        h = acc[:, :2 * lp, :].reshape(B, lp, 2, cout).max(axis=2)

    wf, bf = params["flatten"]
    Kf, cinf, coutf = wf.shape
    z = h[:, :Kf, :].reshape(B, Kf * cinf).astype(jnp.bfloat16)
    z = jnp.maximum(
        jnp.dot(z, wf.reshape(Kf * cinf, coutf).astype(jnp.bfloat16),
                preferred_element_type=jnp.float32) + bf, 0.0)
    for (w, b) in params["linears"]:
        z = jnp.tanh(jnp.dot(z.astype(jnp.bfloat16), w.astype(jnp.bfloat16),
                             preferred_element_type=jnp.float32) + b)
    return z


if __name__ == "__main__":
    # Small but structurally faithful config (same module, scaled down);
    # batch=32 so the grid has 4 parallel steps (pipelining / dual-TC on v7x).
    window = 64
    in_channels = 4
    conv_channels = (8, 16, 16)
    conv_kernels = (5, 3, 3)
    linear_channels = (32, 32)
    batch = 32

    key = jax.random.PRNGKey(0)
    pkey, xkey = jax.random.split(key)
    params = init_ecg_encoder_params(
        pkey,
        window=window,
        in_channels=in_channels,
        conv_channels=conv_channels,
        conv_kernels=conv_kernels,
        linear_channels=linear_channels,
    )
    x = jax.random.normal(xkey, (batch, in_channels, window), jnp.float32)

    out = ecg_encoder_forward(params, x)
    out = jax.block_until_ready(out)

    ref = jax.block_until_ready(reference_forward(params, x))

    assert out.shape == (batch, linear_channels[-1]), out.shape
    assert bool(jnp.all(jnp.isfinite(out)))
    assert bool(jnp.all(jnp.abs(out) <= 1.0 + 1e-6))        # final tanh bound
    assert bool(jnp.allclose(out, ref, atol=2e-3, rtol=2e-3)), \
        float(jnp.max(jnp.abs(out - ref)))
    print("KERNEL_OK")
</pallas_src>

<mosaic_0001>
module attributes {stable_mosaic.version = 11 : i64} {
  func.func @kernel(%arg0: i32, %arg1: memref<8x64x4xf32, #tpu.memory_space<vmem>>, %arg2: memref<20x8xbf16, #tpu.memory_space<vmem>>, %arg3: memref<1x8xf32, #tpu.memory_space<vmem>>, %arg4: memref<24x16xbf16, #tpu.memory_space<vmem>>, %arg5: memref<1x16xf32, #tpu.memory_space<vmem>>, %arg6: memref<48x16xbf16, #tpu.memory_space<vmem>>, %arg7: memref<1x16xf32, #tpu.memory_space<vmem>>, %arg8: memref<128x32xbf16, #tpu.memory_space<vmem>>, %arg9: memref<1x32xf32, #tpu.memory_space<vmem>>, %arg10: memref<32x32xbf16, #tpu.memory_space<vmem>>, %arg11: memref<1x32xf32, #tpu.memory_space<vmem>>, %arg12: memref<8x32xf32, #tpu.memory_space<vmem>>) attributes {dimension_semantics = [#tpu.dimension_semantics<parallel>], iteration_bounds = array<i64: 4>, scalar_prefetch = 0 : i64, scratch_operands = 0 : i64, tpu.core_type = #tpu.core_type<tc>, window_params = [{transform_indices = @transform_0, window_bounds = array<i64: 8, 64, 4>}, {pipeline_mode = #tpu.pipeline_mode<synchronous>, transform_indices = @transform_1, window_bounds = array<i64: 20, 8>}, {pipeline_mode = #tpu.pipeline_mode<synchronous>, transform_indices = @transform_2, window_bounds = array<i64: 1, 8>}, {pipeline_mode = #tpu.pipeline_mode<synchronous>, transform_indices = @transform_3, window_bounds = array<i64: 24, 16>}, {pipeline_mode = #tpu.pipeline_mode<synchronous>, transform_indices = @transform_4, window_bounds = array<i64: 1, 16>}, {pipeline_mode = #tpu.pipeline_mode<synchronous>, transform_indices = @transform_5, window_bounds = array<i64: 48, 16>}, {pipeline_mode = #tpu.pipeline_mode<synchronous>, transform_indices = @transform_6, window_bounds = array<i64: 1, 16>}, {pipeline_mode = #tpu.pipeline_mode<synchronous>, transform_indices = @transform_7, window_bounds = array<i64: 128, 32>}, {pipeline_mode = #tpu.pipeline_mode<synchronous>, transform_indices = @transform_8, window_bounds = array<i64: 1, 32>}, {pipeline_mode = #tpu.pipeline_mode<synchronous>, transform_indices = @transform_9, window_bounds = array<i64: 32, 32>}, {pipeline_mode = #tpu.pipeline_mode<synchronous>, transform_indices = @transform_10, window_bounds = array<i64: 1, 32>}, {transform_indices = @transform_11, window_bounds = array<i64: 8, 32>}]} {
    %c0 = arith.constant 0 : index
    %c0_0 = arith.constant 0 : index
    %c0_1 = arith.constant 0 : index
    %0 = vector.load %arg1[%c0, %c0_0, %c0_1] : memref<8x64x4xf32, #tpu.memory_space<vmem>>, vector<8x64x4xf32>
    %1 = arith.truncf %0 : vector<8x64x4xf32> to vector<8x64x4xbf16>
    %cst = arith.constant 0.000000e+00 : bf16
    %2 = vector.broadcast %cst : bf16 to vector<8x2x4xbf16>
    %3 = tpu.concatenate %2, %1, %2 in 1 : vector<8x2x4xbf16>, vector<8x64x4xbf16>, vector<8x2x4xbf16> -> vector<8x68x4xbf16>
    %4 = vector.extract_strided_slice %3 {offsets = [0, 0, 0], sizes = [8, 64, 4], strides = [1, 1, 1]} : vector<8x68x4xbf16> to vector<8x64x4xbf16>
    %5 = vector.extract_strided_slice %3 {offsets = [0, 1, 0], sizes = [8, 64, 4], strides = [1, 1, 1]} : vector<8x68x4xbf16> to vector<8x64x4xbf16>
    %6 = vector.extract_strided_slice %3 {offsets = [0, 2, 0], sizes = [8, 64, 4], strides = [1, 1, 1]} : vector<8x68x4xbf16> to vector<8x64x4xbf16>
    %7 = vector.extract_strided_slice %3 {offsets = [0, 3, 0], sizes = [8, 64, 4], strides = [1, 1, 1]} : vector<8x68x4xbf16> to vector<8x64x4xbf16>
    %8 = vector.extract_strided_slice %3 {offsets = [0, 4, 0], sizes = [8, 64, 4], strides = [1, 1, 1]} : vector<8x68x4xbf16> to vector<8x64x4xbf16>
    %9 = tpu.concatenate %4, %5, %6, %7, %8 in 2 : vector<8x64x4xbf16>, vector<8x64x4xbf16>, vector<8x64x4xbf16>, vector<8x64x4xbf16>, vector<8x64x4xbf16> -> vector<8x64x20xbf16>
    %10 = vector.shape_cast %9 : vector<8x64x20xbf16> to vector<512x20xbf16>
    %c0_2 = arith.constant 0 : index
    %c0_3 = arith.constant 0 : index
    %11 = vector.load %arg2[%c0_2, %c0_3] : memref<20x8xbf16, #tpu.memory_space<vmem>>, vector<20x8xbf16>
    %cst_4 = arith.constant dense<0.000000e+00> : vector<512x8xf32>
    %12 = tpu.matmul %10, %11, %cst_4 {dimension_numbers = #tpu.dot_dimension_numbers<[1], [0], [0], [1], [0, 0, 1, 1], [], []>} : vector<512x20xbf16>, vector<20x8xbf16>, vector<512x8xf32> -> vector<512x8xf32>
    %c0_5 = arith.constant 0 : index
    %c0_6 = arith.constant 0 : index
    %13 = vector.load %arg3[%c0_5, %c0_6] : memref<1x8xf32, #tpu.memory_space<vmem>>, vector<1x8xf32>
    %14 = vector.broadcast %13 : vector<1x8xf32> to vector<512x8xf32>
    %15 = arith.addf %12, %14 : vector<512x8xf32>
    %cst_7 = arith.constant 0.000000e+00 : f32
    %16 = vector.broadcast %cst_7 : f32 to vector<512x8xf32>
    %17 = arith.maximumf %15, %16 : vector<512x8xf32>
    %18 = vector.shape_cast %17 : vector<512x8xf32> to vector<8x64x8xf32>
    %19 = vector.shape_cast %18 : vector<8x64x8xf32> to vector<8x32x2x8xf32>
    %cst_8 = arith.constant dense<0xFF800000> : vector<8x32x8xf32>
    %20 = vector.multi_reduction <maximumf>, %19, %cst_8 [2] : vector<8x32x2x8xf32> to vector<8x32x8xf32>
    %21 = arith.truncf %20 : vector<8x32x8xf32> to vector<8x32x8xbf16>
    %cst_9 = arith.constant 0.000000e+00 : bf16
    %22 = vector.broadcast %cst_9 : bf16 to vector<8x1x8xbf16>
    %23 = tpu.concatenate %22, %21, %22 in 1 : vector<8x1x8xbf16>, vector<8x32x8xbf16>, vector<8x1x8xbf16> -> vector<8x34x8xbf16>
    %24 = vector.extract_strided_slice %23 {offsets = [0, 0, 0], sizes = [8, 32, 8], strides = [1, 1, 1]} : vector<8x34x8xbf16> to vector<8x32x8xbf16>
    %25 = vector.extract_strided_slice %23 {offsets = [0, 1, 0], sizes = [8, 32, 8], strides = [1, 1, 1]} : vector<8x34x8xbf16> to vector<8x32x8xbf16>
    %26 = vector.extract_strided_slice %23 {offsets = [0, 2, 0], sizes = [8, 32, 8], strides = [1, 1, 1]} : vector<8x34x8xbf16> to vector<8x32x8xbf16>
    %27 = tpu.concatenate %24, %25, %26 in 2 : vector<8x32x8xbf16>, vector<8x32x8xbf16>, vector<8x32x8xbf16> -> vector<8x32x24xbf16>
    %28 = vector.shape_cast %27 : vector<8x32x24xbf16> to vector<256x24xbf16>
    %c0_10 = arith.constant 0 : index
    %c0_11 = arith.constant 0 : index
    %29 = vector.load %arg4[%c0_10, %c0_11] : memref<24x16xbf16, #tpu.memory_space<vmem>>, vector<24x16xbf16>
    %cst_12 = arith.constant dense<0.000000e+00> : vector<256x16xf32>
    %30 = tpu.matmul %28, %29, %cst_12 {dimension_numbers = #tpu.dot_dimension_numbers<[1], [0], [0], [1], [0, 0, 1, 1], [], []>} : vector<256x24xbf16>, vector<24x16xbf16>, vector<256x16xf32> -> vector<256x16xf32>
    %c0_13 = arith.constant 0 : index
    %c0_14 = arith.constant 0 : index
    %31 = vector.load %arg5[%c0_13, %c0_14] : memref<1x16xf32, #tpu.memory_space<vmem>>, vector<1x16xf32>
    %32 = vector.broadcast %31 : vector<1x16xf32> to vector<256x16xf32>
    %33 = arith.addf %30, %32 : vector<256x16xf32>
    %cst_15 = arith.constant 0.000000e+00 : f32
    %34 = vector.broadcast %cst_15 : f32 to vector<256x16xf32>
    %35 = arith.maximumf %33, %34 : vector<256x16xf32>
    %36 = vector.shape_cast %35 : vector<256x16xf32> to vector<8x32x16xf32>
    %37 = vector.shape_cast %36 : vector<8x32x16xf32> to vector<8x16x2x16xf32>
    %cst_16 = arith.constant dense<0xFF800000> : vector<8x16x16xf32>
    %38 = vector.multi_reduction <maximumf>, %37, %cst_16 [2] : vector<8x16x2x16xf32> to vector<8x16x16xf32>
    %39 = arith.truncf %38 : vector<8x16x16xf32> to vector<8x16x16xbf16>
    %cst_17 = arith.constant 0.000000e+00 : bf16
    %40 = vector.broadcast %cst_17 : bf16 to vector<8x1x16xbf16>
    %41 = tpu.concatenate %40, %39, %40 in 1 : vector<8x1x16xbf16>, vector<8x16x16xbf16>, vector<8x1x16xbf16> -> vector<8x18x16xbf16>
    %42 = vector.extract_strided_slice %41 {offsets = [0, 0, 0], sizes = [8, 16, 16], strides = [1, 1, 1]} : vector<8x18x16xbf16> to vector<8x16x16xbf16>
    %43 = vector.extract_strided_slice %41 {offsets = [0, 1, 0], sizes = [8, 16, 16], strides = [1, 1, 1]} : vector<8x18x16xbf16> to vector<8x16x16xbf16>
    %44 = vector.extract_strided_slice %41 {offsets = [0, 2, 0], sizes = [8, 16, 16], strides = [1, 1, 1]} : vector<8x18x16xbf16> to vector<8x16x16xbf16>
    %45 = tpu.concatenate %42, %43, %44 in 2 : vector<8x16x16xbf16>, vector<8x16x16xbf16>, vector<8x16x16xbf16> -> vector<8x16x48xbf16>
    %46 = vector.shape_cast %45 : vector<8x16x48xbf16> to vector<128x48xbf16>
    %c0_18 = arith.constant 0 : index
    %c0_19 = arith.constant 0 : index
    %47 = vector.load %arg6[%c0_18, %c0_19] : memref<48x16xbf16, #tpu.memory_space<vmem>>, vector<48x16xbf16>
    %cst_20 = arith.constant dense<0.000000e+00> : vector<128x16xf32>
    %48 = tpu.matmul %46, %47, %cst_20 {dimension_numbers = #tpu.dot_dimension_numbers<[1], [0], [0], [1], [0, 0, 1, 1], [], []>} : vector<128x48xbf16>, vector<48x16xbf16>, vector<128x16xf32> -> vector<128x16xf32>
    %c0_21 = arith.constant 0 : index
    %c0_22 = arith.constant 0 : index
    %49 = vector.load %arg7[%c0_21, %c0_22] : memref<1x16xf32, #tpu.memory_space<vmem>>, vector<1x16xf32>
    %50 = vector.broadcast %49 : vector<1x16xf32> to vector<128x16xf32>
    %51 = arith.addf %48, %50 : vector<128x16xf32>
    %cst_23 = arith.constant 0.000000e+00 : f32
    %52 = vector.broadcast %cst_23 : f32 to vector<128x16xf32>
    %53 = arith.maximumf %51, %52 : vector<128x16xf32>
    %54 = vector.shape_cast %53 : vector<128x16xf32> to vector<8x16x16xf32>
    %55 = vector.shape_cast %54 : vector<8x16x16xf32> to vector<8x8x2x16xf32>
    %cst_24 = arith.constant dense<0xFF800000> : vector<8x8x16xf32>
    %56 = vector.multi_reduction <maximumf>, %55, %cst_24 [2] : vector<8x8x2x16xf32> to vector<8x8x16xf32>
    %57 = vector.shape_cast %56 : vector<8x8x16xf32> to vector<8x128xf32>
    %58 = arith.truncf %57 : vector<8x128xf32> to vector<8x128xbf16>
    %c0_25 = arith.constant 0 : index
    %c0_26 = arith.constant 0 : index
    %59 = vector.load %arg8[%c0_25, %c0_26] : memref<128x32xbf16, #tpu.memory_space<vmem>>, vector<128x32xbf16>
    %cst_27 = arith.constant dense<0.000000e+00> : vector<8x32xf32>
    %60 = tpu.matmul %58, %59, %cst_27 {dimension_numbers = #tpu.dot_dimension_numbers<[1], [0], [0], [1], [0, 0, 1, 1], [], []>} : vector<8x128xbf16>, vector<128x32xbf16>, vector<8x32xf32> -> vector<8x32xf32>
    %c0_28 = arith.constant 0 : index
    %c0_29 = arith.constant 0 : index
    %61 = vector.load %arg9[%c0_28, %c0_29] : memref<1x32xf32, #tpu.memory_space<vmem>>, vector<1x32xf32>
    %62 = vector.broadcast %61 : vector<1x32xf32> to vector<8x32xf32>
    %63 = arith.addf %60, %62 : vector<8x32xf32>
    %cst_30 = arith.constant 0.000000e+00 : f32
    %64 = vector.broadcast %cst_30 : f32 to vector<8x32xf32>
    %65 = arith.maximumf %63, %64 : vector<8x32xf32>
    %66 = arith.truncf %65 : vector<8x32xf32> to vector<8x32xbf16>
    %c0_31 = arith.constant 0 : index
    %c0_32 = arith.constant 0 : index
    %67 = vector.load %arg10[%c0_31, %c0_32] : memref<32x32xbf16, #tpu.memory_space<vmem>>, vector<32x32xbf16>
    %cst_33 = arith.constant dense<0.000000e+00> : vector<8x32xf32>
    %68 = tpu.matmul %66, %67, %cst_33 {dimension_numbers = #tpu.dot_dimension_numbers<[1], [0], [0], [1], [0, 0, 1, 1], [], []>} : vector<8x32xbf16>, vector<32x32xbf16>, vector<8x32xf32> -> vector<8x32xf32>
    %c0_34 = arith.constant 0 : index
    %c0_35 = arith.constant 0 : index
    %69 = vector.load %arg11[%c0_34, %c0_35] : memref<1x32xf32, #tpu.memory_space<vmem>>, vector<1x32xf32>
    %70 = vector.broadcast %69 : vector<1x32xf32> to vector<8x32xf32>
    %71 = arith.addf %68, %70 : vector<8x32xf32>
    %72 = math.tanh %71 : vector<8x32xf32>
    %c0_36 = arith.constant 0 : index
    %c0_37 = arith.constant 0 : index
    %73 = vector.load %arg12[%c0_36, %c0_37] : memref<8x32xf32, #tpu.memory_space<vmem>>, vector<8x32xf32>
    tpu.vector_store %arg12[%c0_36, %c0_37], %72 {strides = array<i32>} : memref<8x32xf32, #tpu.memory_space<vmem>>, vector<8x32xf32>,
    return
  }
  func.func @transform_0(%arg0: i32) -> (i32, i32, i32) {
    %c0_i32 = arith.constant 0 : i32
    %c0_i32_0 = arith.constant 0 : i32
    %c0_i32_1 = arith.constant 0 : i32
    return %arg0, %c0_i32, %c0_i32_0 : i32, i32, i32
  }
  func.func @transform_1(%arg0: i32) -> (i32, i32) {
    %c0_i32 = arith.constant 0 : i32
    %c0_i32_0 = arith.constant 0 : i32
    %c0_i32_1 = arith.constant 0 : i32
    return %c0_i32, %c0_i32_0 : i32, i32
  }
  func.func @transform_2(%arg0: i32) -> (i32, i32) {
    %c0_i32 = arith.constant 0 : i32
    %c0_i32_0 = arith.constant 0 : i32
    %c0_i32_1 = arith.constant 0 : i32
    return %c0_i32, %c0_i32_0 : i32, i32
  }
  func.func @transform_3(%arg0: i32) -> (i32, i32) {
    %c0_i32 = arith.constant 0 : i32
    %c0_i32_0 = arith.constant 0 : i32
    %c0_i32_1 = arith.constant 0 : i32
    return %c0_i32, %c0_i32_0 : i32, i32
  }
  func.func @transform_4(%arg0: i32) -> (i32, i32) {
    %c0_i32 = arith.constant 0 : i32
    %c0_i32_0 = arith.constant 0 : i32
    %c0_i32_1 = arith.constant 0 : i32
    return %c0_i32, %c0_i32_0 : i32, i32
  }
  func.func @transform_5(%arg0: i32) -> (i32, i32) {
    %c0_i32 = arith.constant 0 : i32
    %c0_i32_0 = arith.constant 0 : i32
    %c0_i32_1 = arith.constant 0 : i32
    return %c0_i32, %c0_i32_0 : i32, i32
  }
  func.func @transform_6(%arg0: i32) -> (i32, i32) {
    %c0_i32 = arith.constant 0 : i32
    %c0_i32_0 = arith.constant 0 : i32
    %c0_i32_1 = arith.constant 0 : i32
    return %c0_i32, %c0_i32_0 : i32, i32
  }
  func.func @transform_7(%arg0: i32) -> (i32, i32) {
    %c0_i32 = arith.constant 0 : i32
    %c0_i32_0 = arith.constant 0 : i32
    %c0_i32_1 = arith.constant 0 : i32
    return %c0_i32, %c0_i32_0 : i32, i32
  }
  func.func @transform_8(%arg0: i32) -> (i32, i32) {
    %c0_i32 = arith.constant 0 : i32
    %c0_i32_0 = arith.constant 0 : i32
    %c0_i32_1 = arith.constant 0 : i32
    return %c0_i32, %c0_i32_0 : i32, i32
  }
  func.func @transform_9(%arg0: i32) -> (i32, i32) {
    %c0_i32 = arith.constant 0 : i32
    %c0_i32_0 = arith.constant 0 : i32
    %c0_i32_1 = arith.constant 0 : i32
    return %c0_i32, %c0_i32_0 : i32, i32
  }
  func.func @transform_10(%arg0: i32) -> (i32, i32) {
    %c0_i32 = arith.constant 0 : i32
    %c0_i32_0 = arith.constant 0 : i32
    %c0_i32_1 = arith.constant 0 : i32
    return %c0_i32, %c0_i32_0 : i32, i32
  }
  func.func @transform_11(%arg0: i32) -> (i32, i32) {
    %c0_i32 = arith.constant 0 : i32
    %c0_i32_0 = arith.constant 0 : i32
    return %arg0, %c0_i32 : i32, i32
  }
}

</mosaic_0001>

<bundles_post_ra>
// kernel: tpu_custom_call.1
= control target key start
LH: loop header
LB: loop body
LE: loop exit
PB: predicated region body
PF: predicated region fallthrough
CT: control target
= control target key end

     0   :  { %16 = vsyncpa [#allocation3], 0  ;;  %s15551_s0 = inlined_call_operand.vmem [shape: f32[32,64,4], index: 0, kind: input, shape index: {}]   ;;  %s15552_s1 = inlined_call_operand.vmem [shape: bf16[20,8], index: 1, kind: input, shape index: {}]   ;;  %s15553_s2 = inlined_call_operand.vmem [shape: f32[1,8], index: 2, kind: input, shape index: {}]   ;;  %s15554_s3 = inlined_call_operand.vmem [shape: bf16[24,16], index: 3, kind: input, shape index: {}]   ;;  %s15555_s4 = inlined_call_operand.vmem [shape: f32[1,16], index: 4, kind: input, shape index: {}]   ;;  %s15556_s5 = inlined_call_operand.vmem [shape: bf16[48,16], index: 5, kind: input, shape index: {}]   ;;  %s15557_s6 = inlined_call_operand.vmem [shape: f32[1,16], index: 6, kind: input, shape index: {}]   ;;  %s15558_s7 = inlined_call_operand.vmem [shape: bf16[128,32], index: 7, kind: input, shape index: {}]   ;;  %s15559_s8 = inlined_call_operand.vmem [shape: f32[1,32], index: 8, kind: input, shape index: {}]   ;;  %s15560_s9 = inlined_call_operand.vmem [shape: bf16[32,32], index: 9, kind: input, shape index: {}]   ;;  %s15561_s10 = inlined_call_operand.vmem [shape: f32[1,32], index: 10, kind: input, shape index: {}]   ;;  %s15562_s11 = inlined_call_operand.hbm [shape: f32[32,32], index: 11, kind: output, shape index: {}]  }
   0x1   :  { %18 = vsyncpa [#allocation3 + $0x1], 0  ;;  %s11450_s17 = smov 0   ;;  %s11452_s18 = smov 0  }
   0x2   :  { %s11454_s19 = smov 0   ;;  %s11456_s20 = smov 0  }
   0x3 LB: > { %s11471_s21 = sadd.s32 4294967295, %s11373_s20   ;;  %s10871_s22 = sadd.s32 4294967294, %s11373_s20   ;;  %s11373_s20 = sphi %s11456_s20, %s15655_s20   ;;  %s11369_s19 = sphi %s11454_s19, %s15654_s19   ;;  %s11365_s18 = sphi %s11452_s18, %s15653_s18   ;;  %s11361_s17 = sphi %s11450_s17, %s15652_s17  }
   0x4   : > { %s11475_s23 = sadd.s32 1, %s11373_s20   ;;  %s267_s24 = sadd.s32 1, %s11369_s19 }
   0x5   : > { %s264_s25 = ssub.s32 %s11373_s20, %s11475_s23  ;;  %p277_p0 = scmp.ne.s32.totalorder %s11369_s19, %s11365_s18 }
   0x6   : > { %p265_p1 = scmp.eq.s32.totalorder %s264_s25, 0  ;;  %p278_p2 = scmp.eq.s32.totalorder %s11471_s21, 3 }
   0x7   : > { %p283_p3 = scmp.ne.s32.totalorder %s11365_s18, %s11361_s17  ;;  %p284_p4 = scmp.eq.s32.totalorder %s10871_s22, 3 }
   0x8   : > { %s11486_s26 = scalar_select %p265_p1, %s11369_s19, %s267_s24  }
   0x9   : > { %p11488_p5 = por %p278_p2, %p277_p0  ;;  %p11492_p6 = por %p284_p4, %p283_p3 }
   0xa   : > { %p10874_p7 = scmp.ge.s32.totalorder %s11373_s20, 1  ;;  %p342_p8 = scmp.lt.s32.totalorder %s11373_s20, 5 }
   0xc   : > { %p343_p9 = pnand %p10874_p7, %p342_p8 }
   0xe   : > { %346 = sbr.rel (%p343_p9) target bundleno = 2650 (0xa5a), region = 64 }
  0x15   : > { %s10876_s29 = sshll.u32 %s11471_s21, 3  ;;  %vm519_vm0 = vcmask 1040384   ;;  %vm1333_vm1 = vcmask 1045504   ;;  %vm963_vm2 = vcmask 1046528   ;;  %s11375_s15 = smov 16   ;;  %v11284_v39 = vld [vmem:[%s15552_s1] sm:$0xff]  }
  0x16   : > { %p384_p10 = scmp.lt.s32.totalorder %s10876_s29, 31  ;;  %s11376_s16 = smov 8   ;;  %vm610_vm3 = vsmask.f32 7424  ;;  %11070 = vmatprep.subr.bf16.mxu0 %v11284_v39  ;;  %11224 = vmatprep.subr.bf16.mxu1 %v11284_v39  ;;  %vm1100_vm4 = vsmask.f32 6400 }
  0x17   : > { %11071 = vmatpush3.bf16.msra.mxu0 %v11284_v39  ;;  %11226 = vmatpush3.bf16.msra.mxu1 %v11284_v39  ;;  %s11377_s25 = smov 4   ;;  %vm1814_vm5 = vcmask 1041408   ;;  %vm1470_vm6 = vcmask 31744   ;;  %vm1535_vm7 = vcmask 64512   ;;  %vm1600_vm8 = vcmask 97280   ;;  %s11384_s13 = smov 64  }
  0x18   : > { %s15657_s29 = smov (!%p384_p10, %s10876_s29), 31  ;;  %vm1665_vm9 = vcmask 130048   ;;  %vm1749_vm10 = vcmask 162816   ;;  %vm3579_vm11 = vcmask 58368   ;;  %vm6140_vm12 = vcmask 1042434   ;;  %s11386_s22 = smov 96  }
  0x19   : > { %s10978_s30 = sshll.u32 %s15657_s29, 6  ;;  %s11378_s29 = smov 12   ;;  %vm6142_vm13 = vcmask 1043459   ;;  %vm6144_vm14 = vcmask 1044484   ;;  %vm6146_vm15 = vcmask 1045509  }
  0x1a   : > { %s11502_s14 = scalar_lea.vmem %s15551_s0, %s10978_s30  ;;  %s11387_s24 = smov 80  }
  0x1b   : > { %v391_v0 = vld [vmem:[%s11502_s14] sm:$0xff]  ;;  %v392_v1 = vld [vmem:[%s11502_s14 + $0x8] sm:$0xff]  ;;  %v393_v2 = vld [vmem:[%s11502_s14 + $0x10] sm:$0xff] }
  0x1c   : > { %v394_v3 = vld [vmem:[%s11502_s14 + $0x18] sm:$0xff]  ;;  %v455_v4 = vpack.c.bf16 %v392_v1, %v391_v0  ;;  %v395_v5 = vld [vmem:[%s11502_s14 + $0x20] sm:$0xff]  ;;  %v396_v6 = vld [vmem:[%s11502_s14 + $0x28] sm:$0xff] }
  0x1d   : > { %v456_v7 = vpack.c.bf16 %v394_v3, %v393_v2  ;;  %v397_v8 = vld [vmem:[%s11502_s14 + $0x30] sm:$0xff]  ;;  %v398_v9 = vld [vmem:[%s11502_s14 + $0x38] sm:$0xff]  ;;  %v457_v10 = vpack.c.bf16 %v396_v6, %v395_v5  ;;  %v399_v42 = vld [vmem:[%s11502_s14 + $0x40] sm:$0xff] }
  0x1e   : > { %v520_v11 = vrot.slane %v455_v4, 7  ;;  %v458_v12 = vpack.c.bf16 %v398_v9, %v397_v8  ;;  %v400_v47 = vld [vmem:[%s11502_s14 + $0x48] sm:$0xff]  ;;  %v401_v48 = vld [vmem:[%s11502_s14 + $0x50] sm:$0xff]  ;;  %v402_v49 = vld [vmem:[%s11502_s14 + $0x58] sm:$0xff] }
  0x1f   : > { %v521_v13 = vrot.slane %v456_v7, 7  ;;  %v523_v14 = vrot.slane %v457_v10, 7  ;;  %v459_v58 = vpack.c.bf16 %v400_v47, %v399_v42  ;;  %v460_v59 = vpack.c.bf16 %v402_v49, %v401_v48  ;;  %v403_v61 = vld [vmem:[%s11502_s14 + $0x60] sm:$0xff]  ;;  %v404_v62 = vld [vmem:[%s11502_s14 + $0x68] sm:$0xff] }
  0x20   : > { %v11513_v15 = vsel %vm519_vm0, 0, %v520_v11  ;;  %v525_v16 = vrot.slane %v458_v12, 7  ;;  %v461_v7 = vpack.c.bf16 %v404_v62, %v403_v61 }
  0x21   : > { %v11516_v17 = vsel %vm519_vm0, %v520_v11, %v521_v13  ;;  %v1334_v18 = vrot.slane %v11513_v15, 2  ;;  %v964_v19 = vrot.slane %v11513_v15, 1  ;;  %v11521_v20 = vsel %vm519_vm0, %v521_v13, %v523_v14 }
  0x22   : > { %v1335_v21 = vrot.slane %v11516_v17, 2  ;;  %v965_v22 = vrot.slane %v11516_v17, 1  ;;  %v11526_v23 = vsel %vm519_vm0, %v523_v14, %v525_v16  ;;  %v967_v24 = vrot.slane %v11521_v20, 1 }
  0x23   : > { %v969_v25 = vrot.slane %v11526_v23, 1  ;;  %v611_v26 = vshrl.u32 %v11513_v15, 16  ;;  %v613_v27 = vshll.u32 %v11513_v15, 16  ;;  %v1337_v30 = vrot.slane %v11521_v20, 2 }
  0x24   : > { %v1336_v28 = vsel %vm1333_vm1, %v1334_v18, %v1335_v21  ;;  %v966_v29 = vsel %vm963_vm2, %v964_v19, %v965_v22  ;;  %v618_v31 = vshll.u32 %v11516_v17, 16  ;;  %v968_v32 = vsel %vm963_vm2, %v965_v22, %v967_v24 }
  0x25   : > { %1406 = vrot.lane.b32.xlu0 %v1336_v28, %s11375_s15  ;;  %1036 = vrot.lane.b32.xlu1 %v966_v29, %s11376_s16  ;;  %v615_v33 = vrot.slane %v613_v27, 1  ;;  %v11540_v34 = vsel %vm519_vm0, %v525_v16, 0  ;;  %v970_v35 = vsel %vm963_vm2, %v967_v24, %v969_v25  ;;  %v622_v37 = vshrl.u32 %v11516_v17, 16 }
  0x26   : > { %v620_v36 = vrot.slane %v618_v31, 1  ;;  %v626_v38 = vshll.u32 %v11521_v20, 16  ;;  %v630_v41 = vshrl.u32 %v11521_v20, 16  ;;  %v1338_v43 = vsel %vm1333_vm1, %v1335_v21, %v1337_v30 }
  0x27   : > { %v616_v40 = vor.u32 %v615_v33, %v611_v26  ;;  %v971_v44 = vrot.slane %v11540_v34, 1  ;;  %v1105_v45 = vrot.slane %v618_v31, 2  ;;  %v1101_v46 = vrot.slane %v611_v26, 1 }
  0x28   : > { %v624_v51 = vor.u32 %v622_v37, %v620_v36  ;;  %v628_v52 = vrot.slane %v626_v38, 1  ;;  %v1104_v53 = vrot.slane %v622_v37, 1  ;;  %v1108_v54 = vrot.slane %v630_v41, 1  ;;  %v406_v37 = vld [vmem:[%s11502_s14 + $0x78] sm:$0xff] }
  0x29   : > { %1040 = vrot.lane.b32.xlu0 %v970_v35, %s11376_s16  ;;  %1038 = vrot.lane.b32.xlu1 %v968_v32, %s11376_s16  ;;  %v621_v50 = vsel %vm610_vm3, %v616_v40, %v620_v36  ;;  %v1109_v55 = vrot.slane %v626_v38, 2  ;;  %v1102_v56 = vrot.slane %v613_v27, 2  ;;  %v634_v57 = vshll.u32 %v11526_v23, 16  ;;  %v405_v36 = vld [vmem:[%s11502_s14 + $0x70] sm:$0xff] }
  0x2a   : > { %v972_v60 = vsel %vm963_vm2, %v969_v25, %v971_v44  ;;  %v629_v63 = vsel %vm610_vm3, %v624_v51, %v628_v52  ;;  %v1106_v0 = vor.u32 %v1105_v45, %v1104_v53  ;;  %v638_v1 = vshrl.u32 %v11526_v23, 16 }
  0x2b   : > { %v1116_v2 = vshrl.u32 %v11540_v34, 16  ;;  %v1110_v3 = vor.u32 %v1109_v55, %v1108_v54  ;;  %v1103_v4 = vor.u32 %v1102_v56, %v1101_v46  ;;  %v636_v5 = vrot.slane %v634_v57, 1 }
  0x2c   : > { %v641_v6 = vshll.u32 %v11540_v34, 16  ;;  %v527_v8 = vrot.slane %v459_v58, 7  ;;  %v528_v9 = vrot.slane %v460_v59, 7  ;;  %v1112_v10 = vrot.slane %v638_v1, 1 }
  0x2d   : > { %1408 = vrot.lane.b32.xlu1 %v1338_v43, %s11375_s15  ;;  %883 = vrot.lane.b32.xlu0 %v621_v50, %s11377_s25  ;;  %v1113_v11 = vrot.slane %v634_v57, 2  ;;  %v632_v12 = vor.u32 %v630_v41, %v628_v52  ;;  %v1118_v13 = vrot.slane %v1116_v2, 1  ;;  %v1111_v16 = vsel %vm1100_vm4, %v1106_v0, %v1110_v3 }
  0x2e   : > { %v1119_v14 = vrot.slane %v641_v6, 2  ;;  %v1107_v18 = vsel %vm1100_vm4, %v1103_v4, %v1106_v0  ;;  %v640_v19 = vor.u32 %v638_v1, %v636_v5  ;;  %v643_v21 = vrot.slane %v641_v6, 1 }
  0x2f   : > { %v11575_v22 = vsel %vm519_vm0, %v527_v8, %v528_v9  ;;  %v530_v24 = vrot.slane %v461_v7, 7  ;;  %v11578_v25 = vsel %vm519_vm0, 0, %v527_v8  ;;  %v1114_v26 = vor.u32 %v1113_v11, %v1112_v10  ;;  %v407_v7 = vld [vmem:[%s11502_s14 + $0x80] sm:$0xff]  ;;  %v408_v8 = vld [vmem:[%s11502_s14 + $0x88] sm:$0xff]  ;;  %v410_v10 = vld [vmem:[%s11502_s14 + $0x98] sm:$0xff] }
  0x30   : > { %v1120_v27 = vor.u32 %v1119_v14, %v1118_v13  ;;  %v644_v28 = vsel %vm610_vm3, %v640_v19, %v643_v21  ;;  %v637_v29 = vsel %vm610_vm3, %v632_v12, %v636_v5  ;;  %v652_v31 = vshll.u32 %v11575_v22, 16 }
  0x31   : > { %1042 = vrot.lane.b32.xlu1 %v972_v60, %s11376_s16  ;;  %885 = vrot.lane.b32.xlu0 %v629_v63, %s11377_s25  ;;  %v647_v32 = vshll.u32 %v11578_v25, 16  ;;  %v11587_v33 = vsel %vm519_vm0, %v528_v9, %v530_v24  ;;  %v1339_v35 = vrot.slane %v11526_v23, 2  ;;  %v1115_v39 = vsel %vm1100_vm4, %v1110_v3, %v1114_v26  ;;  %v409_v9 = vld [vmem:[%s11502_s14 + $0x90] sm:$0xff] }
  0x32   : > { %v1121_v38 = vsel %vm1100_vm4, %v1114_v26, %v1120_v27  ;;  %v1341_v40 = vrot.slane %v11540_v34, 2  ;;  %v656_v41 = vshrl.u32 %v11575_v22, 16  ;;  %v654_v42 = vrot.slane %v652_v31, 1  ;;  %v411_v27 = vld [vmem:[%s11502_s14 + $0xa0] sm:$0xff] }
  0x33   : > { %v660_v43 = vshll.u32 %v11587_v33, 16  ;;  %v645_v44 = vshrl.u32 %v11578_v25, 16  ;;  %v649_v45 = vrot.slane %v647_v32, 1  ;;  %v462_v46 = vpack.c.bf16 %v406_v37, %v405_v36 }
  0x34   : > { %v1342_v47 = vsel %vm1333_vm1, %v1339_v35, %v1341_v40  ;;  %v664_v48 = vshrl.u32 %v11587_v33, 16  ;;  %v1340_v34 = vsel %vm1333_vm1, %v1337_v30, %v1339_v35  ;;  %v658_v49 = vor.u32 %v656_v41, %v654_v42 }
  0x35   : > { %1271 = vrot.lane.b32.xlu1 %v1111_v16, %s11378_s29  ;;  %1269 = vrot.lane.b32.xlu0 %v1107_v18, %s11378_s29  ;;  %v662_v50 = vrot.slane %v660_v43, 1  ;;  %v650_v51 = vor.u32 %v649_v45, %v645_v44  ;;  %v532_v52 = vrot.slane %v462_v46, 7  ;;  %v974_v53 = vrot.slane %v11575_v22, 1 }
  0x36   : > { %v976_v54 = vrot.slane %v11587_v33, 1  ;;  %v973_v55 = vrot.slane %v11578_v25, 1  ;;  %v1125_v56 = vrot.slane %v656_v41, 1  ;;  %v1126_v57 = vrot.slane %v652_v31, 2 }
  0x37   : > { %v1129_v58 = vrot.slane %v664_v48, 1  ;;  %v1130_v59 = vrot.slane %v660_v43, 2  ;;  %v663_v30 = vsel %vm610_vm3, %v658_v49, %v662_v50  ;;  %v655_v60 = vsel %vm610_vm3, %v650_v51, %v654_v42 }
  0x38   : > { %v1122_v61 = vrot.slane %v645_v44, 1  ;;  %v1123_v62 = vrot.slane %v647_v32, 2  ;;  %v11615_v63 = vsel %vm519_vm0, %v530_v24, %v532_v52  ;;  %v1127_v0 = vor.u32 %v1126_v57, %v1125_v56 }
  0x39   : > { %889 = vrot.lane.b32.xlu1 %v644_v28, %s11377_s25  ;;  %887 = vrot.lane.b32.xlu0 %v637_v29, %s11377_s25  ;;  %v11619_v1 = vor.u32 %v1130_v59, %v1129_v58  ;;  %v977_v2 = vsel %vm963_vm2, %v974_v53, %v976_v54  ;;  %v975_v3 = vsel %vm963_vm2, %v973_v55, %v974_v53  ;;  %v668_v5 = vshll.u32 %v11615_v63, 16  ;;  %v412_v28 = vld [vmem:[%s11502_s14 + $0xa8] sm:$0xff] }
  0x3a   : > { %v1124_v4 = vor.u32 %v1123_v62, %v1122_v61  ;;  %v11627_v6 = vsel %vm519_vm0, %v532_v52, 0  ;;  %v1344_v12 = vrot.slane %v11575_v22, 2  ;;  %v1346_v13 = vrot.slane %v11587_v33, 2 }
  0x3b   : > { %v1132_v11 = vsel %vm1100_vm4, %v1127_v0, %v11619_v1  ;;  %v1343_v14 = vrot.slane %v11578_v25, 2  ;;  %v670_v18 = vrot.slane %v668_v5, 1  ;;  %v672_v19 = vshrl.u32 %v11615_v63, 16 }
  0x3c   : > { %v1128_v16 = vsel %vm1100_vm4, %v1124_v4, %v1127_v0  ;;  %v675_v21 = vshll.u32 %v11627_v6, 16  ;;  %v463_v24 = vpack.c.bf16 %v408_v8, %v407_v7  ;;  %v464_v26 = vpack.c.bf16 %v410_v10, %v409_v9 }
  0x3d   : > { %1275 = vrot.lane.b32.xlu1 %v1121_v38, %s11378_s29  ;;  %1273 = vrot.lane.b32.xlu0 %v1115_v39, %s11378_s29  ;;  %v1347_v29 = vsel %vm1333_vm1, %v1344_v12, %v1346_v13  ;;  %v1137_v31 = vshrl.u32 %v11627_v6, 16  ;;  %v1345_v32 = vsel %vm1333_vm1, %v1343_v14, %v1344_v12  ;;  %v674_v35 = vor.u32 %v672_v19, %v670_v18  ;;  %v11285_v12 = vld [vmem:[%s15552_s1 + $0x8] ss:$0 sps:$4 sm:$0x33]  }
  0x3e   : > { %v677_v36 = vrot.slane %v675_v21, 1  ;;  %v666_v37 = vor.u32 %v664_v48, %v662_v50  ;;  %v465_v38 = vpack.c.bf16 %v412_v28, %v411_v27  ;;  %v534_v39 = vrot.slane %v463_v24, 7  ;;  %11228 = vmatprep.subr.msk.bf16.mxu0 %vm1814_vm5, %v11285_v12  ;;  %11229 = vmatprep.subr.msk.bf16.mxu1 %vm1814_vm5, %v11285_v12 }
  0x3f   : > { %v535_v40 = vrot.slane %v464_v26, 7  ;;  %v1133_v41 = vrot.slane %v672_v19, 1  ;;  %v1134_v42 = vrot.slane %v668_v5, 2  ;;  %v1139_v43 = vrot.slane %v1137_v31, 1 }
  0x40   : > { %v1140_v44 = vrot.slane %v675_v21, 2  ;;  %v678_v45 = vsel %vm610_vm3, %v674_v35, %v677_v36  ;;  %v671_v46 = vsel %vm610_vm3, %v666_v37, %v670_v18  ;;  %v980_v48 = vrot.slane %v11627_v6, 1 }
  0x41   : > { %1412 = vrot.lane.b32.xlu1 %v1342_v47, %s11375_s15  ;;  %1410 = vrot.lane.b32.xlu0 %v1340_v34, %s11375_s15  ;;  %v978_v47 = vrot.slane %v11615_v63, 1  ;;  %v11657_v34 = vsel %vm519_vm0, %v534_v39, %v535_v40  ;;  %v537_v49 = vrot.slane %v465_v38, 7  ;;  %v11660_v50 = vsel %vm519_vm0, 0, %v534_v39 }
  0x42   : > { %v1135_v51 = vor.u32 %v1134_v42, %v1133_v41  ;;  %v1141_v52 = vor.u32 %v1140_v44, %v1139_v43  ;;  %v686_v56 = vshll.u32 %v11657_v34, 16  ;;  %v681_v57 = vshll.u32 %v11660_v50, 16  ;;  %v415_v42 = vld [vmem:[%s11502_s14 + $0xc0] sm:$0xff]  ;;  %v416_v44 = vld [vmem:[%s11502_s14 + $0xc8] sm:$0xff] }
  0x43   : > { %v981_v53 = vsel %vm963_vm2, %v978_v47, %v980_v48  ;;  %v979_v55 = vsel %vm963_vm2, %v976_v54, %v978_v47  ;;  %v11671_v58 = vsel %vm519_vm0, %v535_v40, %v537_v49  ;;  %v1348_v59 = vrot.slane %v11615_v63, 2 }
  0x44   : > { %v1142_v61 = vsel %vm1100_vm4, %v1135_v51, %v1141_v52  ;;  %v1136_v54 = vsel %vm1100_vm4, %v11619_v1, %v1135_v51  ;;  %v1350_v62 = vrot.slane %v11627_v6, 2  ;;  %v690_v0 = vshrl.u32 %v11657_v34, 16 }
  0x45   : > { %893 = vrot.lane.b32.xlu1 %v663_v30, %s11377_s25  ;;  %891 = vrot.lane.b32.xlu0 %v655_v60, %s11377_s25  ;;  %v413_v30 = vld [vmem:[%s11502_s14 + $0xb0] sm:$0xff]  ;;  %v414_v60 = vld [vmem:[%s11502_s14 + $0xb8] sm:$0xff]  ;;  %v679_v4 = vshrl.u32 %v11660_v50, 16  ;;  %v683_v5 = vrot.slane %v681_v57, 1  ;;  %v698_v8 = vshrl.u32 %v11671_v58, 16  ;;  %v1349_v1 = vsel %vm1333_vm1, %v1346_v13, %v1348_v59 }
  0x46   : > { %v466_v7 = vpack.c.bf16 %v414_v60, %v413_v30  ;;  %v1351_v9 = vsel %vm1333_vm1, %v1348_v59, %v1350_v62  ;;  %v1146_v18 = vrot.slane %v690_v0, 1  ;;  %v1147_v19 = vrot.slane %v686_v56, 2  ;;  %v419_v30 = vld [vmem:[%s11502_s14 + $0xe0] sm:$0xff]  ;;  %v420_v60 = vld [vmem:[%s11502_s14 + $0xe8] sm:$0xff] }
  0x47   : > { %v1150_v21 = vrot.slane %v698_v8, 1  ;;  %v1143_v26 = vrot.slane %v679_v4, 1  ;;  %v1144_v13 = vrot.slane %v681_v57, 2  ;;  %v982_v31 = vrot.slane %v11660_v50, 1 }
  0x48   : > { %v539_v14 = vrot.slane %v466_v7, 7  ;;  %v1148_v35 = vor.u32 %v1147_v19, %v1146_v18  ;;  %v1353_v43 = vrot.slane %v11657_v34, 2  ;;  %v1352_v51 = vrot.slane %v11660_v50, 2 }
  0x49   : > { %1046 = vrot.lane.b32.xlu1 %v977_v2, %s11376_s16  ;;  %1044 = vrot.lane.b32.xlu0 %v975_v3, %s11376_s16  ;;  %v688_v2 = vrot.slane %v686_v56, 1  ;;  %v694_v3 = vshll.u32 %v11671_v58, 16  ;;  %v1145_v37 = vor.u32 %v1144_v13, %v1143_v26  ;;  %v1816_v56 = vsel %vm1814_vm5, %v11285_v12, 0 }
  0x4a   : > { %v11715_v41 = vsel %vm519_vm0, %v539_v14, 0  ;;  %v467_v57 = vpack.c.bf16 %v416_v44, %v415_v42  ;;  %11073 = vmatpush3.bf16.msra.mxu0 %v1816_v56  ;;  %11227 = vmatpush3.bf16.msra.mxu1 %v1816_v56  ;;  %vm6150_vm5 = vcmask 1047559  }
  0x4b   : > { %v692_v6 = vor.u32 %v690_v0, %v688_v2  ;;  %v696_v10 = vrot.slane %v694_v3, 1  ;;  %v1151_v24 = vrot.slane %v694_v3, 2  ;;  %v1149_v48 = vsel %vm1100_vm4, %v1145_v37, %v1148_v35  ;;  %v421_v37 = vld [vmem:[%s11502_s14 + $0xf0] sm:$0xff] }
  0x4c   : > { %v1354_v0 = vsel %vm1333_vm1, %v1352_v51, %v1353_v43 }
  0x4d   : > { %1279 = vrot.lane.b32.xlu1 %v1132_v11, %s11378_s29  ;;  %1277 = vrot.lane.b32.xlu0 %v1128_v16, %s11378_s29  ;;  %v684_v11 = vor.u32 %v683_v5, %v679_v4  ;;  %v983_v16 = vrot.slane %v11657_v34, 1  ;;  %v697_v27 = vsel %vm610_vm3, %v692_v6, %v696_v10  ;;  %v11707_v36 = vor.u32 %v1151_v24, %v1150_v21 }
  0x4e   : > { %v469_v4 = vpack.c.bf16 %v420_v60, %v419_v30  ;;  %v541_v5 = vrot.slane %v467_v57, 7 }
  0x4f   : > { %v689_v28 = vsel %vm610_vm3, %v684_v11, %v688_v2  ;;  %v984_v39 = vsel %vm963_vm2, %v982_v31, %v983_v16  ;;  %v1153_v47 = vsel %vm1100_vm4, %v1148_v35, %v11707_v36 }
  0x50   : > { %v544_v18 = vrot.slane %v469_v4, 7  ;;  %v11749_v19 = vsel %vm519_vm0, 0, %v541_v5 }
  0x51   : > { %1416 = vrot.lane.b32.xlu1 %v1347_v29, %s11375_s15  ;;  %1414 = vrot.lane.b32.xlu0 %v1345_v32, %s11375_s15  ;;  %v985_v29 = vrot.slane %v11671_v58, 1  ;;  %v11703_v32 = vsel %vm519_vm0, %v537_v49, %v539_v14  ;;  %v1355_v49 = vrot.slane %v11671_v58, 2  ;;  %v989_v14 = vrot.slane %v11715_v41, 1 }
  0x52   : > { %v702_v40 = vshll.u32 %v11703_v32, 16  ;;  %v987_v12 = vrot.slane %v11703_v32, 1  ;;  %v1357_v35 = vrot.slane %v11703_v32, 2  ;;  %v713_v42 = vshrl.u32 %v11749_v19, 16 }
  0x53   : > { %v986_v38 = vsel %vm963_vm2, %v983_v16, %v985_v29  ;;  %v1356_v62 = vsel %vm1333_vm1, %v1353_v43, %v1355_v49  ;;  %v991_v57 = vrot.slane %v11749_v19, 1 }
  0x54   : > { %v704_v52 = vrot.slane %v702_v40, 1  ;;  %v990_v26 = vsel %vm963_vm2, %v987_v12, %v989_v14  ;;  %v988_v13 = vsel %vm963_vm2, %v985_v29, %v987_v12  ;;  %v425_v12 = vld [vmem:[%s11502_s14 + $0x110] sm:$0xff]  ;;  %v426_v14 = vld [vmem:[%s11502_s14 + $0x118] sm:$0xff] }
  0x55   : > { %897 = vrot.lane.b32.xlu1 %v678_v45, %s11377_s25  ;;  %895 = vrot.lane.b32.xlu0 %v671_v46, %s11377_s25  ;;  %v417_v45 = vld [vmem:[%s11502_s14 + $0xd0] sm:$0xff]  ;;  %v418_v46 = vld [vmem:[%s11502_s14 + $0xd8] sm:$0xff] }
  0x56   : > { %v468_v59 = vpack.c.bf16 %v418_v46, %v417_v45 }
  0x58   : > { %v542_v7 = vrot.slane %v468_v59, 7  ;;  %v1164_v59 = vrot.slane %v713_v42, 1 }
  0x59   : > { %1050 = vrot.lane.b32.xlu1 %v981_v53, %s11376_s16  ;;  %1048 = vrot.lane.b32.xlu0 %v979_v55, %s11376_s16  ;;  %v706_v53 = vshrl.u32 %v11703_v32, 16  ;;  %v709_v55 = vshll.u32 %v11715_v41, 16 }
  0x5a   : > { %v11746_v16 = vsel %vm519_vm0, %v541_v5, %v542_v7  ;;  %v11760_v31 = vsel %vm519_vm0, %v542_v7, %v544_v18 }
  0x5b   : > { %v708_v2 = vor.u32 %v706_v53, %v704_v52  ;;  %v711_v3 = vrot.slane %v709_v55, 1  ;;  %v1161_v11 = vrot.slane %v709_v55, 2  ;;  %v724_v44 = vshrl.u32 %v11746_v16, 16 }
  0x5c   : > { %v728_v45 = vshll.u32 %v11760_v31, 16  ;;  %v732_v51 = vshrl.u32 %v11760_v31, 16  ;;  %v992_v56 = vrot.slane %v11746_v16, 1 }
  0x5d   : > { %1283 = vrot.lane.b32.xlu1 %v1142_v61, %s11378_s29  ;;  %1281 = vrot.lane.b32.xlu0 %v1136_v54, %s11378_s29  ;;  %v700_v61 = vor.u32 %v698_v8, %v696_v10  ;;  %v1158_v54 = vshrl.u32 %v11715_v41, 16  ;;  %v712_v8 = vsel %vm610_vm3, %v708_v2, %v711_v3  ;;  %v1167_v30 = vrot.slane %v724_v44, 1 }
  0x5f   : > { %v1160_v6 = vrot.slane %v1158_v54, 1  ;;  %v705_v10 = vsel %vm610_vm3, %v700_v61, %v704_v52  ;;  %v730_v52 = vrot.slane %v728_v45, 1  ;;  %v1172_v61 = vrot.slane %v728_v45, 2 }
  0x61   : > { %1420 = vrot.lane.b32.xlu1 %v1351_v9, %s11375_s15  ;;  %1418 = vrot.lane.b32.xlu0 %v1349_v1, %s11375_s15  ;;  %v1154_v9 = vrot.slane %v706_v53, 1  ;;  %v1155_v1 = vrot.slane %v702_v40, 2  ;;  %v1162_v24 = vor.u32 %v1161_v11, %v1160_v6  ;;  %v1359_v40 = vrot.slane %v11715_v41, 2 }
  0x63   : > { %v1156_v21 = vor.u32 %v1155_v1, %v1154_v9  ;;  %v993_v9 = vsel %vm963_vm2, %v991_v57, %v992_v56 }
  0x65   : > { %901 = vrot.lane.b32.xlu1 %v697_v27, %s11377_s25  ;;  %899 = vrot.lane.b32.xlu0 %v689_v28, %s11377_s25  ;;  %v720_v27 = vshll.u32 %v11746_v16, 16  ;;  %v715_v28 = vshll.u32 %v11749_v19, 16  ;;  %v1157_v29 = vsel %vm1100_vm4, %v11707_v36, %v1156_v21  ;;  %v1360_v36 = vsel %vm1333_vm1, %v1357_v35, %v1359_v40 }
  0x67   : > { %v722_v43 = vrot.slane %v720_v27, 1  ;;  %v717_v46 = vrot.slane %v715_v28, 1  ;;  %v1168_v60 = vrot.slane %v720_v27, 2  ;;  %v1165_v2 = vrot.slane %v715_v28, 2 }
  0x69   : > { %1054 = vrot.lane.b32.xlu1 %v986_v38, %s11376_s16  ;;  %1052 = vrot.lane.b32.xlu0 %v984_v39, %s11376_s16  ;;  %v422_v38 = vld [vmem:[%s11502_s14 + $0xf8] sm:$0xff]  ;;  %v1163_v39 = vsel %vm1100_vm4, %v1156_v21, %v1162_v24  ;;  %v726_v41 = vor.u32 %v724_v44, %v722_v43  ;;  %v718_v53 = vor.u32 %v717_v46, %v713_v42  ;;  %v1362_v21 = vrot.slane %v11746_v16, 2 }
  0x6a   : > { %v1169_v4 = vor.u32 %v1168_v60, %v1167_v30  ;;  %v1166_v1 = vor.u32 %v1165_v2, %v1164_v59  ;;  %v1364_v24 = vrot.slane %v11760_v31, 2  ;;  %v734_v42 = vor.u32 %v732_v51, %v730_v52 }
  0x6b   : > { %v731_v54 = vsel %vm610_vm3, %v726_v41, %v730_v52 }
  0x6c   : > { %v1365_v40 = vsel %vm1333_vm1, %v1362_v21, %v1364_v24 }
  0x6d   : > { %1287 = vrot.lane.b32.xlu1 %v1153_v47, %s11378_s29  ;;  %1285 = vrot.lane.b32.xlu0 %v1149_v48, %s11378_s29  ;;  %v470_v47 = vpack.c.bf16 %v422_v38, %v421_v37  ;;  %v1358_v48 = vsel %vm1333_vm1, %v1355_v49, %v1357_v35  ;;  %v1171_v49 = vrot.slane %v732_v51, 1  ;;  %v427_v37 = vld [vmem:[%s11502_s14 + $0x120] sm:$0xff]  ;;  %v428_v38 = vld [vmem:[%s11502_s14 + $0x128] sm:$0xff] }
  0x6f   : > { %v546_v55 = vrot.slane %v470_v47, 7  ;;  %v11791_v5 = vor.u32 %v1172_v61, %v1171_v49  ;;  %v473_v47 = vpack.c.bf16 %v428_v38, %v427_v37 }
  0x71   : > { %1424 = vrot.lane.b32.xlu1 %v1356_v62, %s11375_s15  ;;  %1422 = vrot.lane.b32.xlu0 %v1354_v0, %s11375_s15  ;;  %v723_v62 = vsel %vm610_vm3, %v718_v53, %v722_v43  ;;  %v994_v0 = vrot.slane %v11760_v31, 1  ;;  %v11787_v3 = vsel %vm519_vm0, %v544_v18, %v546_v55  ;;  %v11797_v11 = vsel %vm519_vm0, %v546_v55, 0 }
  0x72   : > { %v736_v6 = vshll.u32 %v11787_v3, 16  ;;  %v1174_v18 = vsel %vm1100_vm4, %v1169_v4, %v11791_v5  ;;  %v740_v28 = vshrl.u32 %v11787_v3, 16  ;;  %v743_v35 = vshll.u32 %v11797_v11, 16 }
  0x73   : > { %v995_v7 = vsel %vm963_vm2, %v992_v56, %v994_v0  ;;  %v1179_v43 = vshrl.u32 %v11797_v11, 16  ;;  %v996_v41 = vrot.slane %v11787_v3, 1  ;;  %v998_v59 = vrot.slane %v11797_v11, 1 }
  0x74   : > { %v738_v27 = vrot.slane %v736_v6, 1  ;;  %v745_v46 = vrot.slane %v743_v35, 1  ;;  %v1175_v53 = vrot.slane %v740_v28, 1  ;;  %v1176_v55 = vrot.slane %v736_v6, 2 }
  0x75   : > { %905 = vrot.lane.b32.xlu1 %v712_v8, %s11377_s25  ;;  %903 = vrot.lane.b32.xlu0 %v705_v10, %s11377_s25  ;;  %v423_v8 = vld [vmem:[%s11502_s14 + $0x100] sm:$0xff]  ;;  %v424_v10 = vld [vmem:[%s11502_s14 + $0x108] sm:$0xff]  ;;  %v1181_v56 = vrot.slane %v1179_v43, 1  ;;  %v1182_v57 = vrot.slane %v743_v35, 2  ;;  %v551_v30 = vrot.slane %v473_v47, 7  ;;  %v997_v61 = vsel %vm963_vm2, %v994_v0, %v996_v41 }
  0x76   : > { %v742_v45 = vor.u32 %v740_v28, %v738_v27  ;;  %v739_v52 = vsel %vm610_vm3, %v734_v42, %v738_v27  ;;  %v999_v2 = vsel %vm963_vm2, %v996_v41, %v998_v59 }
  0x78   : > { %v746_v51 = vsel %vm610_vm3, %v742_v45, %v745_v46 }
  0x79   : > { %1058 = vrot.lane.b32.xlu1 %v990_v26, %s11376_s16  ;;  %1056 = vrot.lane.b32.xlu0 %v988_v13, %s11376_s16  ;;  %v1361_v26 = vrot.slane %v11749_v19, 2  ;;  %v1170_v13 = vsel %vm1100_vm4, %v1166_v1, %v1169_v4 }
  0x7b   : > { %v1363_v44 = vsel %vm1333_vm1, %v1361_v26, %v1362_v21 }
  0x7d   : > { %1291 = vrot.lane.b32.xlu1 %v1163_v39, %s11378_s29  ;;  %1289 = vrot.lane.b32.xlu0 %v1157_v29, %s11378_s29  ;;  %v471_v39 = vpack.c.bf16 %v424_v10, %v423_v8  ;;  %v472_v29 = vpack.c.bf16 %v426_v14, %v425_v12  ;;  %v1366_v8 = vrot.slane %v11787_v3, 2  ;;  %v429_v10 = vld [vmem:[%s11502_s14 + $0x130] sm:$0xff]  ;;  %v430_v12 = vld [vmem:[%s11502_s14 + $0x138] sm:$0xff]  ;;  %v1368_v14 = vrot.slane %v11797_v11, 2 }
  0x7e   : > { %v474_v38 = vpack.c.bf16 %v430_v12, %v429_v10 }
  0x7f   : > { %v1369_v11 = vsel %vm1333_vm1, %v1366_v8, %v1368_v14  ;;  %v434_v14 = vld [vmem:[%s11502_s14 + $0x158] sm:$0xff] }
  0x80   : > { %v553_v45 = vrot.slane %v474_v38, 7 }
  0x81   : > { %1428 = vrot.lane.b32.xlu1 %v1360_v36, %s11375_s15  ;;  %1426 = vrot.lane.b32.xlu0 %v1358_v48, %s11375_s15  ;;  %v548_v48 = vrot.slane %v471_v39, 7  ;;  %v549_v36 = vrot.slane %v472_v29, 7 }
  0x83   : > { %v11829_v60 = vsel %vm519_vm0, %v548_v48, %v549_v36  ;;  %v11832_v49 = vsel %vm519_vm0, 0, %v548_v48  ;;  %v11839_v4 = vsel %vm519_vm0, %v549_v36, %v551_v30 }
  0x84   : > { %v762_v21 = vshll.u32 %v11839_v4, 16  ;;  %v747_v27 = vshrl.u32 %v11832_v49, 16  ;;  %v766_v39 = vshrl.u32 %v11839_v4, 16  ;;  %v1003_v41 = vrot.slane %v11839_v4, 1 }
  0x85   : > { %909 = vrot.lane.b32.xlu1 %v731_v54, %s11377_s25  ;;  %907 = vrot.lane.b32.xlu0 %v723_v62, %s11377_s25  ;;  %v1177_v54 = vor.u32 %v1176_v55, %v1175_v53  ;;  %v1183_v62 = vor.u32 %v1182_v57, %v1181_v56  ;;  %v1000_v53 = vrot.slane %v11832_v49, 1  ;;  %v1371_v10 = vrot.slane %v11829_v60, 2 }
  0x86   : > { %v1192_v48 = vrot.slane %v766_v39, 1  ;;  %v1193_v36 = vrot.slane %v762_v21, 2  ;;  %v1185_v57 = vrot.slane %v747_v27, 1 }
  0x87   : > { %v1184_v0 = vsel %vm1100_vm4, %v1177_v54, %v1183_v62  ;;  %v1178_v26 = vsel %vm1100_vm4, %v11791_v5, %v1177_v54  ;;  %v1367_v5 = vsel %vm1333_vm1, %v1364_v24, %v1366_v8  ;;  %v1001_v24 = vrot.slane %v11829_v60, 1 }
  0x89   : > { %1062 = vrot.lane.b32.xlu1 %v995_v7, %s11376_s16  ;;  %1060 = vrot.lane.b32.xlu0 %v993_v9, %s11376_s16  ;;  %v754_v7 = vshll.u32 %v11829_v60, 16  ;;  %v749_v9 = vshll.u32 %v11832_v49, 16  ;;  %v1002_v8 = vsel %vm963_vm2, %v1000_v53, %v1001_v24 }
  0x8b   : > { %v751_v28 = vrot.slane %v749_v9, 1  ;;  %v1189_v47 = vrot.slane %v754_v7, 2 }
  0x8d   : > { %1295 = vrot.lane.b32.xlu1 %v1174_v18, %s11378_s29  ;;  %1293 = vrot.lane.b32.xlu0 %v1170_v13, %s11378_s29  ;;  %v758_v18 = vshrl.u32 %v11829_v60, 16  ;;  %v756_v13 = vrot.slane %v754_v7, 1  ;;  %v752_v42 = vor.u32 %v751_v28, %v747_v27  ;;  %v11889_v7 = vor.u32 %v1193_v36, %v1192_v48 }
  0x8e   : > { %v1373_v27 = vrot.slane %v11839_v4, 2  ;;  %v11908_v28 = vsel %vm519_vm0, %v553_v45, 0 }
  0x8f   : > { %v760_v29 = vor.u32 %v758_v18, %v756_v13  ;;  %v1188_v46 = vrot.slane %v758_v18, 1  ;;  %v757_v56 = vsel %vm610_vm3, %v752_v42, %v756_v13  ;;  %v1370_v42 = vrot.slane %v11832_v49, 2 }
  0x91   : > { %1432 = vrot.lane.b32.xlu1 %v1365_v40, %s11375_s15  ;;  %1430 = vrot.lane.b32.xlu0 %v1363_v44, %s11375_s15  ;;  %v11868_v40 = vrot.slane %v762_v21, 1 }
  0x93   : > { %v765_v55 = vsel %vm610_vm3, %v760_v29, %v11868_v40 }
  0x95   : > { %913 = vrot.lane.b32.xlu1 %v746_v51, %s11377_s25  ;;  %911 = vrot.lane.b32.xlu0 %v739_v52, %s11377_s25  ;;  %v1186_v51 = vrot.slane %v749_v9, 2  ;;  %v432_v9 = vld [vmem:[%s11502_s14 + $0x148] sm:$0xff] }
  0x97   : > { %v11843_v1 = vpop.permute.xlu0 %1406  ;;  %v11845_v6 = vpop.permute.xlu1 %1036 }
  0x99   : > { %1066 = vrot.lane.b32.xlu1 %v999_v2, %s11376_s16  ;;  %1064 = vrot.lane.b32.xlu0 %v997_v61, %s11376_s16  ;;  %v11883_v61 = vsel %vm519_vm0, %v551_v30, %v553_v45  ;;  %v1190_v2 = vor.u32 %v1189_v47, %v1188_v46  ;;  %v1004_v30 = vsel %vm963_vm2, %v1001_v24, %v1003_v41  ;;  %v436_v45 = vld [vmem:[%s11502_s14 + $0x168] sm:$0xff]  ;;  %v777_v24 = vshll.u32 %v11908_v28, 16 }
  0x9a   : > { %v770_v12 = vshll.u32 %v11883_v61, 16  ;;  %v774_v36 = vshrl.u32 %v11883_v61, 16 }
  0x9b   : > { %v11859_v35 = vpop.permute.xlu0 %1040  ;;  %v1039_v37 = vpop.permute.xlu1 %1038 }
  0x9c   : > { %v772_v48 = vrot.slane %v770_v12, 1 }
  0x9d   : > { %1299 = vrot.lane.b32.xlu1 %v1184_v0, %s11378_s29  ;;  %1297 = vrot.lane.b32.xlu0 %v1178_v26, %s11378_s29  ;;  %v433_v0 = vld [vmem:[%s11502_s14 + $0x150] sm:$0xff] }
  0x9e   : > { %v476_v46 = vpack.c.bf16 %v434_v14, %v433_v0  ;;  %v1196_v0 = vrot.slane %v774_v36, 1  ;;  %v1197_v14 = vrot.slane %v770_v12, 2 }
  0x9f   : > { %v1409_v43 = vpop.permute.xlu1 %1408  ;;  %v884_v44 = vpop.permute.xlu0 %883 }
  0xa0   : > { %v1472_v54 = vsel %vm1470_vm6, %v11513_v15, %v884_v44  ;;  %v431_v15 = vld [vmem:[%s11502_s14 + $0x140] sm:$0xff] }
  0xa1   : > { %1436 = vrot.lane.b32.xlu1 %v1369_v11, %s11375_s15  ;;  %1434 = vrot.lane.b32.xlu0 %v1367_v5, %s11375_s15  ;;  %v1537_v26 = vsel %vm1535_vm7, %v1472_v54, %v11845_v6  ;;  %v1195_v5 = vsel %vm1100_vm4, %v1190_v2, %v11889_v7  ;;  %v475_v29 = vpack.c.bf16 %v432_v9, %v431_v15  ;;  %v435_v44 = vld [vmem:[%s11502_s14 + $0x160] sm:$0xff]  ;;  %v779_v54 = vrot.slane %v777_v24, 1 }
  0xa3   : > { %v11880_v52 = vpop.permute.xlu1 %1042  ;;  %v886_v59 = vpop.permute.xlu0 %885 }
  0xa4   : > { %v1474_v62 = vsel %vm1470_vm6, %v11516_v17, %v886_v59  ;;  %v1187_v17 = vor.u32 %v1186_v51, %v1185_v57  ;;  %v768_v57 = vor.u32 %v766_v39, %v11868_v40  ;;  %v1200_v51 = vshrl.u32 %v11908_v28, 16 }
  0xa5   : > { %917 = vrot.lane.b32.xlu1 %v765_v55, %s11377_s25  ;;  %915 = vrot.lane.b32.xlu0 %v757_v56, %s11377_s25  ;;  %v1539_v21 = vsel %vm1535_vm7, %v1474_v62, %v1039_v37  ;;  %v477_v55 = vpack.c.bf16 %v436_v45, %v435_v44  ;;  %v1372_v56 = vsel %vm1333_vm1, %v1370_v42, %v1371_v10  ;;  %v555_v62 = vrot.slane %v475_v29, 7 }
  0xa6   : > { %v1191_v47 = vsel %vm1100_vm4, %v1187_v17, %v1190_v2  ;;  %v776_v59 = vor.u32 %v774_v36, %v772_v48  ;;  %v556_v2 = vrot.slane %v476_v46, 7  ;;  %v1005_v17 = vrot.slane %v11883_v61, 1 }
  0xa7   : > { %v1272_v18 = vpop.permute.xlu1 %1271  ;;  %v1270_v13 = vpop.permute.xlu0 %1269  ;;  %v11943_v39 = vrot.slane %v477_v55, 7  ;;  %v773_v40 = vsel %vm610_vm3, %v768_v57, %v772_v48  ;;  %v11959_v12 = vsel %vm519_vm0, 0, %v555_v62  ;;  %v1198_v44 = vor.u32 %v1197_v14, %v1196_v0 }
  0xa8   : > { %v1604_v38 = vsel %vm1600_vm8, %v1539_v21, %v1272_v18  ;;  %v1602_v11 = vsel %vm1600_vm8, %v1537_v26, %v1270_v13  ;;  %v1203_v18 = vrot.slane %v777_v24, 2  ;;  %v780_v26 = vsel %vm610_vm3, %v776_v59, %v779_v54 }
  0xa9   : > { %1070 = vrot.lane.b32.xlu1 %v1004_v30, %s11376_s16  ;;  %1068 = vrot.lane.b32.xlu0 %v1002_v8, %s11376_s16  ;;  %v1667_v6 = vsel %vm1665_vm9, %v1602_v11, %v11843_v1  ;;  %v1669_v37 = vsel %vm1665_vm9, %v1604_v38, %v1409_v43  ;;  %v1374_v43 = vsel %vm1333_vm1, %v1371_v10, %v1373_v27  ;;  %v1007_v10 = vrot.slane %v11908_v28, 1 }
  0xaa   : > { %11074 = vmatprep.mubr.msk.bf16.mxu0 %vm1749_vm10, %v1667_v6  ;;  %v11954_v13 = vsel %vm519_vm0, %v555_v62, %v556_v2  ;;  %v11973_v46 = vsel %vm519_vm0, %v556_v2, %v11943_v39  ;;  %v1375_v24 = vrot.slane %v11883_v61, 2  ;;  %v781_v59 = vshrl.u32 %v11959_v12, 16 }
  0xab   : > { %v890_v53 = vpop.permute.xlu1 %889  ;;  %11075 = vmatmul.mubr.msk.bf16.vlgmr.msra.gmra.mrb[0].mxu0 %vm1749_vm10, %v1669_v37  ;;  %v888_v1 = vpop.permute.xlu0 %887  ;;  %v1006_v37 = vsel %vm963_vm2, %v1003_v41, %v1005_v17  ;;  %v788_v42 = vshll.u32 %v11954_v13, 16  ;;  %v438_v41 = vld [vmem:[%s11502_s14 + $0x178] sm:$0xff]  ;;  %v1012_v14 = vrot.slane %v11973_v46, 1 }
  0xac   : > { %v1478_v30 = vsel %vm1470_vm6, %v11526_v23, %v890_v53  ;;  %v1476_v15 = vsel %vm1470_vm6, %v11521_v20, %v888_v1  ;;  %v1202_v23 = vrot.slane %v1200_v51, 1  ;;  %v437_v53 = vld [vmem:[%s11502_s14 + $0x170] sm:$0xff]  ;;  %v1377_v1 = vrot.slane %v11908_v28, 2 }
  0xad   : > { %1303 = vrot.lane.b32.xlu1 %v1195_v5, %s11378_s29  ;;  %1301 = vrot.lane.b32.xlu0 %v1191_v47, %s11378_s29  ;;  %v1543_v20 = vsel %vm1535_vm7, %v1478_v30, %v11880_v52  ;;  %v1541_v21 = vsel %vm1535_vm7, %v1476_v15, %v11859_v35  ;;  %v1008_v35 = vsel %vm963_vm2, %v1005_v17, %v1007_v10  ;;  %v783_v47 = vshll.u32 %v11959_v12, 16 }
  0xae   : > { %v1204_v45 = vor.u32 %v1203_v18, %v1202_v23  ;;  %v790_v55 = vrot.slane %v788_v42, 1  ;;  %v1199_v51 = vsel %vm1100_vm4, %v11889_v7, %v1198_v44  ;;  %v478_v30 = vpack.c.bf16 %v438_v41, %v437_v53  ;;  %v440_v53 = vld [vmem:[%s11502_s14 + $0x188] sm:$0xff] }
  0xaf   : > { %v1276_v9 = vpop.permute.xlu1 %1275  ;;  %v1274_v8 = vpop.permute.xlu0 %1273  ;;  %v785_v54 = vrot.slane %v783_v47, 1  ;;  %v800_v15 = vshrl.u32 %v11973_v46, 16  ;;  %v1376_v7 = vsel %vm1333_vm1, %v1373_v27, %v1375_v24  ;;  %v1009_v23 = vrot.slane %v11959_v12, 1 }
  0xb0   : > { %v1608_v38 = vsel %vm1600_vm8, %v1543_v20, %v1276_v9  ;;  %v1606_v11 = vsel %vm1600_vm8, %v1541_v21, %v1274_v8  ;;  %v1205_v57 = vsel %vm1100_vm4, %v1198_v44, %v1204_v45  ;;  %v1378_v8 = vsel %vm1333_vm1, %v1375_v24, %v1377_v1  ;;  %v439_v24 = vld [vmem:[%s11502_s14 + $0x180] sm:$0xff]  ;;  %v441_v1 = vld [vmem:[%s11502_s14 + $0x190] sm:$0xff] }
  0xb1   : > { %1440 = vrot.lane.b32.xlu1 %v1374_v43, %s11375_s15  ;;  %1438 = vrot.lane.b32.xlu0 %v1372_v56, %s11375_s15  ;;  %v792_v43 = vshrl.u32 %v11954_v13, 16  ;;  %v796_v56 = vshll.u32 %v11973_v46, 16  ;;  %v786_v17 = vor.u32 %v785_v54, %v781_v59  ;;  %v560_v18 = vrot.slane %v478_v30, 7 }
  0xb2   : > { %v1210_v21 = vrot.slane %v788_v42, 2 }
  0xb3   : > { %v1413_v5 = vpop.permute.xlu1 %1412  ;;  %v1411_v29 = vpop.permute.xlu0 %1410  ;;  %v794_v28 = vor.u32 %v792_v43, %v790_v55  ;;  %v11992_v9 = vrot.slane %v796_v56, 1  ;;  %v1209_v20 = vrot.slane %v792_v43, 1  ;;  %v12018_v45 = vsel %vm519_vm0, %v11943_v39, %v560_v18 }
  0xb4   : > { %v1673_v6 = vsel %vm1665_vm9, %v1608_v38, %v1413_v5  ;;  %v1671_v52 = vsel %vm1665_vm9, %v1606_v11, %v1411_v29  ;;  %v1214_v38 = vrot.slane %v796_v56, 2  ;;  %v1206_v29 = vrot.slane %v781_v59, 1 }
  0xb5   : > { %921 = vrot.lane.b32.xlu1 %v780_v26, %s11377_s25  ;;  %919 = vrot.lane.b32.xlu0 %v773_v40, %s11377_s25  ;;  %v1010_v40 = vrot.slane %v11954_v13, 1  ;;  %v1213_v26 = vrot.slane %v800_v15, 1  ;;  %v799_v5 = vsel %vm610_vm3, %v794_v28, %v11992_v9  ;;  %v12038_v54 = vsel %vm519_vm0, %v560_v18, 0  ;;  %v444_v18 = vld [vmem:[%s11502_s14 + $0x1a8] sm:$0xff] }
  0xb6   : > { %11078 = vmatprep.mubr.msk.bf16.mxu0 %vm1749_vm10, %v1671_v52  ;;  %v1380_v28 = vrot.slane %v11954_v13, 2 }
  0xb7   : > { %11079 = vmatmul.mubr.msk.bf16.gmra.mrb[4].mxu0 %vm1749_vm10, %v1673_v6  ;;  %v894_v48 = vpop.permute.xlu1 %893  ;;  %v892_v36 = vpop.permute.xlu0 %891  ;;  %v12026_v41 = vor.u32 %v1214_v38, %v1213_v26  ;;  %v1013_v39 = vsel %vm963_vm2, %v1010_v40, %v1012_v14  ;;  %v1011_v43 = vsel %vm963_vm2, %v1009_v23, %v1010_v40  ;;  %v811_v40 = vshll.u32 %v12038_v54, 16  ;;  %v443_v23 = vld [vmem:[%s11502_s14 + $0x1a0] sm:$0xff] }
  0xb8   : > { %v1482_v11 = vsel %vm1470_vm6, %v11575_v22, %v894_v48  ;;  %v1480_v27 = vsel %vm1470_vm6, %v11578_v25, %v892_v36  ;;  %v791_v22 = vsel %vm610_vm3, %v786_v17, %v790_v55  ;;  %v442_v55 = vld [vmem:[%s11502_s14 + $0x198] sm:$0xff]  ;;  %v802_v26 = vor.u32 %v800_v15, %v11992_v9 }
  0xb9   : > { %1074 = vrot.lane.b32.xlu1 %v1008_v35, %s11376_s16  ;;  %1072 = vrot.lane.b32.xlu0 %v1006_v37, %s11376_s16  ;;  %v1207_v35 = vrot.slane %v783_v47, 2  ;;  %v1211_v47 = vor.u32 %v1210_v21, %v1209_v20  ;;  %v1221_v38 = vshrl.u32 %v12038_v54, 16  ;;  %v1014_v15 = vrot.slane %v12018_v45, 1 }
  0xba   : > { %v1016_v9 = vrot.slane %v12038_v54, 1 }
  0xbb   : > { %v1047_v62 = vpop.permute.xlu1 %1046  ;;  %v1045_v2 = vpop.permute.xlu0 %1044  ;;  %v1208_v56 = vor.u32 %v1207_v35, %v1206_v29  ;;  %v1216_v30 = vsel %vm1100_vm4, %v1211_v47, %v12026_v41 }
  0xbc   : > { %v1547_v6 = vsel %vm1535_vm7, %v1482_v11, %v1047_v62  ;;  %v1545_v52 = vsel %vm1535_vm7, %v1480_v27, %v1045_v2  ;;  %v479_v62 = vpack.c.bf16 %v440_v53, %v439_v24  ;;  %v480_v2 = vpack.c.bf16 %v442_v55, %v441_v1 }
  0xbd   : > { %1307 = vrot.lane.b32.xlu1 %v1205_v57, %s11378_s29  ;;  %1305 = vrot.lane.b32.xlu0 %v1199_v51, %s11378_s29  ;;  %v804_v57 = vshll.u32 %v12018_v45, 16  ;;  %v1212_v17 = vsel %vm1100_vm4, %v1208_v56, %v1211_v47  ;;  %v481_v11 = vpack.c.bf16 %v444_v18, %v443_v23  ;;  %v1224_v53 = vrot.slane %v811_v40, 2 }
  0xbe   : > { %v562_v27 = vrot.slane %v479_v62, 7  ;;  %v1384_v18 = vrot.slane %v12018_v45, 2 }
  0xbf   : > { %v1280_v10 = vpop.permute.xlu1 %1279  ;;  %v1278_v0 = vpop.permute.xlu0 %1277 }
  0xc0   : > { %v1612_v25 = vsel %vm1600_vm8, %v1547_v6, %v1280_v10  ;;  %v1610_v37 = vsel %vm1600_vm8, %v1545_v52, %v1278_v0  ;;  %v806_v10 = vrot.slane %v804_v57, 1  ;;  %v808_v0 = vshrl.u32 %v12018_v45, 16 }
  0xc1   : > { %1444 = vrot.lane.b32.xlu1 %v1378_v8, %s11375_s15  ;;  %1442 = vrot.lane.b32.xlu0 %v1376_v7, %s11375_s15  ;;  %v1382_v8 = vrot.slane %v11973_v46, 2  ;;  %v1379_v7 = vrot.slane %v11959_v12, 2 }
  0xc2   : > { %v810_v52 = vor.u32 %v808_v0, %v806_v10 }
  0xc3   : > { %v1417_v42 = vpop.permute.xlu1 %1416  ;;  %v1415_v44 = vpop.permute.xlu0 %1414  ;;  %v1383_v29 = vsel %vm1333_vm1, %v1380_v28, %v1382_v8  ;;  %v1381_v6 = vsel %vm1333_vm1, %v1379_v7, %v1380_v28 }
  0xc4   : > { %v1677_v48 = vsel %vm1665_vm9, %v1612_v25, %v1417_v42  ;;  %v1675_v36 = vsel %vm1665_vm9, %v1610_v37, %v1415_v44  ;;  %v807_v37 = vsel %vm610_vm3, %v802_v26, %v806_v10  ;;  %v1217_v42 = vrot.slane %v808_v0, 1 }
  0xc5   : > { %925 = vrot.lane.b32.xlu1 %v799_v5, %s11377_s25  ;;  %923 = vrot.lane.b32.xlu0 %v791_v22, %s11377_s25  ;;  %v563_v5 = vrot.slane %v480_v2, 7  ;;  %v813_v22 = vrot.slane %v811_v40, 1  ;;  %v1218_v44 = vrot.slane %v804_v57, 2  ;;  %v1017_v2 = vsel %vm963_vm2, %v1014_v15, %v1016_v9 }
  0xc6   : > { %11082 = vmatprep.mubr.msk.bf16.mxu0 %vm1749_vm10, %v1675_v36 }
  0xc7   : > { %11083 = vmatmul.mubr.msk.bf16.gmra.mrb[8].mxu0 %vm1749_vm10, %v1677_v48  ;;  %v898_v51 = vpop.permute.xlu1 %897  ;;  %v896_v59 = vpop.permute.xlu0 %895  ;;  %v1223_v48 = vrot.slane %v1221_v38, 1  ;;  %v12072_v47 = vsel %vm519_vm0, %v562_v27, %v563_v5  ;;  %v1219_v7 = vor.u32 %v1218_v44, %v1217_v42 }
  0xc8   : > { %v1486_v36 = vsel %vm1470_vm6, %v11615_v63, %v898_v51  ;;  %v1484_v24 = vsel %vm1470_vm6, %v11587_v33, %v896_v59  ;;  %v12082_v51 = vsel %vm519_vm0, 0, %v562_v27  ;;  %v822_v28 = vshll.u32 %v12072_v47, 16 }
  0xc9   : > { %1078 = vrot.lane.b32.xlu1 %v1013_v39, %s11376_s16  ;;  %1076 = vrot.lane.b32.xlu0 %v1011_v43, %s11376_s16  ;;  %v814_v39 = vsel %vm610_vm3, %v810_v52, %v813_v22  ;;  %v12077_v43 = vrot.slane %v481_v11, 7  ;;  %v817_v0 = vshll.u32 %v12082_v51, 16  ;;  %v826_v38 = vshrl.u32 %v12072_v47, 16 }
  0xca   : > { %v824_v26 = vrot.slane %v822_v28, 1 }
  0xcb   : > { %v1051_v20 = vpop.permute.xlu1 %1050  ;;  %v1049_v21 = vpop.permute.xlu0 %1048  ;;  %v12096_v10 = vsel %vm519_vm0, %v563_v5, %v12077_v43  ;;  %v1220_v5 = vsel %vm1100_vm4, %v12026_v41, %v1219_v7  ;;  %v1385_v41 = vsel %vm1333_vm1, %v1382_v8, %v1384_v18 }
  0xcc   : > { %v1551_v1 = vsel %vm1535_vm7, %v1486_v36, %v1051_v20  ;;  %v1549_v55 = vsel %vm1535_vm7, %v1484_v24, %v1049_v21  ;;  %v445_v20 = vld [vmem:[%s11502_s14 + $0x1b0] sm:$0xff]  ;;  %v1386_v21 = vrot.slane %v12038_v54, 2  ;;  %v830_v11 = vshll.u32 %v12096_v10, 16 }
  0xcd   : > { %1311 = vrot.lane.b32.xlu1 %v1216_v30, %s11378_s29  ;;  %1309 = vrot.lane.b32.xlu0 %v1212_v17, %s11378_s29  ;;  %v1015_v30 = vsel %vm963_vm2, %v1012_v14, %v1014_v15  ;;  %v1225_v17 = vor.u32 %v1224_v53, %v1223_v48  ;;  %v446_v14 = vld [vmem:[%s11502_s14 + $0x1b8] sm:$0xff]  ;;  %v828_v54 = vor.u32 %v826_v38, %v824_v26  ;;  %v1019_v48 = vrot.slane %v12072_v47, 1 }
  0xce   : > { %v12115_v15 = vrot.slane %v830_v11, 1  ;;  %v1387_v9 = vsel %vm1333_vm1, %v1384_v18, %v1386_v21  ;;  %v1021_v36 = vrot.slane %v12096_v10, 1  ;;  %v1018_v24 = vrot.slane %v12082_v51, 1 }
  0xcf   : > { %v1284_v35 = vpop.permute.xlu1 %1283  ;;  %v1282_v25 = vpop.permute.xlu0 %1281  ;;  %v1226_v27 = vsel %vm1100_vm4, %v1219_v7, %v1225_v17 }
  0xd0   : > { %v1616_v63 = vsel %vm1600_vm8, %v1551_v1, %v1284_v35  ;;  %v1614_v33 = vsel %vm1600_vm8, %v1549_v55, %v1282_v25  ;;  %v482_v35 = vpack.c.bf16 %v446_v14, %v445_v20  ;;  %v834_v25 = vshrl.u32 %v12096_v10, 16  ;;  %v447_v20 = vld [vmem:[%s11502_s14 + $0x1c0] sm:$0xff] }
  0xd1   : > { %1448 = vrot.lane.b32.xlu1 %v1383_v29, %s11375_s15  ;;  %1446 = vrot.lane.b32.xlu0 %v1381_v6, %s11375_s15  ;;  %v815_v29 = vshrl.u32 %v12082_v51, 16  ;;  %v819_v6 = vrot.slane %v817_v0, 1  ;;  %v1230_v1 = vrot.slane %v826_v38, 1  ;;  %v1231_v55 = vrot.slane %v822_v28, 2  ;;  %v448_v38 = vld [vmem:[%s11502_s14 + $0x1c8] sm:$0xff] }
  0xd2   : > { %v567_v53 = vrot.slane %v482_v35, 7  ;;  %v1020_v14 = vsel %vm963_vm2, %v1018_v24, %v1019_v48  ;;  %v451_v35 = vld [vmem:[%s11502_s14 + $0x1e0] sm:$0xff] }
  0xd3   : > { %v1421_v56 = vpop.permute.xlu1 %1420  ;;  %v1419_v57 = vpop.permute.xlu0 %1418 }
  0xd4   : > { %v1681_v59 = vsel %vm1665_vm9, %v1616_v63, %v1421_v56  ;;  %v1679_v62 = vsel %vm1665_vm9, %v1614_v33, %v1419_v57  ;;  %v1235_v63 = vrot.slane %v830_v11, 2  ;;  %v833_v56 = vsel %vm610_vm3, %v828_v54, %v12115_v15  ;;  %v449_v11 = vld [vmem:[%s11502_s14 + $0x1d0] sm:$0xff]  ;;  %v452_v54 = vld [vmem:[%s11502_s14 + $0x1e8] sm:$0xff] }
  0xd5   : > { %929 = vrot.lane.b32.xlu1 %v814_v39, %s11377_s25  ;;  %927 = vrot.lane.b32.xlu0 %v807_v37, %s11377_s25  ;;  %v820_v37 = vor.u32 %v819_v6, %v815_v29  ;;  %v1234_v39 = vrot.slane %v834_v25, 1  ;;  %v1227_v57 = vrot.slane %v815_v29, 1  ;;  %v12141_v17 = vsel %vm519_vm0, %v12077_v43, %v567_v53 }
  0xd6   : > { %11086 = vmatprep.mubr.msk.bf16.mxu0 %vm1749_vm10, %v1679_v62  ;;  %v1022_v43 = vsel %vm963_vm2, %v1019_v48, %v1021_v36  ;;  %v12161_v6 = vsel %vm519_vm0, %v567_v53, 0  ;;  %v842_v24 = vshrl.u32 %v12141_v17, 16 }
  0xd7   : > { %11087 = vmatmul.mubr.msk.bf16.gmra.mrb[12].mxu0 %vm1749_vm10, %v1681_v59  ;;  %v902_v40 = vpop.permute.xlu1 %901  ;;  %v900_v23 = vpop.permute.xlu0 %899  ;;  %v12147_v18 = vor.u32 %v1235_v63, %v1234_v39  ;;  %v845_v53 = vshll.u32 %v12161_v6, 16  ;;  %v485_v39 = vpack.c.bf16 %v452_v54, %v451_v35  ;;  %v1242_v63 = vshrl.u32 %v12161_v6, 16 }
  0xd8   : > { %v1490_v33 = vsel %vm1470_vm6, %v11657_v34, %v902_v40  ;;  %v1488_v8 = vsel %vm1470_vm6, %v11660_v50, %v900_v23 }
  0xd9   : > { %1082 = vrot.lane.b32.xlu1 %v1017_v2, %s11376_s16  ;;  %1080 = vrot.lane.b32.xlu0 %v1015_v30, %s11376_s16  ;;  %v825_v2 = vsel %vm610_vm3, %v820_v37, %v824_v26  ;;  %v1228_v30 = vrot.slane %v817_v0, 2  ;;  %v1232_v0 = vor.u32 %v1231_v55, %v1230_v1  ;;  %v838_v26 = vshll.u32 %v12141_v17, 16 }
  0xda   : > { %v483_v37 = vpack.c.bf16 %v448_v38, %v447_v20 }
  0xdb   : > { %v1055_v52 = vpop.permute.xlu1 %1054  ;;  %v1053_v22 = vpop.permute.xlu0 %1052  ;;  %v1229_v21 = vor.u32 %v1228_v30, %v1227_v57  ;;  %v840_v48 = vrot.slane %v838_v26, 1 }
  0xdc   : > { %v1555_v59 = vsel %vm1535_vm7, %v1490_v33, %v1055_v52  ;;  %v1553_v62 = vsel %vm1535_vm7, %v1488_v8, %v1053_v22  ;;  %v1389_v52 = vrot.slane %v12072_v47, 2  ;;  %v1391_v22 = vrot.slane %v12096_v10, 2 }
  0xdd   : > { %1315 = vrot.lane.b32.xlu1 %v1226_v27, %s11378_s29  ;;  %1313 = vrot.lane.b32.xlu0 %v1220_v5, %s11378_s29  ;;  %v450_v27 = vld [vmem:[%s11502_s14 + $0x1d8] sm:$0xff]  ;;  %v836_v33 = vor.u32 %v834_v25, %v12115_v15  ;;  %v569_v8 = vrot.slane %v483_v37, 7  ;;  %v1239_v25 = vrot.slane %v838_v26, 2  ;;  %v1244_v15 = vrot.slane %v1242_v63, 1 }
  0xde   : > { %v1392_v57 = vsel %vm1333_vm1, %v1389_v52, %v1391_v22 }
  0xdf   : > { %v1288_v42 = vpop.permute.xlu1 %1287  ;;  %v1286_v44 = vpop.permute.xlu0 %1285 }
  0xe0   : > { %v1620_v34 = vsel %vm1600_vm8, %v1555_v59, %v1288_v42  ;;  %v1618_v50 = vsel %vm1600_vm8, %v1553_v62, %v1286_v44  ;;  %v484_v42 = vpack.c.bf16 %v450_v27, %v449_v11  ;;  %v1233_v44 = vsel %vm1100_vm4, %v1229_v21, %v1232_v0 }
  0xe1   : > { %1452 = vrot.lane.b32.xlu1 %v1387_v9, %s11375_s15  ;;  %1450 = vrot.lane.b32.xlu0 %v1385_v41, %s11375_s15  ;;  %v1237_v9 = vsel %vm1100_vm4, %v1232_v0, %v12147_v18  ;;  %v1388_v41 = vrot.slane %v12082_v51, 2  ;;  %v844_v62 = vor.u32 %v842_v24, %v840_v48  ;;  %v454_v0 = vld [vmem:[%s11502_s14 + $0x1f8] sm:$0xff]  ;;  %v841_v27 = vsel %vm610_vm3, %v836_v33, %v840_v48 }
  0xe3   : > { %v1425_v28 = vpop.permute.xlu1 %1424  ;;  %v1423_v7 = vpop.permute.xlu0 %1422  ;;  %v1390_v59 = vsel %vm1333_vm1, %v1388_v41, %v1389_v52  ;;  %v12205_v52 = vsel %vm519_vm0, 0, %v569_v8 }
  0xe4   : > { %v1685_v40 = vsel %vm1665_vm9, %v1620_v34, %v1425_v28  ;;  %v1683_v23 = vsel %vm1665_vm9, %v1618_v50, %v1423_v7  ;;  %v1023_v50 = vrot.slane %v12141_v17, 1  ;;  %v572_v28 = vrot.slane %v485_v39, 7 }
  0xe5   : > { %933 = vrot.lane.b32.xlu1 %v833_v56, %s11377_s25  ;;  %931 = vrot.lane.b32.xlu0 %v825_v2, %s11377_s25  ;;  %v570_v56 = vrot.slane %v484_v42, 7  ;;  %v847_v2 = vrot.slane %v845_v53, 1  ;;  %v1025_v7 = vrot.slane %v12161_v6, 1 }
  0xe6   : > { %11090 = vmatprep.mubr.msk.bf16.mxu0 %vm1749_vm10, %v1683_v23  ;;  %v453_v23 = vld [vmem:[%s11502_s14 + $0x1f0] sm:$0xff]  ;;  %v1024_v37 = vsel %vm963_vm2, %v1021_v36, %v1023_v50  ;;  %s11385_s14 = smov 48  }
  0xe7   : > { %11091 = vmatmul.mubr.msk.bf16.gmra.mrb[16].mxu0 %vm1749_vm10, %v1685_v40  ;;  %v906_v5 = vpop.permute.xlu1 %905  ;;  %v904_v29 = vpop.permute.xlu0 %903  ;;  %v1238_v40 = vrot.slane %v842_v24, 1  ;;  %v12196_v21 = vsel %vm519_vm0, %v569_v8, %v570_v56  ;;  %v848_v11 = vsel %vm610_vm3, %v844_v62, %v847_v2  ;;  %v486_v35 = vpack.c.bf16 %v454_v0, %v453_v23 }
  0xe8   : > { %v1494_v20 = vsel %vm1470_vm6, %v11703_v32, %v906_v5  ;;  %v856_v41 = vshll.u32 %v12196_v21, 16  ;;  %v12216_v42 = vsel %vm519_vm0, %v570_v56, %v572_v28  ;;  %v860_v33 = vshrl.u32 %v12196_v21, 16 }
  0xe9   : > { %1086 = vrot.lane.b32.xlu1 %v1022_v43, %s11376_s16  ;;  %1084 = vrot.lane.b32.xlu0 %v1020_v14, %s11376_s16  ;;  %v1492_v43 = vsel %vm1470_vm6, %v11671_v58, %v904_v29  ;;  %v1245_v14 = vrot.slane %v845_v53, 2  ;;  %v1240_v48 = vor.u32 %v1239_v25, %v1238_v40  ;;  %v851_v53 = vshll.u32 %v12205_v52, 16 }
  0xea   : > { %v574_v39 = vrot.slane %v486_v35, 7  ;;  %v858_v63 = vrot.slane %v856_v41, 1  ;;  %v864_v36 = vshll.u32 %v12216_v42, 16  ;;  %v1393_v8 = vrot.slane %v12141_v17, 2 }
  0xeb   : > { %v1059_v1 = vpop.permute.xlu1 %1058  ;;  %v1057_v55 = vpop.permute.xlu0 %1056  ;;  %v1246_v24 = vor.u32 %v1245_v14, %v1244_v15  ;;  %v1395_v56 = vrot.slane %v12161_v6, 2  ;;  %v849_v62 = vshrl.u32 %v12205_v52, 16  ;;  %v853_v2 = vrot.slane %v851_v53, 1 }
  0xec   : > { %v1559_v38 = vsel %vm1535_vm7, %v1494_v20, %v1059_v1  ;;  %v1557_v26 = vsel %vm1535_vm7, %v1492_v43, %v1057_v55  ;;  %v862_v40 = vor.u32 %v860_v33, %v858_v63  ;;  %v866_v25 = vrot.slane %v864_v36, 1 }
  0xed   : > { %1319 = vrot.lane.b32.xlu1 %v1237_v9, %s11378_s29  ;;  %1317 = vrot.lane.b32.xlu0 %v1233_v44, %s11378_s29  ;;  %v1026_v44 = vsel %vm963_vm2, %v1023_v50, %v1025_v7  ;;  %v12233_v50 = vsel %vm519_vm0, %v572_v28, %v574_v39  ;;  %v868_v7 = vshrl.u32 %v12216_v42, 16  ;;  %v1394_v6 = vsel %vm1333_vm1, %v1391_v22, %v1393_v8 }
  0xee   : > { %v854_v15 = vor.u32 %v853_v2, %v849_v62  ;;  %v872_v28 = vshll.u32 %v12233_v50, 16  ;;  %v1027_v43 = vrot.slane %v12205_v52, 1  ;;  %v867_v14 = vsel %vm610_vm3, %v862_v40, %v866_v25 }
  0xef   : > { %v1292_v30 = vpop.permute.xlu1 %1291  ;;  %v1290_v34 = vpop.permute.xlu0 %1289  ;;  %v870_v20 = vor.u32 %v868_v7, %v866_v25  ;;  %v1256_v40 = vrot.slane %v864_v36, 2 }
  0xf0   : > { %v1624_v32 = vsel %vm1600_vm8, %v1559_v38, %v1292_v30  ;;  %v1622_v58 = vsel %vm1600_vm8, %v1557_v26, %v1290_v34  ;;  %v1028_v38 = vrot.slane %v12196_v21, 1  ;;  %v1248_v26 = vrot.slane %v849_v62, 1 }
  0xf1   : > { %1456 = vrot.lane.b32.xlu1 %v1392_v57, %s11375_s15  ;;  %1454 = vrot.lane.b32.xlu0 %v1390_v59, %s11375_s15  ;;  %v1247_v57 = vsel %vm1100_vm4, %v1240_v48, %v1246_v24  ;;  %v1241_v59 = vsel %vm1100_vm4, %v12147_v18, %v1240_v48  ;;  %v1396_v18 = vsel %vm1333_vm1, %v1393_v8, %v1395_v56  ;;  %v1032_v62 = vrot.slane %v12233_v50, 1 }
  0xf2   : > { %v859_v35 = vsel %vm610_vm3, %v854_v15, %v858_v63  ;;  %v1029_v63 = vsel %vm963_vm2, %v1027_v43, %v1028_v38  ;;  %v1398_v15 = vrot.slane %v12196_v21, 2 }
  0xf3   : > { %v1429_v5 = vpop.permute.xlu1 %1428  ;;  %v1427_v29 = vpop.permute.xlu0 %1426 }
  0xf4   : > { %v1689_v54 = vsel %vm1665_vm9, %v1624_v32, %v1429_v5  ;;  %v1687_v9 = vsel %vm1665_vm9, %v1622_v58, %v1427_v29  ;;  %v1251_v32 = vrot.slane %v860_v33, 1  ;;  %v1252_v58 = vrot.slane %v856_v41, 2 }
  0xf5   : > { %937 = vrot.lane.b32.xlu1 %v848_v11, %s11377_s25  ;;  %935 = vrot.lane.b32.xlu0 %v841_v27, %s11377_s25  ;;  %v1249_v11 = vrot.slane %v851_v53, 2 }
  0xf6   : > { %11094 = vmatprep.mubr.msk.bf16.mxu0 %vm1749_vm10, %v1687_v9  ;;  %v1253_v53 = vor.u32 %v1252_v58, %v1251_v32 }
  0xf7   : > { %11095 = vmatmul.mubr.msk.bf16.gmra.mrb[20].mxu0 %vm1749_vm10, %v1689_v54  ;;  %v910_v1 = vpop.permute.xlu1 %909  ;;  %v908_v55 = vpop.permute.xlu0 %907  ;;  %v874_v54 = vrot.slane %v872_v28, 1  ;;  %v1250_v24 = vor.u32 %v1249_v11, %v1248_v26 }
  0xf8   : > { %v1498_v27 = vsel %vm1470_vm6, %v11746_v16, %v910_v1  ;;  %v1496_v22 = vsel %vm1470_vm6, %v11749_v19, %v908_v55  ;;  %v12260_v19 = vsel %vm519_vm0, %v574_v39, 0  ;;  %v1030_v1 = vrot.slane %v12216_v42, 1 }
  0xf9   : > { %1090 = vrot.lane.b32.xlu1 %v1026_v44, %s11376_s16  ;;  %1088 = vrot.lane.b32.xlu0 %v1024_v37, %s11376_s16  ;;  %v875_v55 = vsel %vm610_vm3, %v870_v20, %v874_v54  ;;  %v876_v39 = vshrl.u32 %v12233_v50, 16  ;;  %v879_v33 = vshll.u32 %v12260_v19, 16 }
  0xfa   : > { %v1033_v20 = vsel %vm963_vm2, %v1030_v1, %v1032_v62 }
  0xfb   : > { %v1063_v30 = vpop.permute.xlu1 %1062  ;;  %v1061_v34 = vpop.permute.xlu0 %1060  ;;  %v878_v2 = vor.u32 %v876_v39, %v874_v54  ;;  %v1266_v32 = vrot.slane %v879_v33, 2 }
  0xfc   : > { %v1563_v5 = vsel %vm1535_vm7, %v1498_v27, %v1063_v30  ;;  %v1561_v29 = vsel %vm1535_vm7, %v1496_v22, %v1061_v34  ;;  %v881_v30 = vrot.slane %v879_v33, 1  ;;  %v1255_v34 = vrot.slane %v868_v7, 1 }
  0xfd   : > { %1323 = vrot.lane.b32.xlu1 %v1247_v57, %s11378_s29  ;;  %1321 = vrot.lane.b32.xlu0 %v1241_v59, %s11378_s29  ;;  %v1254_v57 = vsel %vm1100_vm4, %v1250_v24, %v1253_v53  ;;  %v1031_v59 = vsel %vm963_vm2, %v1028_v38, %v1030_v1  ;;  %v1034_v22 = vrot.slane %v12260_v19, 1  ;;  %v1400_v24 = vrot.slane %v12216_v42, 2 }
  0xfe   : > { %v882_v43 = vsel %vm610_vm3, %v878_v2, %v881_v30  ;;  %v1257_v7 = vor.u32 %v1256_v40, %v1255_v34  ;;  %v1404_v33 = vrot.slane %v12260_v19, 2 }
  0xff   : > { %v1296_v23 = vpop.permute.xlu1 %1295  ;;  %v1294_v0 = vpop.permute.xlu0 %1293 }
 0x100   : > { %v1628_v9 = vsel %vm1600_vm8, %v1563_v5, %v1296_v23  ;;  %v1626_v16 = vsel %vm1600_vm8, %v1561_v29, %v1294_v0  ;;  %v1259_v23 = vrot.slane %v876_v39, 1  ;;  %v1260_v0 = vrot.slane %v872_v28, 2 }
 0x101   : > { %1460 = vrot.lane.b32.xlu1 %v1396_v18, %s11375_s15  ;;  %1458 = vrot.lane.b32.xlu0 %v1394_v6, %s11375_s15  ;;  %v1397_v6 = vrot.slane %v12205_v52, 2  ;;  %v1258_v29 = vsel %vm1100_vm4, %v1253_v53, %v1257_v7  ;;  %v1402_v39 = vrot.slane %v12233_v50, 2 }
 0x102   : > { %v1261_v11 = vor.u32 %v1260_v0, %v1259_v23 }
 0x103   : > { %v1433_v37 = vpop.permute.xlu1 %1432  ;;  %v1431_v44 = vpop.permute.xlu0 %1430  ;;  %v1399_v26 = vsel %vm1333_vm1, %v1397_v6, %v1398_v15 }
 0x104   : > { %v1693_v48 = vsel %vm1665_vm9, %v1628_v9, %v1433_v37  ;;  %v1691_v41 = vsel %vm1665_vm9, %v1626_v16, %v1431_v44  ;;  %v1262_v44 = vsel %vm1100_vm4, %v1257_v7, %v1261_v11 }
 0x105   : > { %941 = vrot.lane.b32.xlu1 %v867_v14, %s11377_s25  ;;  %939 = vrot.lane.b32.xlu0 %v859_v35, %s11377_s25  ;;  %v1263_v14 = vshrl.u32 %v12260_v19, 16 }
 0x106   : > { %11098 = vmatprep.mubr.msk.bf16.mxu0 %vm1749_vm10, %v1691_v41 }
 0x107   : > { %11099 = vmatmul.mubr.msk.bf16.gmra.mrb[24].mxu0 %vm1749_vm10, %v1693_v48  ;;  %v914_v8 = vpop.permute.xlu1 %913  ;;  %v912_v56 = vpop.permute.xlu0 %911  ;;  %v1265_v35 = vrot.slane %v1263_v14, 1  ;;  %v1035_v48 = vsel %vm963_vm2, %v1032_v62, %v1034_v22 }
 0x108   : > { %v1502_v27 = vsel %vm1470_vm6, %v11787_v3, %v914_v8  ;;  %v1500_v28 = vsel %vm1470_vm6, %v11760_v31, %v912_v56 }
 0x109   : > { %943 = vrot.lane.b32.xlu1 %v875_v55, %s11377_s25  ;;  %1092 = vrot.lane.b32.xlu0 %v1029_v63, %s11376_s16  ;;  %v1267_v41 = vor.u32 %v1266_v32, %v1265_v35  ;;  %v1401_v63 = vsel %vm1333_vm1, %v1398_v15, %v1400_v24 }
 0x10b   : > { %v1067_v25 = vpop.permute.xlu1 %1066  ;;  %v1065_v18 = vpop.permute.xlu0 %1064  ;;  %v1268_v55 = vsel %vm1100_vm4, %v1261_v11, %v1267_v41  ;;  %vm6152_vm4 = vcmask 1041409  }
 0x10c   : > { %v1567_v58 = vsel %vm1535_vm7, %v1502_v27, %v1067_v25  ;;  %v1565_v5 = vsel %vm1535_vm7, %v1500_v28, %v1065_v18 }
 0x10d   : > { %1325 = vrot.lane.b32.xlu1 %v1254_v57, %s11378_s29  ;;  %1094 = vrot.lane.b32.xlu0 %v1031_v59, %s11376_s16  ;;  %v1405_v57 = vsel %vm1333_vm1, %v1402_v39, %v1404_v33  ;;  %v1403_v59 = vsel %vm1333_vm1, %v1400_v24, %v1402_v39  ;;  %vm6148_vm1 = vcmask 1046534  }
 0x10f   : > { %v1300_v36 = vpop.permute.xlu1 %1299  ;;  %v1298_v38 = vpop.permute.xlu0 %1297 }
 0x110   : > { %v1632_v54 = vsel %vm1600_vm8, %v1567_v58, %v1300_v36  ;;  %v1630_v3 = vsel %vm1600_vm8, %v1565_v5, %v1298_v38 }
 0x111   : > { %1096 = vrot.lane.b32.xlu1 %v1033_v20, %s11376_s16  ;;  %945 = vrot.lane.b32.xlu0 %v882_v43, %s11377_s25  ;;  %s11388_s25 = smov 112  }
 0x113   : > { %v1437_v9 = vpop.permute.xlu1 %1436  ;;  %v1435_v31 = vpop.permute.xlu0 %1434 }
 0x114   : > { %v1697_v16 = vsel %vm1665_vm9, %v1632_v54, %v1437_v9  ;;  %v1695_v37 = vsel %vm1665_vm9, %v1630_v3, %v1435_v31 }
 0x115   : > { %1462 = vrot.lane.b32.xlu1 %v1399_v26, %s11375_s15  ;;  %1327 = vrot.lane.b32.xlu0 %v1258_v29, %s11378_s29 }
 0x116   : > { %11102 = vmatprep.mubr.msk.bf16.mxu0 %vm1749_vm10, %v1695_v37 }
 0x117   : > { %11103 = vmatmul.mubr.msk.bf16.gmra.mrb[28].mxu0 %vm1749_vm10, %v1697_v16  ;;  %v918_v53 = vpop.permute.xlu1 %917  ;;  %v916_v1 = vpop.permute.xlu0 %915 }
 0x118   : > { %v1506_v30 = vsel %vm1470_vm6, %v11829_v60, %v918_v53  ;;  %v1504_v34 = vsel %vm1470_vm6, %v11832_v49, %v916_v1 }
 0x119   : > { %1329 = vrot.lane.b32.xlu1 %v1262_v44, %s11378_s29  ;;  %1098 = vrot.lane.b32.xlu0 %v1035_v48, %s11376_s16 }
 0x11b   : > { %v1071_v8 = vpop.permute.xlu1 %1070  ;;  %v1069_v56 = vpop.permute.xlu0 %1068 }
 0x11c   : > { %v1571_v19 = vsel %vm1535_vm7, %v1506_v30, %v1071_v8  ;;  %v1569_v40 = vsel %vm1535_vm7, %v1504_v34, %v1069_v56 }
 0x11d   : > { %1331 = vrot.lane.b32.xlu1 %v1268_v55, %s11378_s29  ;;  %1464 = vrot.lane.b32.xlu0 %v1401_v63, %s11375_s15 }
 0x11f   : > { %v1304_v62 = vpop.permute.xlu1 %1303  ;;  %v1302_v2 = vpop.permute.xlu0 %1301 }
 0x120   : > { %v1636_v25 = vsel %vm1600_vm8, %v1571_v19, %v1304_v62  ;;  %v1634_v18 = vsel %vm1600_vm8, %v1569_v40, %v1302_v2 }
 0x121   : > { %1468 = vrot.lane.b32.xlu1 %v1405_v57, %s11375_s15  ;;  %1466 = vrot.lane.b32.xlu0 %v1403_v59, %s11375_s15 }
 0x123   : > { %v1441_v6 = vpop.permute.xlu1 %1440  ;;  %v1439_v15 = vpop.permute.xlu0 %1438 }
 0x124   : > { %v1701_v23 = vsel %vm1665_vm9, %v1636_v25, %v1441_v6  ;;  %v1699_v60 = vsel %vm1665_vm9, %v1634_v18, %v1439_v15 }
 0x125   : > { %11106 = vmatprep.mubr.msk.bf16.mxu0 %vm1749_vm10, %v1699_v60 }
 0x126   : > { %11107 = vmatmul.mubr.msk.bf16.gmra.mrb[32].mxu0 %vm1749_vm10, %v1701_v23 }
 0x127   : > { %v922_v49 = vpop.permute.xlu1 %921  ;;  %v920_v0 = vpop.permute.xlu0 %919 }
 0x128   : > { %v1510_v36 = vsel %vm1470_vm6, %v11883_v61, %v922_v49  ;;  %v1508_v38 = vsel %vm1470_vm6, %v11839_v4, %v920_v0 }
 0x12b   : > { %v1075_v20 = vpop.permute.xlu1 %1074  ;;  %v1073_v43 = vpop.permute.xlu0 %1072 }
 0x12c   : > { %v1575_v26 = vsel %vm1535_vm7, %v1510_v36, %v1075_v20  ;;  %v1573_v11 = vsel %vm1535_vm7, %v1508_v38, %v1073_v43 }
 0x12f   : > { %v1308_v7 = vpop.permute.xlu1 %1307  ;;  %v1306_v14 = vpop.permute.xlu0 %1305 }
 0x130   : > { %v1640_v27 = vsel %vm1600_vm8, %v1575_v26, %v1308_v7  ;;  %v1638_v28 = vsel %vm1600_vm8, %v1573_v11, %v1306_v14 }
 0x133   : > { %v1445_v22 = vpop.permute.xlu1 %1444  ;;  %v1443_v32 = vpop.permute.xlu0 %1442 }
 0x134   : > { %v1705_v58 = vsel %vm1665_vm9, %v1640_v27, %v1445_v22  ;;  %v1703_v5 = vsel %vm1665_vm9, %v1638_v28, %v1443_v32 }
 0x135   : > { %11110 = vmatprep.mubr.msk.bf16.mxu0 %vm1749_vm10, %v1703_v5 }
 0x136   : > { %11111 = vmatmul.mubr.msk.bf16.gmra.mrb[36].mxu0 %vm1749_vm10, %v1705_v58 }
 0x137   : > { %v926_v61 = vpop.permute.xlu1 %925  ;;  %v924_v4 = vpop.permute.xlu0 %923 }
 0x138   : > { %v1514_v9 = vsel %vm1470_vm6, %v11954_v13, %v926_v61  ;;  %v1512_v31 = vsel %vm1470_vm6, %v11959_v12, %v924_v4 }
 0x13b   : > { %v1079_v29 = vpop.permute.xlu1 %1078  ;;  %v1077_v35 = vpop.permute.xlu0 %1076 }
 0x13c   : > { %v1579_v16 = vsel %vm1535_vm7, %v1514_v9, %v1079_v29  ;;  %v1577_v37 = vsel %vm1535_vm7, %v1512_v31, %v1077_v35  ;;  %v11379_v9 = vmov 1983009808  }
 0x13d   : > { %v2237_v31 = vunpack.c.l.s4 %v11379_v9 }
 0x13f   : > { %v1312_v54 = vpop.permute.xlu1 %1311  ;;  %v1310_v3 = vpop.permute.xlu0 %1309 }
 0x140   : > { %v1644_v44 = vsel %vm1600_vm8, %v1579_v16, %v1312_v54  ;;  %v1642_v48 = vsel %vm1600_vm8, %v1577_v37, %v1310_v3  ;;  %v2239_v16 = vlaneseq }
 0x143   : > { %v1449_v41 = vpop.permute.xlu1 %1448  ;;  %v1447_v24 = vpop.permute.xlu0 %1446 }
 0x144   : > { %v1709_v53 = vsel %vm1665_vm9, %v1644_v44, %v1449_v41  ;;  %v1707_v1 = vsel %vm1665_vm9, %v1642_v48, %v1447_v24  ;;  %v2238_v48 = vunpack.c.0.s8 %v2237_v31  ;;  %v12393_v41 = vshrl.u32 %v2239_v16, 7  ;;  %v12398_v24 = vld [vmem:[%s15553_s2] ss:$0 sm:$0xff] }
 0x145   : > { %11114 = vmatprep.mubr.msk.bf16.mxu0 %vm1749_vm10, %v1707_v1 }
 0x146   : > { %11115 = vmatmul.mubr.msk.bf16.gmra.mrb[40].mxu0 %vm1749_vm10, %v1709_v53  ;;  %15578 = vst [vmem:[#allocation5_spill] sm:$0xff] %v12393_v41 }
 0x147   : > { %v930_v13 = vpop.permute.xlu1 %929  ;;  %v928_v12 = vpop.permute.xlu0 %927 }
 0x148   : > { %v1518_v8 = vsel %vm1470_vm6, %v12018_v45, %v930_v13  ;;  %v1516_v56 = vsel %vm1470_vm6, %v11973_v46, %v928_v12  ;;  %v12402_v13 = vsub.s32 %v2238_v48, %v12393_v41 }
 0x14b   : > { %v1083_v55 = vpop.permute.xlu1 %1082  ;;  %v1081_v63 = vpop.permute.xlu0 %1080 }
 0x14c   : > { %v1583_v57 = vsel %vm1535_vm7, %v1518_v8, %v1083_v55  ;;  %v1581_v59 = vsel %vm1535_vm7, %v1516_v56, %v1081_v63 }
 0x14f   : > { %v1316_v39 = vpop.permute.xlu1 %1315  ;;  %v1314_v33 = vpop.permute.xlu0 %1313 }
 0x150   : > { %v1648_v62 = vsel %vm1600_vm8, %v1583_v57, %v1316_v39  ;;  %v1646_v2 = vsel %vm1600_vm8, %v1581_v59, %v1314_v33 }
 0x153   : > { %v1453_v30 = vpop.permute.xlu1 %1452  ;;  %v1451_v34 = vpop.permute.xlu0 %1450 }
 0x154   : > { %v1713_v19 = vsel %vm1665_vm9, %v1648_v62, %v1453_v30  ;;  %v1711_v40 = vsel %vm1665_vm9, %v1646_v2, %v1451_v34 }
 0x155   : > { %11118 = vmatprep.mubr.msk.bf16.mxu0 %vm1749_vm10, %v1711_v40 }
 0x156   : > { %11119 = vmatmul.mubr.msk.bf16.gmra.mrb[44].mxu0 %vm1749_vm10, %v1713_v19 }
 0x157   : > { %v934_v45 = vpop.permute.xlu1 %933  ;;  %v932_v46 = vpop.permute.xlu0 %931 }
 0x158   : > { %v1522_v23 = vsel %vm1470_vm6, %v12072_v47, %v934_v45  ;;  %v1520_v60 = vsel %vm1470_vm6, %v12082_v51, %v932_v46 }
 0x15b   : > { %v1087_v25 = vpop.permute.xlu1 %1086  ;;  %v1085_v18 = vpop.permute.xlu0 %1084 }
 0x15c   : > { %v1587_v49 = vsel %vm1535_vm7, %v1522_v23, %v1087_v25  ;;  %v1585_v0 = vsel %vm1535_vm7, %v1520_v60, %v1085_v18 }
 0x15f   : > { %v1320_v6 = vpop.permute.xlu1 %1319  ;;  %v1318_v15 = vpop.permute.xlu0 %1317 }
 0x160   : > { %v1652_v20 = vsel %vm1600_vm8, %v1587_v49, %v1320_v6  ;;  %v1650_v43 = vsel %vm1600_vm8, %v1585_v0, %v1318_v15 }
 0x163   : > { %v1457_v7 = vpop.permute.xlu1 %1456  ;;  %v1455_v14 = vpop.permute.xlu0 %1454 }
 0x164   : > { %v1717_v36 = vsel %vm1665_vm9, %v1652_v20, %v1457_v7  ;;  %v1715_v38 = vsel %vm1665_vm9, %v1650_v43, %v1455_v14 }
 0x165   : > { %11122 = vmatprep.mubr.msk.bf16.mxu0 %vm1749_vm10, %v1715_v38 }
 0x166   : > { %11123 = vmatmul.mubr.msk.bf16.gmra.mrb[48].mxu0 %vm1749_vm10, %v1717_v36 }
 0x167   : > { %v938_v47 = vpop.permute.xlu1 %937  ;;  %v936_v51 = vpop.permute.xlu0 %935 }
 0x168   : > { %v1526_v22 = vsel %vm1470_vm6, %v12141_v17, %v938_v47  ;;  %v1524_v32 = vsel %vm1470_vm6, %v12096_v10, %v936_v51 }
 0x16b   : > { %v1091_v26 = vpop.permute.xlu1 %1090  ;;  %v1089_v11 = vpop.permute.xlu0 %1088 }
 0x16c   : > { %v1591_v58 = vsel %vm1535_vm7, %v1526_v22, %v1091_v26  ;;  %v1589_v5 = vsel %vm1535_vm7, %v1524_v32, %v1089_v11 }
 0x16f   : > { %v1324_v27 = vpop.permute.xlu1 %1323  ;;  %v1322_v28 = vpop.permute.xlu0 %1321 }
 0x170   : > { %v1656_v61 = vsel %vm1600_vm8, %v1591_v58, %v1324_v27  ;;  %v1654_v4 = vsel %vm1600_vm8, %v1589_v5, %v1322_v28 }
 0x173   : > { %v1461_v29 = vpop.permute.xlu1 %1460  ;;  %v1459_v35 = vpop.permute.xlu0 %1458 }
 0x174   : > { %v1721_v54 = vsel %vm1665_vm9, %v1656_v61, %v1461_v29  ;;  %v1719_v3 = vsel %vm1665_vm9, %v1654_v4, %v1459_v35 }
 0x175   : > { %11126 = vmatprep.mubr.msk.bf16.mxu0 %vm1749_vm10, %v1719_v3 }
 0x176   : > { %11127 = vmatmul.mubr.msk.bf16.gmra.mrb[52].mxu0 %vm1749_vm10, %v1721_v54 }
 0x177   : > { %v942_v17 = vpop.permute.xlu1 %941  ;;  %v940_v10 = vpop.permute.xlu0 %939 }
 0x178   : > { %v1530_v33 = vsel %vm1470_vm6, %v12196_v21, %v942_v17  ;;  %v1528_v8 = vsel %vm1470_vm6, %v12205_v52, %v940_v10 }
 0x17b   : > { %v944_v37 = vpop.permute.xlu1 %943  ;;  %v1093_v44 = vpop.permute.xlu0 %1092 }
 0x17c   : > { %v12412_v2 = vsel %vm1470_vm6, %v12216_v42, %v944_v37  ;;  %v1593_v30 = vsel %vm1535_vm7, %v1528_v8, %v1093_v44 }
 0x17e   : > { %v11076_v53 = vpop.f32.mrb[0].mxu0 }
 0x17f   : > { %v1861_v1 = vadd.f32 %v11076_v53, %v12398_v24  ;;  %v1852_v12 = vpop.f32.mrb[1].mxu0  ;;  %v1326_v55 = vpop.permute.xlu1 %1325 }
 0x180   : > { %v1853_v63 = vadd.f32 %v12398_v24, %v1852_v12  ;;  %v11077_v39 = vpop.f32.mrb[2].mxu0  ;;  %v1095_v57 = vpop.permute.xlu0 %1094  ;;  %v12418_v45 = vsel %vm1600_vm8, %v1593_v30, %v1326_v55 }
 0x181   : > { %v2109_v56 = vmax.f32 %v1861_v1, 0.0  ;;  %v1864_v59 = vadd.f32 %v11077_v39, %v12398_v24  ;;  %v1855_v62 = vpop.f32.mrb[3].mxu0  ;;  %v12424_v18 = vsel %vm1535_vm7, %v1530_v33, %v1095_v57 }
 0x182   : > { %v2107_v34 = vmax.f32 %v1853_v63, 0.0  ;;  %v1856_v19 = vadd.f32 %v12398_v24, %v1855_v62 }
 0x183   : > { %v2269_v40 = vcombine.high %v2109_v56, %v2109_v56  ;;  %v2276_v21 = vrot.slane %v2109_v56, %v12402_v13  ;;  %v12420_v52 = vmax.f32 %v1864_v59, 0.0 }
 0x184   : > { %v2235_v46 = vcombine.high %v2107_v34, %v2107_v34  ;;  %v2242_v25 = vrot.slane %v2107_v34, %v12402_v13  ;;  %v12426_v42 = vmax.f32 %v1856_v19, 0.0 }
 0x185   : > { %v2283_v6 = vrot.slane %v2269_v40, %v12402_v13  ;;  %v2284_v15 = vcombine.high %v2276_v21, %v2276_v21  ;;  %v3636_v23 = vsel %vm3579_vm11, %v2276_v21, -inf  ;;  %v2286_v60 = vcombine.high %v12420_v52, %v12420_v52 }
 0x186   : > { %v3637_v49 = vrot.slane %v3636_v23, 4  ;;  %v2249_v0 = vrot.slane %v2235_v46, %v12402_v13  ;;  %v2250_v20 = vcombine.high %v2242_v25, %v2242_v25  ;;  %v3580_v43 = vsel %vm3579_vm11, %v2242_v25, -inf }
 0x187   : > { %v2285_v7 = vcombine.high %v2283_v6, %v2283_v6  ;;  %v3643_v14 = vsel %vm3579_vm11, %v2284_v15, -inf  ;;  %v3650_v36 = vsel %vm3579_vm11, %v2283_v6, -inf  ;;  %v3581_v38 = vrot.slane %v3580_v43, 4  ;;  %v1097_v15 = vpop.permute.xlu1 %1096 }
 0x188   : > { %v3638_v47 = vmax.f32 %v3636_v23, %v3637_v49  ;;  %v3644_v51 = vrot.slane %v3643_v14, 4  ;;  %v3651_v26 = vrot.slane %v3650_v36, 4  ;;  %v2251_v11 = vcombine.high %v2249_v0, %v2249_v0 }
 0x189   : > { %v3657_v27 = vsel %vm3579_vm11, %v2285_v7, -inf  ;;  %v3582_v28 = vmax.f32 %v3580_v43, %v3581_v38  ;;  %v3587_v22 = vsel %vm3579_vm11, %v2250_v20, -inf  ;;  %v3594_v32 = vsel %vm3579_vm11, %v2249_v0, -inf }
 0x18a   : > { %v3639_v58 = vrot.slane %v3638_v47, 2  ;;  %v3645_v5 = vmax.f32 %v3643_v14, %v3644_v51  ;;  %v3652_v61 = vmax.f32 %v3650_v36, %v3651_v26  ;;  %v3658_v4 = vrot.slane %v3657_v27, 4  ;;  %v12439_v29 = vpop.f32.mrb[4].mxu0 }
 0x18b   : > { %v3583_v35 = vrot.slane %v3582_v28, 2  ;;  %v3588_v54 = vrot.slane %v3587_v22, 4  ;;  %v3595_v3 = vrot.slane %v3594_v32, 4  ;;  %v3601_v17 = vsel %vm3579_vm11, %v2251_v11, -inf  ;;  %v12442_v10 = vpop.f32.mrb[5].mxu0 }
 0x18c   : > { %v3640_v9 = vmax.f32 %v3638_v47, %v3639_v58  ;;  %v3646_v31 = vrot.slane %v3645_v5, 2  ;;  %v3653_v16 = vrot.slane %v3652_v61, 2  ;;  %v3659_v37 = vmax.f32 %v3657_v27, %v3658_v4  ;;  %v12444_v44 = vpop.f32.mrb[6].mxu0 }
 0x18d   : > { %v3584_v48 = vmax.f32 %v3582_v28, %v3583_v35  ;;  %v3589_v53 = vmax.f32 %v3587_v22, %v3588_v54  ;;  %v3596_v1 = vmax.f32 %v3594_v32, %v3595_v3  ;;  %v3602_v12 = vrot.slane %v3601_v17, 4  ;;  %v12446_v55 = vpop.f32.mrb[7].mxu0 }
 0x18e   : > { %v3641_v63 = vrot.slane %v3640_v9, 1  ;;  %v3647_v39 = vmax.f32 %v3645_v5, %v3646_v31  ;;  %v3654_v33 = vmax.f32 %v3652_v61, %v3653_v16  ;;  %v3660_v8 = vrot.slane %v3659_v37, 2 }
 0x18f   : > { %v3585_v56 = vrot.slane %v3584_v48, 1  ;;  %v3590_v57 = vrot.slane %v3589_v53, 2  ;;  %v3597_v59 = vrot.slane %v3596_v1, 2  ;;  %v3603_v62 = vmax.f32 %v3601_v17, %v3602_v12 }
 0x190   : > { %v3642_v30 = vmax.f32 %v3640_v9, %v3641_v63  ;;  %v3648_v34 = vrot.slane %v3647_v39, 1  ;;  %v3655_v19 = vrot.slane %v3654_v33, 1  ;;  %v3661_v40 = vmax.f32 %v3659_v37, %v3660_v8 }
 0x191   : > { %v3586_v21 = vmax.f32 %v3584_v48, %v3585_v56  ;;  %v3591_v46 = vmax.f32 %v3589_v53, %v3590_v57  ;;  %v3598_v25 = vmax.f32 %v3596_v1, %v3597_v59  ;;  %v3604_v6 = vrot.slane %v3603_v62, 2 }
 0x192   : > { %v3649_v23 = vmax.f32 %v3647_v39, %v3648_v34  ;;  %v3656_v49 = vmax.f32 %v3654_v33, %v3655_v19  ;;  %v3662_v0 = vrot.slane %v3661_v40, 1  ;;  %v5380_v20 = vpack.c.bf16 %v3642_v30, %v3642_v30 }
 0x193   : > { %v3592_v43 = vrot.slane %v3591_v46, 1  ;;  %v3599_v7 = vrot.slane %v3598_v25, 1  ;;  %v3605_v14 = vmax.f32 %v3603_v62, %v3604_v6  ;;  %v5372_v36 = vpack.c.bf16 %v3586_v21, %v3586_v21 }
 0x194   : > { %v3663_v38 = vmax.f32 %v3661_v40, %v3662_v0  ;;  %v5381_v47 = vpack.c.bf16 %v3649_v23, %v3649_v23  ;;  %v5382_v51 = vpack.c.bf16 %v3656_v49, %v3656_v49  ;;  %v12450_v26 = vsel %vm1535_vm7, %v12412_v2, %v1097_v15 }
 0x195   : > { %v12452_v11 = vunpack.c.l.b16 %v5380_v20  ;;  %v3593_v27 = vmax.f32 %v3591_v46, %v3592_v43  ;;  %v3600_v28 = vmax.f32 %v3598_v25, %v3599_v7  ;;  %v3606_v22 = vrot.slane %v3605_v14, 1 }
 0x196   : > { %v5383_v32 = vpack.c.bf16 %v3663_v38, %v3663_v38  ;;  %v12454_v58 = vunpack.c.l.b16 %v5381_v47  ;;  %v5884_v5 = vunpack.c.l.b16 %v5372_v36  ;;  %v2293_v61 = vrot.slane %v12420_v52, %v12402_v13 }
 0x197   : > { %v3607_v4 = vmax.f32 %v3605_v14, %v3606_v22  ;;  %v5373_v35 = vpack.c.bf16 %v3593_v27, %v3593_v27  ;;  %v5374_v54 = vpack.c.bf16 %v3600_v28, %v3600_v28  ;;  %v2300_v2 = vrot.slane %v2286_v60, %v12402_v13 }
 0x198   : > { %v12462_v3 = vunpack.c.l.b16 %v5382_v51  ;;  %v2301_v17 = vcombine.high %v2293_v61, %v2293_v61  ;;  %v3664_v9 = vsel %vm3579_vm11, %v2293_v61, -inf  ;;  %v2252_v31 = vcombine.high %v12426_v42, %v12426_v42 }
 0x199   : > { %v12467_v16 = vunpack.c.l.b16 %v5383_v32  ;;  %v5375_v37 = vpack.c.bf16 %v3607_v4, %v3607_v4  ;;  %v5885_v48 = vunpack.c.l.b16 %v5373_v35  ;;  %v2302_v53 = vcombine.high %v2300_v2, %v2300_v2  ;;  %v946_v32 = vpop.permute.xlu0 %945 }
 0x19a   : > { %v3665_v1 = vrot.slane %v3664_v9, 4  ;;  %v3671_v12 = vsel %vm3579_vm11, %v2301_v17, -inf  ;;  %v3678_v63 = vsel %vm3579_vm11, %v2300_v2, -inf  ;;  %v2259_v52 = vrot.slane %v12426_v42, %v12402_v13  ;;  %v12473_v60 = vpop.f32.mrb[8].mxu0 }
 0x19b   : > { %v12475_v39 = vunpack.c.l.b16 %v5374_v54  ;;  %v12477_v33 = vunpack.c.l.b16 %v5375_v37  ;;  %v3672_v8 = vrot.slane %v3671_v12, 4  ;;  %v3679_v56 = vrot.slane %v3678_v63, 4  ;;  %v12479_v57 = vpop.f32.mrb[9].mxu0 }
 0x19c   : > { %v6141_v59 = vsel %vm6140_vm12, %v5885_v48, %v5884_v5  ;;  %v3666_v62 = vmax.f32 %v3664_v9, %v3665_v1  ;;  %v3685_v30 = vsel %vm3579_vm11, %v2302_v53, -inf  ;;  %v2266_v34 = vrot.slane %v2252_v31, %v12402_v13  ;;  %v12484_v19 = vpop.f32.mrb[10].mxu0 }
 0x19d   : > { %v3673_v42 = vmax.f32 %v3671_v12, %v3672_v8  ;;  %v3680_v40 = vmax.f32 %v3678_v63, %v3679_v56  ;;  %v3686_v21 = vrot.slane %v3685_v30, 4  ;;  %v2267_v46 = vcombine.high %v2259_v52, %v2259_v52  ;;  %v12486_v25 = vpop.f32.mrb[11].mxu0  ;;  %v1463_v8 = vpop.permute.xlu1 %1462 }
 0x19e   : > { %v3667_v6 = vrot.slane %v3666_v62, 2  ;;  %v2268_v15 = vcombine.high %v2266_v34, %v2266_v34  ;;  %v3608_v23 = vsel %vm3579_vm11, %v2259_v52, -inf  ;;  %v3622_v49 = vsel %vm3579_vm11, %v2266_v34, -inf }
 0x19f   : > { %v3674_v0 = vrot.slane %v3673_v42, 2  ;;  %v3681_v20 = vrot.slane %v3680_v40, 2  ;;  %v3687_v43 = vmax.f32 %v3685_v30, %v3686_v21  ;;  %v3609_v7 = vrot.slane %v3608_v23, 4 }
 0x1a0   : > { %v3668_v14 = vmax.f32 %v3666_v62, %v3667_v6  ;;  %v3615_v36 = vsel %vm3579_vm11, %v2267_v46, -inf  ;;  %v3623_v38 = vrot.slane %v3622_v49, 4  ;;  %v3629_v47 = vsel %vm3579_vm11, %v2268_v15, -inf  ;;  %v1328_v6 = vpop.permute.xlu0 %1327 }
 0x1a1   : > { %v3675_v51 = vmax.f32 %v3673_v42, %v3674_v0  ;;  %v3682_v27 = vmax.f32 %v3680_v40, %v3681_v20  ;;  %v3688_v28 = vrot.slane %v3687_v43, 2  ;;  %v3610_v22 = vmax.f32 %v3608_v23, %v3609_v7 }
 0x1a2   : > { %v3669_v5 = vrot.slane %v3668_v14, 1  ;;  %v3616_v61 = vrot.slane %v3615_v36, 4  ;;  %v3624_v4 = vmax.f32 %v3622_v49, %v3623_v38  ;;  %v3630_v35 = vrot.slane %v3629_v47, 4 }
 0x1a3   : > { %v3676_v54 = vrot.slane %v3675_v51, 1  ;;  %v3683_v2 = vrot.slane %v3682_v27, 1  ;;  %v3689_v17 = vmax.f32 %v3687_v43, %v3688_v28  ;;  %v3611_v9 = vrot.slane %v3610_v22, 2 }
 0x1a4   : > { %v3670_v31 = vmax.f32 %v3668_v14, %v3669_v5  ;;  %v3617_v37 = vmax.f32 %v3615_v36, %v3616_v61  ;;  %v3625_v48 = vrot.slane %v3624_v4, 2  ;;  %v3631_v53 = vmax.f32 %v3629_v47, %v3630_v35  ;;  %v1330_v5 = vpop.permute.xlu1 %1329 }
 0x1a5   : > { %v3677_v1 = vmax.f32 %v3675_v51, %v3676_v54  ;;  %v3684_v12 = vmax.f32 %v3682_v27, %v3683_v2  ;;  %v3690_v63 = vrot.slane %v3689_v17, 1  ;;  %v3612_v52 = vmax.f32 %v3610_v22, %v3611_v9 }
 0x1a6   : > { %v5384_v56 = vpack.c.bf16 %v3670_v31, %v3670_v31  ;;  %v3618_v62 = vrot.slane %v3617_v37, 2  ;;  %v3626_v30 = vmax.f32 %v3624_v4, %v3625_v48  ;;  %v3632_v34 = vrot.slane %v3631_v53, 2 }
 0x1a7   : > { %v3691_v42 = vmax.f32 %v3689_v17, %v3690_v63  ;;  %v5385_v40 = vpack.c.bf16 %v3677_v1, %v3677_v1  ;;  %v5386_v21 = vpack.c.bf16 %v3684_v12, %v3684_v12  ;;  %v3613_v46 = vrot.slane %v3612_v52, 1 }
 0x1a8   : > { %v6143_v15 = vsel %vm6142_vm13, %v12475_v39, %v6141_v59  ;;  %v3619_v23 = vmax.f32 %v3617_v37, %v3618_v62  ;;  %v3627_v49 = vrot.slane %v3626_v30, 1  ;;  %v3633_v0 = vmax.f32 %v3631_v53, %v3632_v34  ;;  %v1099_v37 = vpop.permute.xlu0 %1098 }
 0x1a9   : > { %v5387_v20 = vpack.c.bf16 %v3691_v42, %v3691_v42  ;;  %v12494_v43 = vunpack.c.l.b16 %v5384_v56  ;;  %v12496_v7 = vunpack.c.l.b16 %v5385_v40  ;;  %v3614_v14 = vmax.f32 %v3612_v52, %v3613_v46 }
 0x1aa   : > { %v12498_v36 = vunpack.c.l.b16 %v5386_v21  ;;  %v3620_v38 = vrot.slane %v3619_v23, 1  ;;  %v3628_v47 = vmax.f32 %v3626_v30, %v3627_v49  ;;  %v3634_v51 = vrot.slane %v3633_v0, 1  ;;  %v12500_v27 = vpop.f32.mrb[12].mxu0 }
 0x1ab   : > { %v12502_v28 = vunpack.c.l.b16 %v5387_v20  ;;  %v5376_v22 = vpack.c.bf16 %v3614_v14, %v3614_v14  ;;  %v6145_v39 = vsel %vm6144_vm14, %v12477_v33, %v6143_v15  ;;  %v1723_v59 = vsel %vm1665_vm9, %v12418_v45, %v1463_v8  ;;  %v12508_v61 = vpop.f32.mrb[13].mxu0 }
 0x1ac   : > { %v3621_v4 = vmax.f32 %v3619_v23, %v3620_v38  ;;  %v3635_v35 = vmax.f32 %v3633_v0, %v3634_v51  ;;  %v5378_v54 = vpack.c.bf16 %v3628_v47, %v3628_v47  ;;  %v1534_v2 = vsel %vm1470_vm6, %v12233_v50, %v946_v32  ;;  %11130 = vmatprep.mubr.msk.bf16.mxu0 %vm1749_vm10, %v1723_v59  ;;  %v12513_v17 = vpop.f32.mrb[14].mxu0 }
 0x1ad   : > { %v5888_v9 = vunpack.c.l.b16 %v5376_v22  ;;  %v12517_v33 = vsel %vm1600_vm8, %v12424_v18, %v1328_v6  ;;  %v1877_v45 = vadd.f32 %v12439_v29, %v12398_v24  ;;  %v1869_v31 = vadd.f32 %v12398_v24, %v12442_v10  ;;  %v12523_v48 = vpop.f32.mrb[15].mxu0 }
 0x1ae   : > { %v5377_v53 = vpack.c.bf16 %v3621_v4, %v3621_v4  ;;  %v5379_v50 = vpack.c.bf16 %v3635_v35, %v3635_v35  ;;  %v12527_v32 = vsel %vm1600_vm8, %v12450_v26, %v1330_v5  ;;  %v1880_v1 = vadd.f32 %v12444_v44, %v12398_v24 }
 0x1af   : > { %v12531_v18 = vunpack.c.l.b16 %v5378_v54  ;;  %v6147_v12 = vsel %vm6146_vm15, %v5888_v9, %v6145_v39  ;;  %v2113_v29 = vmax.f32 %v1877_v45, 0.0  ;;  %v2111_v63 = vmax.f32 %v1869_v31, 0.0 }
 0x1b0   : > { %v5889_v52 = vunpack.c.l.b16 %v5377_v53  ;;  %v5891_v10 = vunpack.c.l.b16 %v5379_v50  ;;  %v12534_v8 = vmax.f32 %v1880_v1, 0.0  ;;  %v12537_v56 = vsel %vm1535_vm7, %v1534_v2, %v1099_v37 }
 0x1b1   : > { %v2337_v62 = vcombine.high %v2113_v29, %v2113_v29  ;;  %v2344_v26 = vrot.slane %v2113_v29, %v12402_v13  ;;  %v2303_v30 = vcombine.high %v2111_v63, %v2111_v63  ;;  %v2310_v34 = vrot.slane %v2111_v63, %v12402_v13 }
 0x1b2   : > { %v12542_v44 = vsel %vm6148_vm1, %v5889_v52, %v6147_v12  ;;  %v6153_v42 = vsel %vm6152_vm4, %v12452_v11, %v5891_v10  ;;  %v2354_v40 = vcombine.high %v12534_v8, %v12534_v8  ;;  %v12550_v21 = vadd.f32 %v12398_v24, %v12446_v55 }
 0x1b3   : > { %v6154_v46 = vsel %vm6140_vm12, %v12454_v58, %v6153_v42  ;;  %v2351_v6 = vrot.slane %v2337_v62, %v12402_v13  ;;  %v2352_v15 = vcombine.high %v2344_v26, %v2344_v26  ;;  %v3748_v23 = vsel %vm3579_vm11, %v2344_v26, -inf }
 0x1b4   : > { %v12558_v49 = vsel %vm6142_vm13, %v12462_v3, %v6154_v46  ;;  %v3749_v11 = vrot.slane %v3748_v23, 4  ;;  %v2317_v0 = vrot.slane %v2303_v30, %v12402_v13  ;;  %v2318_v20 = vcombine.high %v2310_v34, %v2310_v34 }
 0x1b5   : > { %v2353_v14 = vcombine.high %v2351_v6, %v2351_v6  ;;  %v3755_v55 = vsel %vm3579_vm11, %v2352_v15, -inf  ;;  %v3762_v38 = vsel %vm3579_vm11, %v2351_v6, -inf  ;;  %v3692_v58 = vsel %vm3579_vm11, %v2310_v34, -inf }
 0x1b6   : > { %v3750_v47 = vmax.f32 %v3748_v23, %v3749_v11  ;;  %v3756_v51 = vrot.slane %v3755_v55, 4  ;;  %v3763_v22 = vrot.slane %v3762_v38, 4  ;;  %v2319_v39 = vcombine.high %v2317_v0, %v2317_v0 }
 0x1b7   : > { %v3769_v59 = vsel %vm3579_vm11, %v2353_v14, -inf  ;;  %v3693_v5 = vrot.slane %v3692_v58, 4  ;;  %v3699_v3 = vsel %vm3579_vm11, %v2318_v20, -inf  ;;  %v3706_v4 = vsel %vm3579_vm11, %v2317_v0, -inf }
 0x1b8   : > { %v3751_v35 = vrot.slane %v3750_v47, 2  ;;  %v3757_v54 = vmax.f32 %v3755_v55, %v3756_v51  ;;  %v3764_v2 = vmax.f32 %v3762_v38, %v3763_v22  ;;  %v3770_v9 = vrot.slane %v3769_v59, 4 }
 0x1b9   : > { %v3694_v45 = vmax.f32 %v3692_v58, %v3693_v5  ;;  %v3700_v31 = vrot.slane %v3699_v3, 4  ;;  %v3707_v37 = vrot.slane %v3706_v4, 4  ;;  %v3713_v53 = vsel %vm3579_vm11, %v2319_v39, -inf }
 0x1ba   : > { %v3752_v50 = vmax.f32 %v3750_v47, %v3751_v35  ;;  %v3758_v1 = vrot.slane %v3757_v54, 2  ;;  %v3765_v12 = vrot.slane %v3764_v2, 2  ;;  %v3771_v29 = vmax.f32 %v3769_v59, %v3770_v9 }
 0x1bb   : > { %v3695_v63 = vrot.slane %v3694_v45, 2  ;;  %v3701_v52 = vmax.f32 %v3699_v3, %v3700_v31  ;;  %v3708_v10 = vmax.f32 %v3706_v4, %v3707_v37  ;;  %v3714_v62 = vrot.slane %v3713_v53, 4 }
 0x1bc   : > { %v3753_v26 = vrot.slane %v3752_v50, 1  ;;  %v3759_v30 = vmax.f32 %v3757_v54, %v3758_v1  ;;  %v3766_v34 = vmax.f32 %v3764_v2, %v3765_v12  ;;  %v3772_v42 = vrot.slane %v3771_v29, 2  ;;  %v12568_v54 = vpop.f32.mrb[16].mxu0 }
 0x1bd   : > { %v3696_v46 = vmax.f32 %v3694_v45, %v3695_v63  ;;  %v3702_v6 = vrot.slane %v3701_v52, 2  ;;  %v3709_v15 = vrot.slane %v3708_v10, 2  ;;  %v3715_v23 = vmax.f32 %v3713_v53, %v3714_v62 }
 0x1be   : > { %v3754_v11 = vmax.f32 %v3752_v50, %v3753_v26  ;;  %v3760_v0 = vrot.slane %v3759_v30, 1  ;;  %v3767_v20 = vrot.slane %v3766_v34, 1  ;;  %v3773_v14 = vmax.f32 %v3771_v29, %v3772_v42 }
 0x1bf   : > { %v3697_v55 = vrot.slane %v3696_v46, 1  ;;  %v3703_v38 = vmax.f32 %v3701_v52, %v3702_v6  ;;  %v3710_v58 = vmax.f32 %v3708_v10, %v3709_v15  ;;  %v3716_v47 = vrot.slane %v3715_v23, 2 }
 0x1c0   : > { %v3761_v51 = vmax.f32 %v3759_v30, %v3760_v0  ;;  %v3768_v22 = vmax.f32 %v3766_v34, %v3767_v20  ;;  %v3774_v39 = vrot.slane %v3773_v14, 1  ;;  %v5396_v59 = vpack.c.bf16 %v3754_v11, %v3754_v11  ;;  %v1332_v34 = vpop.permute.xlu1 %1331 }
 0x1c1   : > { %v3698_v5 = vmax.f32 %v3696_v46, %v3697_v55  ;;  %v3704_v3 = vrot.slane %v3703_v38, 1  ;;  %v3711_v4 = vrot.slane %v3710_v58, 1  ;;  %v3717_v35 = vmax.f32 %v3715_v23, %v3716_v47  ;;  %v1465_v23 = vpop.permute.xlu0 %1464 }
 0x1c2   : > { %v3775_v2 = vmax.f32 %v3773_v14, %v3774_v39  ;;  %v5397_v9 = vpack.c.bf16 %v3761_v51, %v3761_v51  ;;  %v5398_v45 = vpack.c.bf16 %v3768_v22, %v3768_v22  ;;  %v2361_v31 = vrot.slane %v12534_v8, %v12402_v13 }
 0x1c3   : > { %v3705_v37 = vmax.f32 %v3703_v38, %v3704_v3  ;;  %v3712_v53 = vmax.f32 %v3710_v58, %v3711_v4  ;;  %v3718_v50 = vrot.slane %v3717_v35, 1  ;;  %v5388_v1 = vpack.c.bf16 %v3698_v5, %v3698_v5 }
 0x1c4   : > { %v5399_v12 = vpack.c.bf16 %v3775_v2, %v3775_v2  ;;  %v12572_v29 = vunpack.c.l.b16 %v5396_v59  ;;  %v12574_v63 = vunpack.c.l.b16 %v5397_v9  ;;  %v2368_v52 = vrot.slane %v2354_v40, %v12402_v13  ;;  %v1469_v9 = vpop.permute.xlu1 %1468 }
 0x1c5   : > { %v3719_v10 = vmax.f32 %v3717_v35, %v3718_v50  ;;  %v5389_v62 = vpack.c.bf16 %v3705_v37, %v3705_v37  ;;  %v5390_v26 = vpack.c.bf16 %v3712_v53, %v3712_v53  ;;  %v5900_v30 = vunpack.c.l.b16 %v5388_v1  ;;  %v1467_v50 = vpop.permute.xlu0 %1466 }
 0x1c6   : > { %v12580_v42 = vunpack.c.l.b16 %v5398_v45  ;;  %v2369_v46 = vcombine.high %v2361_v31, %v2361_v31  ;;  %v2370_v6 = vcombine.high %v2368_v52, %v2368_v52  ;;  %v3776_v15 = vsel %vm3579_vm11, %v2361_v31, -inf }
 0x1c7   : > { %v5391_v11 = vpack.c.bf16 %v3719_v10, %v3719_v10  ;;  %v5901_v0 = vunpack.c.l.b16 %v5389_v62  ;;  %v5902_v20 = vunpack.c.l.b16 %v5390_v26  ;;  %v6160_v14 = vsel %vm6152_vm4, %v5900_v30, %v12502_v28 }
 0x1c8   : > { %v3777_v8 = vrot.slane %v3776_v15, 4  ;;  %v3783_v40 = vsel %vm3579_vm11, %v2369_v46, -inf  ;;  %v3790_v55 = vsel %vm3579_vm11, %v2368_v52, -inf  ;;  %v3797_v38 = vsel %vm3579_vm11, %v2370_v6, -inf }
 0x1c9   : > { %v5903_v58 = vunpack.c.l.b16 %v5391_v11  ;;  %v6161_v47 = vsel %vm6140_vm12, %v5901_v0, %v6160_v14  ;;  %v3784_v51 = vrot.slane %v3783_v40, 4  ;;  %v3791_v22 = vrot.slane %v3790_v55, 4 }
 0x1ca   : > { %v6162_v39 = vsel %vm6142_vm13, %v5902_v20, %v6161_v47  ;;  %v3778_v59 = vmax.f32 %v3776_v15, %v3777_v8  ;;  %v3798_v5 = vrot.slane %v3797_v38, 4  ;;  %v2112_v3 = vmax.f32 %v12550_v21, 0.0 }
 0x1cb   : > { %v12591_v4 = vunpack.c.l.b16 %v5399_v12  ;;  %v3785_v28 = vmax.f32 %v3783_v40, %v3784_v51  ;;  %v3792_v35 = vmax.f32 %v3790_v55, %v3791_v22  ;;  %v12594_v2 = vsel %vm6144_vm14, %v5903_v58, %v6162_v39 }
 0x1cc   : > { %v3779_v45 = vrot.slane %v3778_v59, 2  ;;  %v3799_v31 = vmax.f32 %v3797_v38, %v3798_v5  ;;  %v2320_v37 = vcombine.high %v2112_v3, %v2112_v3  ;;  %v2327_v53 = vrot.slane %v2112_v3, %v12402_v13 }
 0x1cd   : > { %v3786_v1 = vrot.slane %v3785_v28, 2  ;;  %v3793_v52 = vrot.slane %v3792_v35, 2  ;;  %v1664_v10 = vsel %vm1600_vm8, %v12537_v56, %v1332_v34  ;;  %v1725_v21 = vsel %vm1665_vm9, %v12517_v33, %v1465_v23  ;;  %v12608_v33 = vpop.f32.mrb[17].mxu0 }
 0x1ce   : > { %v3780_v12 = vmax.f32 %v3778_v59, %v3779_v45  ;;  %v2334_v62 = vrot.slane %v2320_v37, %v12402_v13  ;;  %v2335_v26 = vcombine.high %v2327_v53, %v2327_v53  ;;  %11131 = vmatmul.mubr.msk.bf16.gmra.mrb[56].mxu0 %vm1749_vm10, %v1725_v21  ;;  %v1729_v30 = vsel %vm1665_vm9, %v1664_v10, %v1469_v9  ;;  %v12618_v10 = vpop.f32.mrb[18].mxu0 }
 0x1cf   : > { %v3787_v46 = vmax.f32 %v3785_v28, %v3786_v1  ;;  %v3794_v6 = vmax.f32 %v3792_v35, %v3793_v52  ;;  %v3720_v15 = vsel %vm3579_vm11, %v2327_v53, -inf  ;;  %v1727_v11 = vsel %vm1665_vm9, %v12527_v32, %v1467_v50 }
 0x1d0   : > { %v3781_v0 = vrot.slane %v3780_v12, 1  ;;  %v3800_v56 = vrot.slane %v3799_v31, 2  ;;  %v2336_v34 = vcombine.high %v2334_v62, %v2334_v62  ;;  %v3721_v20 = vrot.slane %v3720_v15, 4  ;;  %11134 = vmatprep.mubr.msk.bf16.mxu1 %vm1749_vm10, %v1727_v11 }
 0x1d1   : > { %v3788_v23 = vrot.slane %v3787_v46, 1  ;;  %v3795_v14 = vrot.slane %v3794_v6, 1  ;;  %v3727_v8 = vsel %vm3579_vm11, %v2335_v26, -inf  ;;  %v3734_v40 = vsel %vm3579_vm11, %v2334_v62, -inf  ;;  %11135 = vmatmul.mubr.msk.bf16.vlgmr.msra.gmra.mrb[0].mxu1 %vm1749_vm10, %v1729_v30 }
 0x1d2   : > { %v3782_v55 = vmax.f32 %v3780_v12, %v3781_v0  ;;  %v3722_v38 = vmax.f32 %v3720_v15, %v3721_v20  ;;  %v3728_v58 = vrot.slane %v3727_v8, 4  ;;  %v3735_v32 = vrot.slane %v3734_v40, 4 }
 0x1d3   : > { %v3789_v47 = vmax.f32 %v3787_v46, %v3788_v23  ;;  %v3796_v51 = vmax.f32 %v3794_v6, %v3795_v14  ;;  %v3741_v22 = vsel %vm3579_vm11, %v2336_v34, -inf  ;;  %v1893_v39 = vadd.f32 %v12473_v60, %v12398_v24  ;;  %v12630_v14 = vpop.f32.mrb[19].mxu0 }
 0x1d4   : > { %v5400_v59 = vpack.c.bf16 %v3782_v55, %v3782_v55  ;;  %v3723_v5 = vrot.slane %v3722_v38, 2  ;;  %v3729_v3 = vmax.f32 %v3727_v8, %v3728_v58  ;;  %v3736_v28 = vmax.f32 %v3734_v40, %v3735_v32 }
 0x1d5   : > { %v5401_v35 = vpack.c.bf16 %v3789_v47, %v3789_v47  ;;  %v5402_v9 = vpack.c.bf16 %v3796_v51, %v3796_v51  ;;  %v3742_v45 = vrot.slane %v3741_v22, 4  ;;  %v2117_v37 = vmax.f32 %v1893_v39, 0.0 }
 0x1d6   : > { %v12616_v53 = vmax.f32 %v3799_v31, %v3800_v56  ;;  %v3724_v50 = vmax.f32 %v3722_v38, %v3723_v5  ;;  %v3730_v1 = vrot.slane %v3729_v3, 2  ;;  %v3737_v52 = vrot.slane %v3736_v28, 2 }
 0x1d7   : > { %v12620_v21 = vunpack.c.l.b16 %v5400_v59  ;;  %v12622_v12 = vunpack.c.l.b16 %v5401_v35  ;;  %v3743_v60 = vmax.f32 %v3741_v22, %v3742_v45  ;;  %v2405_v62 = vcombine.high %v2117_v37, %v2117_v37 }
 0x1d8   : > { %v3725_v26 = vrot.slane %v3724_v50, 1  ;;  %v3731_v30 = vmax.f32 %v3729_v3, %v3730_v1  ;;  %v3738_v46 = vmax.f32 %v3736_v28, %v3737_v52  ;;  %v2412_v6 = vrot.slane %v2117_v37, %v12402_v13 }
 0x1d9   : > { %v12625_v15 = vunpack.c.l.b16 %v5402_v9  ;;  %v3744_v31 = vrot.slane %v3743_v60, 2  ;;  %v2419_v11 = vrot.slane %v2405_v62, %v12402_v13  ;;  %v1885_v0 = vadd.f32 %v12398_v24, %v12479_v57 }
 0x1da   : > { %v3726_v56 = vmax.f32 %v3724_v50, %v3725_v26  ;;  %v3732_v34 = vrot.slane %v3731_v30, 1  ;;  %v3739_v20 = vrot.slane %v3738_v46, 1  ;;  %v2420_v23 = vcombine.high %v2412_v6, %v2412_v6 }
 0x1db   : > { %v3745_v8 = vmax.f32 %v3743_v60, %v3744_v31  ;;  %v2421_v40 = vcombine.high %v2419_v11, %v2419_v11  ;;  %v3860_v55 = vsel %vm3579_vm11, %v2412_v6, -inf  ;;  %v3874_v38 = vsel %vm3579_vm11, %v2419_v11, -inf }
 0x1dc   : > { %v3733_v58 = vmax.f32 %v3731_v30, %v3732_v34  ;;  %v3740_v32 = vmax.f32 %v3738_v46, %v3739_v20  ;;  %v5392_v47 = vpack.c.bf16 %v3726_v56, %v3726_v56  ;;  %v3861_v51 = vrot.slane %v3860_v55, 4 }
 0x1dd   : > { %v3746_v22 = vrot.slane %v3745_v8, 1  ;;  %v3867_v39 = vsel %vm3579_vm11, %v2420_v23, -inf  ;;  %v3875_v57 = vrot.slane %v3874_v38, 4  ;;  %v3881_v59 = vsel %vm3579_vm11, %v2421_v40, -inf }
 0x1de   : > { %v5393_v5 = vpack.c.bf16 %v3733_v58, %v3733_v58  ;;  %v5904_v3 = vunpack.c.l.b16 %v5392_v47  ;;  %v3862_v28 = vmax.f32 %v3860_v55, %v3861_v51  ;;  %v1896_v35 = vadd.f32 %v12484_v19, %v12398_v24 }
 0x1df   : > { %v3747_v9 = vmax.f32 %v3745_v8, %v3746_v22  ;;  %v3868_v45 = vrot.slane %v3867_v39, 4  ;;  %v3876_v37 = vmax.f32 %v3874_v38, %v3875_v57  ;;  %v3882_v50 = vrot.slane %v3881_v59, 4 }
 0x1e0   : > { %v5394_v1 = vpack.c.bf16 %v3740_v32, %v3740_v32  ;;  %v5905_v52 = vunpack.c.l.b16 %v5393_v5  ;;  %v6164_v60 = vsel %vm6146_vm15, %v5904_v3, %v12594_v2  ;;  %v3863_v62 = vrot.slane %v3862_v28, 2 }
 0x1e1   : > { %v5395_v26 = vpack.c.bf16 %v3747_v9, %v3747_v9  ;;  %v3869_v30 = vmax.f32 %v3867_v39, %v3868_v45  ;;  %v3877_v46 = vrot.slane %v3876_v37, 2  ;;  %v3883_v6 = vmax.f32 %v3881_v59, %v3882_v50 }
 0x1e2   : > { %v12641_v31 = vsel %vm6148_vm1, %v5905_v52, %v6164_v60  ;;  %v3864_v11 = vmax.f32 %v3862_v28, %v3863_v62  ;;  %v2115_v56 = vmax.f32 %v1885_v0, 0.0  ;;  %v2118_v24 = vmax.f32 %v1896_v35, 0.0  ;;  %v12653_v28 = vpop.f32.mrb[20].mxu0 }
 0x1e3   : > { %v5907_v19 = vunpack.c.l.b16 %v5395_v26  ;;  %v3870_v34 = vrot.slane %v3869_v30, 2  ;;  %v3878_v20 = vmax.f32 %v3876_v37, %v3877_v46  ;;  %v3884_v23 = vrot.slane %v3883_v6, 2 }
 0x1e4   : > { %v3865_v8 = vrot.slane %v3864_v11, 1  ;;  %v2371_v40 = vcombine.high %v2115_v56, %v2115_v56  ;;  %v2378_v55 = vrot.slane %v2115_v56, %v12402_v13  ;;  %v2422_v2 = vcombine.high %v2118_v24, %v2118_v24 }
 0x1e5   : > { %v6167_v38 = vsel %vm6152_vm4, %v12572_v29, %v5907_v19  ;;  %v3871_v58 = vmax.f32 %v3869_v30, %v3870_v34  ;;  %v3879_v32 = vrot.slane %v3878_v20, 1  ;;  %v3885_v47 = vmax.f32 %v3883_v6, %v3884_v23 }
 0x1e6   : > { %v6168_v51 = vsel %vm6140_vm12, %v12574_v63, %v6167_v38  ;;  %v3866_v0 = vmax.f32 %v3864_v11, %v3865_v8  ;;  %v2385_v22 = vrot.slane %v2371_v40, %v12402_v13  ;;  %v2386_v39 = vcombine.high %v2378_v55, %v2378_v55  ;;  %v12657_v63 = vpop.f32.mrb[21].mxu0 }
 0x1e7   : > { %v12651_v57 = vsel %vm6142_vm13, %v12580_v42, %v6168_v51  ;;  %v3872_v59 = vrot.slane %v3871_v58, 1  ;;  %v3880_v5 = vmax.f32 %v3878_v20, %v3879_v32  ;;  %v3886_v3 = vrot.slane %v3885_v47, 1  ;;  %15579 = vst [vmem:[#allocation6_spill] sm:$0xff] %v12657_v63 }
 0x1e8   : > { %v5412_v29 = vpack.c.bf16 %v3866_v0, %v3866_v0  ;;  %v2387_v35 = vcombine.high %v2385_v22, %v2385_v22  ;;  %v3804_v9 = vsel %vm3579_vm11, %v2378_v55, -inf  ;;  %v3811_v45 = vsel %vm3579_vm11, %v2386_v39, -inf }
 0x1e9   : > { %v3873_v37 = vmax.f32 %v3871_v58, %v3872_v59  ;;  %v12659_v50 = vmax.f32 %v3885_v47, %v3886_v3  ;;  %v5414_v52 = vpack.c.bf16 %v3880_v5, %v3880_v5  ;;  %v3805_v60 = vrot.slane %v3804_v9, 4 }
 0x1ea   : > { %v12661_v42 = vunpack.c.l.b16 %v5394_v1  ;;  %v3812_v62 = vrot.slane %v3811_v45, 4  ;;  %v3818_v26 = vsel %vm3579_vm11, %v2385_v22, -inf  ;;  %v3825_v30 = vsel %vm3579_vm11, %v2387_v35, -inf }
 0x1eb   : > { %v5413_v46 = vpack.c.bf16 %v3873_v37, %v3873_v37  ;;  %v12667_v11 = vunpack.c.l.b16 %v5412_v29  ;;  %v3806_v56 = vmax.f32 %v3804_v9, %v3805_v60  ;;  %v3819_v34 = vrot.slane %v3818_v26, 4 }
 0x1ec   : > { %v3813_v19 = vmax.f32 %v3811_v45, %v3812_v62  ;;  %v3826_v20 = vrot.slane %v3825_v30, 4  ;;  %v2429_v23 = vrot.slane %v2118_v24, %v12402_v13  ;;  %v12672_v1 = vunpack.c.l.b16 %v5414_v52 }
 0x1ed   : > { %v12670_v8 = vunpack.c.l.b16 %v5413_v46  ;;  %v3807_v40 = vrot.slane %v3806_v56, 2  ;;  %v2436_v55 = vrot.slane %v2422_v2, %v12402_v13  ;;  %v3820_v58 = vmax.f32 %v3818_v26, %v3819_v34 }
 0x1ee   : > { %v3814_v38 = vrot.slane %v3813_v19, 2  ;;  %v3827_v32 = vmax.f32 %v3825_v30, %v3826_v20  ;;  %v2437_v47 = vcombine.high %v2429_v23, %v2429_v23  ;;  %v3888_v22 = vsel %vm3579_vm11, %v2429_v23, -inf }
 0x1ef   : > { %v3808_v51 = vmax.f32 %v3806_v56, %v3807_v40  ;;  %v2438_v0 = vcombine.high %v2436_v55, %v2436_v55  ;;  %v3902_v39 = vsel %vm3579_vm11, %v2436_v55, -inf  ;;  %v3821_v5 = vrot.slane %v3820_v58, 2  ;;  %v12679_v56 = vpop.f32.mrb[22].mxu0 }
 0x1f0   : > { %v3815_v59 = vmax.f32 %v3813_v19, %v3814_v38  ;;  %v3828_v24 = vrot.slane %v3827_v32, 2  ;;  %v3889_v3 = vrot.slane %v3888_v22, 4  ;;  %v3895_v35 = vsel %vm3579_vm11, %v2437_v47, -inf  ;;  %15580 = vst [vmem:[#allocation7_spill] sm:$0xff] %v12679_v56 }
 0x1f1   : > { %v3809_v29 = vrot.slane %v3808_v51, 1  ;;  %v3903_v9 = vrot.slane %v3902_v39, 4  ;;  %v3909_v2 = vsel %vm3579_vm11, %v2438_v0, -inf  ;;  %v3822_v37 = vmax.f32 %v3820_v58, %v3821_v5 }
 0x1f2   : > { %v3816_v45 = vrot.slane %v3815_v59, 1  ;;  %v3829_v52 = vmax.f32 %v3827_v32, %v3828_v24  ;;  %v3890_v60 = vmax.f32 %v3888_v22, %v3889_v3  ;;  %v3896_v26 = vrot.slane %v3895_v35, 4 }
 0x1f3   : > { %v3810_v62 = vmax.f32 %v3808_v51, %v3809_v29  ;;  %v3904_v30 = vmax.f32 %v3902_v39, %v3903_v9  ;;  %v3910_v46 = vrot.slane %v3909_v2, 4  ;;  %v3823_v34 = vrot.slane %v3822_v37, 1 }
 0x1f4   : > { %v3817_v19 = vmax.f32 %v3815_v59, %v3816_v45  ;;  %v3830_v20 = vrot.slane %v3829_v52, 1  ;;  %v3891_v23 = vrot.slane %v3890_v60, 2  ;;  %v3897_v55 = vmax.f32 %v3895_v35, %v3896_v26  ;;  %v12684_v35 = vld [vmem:[%s15553_s2] ss:$0 sm:$0xff] }
 0x1f5   : > { %v5404_v40 = vpack.c.bf16 %v3810_v62, %v3810_v62  ;;  %v3905_v38 = vrot.slane %v3904_v30, 2  ;;  %v3911_v47 = vmax.f32 %v3909_v2, %v3910_v46  ;;  %v3824_v6 = vmax.f32 %v3822_v37, %v3823_v34  ;;  %v12688_v37 = vpop.f32.mrb[23].mxu0 }
 0x1f6   : > { %v3831_v0 = vmax.f32 %v3829_v52, %v3830_v20  ;;  %v5405_v41 = vpack.c.bf16 %v3817_v19, %v3817_v19  ;;  %v3892_v58 = vmax.f32 %v3890_v60, %v3891_v23  ;;  %v3898_v22 = vrot.slane %v3897_v55, 2  ;;  %15581 = vst [vmem:[#allocation8_spill] sm:$0xff] %v12688_v37 }
 0x1f7   : > { %v5916_v32 = vunpack.c.l.b16 %v5404_v40  ;;  %v3906_v51 = vmax.f32 %v3904_v30, %v3905_v38  ;;  %v3912_v5 = vrot.slane %v3911_v47, 2  ;;  %v5406_v39 = vpack.c.bf16 %v3824_v6, %v3824_v6 }
 0x1f8   : > { %v5407_v24 = vpack.c.bf16 %v3831_v0, %v3831_v0  ;;  %v5917_v3 = vunpack.c.l.b16 %v5405_v41  ;;  %v3893_v29 = vrot.slane %v3892_v58, 1  ;;  %v3899_v59 = vmax.f32 %v3897_v55, %v3898_v22 }
 0x1f9   : > { %v3907_v9 = vrot.slane %v3906_v51, 1  ;;  %v3913_v45 = vmax.f32 %v3911_v47, %v3912_v5  ;;  %v1888_v2 = vadd.f32 %v12684_v35, %v12486_v25  ;;  %v5918_v52 = vunpack.c.l.b16 %v5406_v39 }
 0x1fa   : > { %v5919_v60 = vunpack.c.l.b16 %v5407_v24  ;;  %v6174_v6 = vsel %vm6140_vm12, %v5917_v3, %v5916_v32  ;;  %v3894_v62 = vmax.f32 %v3892_v58, %v3893_v29  ;;  %v3900_v41 = vrot.slane %v3899_v59, 1 }
 0x1fb   : > { %v3908_v26 = vmax.f32 %v3906_v51, %v3907_v9  ;;  %v3914_v30 = vrot.slane %v3913_v45, 1  ;;  %v2116_v46 = vmax.f32 %v1888_v2, 0.0  ;;  %v15582_v19 = vpack.c.bf16 %v12659_v50, %v12659_v50 }
 0x1fc   : > { %v6175_v20 = vsel %vm6142_vm13, %v5918_v52, %v6174_v6  ;;  %v5416_v23 = vpack.c.bf16 %v3894_v62, %v3894_v62  ;;  %v1909_v25 = vadd.f32 %v12684_v35, %v12500_v27  ;;  %v3901_v40 = vmax.f32 %v3899_v59, %v3900_v41 }
 0x1fd   : > { %v12694_v34 = vunpack.c.l.b16 %v15582_v19  ;;  %v12699_v55 = vmax.f32 %v3913_v45, %v3914_v30  ;;  %v5418_v38 = vpack.c.bf16 %v3908_v26, %v3908_v26  ;;  %v2388_v47 = vcombine.high %v2116_v46, %v2116_v46 }
 0x1fe   : > { %v12701_v0 = vunpack.c.l.b16 %v5416_v23  ;;  %v2395_v58 = vrot.slane %v2116_v46, %v12402_v13  ;;  %v2121_v32 = vmax.f32 %v1909_v25, 0.0  ;;  %v12706_v50 = vadd.f32 %v12684_v35, %v12508_v61 }
 0x1ff   : > { %15583 = vst [vmem:[#allocation9_spill] sm:$0xff] %v12694_v34  ;;  %v5417_v22 = vpack.c.bf16 %v3901_v40, %v3901_v40  ;;  %v2402_v27 = vrot.slane %v2388_v47, %v12402_v13  ;;  %v12712_v5 = vsel %vm6144_vm14, %v5919_v60, %v6175_v20  ;;  %v12718_v9 = vunpack.c.l.b16 %v5418_v38 }
 0x200   : > { %15584 = vst [vmem:[#allocation10_spill] sm:$0xff] %v12701_v0  ;;  %v2403_v39 = vcombine.high %v2395_v58, %v2395_v58  ;;  %v3832_v24 = vsel %vm3579_vm11, %v2395_v58, -inf  ;;  %v2473_v3 = vcombine.high %v2121_v32, %v2121_v32  ;;  %v2480_v29 = vrot.slane %v2121_v32, %v12402_v13 }
 0x201   : > { %v12716_v59 = vunpack.c.l.b16 %v5417_v22  ;;  %15586 = vst [vmem:[#allocation12_spill] sm:$0xff] %v12718_v9  ;;  %v2404_v61 = vcombine.high %v2402_v27, %v2402_v27  ;;  %v3833_v45 = vrot.slane %v3832_v24, 4  ;;  %v3846_v52 = vsel %vm3579_vm11, %v2402_v27, -inf }
 0x202   : > { %v3839_v2 = vsel %vm3579_vm11, %v2403_v39, -inf  ;;  %v2487_v6 = vrot.slane %v2473_v3, %v12402_v13  ;;  %v2488_v60 = vcombine.high %v2480_v29, %v2480_v29  ;;  %v3847_v26 = vrot.slane %v3846_v52, 4 }
 0x203   : > { %15585 = vst [vmem:[#allocation11_spill] sm:$0xff] %v12716_v59  ;;  %v3834_v62 = vmax.f32 %v3832_v24, %v3833_v45  ;;  %v3840_v41 = vrot.slane %v3839_v2, 4  ;;  %v3853_v30 = vsel %vm3579_vm11, %v2404_v61, -inf  ;;  %v3972_v20 = vsel %vm3579_vm11, %v2480_v29, -inf }
 0x204   : > { %v3854_v46 = vrot.slane %v3853_v30, 4  ;;  %v2489_v19 = vcombine.high %v2487_v6, %v2487_v6  ;;  %v3979_v23 = vsel %vm3579_vm11, %v2488_v60, -inf  ;;  %v3848_v38 = vmax.f32 %v3846_v52, %v3847_v26 }
 0x205   : > { %v3835_v25 = vrot.slane %v3834_v62, 2  ;;  %v3841_v40 = vmax.f32 %v3839_v2, %v3840_v41  ;;  %v3973_v47 = vrot.slane %v3972_v20, 4  ;;  %v3980_v32 = vrot.slane %v3979_v23, 4 }
 0x206   : > { %v3855_v58 = vmax.f32 %v3853_v30, %v3854_v46  ;;  %v3986_v22 = vsel %vm3579_vm11, %v2487_v6, -inf  ;;  %v3993_v27 = vsel %vm3579_vm11, %v2489_v19, -inf  ;;  %v3849_v3 = vrot.slane %v3848_v38, 2 }
 0x207   : > { %v3836_v39 = vmax.f32 %v3834_v62, %v3835_v25  ;;  %v3842_v24 = vrot.slane %v3841_v40, 2  ;;  %v3974_v61 = vmax.f32 %v3972_v20, %v3973_v47  ;;  %v3981_v51 = vmax.f32 %v3979_v23, %v3980_v32 }
 0x208   : > { %v3856_v45 = vrot.slane %v3855_v58, 2  ;;  %v3987_v9 = vrot.slane %v3986_v22, 4  ;;  %v3994_v29 = vrot.slane %v3993_v27, 4  ;;  %v3850_v0 = vmax.f32 %v3848_v38, %v3849_v3 }
 0x209   : > { %v3837_v59 = vrot.slane %v3836_v39, 1  ;;  %v3843_v60 = vmax.f32 %v3841_v40, %v3842_v24  ;;  %v3975_v2 = vrot.slane %v3974_v61, 2  ;;  %v3982_v41 = vrot.slane %v3981_v51, 2 }
 0x20a   : > { %v3857_v52 = vmax.f32 %v3855_v58, %v3856_v45  ;;  %v3988_v26 = vmax.f32 %v3986_v22, %v3987_v9  ;;  %v3995_v30 = vmax.f32 %v3993_v27, %v3994_v29  ;;  %v3851_v34 = vrot.slane %v3850_v0, 1 }
 0x20b   : > { %v3838_v46 = vmax.f32 %v3836_v39, %v3837_v59  ;;  %v3844_v6 = vrot.slane %v3843_v60, 1  ;;  %v3976_v19 = vmax.f32 %v3974_v61, %v3975_v2  ;;  %v3983_v25 = vmax.f32 %v3981_v51, %v3982_v41 }
 0x20c   : > { %v3858_v62 = vrot.slane %v3857_v52, 1  ;;  %v3989_v37 = vrot.slane %v3988_v26, 2  ;;  %v3996_v20 = vrot.slane %v3995_v30, 2  ;;  %v3852_v23 = vmax.f32 %v3850_v0, %v3851_v34 }
 0x20d   : > { %v3845_v47 = vmax.f32 %v3843_v60, %v3844_v6  ;;  %v5408_v32 = vpack.c.bf16 %v3838_v46, %v3838_v46  ;;  %v3977_v56 = vrot.slane %v3976_v19, 1  ;;  %v3984_v40 = vrot.slane %v3983_v25, 1 }
 0x20e   : > { %v3859_v63 = vmax.f32 %v3857_v52, %v3858_v62  ;;  %v3990_v38 = vmax.f32 %v3988_v26, %v3989_v37  ;;  %v3997_v24 = vmax.f32 %v3995_v30, %v3996_v20  ;;  %v5410_v3 = vpack.c.bf16 %v3852_v23, %v3852_v23 }
 0x20f   : > { %v5409_v58 = vpack.c.bf16 %v3845_v47, %v3845_v47  ;;  %v5920_v9 = vunpack.c.l.b16 %v5408_v32  ;;  %v3978_v22 = vmax.f32 %v3976_v19, %v3977_v56  ;;  %v3985_v27 = vmax.f32 %v3983_v25, %v3984_v40 }
 0x210   : > { %v5411_v59 = vpack.c.bf16 %v3859_v63, %v3859_v63  ;;  %v3991_v39 = vrot.slane %v3990_v38, 1  ;;  %v3998_v61 = vrot.slane %v3997_v24, 1  ;;  %v15587_v51 = vpack.c.bf16 %v12699_v55, %v12699_v55 }
 0x211   : > { %v5921_v34 = vunpack.c.l.b16 %v5409_v58  ;;  %v6177_v0 = vsel %vm6146_vm15, %v5920_v9, %v12712_v5  ;;  %v5428_v29 = vpack.c.bf16 %v3978_v22, %v3978_v22  ;;  %v5429_v52 = vpack.c.bf16 %v3985_v27, %v3985_v27 }
 0x212   : > { %v12731_v45 = vunpack.c.l.b16 %v15587_v51  ;;  %v5923_v37 = vunpack.c.l.b16 %v5411_v59  ;;  %v3992_v60 = vmax.f32 %v3990_v38, %v3991_v39  ;;  %v3999_v2 = vmax.f32 %v3997_v24, %v3998_v61 }
 0x213   : > { %v12735_v41 = vunpack.c.l.b16 %v5410_v3  ;;  %v12738_v63 = vsel %vm6148_vm1, %v5921_v34, %v6177_v0  ;;  %v2119_v56 = vmax.f32 %v12706_v50, 0.0  ;;  %v1912_v55 = vadd.f32 %v12684_v35, %v12513_v17 }
 0x214   : > { %v6180_v26 = vsel %vm6152_vm4, %v12667_v11, %v5923_v37  ;;  %v5430_v30 = vpack.c.bf16 %v3992_v60, %v3992_v60  ;;  %v5431_v5 = vpack.c.bf16 %v3999_v2, %v3999_v2  ;;  %v12745_v46 = vunpack.c.l.b16 %v5428_v29 }
 0x215   : > { %v6181_v6 = vsel %vm6140_vm12, %v12670_v8, %v6180_v26  ;;  %v2439_v19 = vcombine.high %v2119_v56, %v2119_v56  ;;  %v2446_v62 = vrot.slane %v2119_v56, %v12402_v13  ;;  %v2122_v25 = vmax.f32 %v1912_v55, 0.0 }
 0x216   : > { %v12752_v50 = vsel %vm6142_vm13, %v12672_v1, %v6181_v6  ;;  %v12754_v20 = vunpack.c.l.b16 %v5429_v52  ;;  %v12756_v17 = vunpack.c.l.b16 %v5430_v30  ;;  %v1904_v11 = vadd.f32 %v12684_v35, %v12523_v48 }
 0x217   : > { %v2453_v47 = vrot.slane %v2439_v19, %v12402_v13  ;;  %v2454_v23 = vcombine.high %v2446_v62, %v2446_v62  ;;  %v3916_v8 = vsel %vm3579_vm11, %v2446_v62, -inf  ;;  %v2490_v32 = vcombine.high %v2122_v25, %v2122_v25 }
 0x218   : > { %v12762_v40 = vunpack.c.l.b16 %v5431_v5  ;;  %v3917_v38 = vrot.slane %v3916_v8, 4  ;;  %v2497_v24 = vrot.slane %v2122_v25, %v12402_v13  ;;  %v12765_v1 = vmax.f32 %v1904_v11, 0.0 }
 0x219   : > { %v2455_v58 = vcombine.high %v2453_v47, %v2453_v47  ;;  %v3923_v3 = vsel %vm3579_vm11, %v2454_v23, -inf  ;;  %v3930_v9 = vsel %vm3579_vm11, %v2453_v47, -inf  ;;  %v2504_v48 = vrot.slane %v2490_v32, %v12402_v13 }
 0x21a   : > { %v3918_v22 = vmax.f32 %v3916_v8, %v3917_v38  ;;  %v3924_v59 = vrot.slane %v3923_v3, 4  ;;  %v3931_v27 = vrot.slane %v3930_v9, 4  ;;  %v2505_v39 = vcombine.high %v2497_v24, %v2497_v24 }
 0x21b   : > { %v3937_v61 = vsel %vm3579_vm11, %v2455_v58, -inf  ;;  %v2506_v51 = vcombine.high %v2504_v48, %v2504_v48  ;;  %v4000_v34 = vsel %vm3579_vm11, %v2497_v24, -inf  ;;  %v4014_v0 = vsel %vm3579_vm11, %v2504_v48, -inf }
 0x21c   : > { %v3919_v29 = vrot.slane %v3918_v22, 2  ;;  %v3925_v37 = vmax.f32 %v3923_v3, %v3924_v59  ;;  %v3932_v60 = vmax.f32 %v3930_v9, %v3931_v27  ;;  %v3938_v2 = vrot.slane %v3937_v61, 4 }
 0x21d   : > { %v4001_v52 = vrot.slane %v4000_v34, 4  ;;  %v4007_v56 = vsel %vm3579_vm11, %v2505_v39, -inf  ;;  %v4015_v55 = vrot.slane %v4014_v0, 4  ;;  %v4021_v26 = vsel %vm3579_vm11, %v2506_v51, -inf }
 0x21e   : > { %v3920_v30 = vmax.f32 %v3918_v22, %v3919_v29  ;;  %v3926_v5 = vrot.slane %v3925_v37, 2  ;;  %v3933_v6 = vrot.slane %v3932_v60, 2  ;;  %v3939_v19 = vmax.f32 %v3937_v61, %v3938_v2 }
 0x21f   : > { %v4002_v62 = vmax.f32 %v4000_v34, %v4001_v52  ;;  %v4008_v25 = vrot.slane %v4007_v56, 4  ;;  %v4016_v11 = vmax.f32 %v4014_v0, %v4015_v55  ;;  %v4022_v47 = vrot.slane %v4021_v26, 4 }
 0x220   : > { %v3921_v23 = vrot.slane %v3920_v30, 1  ;;  %v3927_v8 = vmax.f32 %v3925_v37, %v3926_v5  ;;  %v3934_v32 = vmax.f32 %v3932_v60, %v3933_v6  ;;  %v3940_v38 = vrot.slane %v3939_v19, 2  ;;  %v12775_v5 = vpop.f32.mrb[24].mxu0 }
 0x221   : > { %v4003_v24 = vrot.slane %v4002_v62, 2  ;;  %v4009_v58 = vmax.f32 %v4007_v56, %v4008_v25  ;;  %v4017_v3 = vrot.slane %v4016_v11, 2  ;;  %v4023_v9 = vmax.f32 %v4021_v26, %v4022_v47 }
 0x222   : > { %v3922_v48 = vmax.f32 %v3920_v30, %v3921_v23  ;;  %v3928_v59 = vrot.slane %v3927_v8, 1  ;;  %v3935_v27 = vrot.slane %v3934_v32, 1  ;;  %v3941_v39 = vmax.f32 %v3939_v19, %v3940_v38 }
 0x223   : > { %v4004_v22 = vmax.f32 %v4002_v62, %v4003_v24  ;;  %v4010_v51 = vrot.slane %v4009_v58, 2  ;;  %v4018_v29 = vmax.f32 %v4016_v11, %v4017_v3  ;;  %v4024_v55 = vrot.slane %v4023_v9, 2 }
 0x224   : > { %v3929_v61 = vmax.f32 %v3927_v8, %v3928_v59  ;;  %v3936_v34 = vmax.f32 %v3934_v32, %v3935_v27  ;;  %v3942_v0 = vrot.slane %v3941_v39, 1  ;;  %v5420_v2 = vpack.c.bf16 %v3922_v48, %v3922_v48 }
 0x225   : > { %v4005_v52 = vrot.slane %v4004_v22, 1  ;;  %v4011_v37 = vmax.f32 %v4009_v58, %v4010_v51  ;;  %v4019_v60 = vrot.slane %v4018_v29, 1  ;;  %v2456_v11 = vcombine.high %v12765_v1, %v12765_v1 }
 0x226   : > { %v3943_v56 = vmax.f32 %v3941_v39, %v3942_v0  ;;  %v5421_v26 = vpack.c.bf16 %v3929_v61, %v3929_v61  ;;  %v5422_v30 = vpack.c.bf16 %v3936_v34, %v3936_v34  ;;  %v5932_v6 = vunpack.c.l.b16 %v5420_v2 }
 0x227   : > { %v4006_v25 = vmax.f32 %v4004_v22, %v4005_v52  ;;  %v4012_v19 = vrot.slane %v4011_v37, 1  ;;  %v4020_v62 = vmax.f32 %v4018_v29, %v4019_v60  ;;  %v2463_v3 = vrot.slane %v12765_v1, %v12402_v13 }
 0x228   : > { %v5423_v47 = vpack.c.bf16 %v3943_v56, %v3943_v56  ;;  %v5933_v23 = vunpack.c.l.b16 %v5421_v26  ;;  %v5934_v8 = vunpack.c.l.b16 %v5422_v30  ;;  %v6187_v32 = vsel %vm6152_vm4, %v5932_v6, %v12731_v45 }
 0x229   : > { %v4013_v38 = vmax.f32 %v4011_v37, %v4012_v19  ;;  %v5432_v24 = vpack.c.bf16 %v4006_v25, %v4006_v25  ;;  %v5434_v58 = vpack.c.bf16 %v4020_v62, %v4020_v62  ;;  %v2470_v27 = vrot.slane %v2456_v11, %v12402_v13 }
 0x22a   : > { %v5935_v48 = vunpack.c.l.b16 %v5423_v47  ;;  %v6188_v59 = vsel %vm6140_vm12, %v5933_v23, %v6187_v32  ;;  %v6151_v39 = vsel %vm6150_vm5, %v12531_v18, %v12542_v44  ;;  %v12789_v51 = vmax.f32 %v4023_v9, %v4024_v55  ;;  %v12814_v23 = vpop.f32.mrb[25].mxu0 }
 0x22b   : > { %v6189_v22 = vsel %vm6142_vm13, %v5934_v8, %v6188_v59  ;;  %v5433_v45 = vpack.c.bf16 %v4013_v38, %v4013_v38  ;;  %v12791_v29 = vunpack.c.l.b16 %v5432_v24  ;;  %v2471_v61 = vcombine.high %v2463_v3, %v2463_v3 }
 0x22c   : > { %v2472_v34 = vcombine.high %v2470_v27, %v2470_v27  ;;  %v3944_v1 = vsel %vm3579_vm11, %v2463_v3, -inf  ;;  %v3958_v0 = vsel %vm3579_vm11, %v2470_v27, -inf  ;;  %v12795_v2 = vunpack.c.l.b16 %v5434_v58 }
 0x22d   : > { %v3945_v52 = vrot.slane %v3944_v1, 4  ;;  %v3959_v37 = vrot.slane %v3958_v0, 4  ;;  %v12798_v60 = vsel %vm6144_vm14, %v5935_v48, %v6189_v22  ;;  %v3951_v18 = vsel %vm3579_vm11, %v2471_v61, -inf }
 0x22e   : > { %v3965_v44 = vsel %vm3579_vm11, %v2472_v34, -inf  ;;  %v6156_v9 = vsel %vm6144_vm14, %v12467_v16, %v12558_v49  ;;  %v6166_v55 = vsel %vm6150_vm5, %v12661_v42, %v12641_v31  ;;  %v3952_v26 = vrot.slane %v3951_v18, 4 }
 0x22f   : > { %v3946_v56 = vmax.f32 %v3944_v1, %v3945_v52  ;;  %v3960_v30 = vmax.f32 %v3958_v0, %v3959_v37  ;;  %v3966_v6 = vrot.slane %v3965_v44, 4  ;;  %v6157_v25 = vsel %vm6146_vm15, %v12494_v43, %v6156_v9  ;;  %v12843_v52 = vpop.f32.mrb[26].mxu0 }
 0x230   : > { %v6170_v19 = vsel %vm6144_vm14, %v12591_v4, %v12651_v57  ;;  %vm6403_vm6 = vsmask.f32 256  ;;  %v3802_v62 = vrot.slane %v12616_v53, 1  ;;  %v3953_v16 = vmax.f32 %v3951_v18, %v3952_v26 }
 0x231   : > { %v3947_v11 = vrot.slane %v3946_v56, 2  ;;  %v3961_v49 = vrot.slane %v3960_v30, 2  ;;  %v3967_v47 = vmax.f32 %v3965_v44, %v3966_v6  ;;  %v6158_v31 = vsel %vm6148_vm1, %v12496_v7, %v6157_v25  ;;  %vm12825_vm8 = vmand %vm519_vm0, %vm6403_vm6 }
 0x232   : > { %v6171_v42 = vsel %vm6146_vm15, %v12620_v21, %v6170_v19  ;;  %v3803_v43 = vmax.f32 %v12616_v53, %v3802_v62  ;;  %v1925_v4 = vadd.f32 %v12684_v35, %v12568_v54  ;;  %v3954_v8 = vrot.slane %v3953_v16, 2 }
 0x233   : > { %v3948_v57 = vmax.f32 %v3946_v56, %v3947_v11  ;;  %v3962_v32 = vmax.f32 %v3960_v30, %v3961_v49  ;;  %v3968_v38 = vrot.slane %v3967_v47, 2  ;;  %v6159_v7 = vsel %vm6150_vm5, %v12498_v36, %v6158_v31 }
 0x234   : > { %v6172_v21 = vsel %vm6148_vm1, %v12622_v12, %v6171_v42  ;;  %v10979_v53 = vpack.c.bf16 %v3803_v43, %v3803_v43  ;;  %v2125_v58 = vmax.f32 %v1925_v4, 0.0  ;;  %v3955_v54 = vmax.f32 %v3953_v16, %v3954_v8  ;;  %v12862_v8 = vpop.f32.mrb[27].mxu0 }
 0x235   : > { %v3949_v3 = vrot.slane %v3948_v57, 1  ;;  %v3963_v48 = vrot.slane %v3962_v32, 1  ;;  %v3969_v59 = vmax.f32 %v3967_v47, %v3968_v38  ;;  %v12833_v27 = vunpack.c.l.b16 %v5433_v45 }
 0x236   : > { %v6173_v22 = vsel %vm6150_vm5, %v12625_v15, %v6172_v21  ;;  %v6363_v61 = vpack.c.b16 %v6159_v7, %v6151_v39  ;;  %v12839_v34 = vsel %vm12825_vm8, %v10979_v53, 0  ;;  %v3956_v1 = vrot.slane %v3955_v54, 1 }
 0x237   : > { %v3950_v36 = vmax.f32 %v3948_v57, %v3949_v3  ;;  %v12841_v0 = vmax.f32 %v3962_v32, %v3963_v48  ;;  %v3970_v12 = vrot.slane %v3969_v59, 1  ;;  %v12845_v37 = vpack.c.b16 %v6173_v22, %v6166_v55 }
 0x238   : > { %v12849_v45 = vsel %vm12825_vm8, 0, %v6363_v61  ;;  %v6437_v15 = vshll.u32 %v12839_v34, 16  ;;  %v2541_v39 = vcombine.high %v2125_v58, %v2125_v58  ;;  %v3957_v18 = vmax.f32 %v3955_v54, %v3956_v1 }
 0x239   : > { %15590 = vst [vmem:[#allocation13_spill] sm:$0xff] %v12845_v37  ;;  %15591 = vst [vmem:[#allocation14_spill] sm:$0xff] %v12849_v45  ;;  %v3971_v44 = vmax.f32 %v3969_v59, %v3970_v12  ;;  %v5424_v9 = vpack.c.bf16 %v3950_v36, %v3950_v36  ;;  %v2548_v56 = vrot.slane %v2125_v58, %v12402_v13  ;;  %v6422_v30 = vshrl.u32 %v12849_v45, 16 }
 0x23a   : > { %v5426_v26 = vpack.c.bf16 %v12841_v0, %v12841_v0  ;;  %v6424_v55 = vshll.u32 %v12849_v45, 16  ;;  %v6429_v6 = vshll.u32 %v12845_v37, 16  ;;  %v5425_v25 = vpack.c.bf16 %v3957_v18, %v3957_v18 }
 0x23b   : > { %v5427_v19 = vpack.c.bf16 %v3971_v44, %v3971_v44  ;;  %v5936_v62 = vunpack.c.l.b16 %v5424_v9  ;;  %v6433_v11 = vshrl.u32 %v12845_v37, 16  ;;  %v6439_v47 = vrot.slane %v6437_v15, 1 }
 0x23c   : > { %v6426_v16 = vrot.slane %v6424_v55, 1  ;;  %v6431_v49 = vrot.slane %v6429_v6, 1  ;;  %v2555_v31 = vrot.slane %v2541_v39, %v12402_v13  ;;  %v5937_v42 = vunpack.c.l.b16 %v5425_v25 }
 0x23d   : > { %v5939_v43 = vunpack.c.l.b16 %v5427_v19  ;;  %v6191_v4 = vsel %vm6146_vm15, %v5936_v62, %v12798_v60  ;;  %v2556_v57 = vcombine.high %v2548_v56, %v2548_v56  ;;  %v4084_v21 = vsel %vm3579_vm11, %v2548_v56, -inf }
 0x23e   : > { %v6427_v32 = vor.u32 %v6426_v16, %v6422_v30  ;;  %v6435_v38 = vor.u32 %v6433_v11, %v6431_v49  ;;  %v2557_v7 = vcombine.high %v2555_v31, %v2555_v31  ;;  %v12866_v53 = vsel %vm6148_vm1, %v5937_v42, %v6191_v4 }
 0x23f   : > { %v6194_v58 = vsel %vm6152_vm4, %v12745_v46, %v5939_v43  ;;  %v4085_v3 = vrot.slane %v4084_v21, 4  ;;  %v4091_v54 = vsel %vm3579_vm11, %v2556_v57, -inf  ;;  %v4098_v36 = vsel %vm3579_vm11, %v2555_v31, -inf }
 0x240   : > { %v6195_v60 = vsel %vm6140_vm12, %v12754_v20, %v6194_v58  ;;  %v6432_v48 = vsel %vm610_vm3, %v6427_v32, %v6431_v49  ;;  %v6440_v59 = vsel %vm610_vm3, %v6435_v38, %v6439_v47  ;;  %v4092_v22 = vrot.slane %v4091_v54, 4 }
 0x241   : > { %v12877_v61 = vsel %vm6142_vm13, %v12756_v17, %v6195_v60  ;;  %6581 = vrot.lane.b32.xlu0 %v6432_v48, %s11376_s16  ;;  %6583 = vrot.lane.b32.xlu1 %v6440_v59, %s11376_s16  ;;  %v4086_v46 = vmax.f32 %v4084_v21, %v4085_v3  ;;  %v4105_v1 = vsel %vm3579_vm11, %v2557_v7, -inf  ;;  %v4099_v20 = vrot.slane %v4098_v36, 4  ;;  %v12898_v59 = vpop.f32.mrb[28].mxu0 }
 0x242   : > { %v4093_v12 = vmax.f32 %v4091_v54, %v4092_v22  ;;  %v4106_v15 = vrot.slane %v4105_v1, 4  ;;  %v6629_v39 = vrot.slane %v12849_v45, 1  ;;  %v6630_v44 = vrot.slane %v12845_v37, 1 }
 0x243   : > { %v4087_v18 = vrot.slane %v4086_v46, 2  ;;  %v1917_v17 = vadd.f32 %v12684_v35, %v12608_v33  ;;  %v1928_v9 = vadd.f32 %v12684_v35, %v12618_v10  ;;  %v4100_v30 = vmax.f32 %v4098_v36, %v4099_v20 }
 0x244   : > { %v4094_v56 = vrot.slane %v4093_v12, 2  ;;  %v4107_v55 = vmax.f32 %v4105_v1, %v4106_v15  ;;  %v6632_v6 = vrot.slane %v12839_v34, 1  ;;  %v6631_v19 = vsel %vm963_vm2, %v6629_v39, %v6630_v44 }
 0x245   : > { %v4088_v25 = vmax.f32 %v4086_v46, %v4087_v18  ;;  %v2123_v62 = vmax.f32 %v1917_v17, 0.0  ;;  %v2126_v11 = vmax.f32 %v1928_v9, 0.0  ;;  %v4101_v49 = vrot.slane %v4100_v30, 2  ;;  %6669 = vrot.lane.b32.xlu0 %v6631_v19, %s11375_s15 }
 0x246   : > { %v4095_v16 = vmax.f32 %v4093_v12, %v4094_v56  ;;  %v4108_v47 = vrot.slane %v4107_v55, 2  ;;  %v6633_v33 = vsel %vm963_vm2, %v6630_v44, %v6632_v6  ;;  %v12902_v12 = vpop.f32.mrb[29].mxu0  ;;  %v12909_v44 = vunpack.c.l.b16 %v5426_v26 }
 0x247   : > { %v4089_v31 = vrot.slane %v4088_v25, 1  ;;  %v2507_v42 = vcombine.high %v2123_v62, %v2123_v62  ;;  %v2514_v10 = vrot.slane %v2123_v62, %v12402_v13  ;;  %v2558_v43 = vcombine.high %v2126_v11, %v2126_v11  ;;  %6671 = vrot.lane.b32.xlu1 %v6633_v33, %s11375_s15 }
 0x248   : > { %v4096_v34 = vrot.slane %v4095_v16, 1  ;;  %v4102_v4 = vmax.f32 %v4100_v30, %v4101_v49  ;;  %v4109_v57 = vmax.f32 %v4107_v55, %v4108_v47  ;;  %v2565_v32 = vrot.slane %v2126_v11, %v12402_v13 }
 0x249   : > { %v4090_v38 = vmax.f32 %v4088_v25, %v4089_v31  ;;  %v2521_v7 = vrot.slane %v2507_v42, %v12402_v13  ;;  %v2522_v21 = vcombine.high %v2514_v10, %v2514_v10  ;;  %v4028_v58 = vsel %vm3579_vm11, %v2514_v10, -inf }
 0x24a   : > { %v4097_v3 = vmax.f32 %v4095_v16, %v4096_v34  ;;  %v4103_v54 = vrot.slane %v4102_v4, 1  ;;  %v4110_v60 = vrot.slane %v4109_v57, 1  ;;  %v4029_v48 = vrot.slane %v4028_v58, 4 }
 0x24b   : > { %v5444_v22 = vpack.c.bf16 %v4090_v38, %v4090_v38  ;;  %v2523_v46 = vcombine.high %v2521_v7, %v2521_v7  ;;  %v4035_v36 = vsel %vm3579_vm11, %v2522_v21, -inf  ;;  %v4042_v1 = vsel %vm3579_vm11, %v2521_v7, -inf }
 0x24c   : > { %v4104_v20 = vmax.f32 %v4102_v4, %v4103_v54  ;;  %v12904_v15 = vmax.f32 %v4109_v57, %v4110_v60  ;;  %v5445_v39 = vpack.c.bf16 %v4097_v3, %v4097_v3  ;;  %v4030_v18 = vmax.f32 %v4028_v58, %v4029_v48  ;;  %v12924_v3 = vpop.f32.mrb[30].mxu0 }
 0x24d   : > { %v4036_v17 = vrot.slane %v4035_v36, 4  ;;  %v4043_v9 = vrot.slane %v4042_v1, 4  ;;  %v4049_v56 = vsel %vm3579_vm11, %v2523_v46, -inf  ;;  %v12914_v6 = vunpack.c.l.b16 %v5444_v22 }
 0x24e   : > { %v5446_v30 = vpack.c.bf16 %v4104_v20, %v4104_v20  ;;  %v5447_v55 = vpack.c.bf16 %v12904_v15, %v12904_v15  ;;  %v4031_v25 = vrot.slane %v4030_v18, 2  ;;  %v4050_v11 = vrot.slane %v4049_v56, 4 }
 0x24f   : > { %v4037_v19 = vmax.f32 %v4035_v36, %v4036_v17  ;;  %v4044_v62 = vmax.f32 %v4042_v1, %v4043_v9  ;;  %v2572_v16 = vrot.slane %v2558_v43, %v12402_v13  ;;  %v12917_v49 = vunpack.c.l.b16 %v5445_v39 }
 0x250   : > { %v12919_v0 = vunpack.c.l.b16 %v5446_v30  ;;  %v4032_v26 = vmax.f32 %v4030_v18, %v4031_v25  ;;  %v2573_v47 = vcombine.high %v2565_v32, %v2565_v32  ;;  %v4051_v42 = vmax.f32 %v4049_v56, %v4050_v11 }
 0x251   : > { %v4038_v33 = vrot.slane %v4037_v19, 2  ;;  %v4045_v31 = vrot.slane %v4044_v62, 2  ;;  %v2574_v10 = vcombine.high %v2572_v16, %v2572_v16  ;;  %v4112_v4 = vsel %vm3579_vm11, %v2565_v32, -inf }
 0x252   : > { %v4033_v34 = vrot.slane %v4032_v26, 1  ;;  %v4119_v57 = vsel %vm3579_vm11, %v2573_v47, -inf  ;;  %v4126_v38 = vsel %vm3579_vm11, %v2572_v16, -inf  ;;  %v4052_v43 = vrot.slane %v4051_v42, 2 }
 0x253   : > { %v4039_v7 = vmax.f32 %v4037_v19, %v4038_v33  ;;  %v4046_v21 = vmax.f32 %v4044_v62, %v4045_v31  ;;  %v4113_v58 = vrot.slane %v4112_v4, 4  ;;  %v4120_v60 = vrot.slane %v4119_v57, 4 }
 0x254   : > { %v4034_v54 = vmax.f32 %v4032_v26, %v4033_v34  ;;  %v4127_v48 = vrot.slane %v4126_v38, 4  ;;  %v4133_v22 = vsel %vm3579_vm11, %v2574_v10, -inf  ;;  %v4053_v1 = vmax.f32 %v4051_v42, %v4052_v43 }
 0x255   : > { %v4040_v46 = vrot.slane %v4039_v7, 1  ;;  %v4047_v36 = vrot.slane %v4046_v21, 1  ;;  %v4114_v20 = vmax.f32 %v4112_v4, %v4113_v58  ;;  %v4121_v39 = vmax.f32 %v4119_v57, %v4120_v60 }
 0x256   : > { %v5436_v32 = vpack.c.bf16 %v4034_v54, %v4034_v54  ;;  %v4128_v18 = vmax.f32 %v4126_v38, %v4127_v48  ;;  %v4134_v17 = vrot.slane %v4133_v22, 4  ;;  %v4054_v30 = vrot.slane %v4053_v1, 1  ;;  %v12929_v48 = vpop.f32.mrb[31].mxu0 }
 0x257   : > { %v4041_v9 = vmax.f32 %v4039_v7, %v4040_v46  ;;  %v4048_v56 = vmax.f32 %v4046_v21, %v4047_v36  ;;  %v4115_v25 = vrot.slane %v4114_v20, 2  ;;  %v4122_v62 = vrot.slane %v4121_v39, 2 }
 0x258   : > { %v5948_v19 = vunpack.c.l.b16 %v5436_v32  ;;  %v4129_v11 = vrot.slane %v4128_v18, 2  ;;  %v4135_v16 = vmax.f32 %v4133_v22, %v4134_v17  ;;  %v4055_v26 = vmax.f32 %v4053_v1, %v4054_v30 }
 0x259   : > { %v5437_v47 = vpack.c.bf16 %v4041_v9, %v4041_v9  ;;  %v5438_v33 = vpack.c.bf16 %v4048_v56, %v4048_v56  ;;  %v4116_v31 = vmax.f32 %v4114_v20, %v4115_v25  ;;  %v4123_v10 = vmax.f32 %v4121_v39, %v4122_v62 }
 0x25a   : > { %v4130_v34 = vmax.f32 %v4128_v18, %v4129_v11  ;;  %v4136_v42 = vrot.slane %v4135_v16, 2  ;;  %v1920_v4 = vadd.f32 %v12684_v35, %v12630_v14  ;;  %v5439_v57 = vpack.c.bf16 %v4055_v26, %v4055_v26 }
 0x25b   : > { %v5949_v38 = vunpack.c.l.b16 %v5437_v47  ;;  %v5950_v7 = vunpack.c.l.b16 %v5438_v33  ;;  %v4117_v21 = vrot.slane %v4116_v31, 1  ;;  %v4124_v43 = vrot.slane %v4123_v10, 1 }
 0x25c   : > { %v4131_v58 = vrot.slane %v4130_v34, 1  ;;  %v4137_v54 = vmax.f32 %v4135_v16, %v4136_v42  ;;  %v2124_v60 = vmax.f32 %v1920_v4, 0.0  ;;  %v5951_v22 = vunpack.c.l.b16 %v5439_v57 }
 0x25d   : > { %v6201_v46 = vsel %vm6140_vm12, %v5949_v38, %v5948_v19  ;;  %v4118_v36 = vmax.f32 %v4116_v31, %v4117_v21  ;;  %v1941_v1 = vadd.f32 %v12684_v35, %v12653_v28  ;;  %v4125_v14 = vmax.f32 %v4123_v10, %v4124_v43 }
 0x25e   : > { %v6202_v20 = vsel %vm6142_vm13, %v5950_v7, %v6201_v46  ;;  %v4132_v32 = vmax.f32 %v4130_v34, %v4131_v58  ;;  %v4138_v39 = vrot.slane %v4137_v54, 1  ;;  %v12938_v18 = vunpack.c.l.b16 %v5447_v55 }
 0x25f   : > { %v5448_v17 = vpack.c.bf16 %v4118_v36, %v4118_v36  ;;  %v2524_v9 = vcombine.high %v2124_v60, %v2124_v60  ;;  %v2531_v56 = vrot.slane %v2124_v60, %v12402_v13  ;;  %v5449_v25 = vpack.c.bf16 %v4125_v14, %v4125_v14 }
 0x260   : > { %v4139_v30 = vmax.f32 %v4137_v54, %v4138_v39  ;;  %v5450_v19 = vpack.c.bf16 %v4132_v32, %v4132_v32  ;;  %v2129_v62 = vmax.f32 %v1941_v1, 0.0  ;;  %v12944_v26 = vsel %vm6144_vm14, %v5951_v22, %v6202_v20 }
 0x261   : > { %v2538_v28 = vrot.slane %v2524_v9, %v12402_v13  ;;  %v2539_v11 = vcombine.high %v2531_v56, %v2531_v56  ;;  %v4056_v16 = vsel %vm3579_vm11, %v2531_v56, -inf  ;;  %v12946_v15 = vunpack.c.l.b16 %v5448_v17 }
 0x262   : > { %v5451_v47 = vpack.c.bf16 %v4139_v30, %v4139_v30  ;;  %v12948_v55 = vunpack.c.l.b16 %v5449_v25  ;;  %v4057_v33 = vrot.slane %v4056_v16, 4  ;;  %v2609_v42 = vcombine.high %v2129_v62, %v2129_v62 }
 0x263   : > { %v2540_v31 = vcombine.high %v2538_v28, %v2538_v28  ;;  %v4063_v10 = vsel %vm3579_vm11, %v2539_v11, -inf  ;;  %v4070_v34 = vsel %vm3579_vm11, %v2538_v28, -inf  ;;  %v12952_v4 = vunpack.c.l.b16 %v5450_v19 }
 0x264   : > { %v4058_v57 = vmax.f32 %v4056_v16, %v4057_v33  ;;  %v4064_v38 = vrot.slane %v4063_v10, 4  ;;  %v4071_v7 = vrot.slane %v4070_v34, 4  ;;  %v12954_v21 = vunpack.c.l.b16 %v5451_v47 }
 0x265   : > { %v4077_v43 = vsel %vm3579_vm11, %v2540_v31, -inf  ;;  %v2616_v58 = vrot.slane %v2129_v62, %v12402_v13  ;;  %v2623_v54 = vrot.slane %v2609_v42, %v12402_v13  ;;  %vm6817_vm0 = vcmask 1043456  }
 0x266   : > { %v4059_v60 = vrot.slane %v4058_v57, 2  ;;  %v4065_v22 = vmax.f32 %v4063_v10, %v4064_v38  ;;  %v4072_v46 = vmax.f32 %v4070_v34, %v4071_v7  ;;  %v4078_v36 = vrot.slane %v4077_v43, 4 }
 0x267   : > { %v2624_v1 = vcombine.high %v2616_v58, %v2616_v58  ;;  %v2625_v20 = vcombine.high %v2623_v54, %v2623_v54  ;;  %v4196_v14 = vsel %vm3579_vm11, %v2616_v58, -inf  ;;  %v4210_v32 = vsel %vm3579_vm11, %v2623_v54, -inf }
 0x268   : > { %v4060_v39 = vmax.f32 %v4058_v57, %v4059_v60  ;;  %v4066_v17 = vrot.slane %v4065_v22, 2  ;;  %v4073_v9 = vrot.slane %v4072_v46, 2  ;;  %v4079_v56 = vmax.f32 %v4077_v43, %v4078_v36 }
 0x269   : > { %v4197_v30 = vrot.slane %v4196_v14, 4  ;;  %v4203_v25 = vsel %vm3579_vm11, %v2624_v1, -inf  ;;  %v4211_v19 = vrot.slane %v4210_v32, 4  ;;  %v4217_v62 = vsel %vm3579_vm11, %v2625_v20, -inf }
 0x26a   : > { %v4061_v28 = vrot.slane %v4060_v39, 1  ;;  %v4067_v11 = vmax.f32 %v4065_v22, %v4066_v17  ;;  %v4074_v16 = vmax.f32 %v4072_v46, %v4073_v9  ;;  %v4080_v47 = vrot.slane %v4079_v56, 2 }
 0x26b   : > { %v4198_v33 = vmax.f32 %v4196_v14, %v4197_v30  ;;  %v4204_v31 = vrot.slane %v4203_v25, 4  ;;  %v4212_v10 = vmax.f32 %v4210_v32, %v4211_v19  ;;  %v4218_v34 = vrot.slane %v4217_v62, 4  ;;  %v15592_v30 = vld [vmem:[#allocation6_spill] sm:$0xff] }
 0x26c   : > { %v4062_v42 = vmax.f32 %v4060_v39, %v4061_v28  ;;  %v4068_v38 = vrot.slane %v4067_v11, 1  ;;  %v4075_v57 = vrot.slane %v4074_v16, 1  ;;  %v4081_v7 = vmax.f32 %v4079_v56, %v4080_v47 }
 0x26d   : > { %v4199_v58 = vrot.slane %v4198_v33, 2  ;;  %v4205_v43 = vmax.f32 %v4203_v25, %v4204_v31  ;;  %v4213_v54 = vrot.slane %v4212_v10, 2  ;;  %v4219_v60 = vmax.f32 %v4217_v62, %v4218_v34 }
 0x26e   : > { %v4069_v36 = vmax.f32 %v4067_v11, %v4068_v38  ;;  %v4076_v1 = vmax.f32 %v4074_v16, %v4075_v57  ;;  %v4082_v37 = vrot.slane %v4081_v7, 1  ;;  %v5440_v20 = vpack.c.bf16 %v4062_v42, %v4062_v42  ;;  %v15593_v57 = vld [vmem:[#allocation7_spill] sm:$0xff] }
 0x26f   : > { %v4200_v45 = vmax.f32 %v4198_v33, %v4199_v58  ;;  %v4206_v22 = vrot.slane %v4205_v43, 2  ;;  %v4214_v46 = vmax.f32 %v4212_v10, %v4213_v54  ;;  %v4220_v17 = vrot.slane %v4219_v60, 2 }
 0x270   : > { %v4083_v14 = vmax.f32 %v4081_v7, %v4082_v37  ;;  %v5441_v9 = vpack.c.bf16 %v4069_v36, %v4069_v36  ;;  %v5952_v32 = vunpack.c.l.b16 %v5440_v20  ;;  %v1933_v39 = vadd.f32 %v12684_v35, %v15592_v30 }
 0x271   : > { %v4201_v19 = vrot.slane %v4200_v45, 1  ;;  %v4207_v56 = vmax.f32 %v4205_v43, %v4206_v22  ;;  %v4215_v28 = vrot.slane %v4214_v46, 1  ;;  %v4221_v25 = vmax.f32 %v4219_v60, %v4220_v17 }
 0x272   : > { %v5442_v47 = vpack.c.bf16 %v4076_v1, %v4076_v1  ;;  %v5443_v62 = vpack.c.bf16 %v4083_v14, %v4083_v14  ;;  %v5953_v11 = vunpack.c.l.b16 %v5441_v9  ;;  %v6204_v16 = vsel %vm6146_vm15, %v5952_v32, %v12944_v26 }
 0x273   : > { %v4202_v33 = vmax.f32 %v4200_v45, %v4201_v19  ;;  %v4208_v31 = vrot.slane %v4207_v56, 1  ;;  %v4216_v10 = vmax.f32 %v4214_v46, %v4215_v28  ;;  %v4222_v34 = vrot.slane %v4221_v25, 1 }
 0x274   : > { %v5955_v37 = vunpack.c.l.b16 %v5443_v62  ;;  %v12968_v42 = vsel %vm6148_vm1, %v5953_v11, %v6204_v16  ;;  %v2127_v38 = vmax.f32 %v1933_v39, 0.0  ;;  %v1944_v7 = vadd.f32 %v12684_v35, %v15593_v57 }
 0x275   : > { %v4209_v58 = vmax.f32 %v4207_v56, %v4208_v31  ;;  %v4223_v43 = vmax.f32 %v4221_v25, %v4222_v34  ;;  %v5460_v54 = vpack.c.bf16 %v4202_v33, %v4202_v33  ;;  %v5462_v60 = vpack.c.bf16 %v4216_v10, %v4216_v10 }
 0x276   : > { %v6207_v36 = vsel %vm6152_vm4, %v12914_v6, %v5955_v37  ;;  %v2575_v26 = vcombine.high %v2127_v38, %v2127_v38  ;;  %v2582_v45 = vrot.slane %v2127_v38, %v12402_v13  ;;  %v2130_v1 = vmax.f32 %v1944_v7, 0.0 }
 0x277   : > { %v12975_v20 = vunpack.c.l.b16 %v5442_v47  ;;  %v6208_v22 = vsel %vm6140_vm12, %v12917_v49, %v6207_v36  ;;  %v5461_v46 = vpack.c.bf16 %v4209_v58, %v4209_v58  ;;  %v5463_v17 = vpack.c.bf16 %v4223_v43, %v4223_v43 }
 0x278   : > { %v12981_v35 = vsel %vm6142_vm13, %v12919_v0, %v6208_v22  ;;  %v12983_v14 = vunpack.c.l.b16 %v5460_v54  ;;  %v2589_v9 = vrot.slane %v2575_v26, %v12402_v13  ;;  %v2590_v6 = vcombine.high %v2582_v45, %v2582_v45 }
 0x279   : > { %v12986_v32 = vunpack.c.l.b16 %v5461_v46  ;;  %v12988_v30 = vunpack.c.l.b16 %v5462_v60  ;;  %v4140_v39 = vsel %vm3579_vm11, %v2582_v45, -inf  ;;  %v2626_v19 = vcombine.high %v2130_v1, %v2130_v1 }
 0x27a   : > { %v2591_v56 = vcombine.high %v2589_v9, %v2589_v9  ;;  %v4141_v49 = vrot.slane %v4140_v39, 4  ;;  %v4147_v28 = vsel %vm3579_vm11, %v2590_v6, -inf  ;;  %v4154_v25 = vsel %vm3579_vm11, %v2589_v9, -inf }
 0x27b   : > { %v4148_v0 = vrot.slane %v4147_v28, 4  ;;  %v4155_v47 = vrot.slane %v4154_v25, 4  ;;  %v2633_v62 = vrot.slane %v2130_v1, %v12402_v13  ;;  %v2640_v11 = vrot.slane %v2626_v19, %v12402_v13 }
 0x27c   : > { %v12995_v16 = vunpack.c.l.b16 %v5463_v17  ;;  %v4142_v33 = vmax.f32 %v4140_v39, %v4141_v49  ;;  %v4161_v31 = vsel %vm3579_vm11, %v2591_v56, -inf  ;;  %v13001_v10 = vsel %vm6150_vm5, %v12735_v41, %v12738_v63 }
 0x27d   : > { %v4149_v34 = vmax.f32 %v4147_v28, %v4148_v0  ;;  %v4156_v37 = vmax.f32 %v4154_v25, %v4155_v47  ;;  %v4162_v38 = vrot.slane %v4161_v31, 4  ;;  %v2641_v57 = vcombine.high %v2633_v62, %v2633_v62 }
 0x27e   : > { %v4143_v7 = vrot.slane %v4142_v33, 2  ;;  %v2642_v58 = vcombine.high %v2640_v11, %v2640_v11  ;;  %v4224_v43 = vsel %vm3579_vm11, %v2633_v62, -inf  ;;  %v4238_v54 = vsel %vm3579_vm11, %v2640_v11, -inf }
 0x27f   : > { %v4150_v60 = vrot.slane %v4149_v34, 2  ;;  %v4157_v36 = vrot.slane %v4156_v37, 2  ;;  %v4163_v26 = vmax.f32 %v4161_v31, %v4162_v38  ;;  %v4225_v45 = vrot.slane %v4224_v43, 4 }
 0x280   : > { %v4144_v1 = vmax.f32 %v4142_v33, %v4143_v7  ;;  %v4231_v22 = vsel %vm3579_vm11, %v2641_v57, -inf  ;;  %v4239_v46 = vrot.slane %v4238_v54, 4  ;;  %v4245_v41 = vsel %vm3579_vm11, %v2642_v58, -inf }
 0x281   : > { %v4151_v63 = vmax.f32 %v4149_v34, %v4150_v60  ;;  %v4158_v17 = vmax.f32 %v4156_v37, %v4157_v36  ;;  %v4164_v9 = vrot.slane %v4163_v26, 2  ;;  %v4226_v6 = vmax.f32 %v4224_v43, %v4225_v45  ;;  %v13007_v34 = vpop.f32.mrb[32].mxu0  ;;  %v15594_v36 = vld [vmem:[#allocation8_spill] sm:$0xff] }
 0x282   : > { %v4145_v39 = vrot.slane %v4144_v1, 1  ;;  %v4232_v19 = vrot.slane %v4231_v22, 4  ;;  %v4240_v56 = vmax.f32 %v4238_v54, %v4239_v46  ;;  %v4246_v49 = vrot.slane %v4245_v41, 4  ;;  %v13012_v54 = vld [vmem:[%s15553_s2] ss:$0 sm:$0xff] }
 0x283   : > { %v4152_v28 = vrot.slane %v4151_v63, 1  ;;  %v4159_v25 = vrot.slane %v4158_v17, 1  ;;  %v4165_v0 = vmax.f32 %v4163_v26, %v4164_v9  ;;  %v4227_v47 = vrot.slane %v4226_v6, 2 }
 0x284   : > { %v4146_v62 = vmax.f32 %v4144_v1, %v4145_v39  ;;  %v4233_v11 = vmax.f32 %v4231_v22, %v4232_v19  ;;  %v4241_v33 = vrot.slane %v4240_v56, 2  ;;  %v4247_v31 = vmax.f32 %v4245_v41, %v4246_v49 }
 0x285   : > { %v4153_v38 = vmax.f32 %v4151_v63, %v4152_v28  ;;  %v4160_v57 = vmax.f32 %v4158_v17, %v4159_v25  ;;  %v4166_v7 = vrot.slane %v4165_v0, 1  ;;  %v4228_v58 = vmax.f32 %v4226_v6, %v4227_v47 }
 0x286   : > { %v5452_v37 = vpack.c.bf16 %v4146_v62, %v4146_v62  ;;  %v4234_v43 = vrot.slane %v4233_v11, 2  ;;  %v4242_v60 = vmax.f32 %v4240_v56, %v4241_v33  ;;  %v1936_v26 = vadd.f32 %v13012_v54, %v15594_v36  ;;  %v15596_v36 = vld [vmem:[#allocation10_spill] sm:$0xff] }
 0x287   : > { %v4167_v45 = vmax.f32 %v4165_v0, %v4166_v7  ;;  %v5453_v1 = vpack.c.bf16 %v4153_v38, %v4153_v38  ;;  %v5454_v22 = vpack.c.bf16 %v4160_v57, %v4160_v57  ;;  %v4229_v46 = vrot.slane %v4228_v58, 1  ;;  %v15595_v38 = vld [vmem:[#allocation9_spill] sm:$0xff] }
 0x288   : > { %v5964_v41 = vunpack.c.l.b16 %v5452_v37  ;;  %v4235_v63 = vmax.f32 %v4233_v11, %v4234_v43  ;;  %v4243_v17 = vrot.slane %v4242_v60, 1  ;;  %v4248_v9 = vrot.slane %v4247_v31, 2 }
 0x289   : > { %v5455_v6 = vpack.c.bf16 %v4167_v45, %v4167_v45  ;;  %v5965_v39 = vunpack.c.l.b16 %v5453_v1  ;;  %v5966_v19 = vunpack.c.l.b16 %v5454_v22  ;;  %v4230_v56 = vmax.f32 %v4228_v58, %v4229_v46  ;;  %v15597_v22 = vld [vmem:[#allocation11_spill] sm:$0xff] }
 0x28a   : > { %v6214_v49 = vsel %vm6152_vm4, %v5964_v41, %v12954_v21  ;;  %v4236_v28 = vrot.slane %v4235_v63, 1  ;;  %v4244_v25 = vmax.f32 %v4242_v60, %v4243_v17  ;;  %v2128_v47 = vmax.f32 %v1936_v26, 0.0 }
 0x28b   : > { %v5967_v62 = vunpack.c.l.b16 %v5455_v6  ;;  %v6215_v0 = vsel %vm6140_vm12, %v5965_v39, %v6214_v49  ;;  %v5464_v33 = vpack.c.bf16 %v4230_v56, %v4230_v56  ;;  %v6183_v11 = vsel %vm6144_vm14, %v15595_v38, %v12752_v50 }
 0x28c   : > { %v6216_v57 = vsel %vm6142_vm13, %v5966_v19, %v6215_v0  ;;  %v4237_v7 = vmax.f32 %v4235_v63, %v4236_v28  ;;  %v5466_v37 = vpack.c.bf16 %v4244_v25, %v4244_v25  ;;  %v2592_v43 = vcombine.high %v2128_v47, %v2128_v47  ;;  %v15598_v63 = vld [vmem:[#allocation12_spill] sm:$0xff] }
 0x28d   : > { %v13023_v58 = vmax.f32 %v4247_v31, %v4248_v9  ;;  %v2599_v21 = vrot.slane %v2128_v47, %v12402_v13  ;;  %v13027_v60 = vsel %vm6144_vm14, %v5967_v62, %v6216_v57  ;;  %v6184_v26 = vsel %vm6146_vm15, %v15596_v36, %v6183_v11 }
 0x28e   : > { %v5465_v45 = vpack.c.bf16 %v4237_v7, %v4237_v7  ;;  %v13031_v1 = vunpack.c.l.b16 %v5464_v33  ;;  %v2606_v50 = vrot.slane %v2592_v43, %v12402_v13  ;;  %v6185_v46 = vsel %vm6148_vm1, %v15597_v22, %v6184_v26 }
 0x28f   : > { %v2607_v41 = vcombine.high %v2599_v21, %v2599_v21  ;;  %v4168_v31 = vsel %vm3579_vm11, %v2599_v21, -inf  ;;  %v6186_v17 = vsel %vm6150_vm5, %v15598_v63, %v6185_v46  ;;  %v6193_v9 = vsel %vm6150_vm5, %v12909_v44, %v12866_v53 }
 0x290   : > { %v13042_v6 = vunpack.c.l.b16 %v5466_v37  ;;  %v2608_v39 = vcombine.high %v2606_v50, %v2606_v50  ;;  %v4169_v19 = vrot.slane %v4168_v31, 4  ;;  %v4182_v56 = vsel %vm3579_vm11, %v2606_v50, -inf }
 0x291   : > { %v4175_v49 = vsel %vm3579_vm11, %v2607_v41, -inf  ;;  %v4183_v28 = vrot.slane %v4182_v56, 4  ;;  %v6197_v25 = vsel %vm6144_vm14, %v12762_v40, %v12877_v61  ;;  %v6366_v47 = vpack.c.b16 %v6186_v17, %v13001_v10 }
 0x292   : > { %v4170_v62 = vmax.f32 %v4168_v31, %v4169_v19  ;;  %v4176_v0 = vrot.slane %v4175_v49, 4  ;;  %v4189_v33 = vsel %vm3579_vm11, %v2608_v39, -inf  ;;  %v6198_v53 = vsel %vm6146_vm15, %v12791_v29, %v6197_v25  ;;  %v13069_v31 = vpop.f32.mrb[33].mxu0 }
 0x293   : > { %v4184_v44 = vmax.f32 %v4182_v56, %v4183_v28  ;;  %v4190_v38 = vrot.slane %v4189_v33, 4  ;;  %v6199_v11 = vsel %vm6148_vm1, %v12833_v27, %v6198_v53  ;;  %v13057_v57 = vsel %vm12825_vm8, 0, %v6366_v47 }
 0x294   : > { %15599 = vst [vmem:[#allocation6_spill] sm:$0xff] %v13057_v57  ;;  %v4171_v7 = vrot.slane %v4170_v62, 2  ;;  %v4177_v40 = vmax.f32 %v4175_v49, %v4176_v0  ;;  %v6200_v61 = vsel %vm6150_vm5, %v12795_v2, %v6199_v11  ;;  %v6442_v10 = vshrl.u32 %v13057_v57, 16  ;;  %v13074_v0 = vpop.f32.mrb[34].mxu0 }
 0x295   : > { %v4185_v37 = vrot.slane %v4184_v44, 2  ;;  %v4191_v43 = vmax.f32 %v4189_v33, %v4190_v38  ;;  %v13062_v21 = vpack.c.b16 %v6200_v61, %v6193_v9  ;;  %v6444_v29 = vshll.u32 %v13057_v57, 16 }
 0x296   : > { %v4172_v36 = vmax.f32 %v4170_v62, %v4171_v7  ;;  %v4178_v26 = vrot.slane %v4177_v40, 2  ;;  %v4026_v27 = vrot.slane %v12789_v51, 1  ;;  %v1957_v50 = vadd.f32 %v13012_v54, %v12775_v5 }
 0x297   : > { %15600 = vst [vmem:[#allocation7_spill] sm:$0xff] %v13062_v21  ;;  %v4186_v22 = vmax.f32 %v4184_v44, %v4185_v37  ;;  %v4192_v46 = vrot.slane %v4191_v43, 2  ;;  %v6446_v41 = vrot.slane %v6444_v29, 1  ;;  %v6449_v2 = vshll.u32 %v13062_v21, 16 }
 0x298   : > { %v13071_v63 = vunpack.c.l.b16 %v5465_v45  ;;  %v4173_v17 = vrot.slane %v4172_v36, 1  ;;  %v4179_v9 = vmax.f32 %v4177_v40, %v4178_v26  ;;  %v4027_v39 = vmax.f32 %v12789_v51, %v4026_v27 }
 0x299   : > { %v4187_v19 = vrot.slane %v4186_v22, 1  ;;  %v4193_v56 = vmax.f32 %v4191_v43, %v4192_v46  ;;  %v6447_v49 = vor.u32 %v6446_v41, %v6442_v10  ;;  %v6451_v28 = vrot.slane %v6449_v2, 1 }
 0x29a   : > { %v4174_v25 = vmax.f32 %v4172_v36, %v4173_v17  ;;  %v4180_v47 = vrot.slane %v4179_v9, 1  ;;  %v10980_v5 = vpack.c.bf16 %v4027_v39, %v4027_v39  ;;  %v2133_v62 = vmax.f32 %v1957_v50, 0.0 }
 0x29b   : > { %v13076_v33 = vmax.f32 %v4186_v22, %v4187_v19  ;;  %v4194_v53 = vrot.slane %v4193_v56, 1  ;;  %v6452_v45 = vsel %vm610_vm3, %v6447_v49, %v6451_v28  ;;  %v6453_v44 = vshrl.u32 %v13062_v21, 16 }
 0x29c   : > { %v4181_v38 = vmax.f32 %v4179_v9, %v4180_v47  ;;  %v5456_v11 = vpack.c.bf16 %v4174_v25, %v4174_v25  ;;  %6585 = vrot.lane.b32.xlu0 %v6452_v45, %s11376_s16  ;;  %v6414_v51 = vsel %vm12825_vm8, %v10980_v5, 0  ;;  %v2677_v7 = vcombine.high %v2133_v62, %v2133_v62 }
 0x29d   : > { %v4195_v40 = vmax.f32 %v4193_v56, %v4194_v53  ;;  %v6455_v61 = vor.u32 %v6453_v44, %v6451_v28  ;;  %v6457_v10 = vshll.u32 %v6414_v51, 16  ;;  %v2684_v37 = vrot.slane %v2133_v62, %v12402_v13 }
 0x29e   : > { %v5457_v43 = vpack.c.bf16 %v4181_v38, %v4181_v38  ;;  %v5458_v29 = vpack.c.bf16 %v13076_v33, %v13076_v33  ;;  %v5968_v36 = vunpack.c.l.b16 %v5456_v11  ;;  %v2691_v26 = vrot.slane %v2677_v7, %v12402_v13 }
 0x29f   : > { %v5459_v27 = vpack.c.bf16 %v4195_v40, %v4195_v40  ;;  %v6459_v50 = vrot.slane %v6457_v10, 1  ;;  %v2692_v22 = vcombine.high %v2684_v37, %v2684_v37  ;;  %v6634_v46 = vrot.slane %v13057_v57, 1 }
 0x2a0   : > { %v5969_v41 = vunpack.c.l.b16 %v5457_v43  ;;  %v6218_v2 = vsel %vm6146_vm15, %v5968_v36, %v13027_v60  ;;  %v2693_v17 = vcombine.high %v2691_v26, %v2691_v26  ;;  %v4308_v9 = vsel %vm3579_vm11, %v2684_v37, -inf }
 0x2a1   : > { %v5971_v39 = vunpack.c.l.b16 %v5459_v27  ;;  %v6460_v19 = vsel %vm610_vm3, %v6455_v61, %v6459_v50  ;;  %v4309_v56 = vrot.slane %v4308_v9, 4  ;;  %v4315_v49 = vsel %vm3579_vm11, %v2692_v22, -inf }
 0x2a2   : > { %v13094_v28 = vsel %vm6148_vm1, %v5969_v41, %v6218_v2  ;;  %6587 = vrot.lane.b32.xlu1 %v6460_v19, %s11376_s16  ;;  %v4316_v25 = vrot.slane %v4315_v49, 4  ;;  %v4322_v47 = vsel %vm3579_vm11, %v2691_v26, -inf  ;;  %v4329_v5 = vsel %vm3579_vm11, %v2693_v17, -inf }
 0x2a3   : > { %v6221_v60 = vsel %vm6152_vm4, %v12983_v14, %v5971_v39  ;;  %v4310_v62 = vmax.f32 %v4308_v9, %v4309_v56  ;;  %v4323_v53 = vrot.slane %v4322_v47, 4  ;;  %v4330_v45 = vrot.slane %v4329_v5, 4 }
 0x2a4   : > { %v6222_v44 = vsel %vm6140_vm12, %v12986_v32, %v6221_v60  ;;  %v4317_v38 = vmax.f32 %v4315_v49, %v4316_v25  ;;  %v6635_v11 = vrot.slane %v13062_v21, 1  ;;  %v1949_v7 = vadd.f32 %v13012_v54, %v12814_v23  ;;  %v13119_v25 = vpop.f32.mrb[35].mxu0 }
 0x2a5   : > { %v13108_v40 = vsel %vm6142_vm13, %v12988_v30, %v6222_v44  ;;  %v4311_v61 = vrot.slane %v4310_v62, 2  ;;  %v4324_v10 = vmax.f32 %v4322_v47, %v4323_v53  ;;  %v4331_v37 = vmax.f32 %v4329_v5, %v4330_v45 }
 0x2a6   : > { %v4318_v14 = vrot.slane %v4317_v38, 2  ;;  %v6636_v43 = vsel %vm963_vm2, %v6634_v46, %v6635_v11  ;;  %v2131_v36 = vmax.f32 %v1949_v7, 0.0  ;;  %v1960_v32 = vadd.f32 %v13012_v54, %v12843_v52 }
 0x2a7   : > { %v4312_v26 = vmax.f32 %v4310_v62, %v4311_v61  ;;  %v4325_v27 = vrot.slane %v4324_v10, 2  ;;  %v4332_v50 = vrot.slane %v4331_v37, 2  ;;  %6673 = vrot.lane.b32.xlu0 %v6636_v43, %s11375_s15  ;;  %v6637_v23 = vrot.slane %v6414_v51, 1 }
 0x2a8   : > { %v4319_v22 = vmax.f32 %v4317_v38, %v4318_v14  ;;  %v2643_v41 = vcombine.high %v2131_v36, %v2131_v36  ;;  %v2650_v30 = vrot.slane %v2131_v36, %v12402_v13  ;;  %v2134_v2 = vmax.f32 %v1960_v32, 0.0 }
 0x2a9   : > { %v4313_v17 = vrot.slane %v4312_v26, 1  ;;  %v4326_v9 = vmax.f32 %v4324_v10, %v4325_v27  ;;  %v4333_v39 = vmax.f32 %v4331_v37, %v4332_v50  ;;  %v6638_v46 = vsel %vm963_vm2, %v6635_v11, %v6637_v23 }
 0x2aa   : > { %v4320_v19 = vrot.slane %v4319_v22, 1  ;;  %v2657_v56 = vrot.slane %v2643_v41, %v12402_v13  ;;  %v2658_v52 = vcombine.high %v2650_v30, %v2650_v30  ;;  %v4252_v49 = vsel %vm3579_vm11, %v2650_v30, -inf  ;;  %6675 = vrot.lane.b32.xlu1 %v6638_v46, %s11375_s15 }
 0x2ab   : > { %v4314_v51 = vmax.f32 %v4312_v26, %v4313_v17  ;;  %v4327_v47 = vrot.slane %v4326_v9, 1  ;;  %v4334_v5 = vrot.slane %v4333_v39, 1  ;;  %v4253_v60 = vrot.slane %v4252_v49, 4 }
 0x2ac   : > { %v4321_v62 = vmax.f32 %v4319_v22, %v4320_v19  ;;  %v2659_v53 = vcombine.high %v2657_v56, %v2657_v56  ;;  %v4259_v45 = vsel %vm3579_vm11, %v2658_v52, -inf  ;;  %v4266_v44 = vsel %vm3579_vm11, %v2657_v56, -inf }
 0x2ad   : > { %v4328_v38 = vmax.f32 %v4326_v9, %v4327_v47  ;;  %v4335_v11 = vmax.f32 %v4333_v39, %v4334_v5  ;;  %v5476_v7 = vpack.c.bf16 %v4314_v51, %v4314_v51  ;;  %v4254_v61 = vmax.f32 %v4252_v49, %v4253_v60 }
 0x2ae   : > { %v5477_v10 = vpack.c.bf16 %v4321_v62, %v4321_v62  ;;  %v4260_v37 = vrot.slane %v4259_v45, 4  ;;  %v4267_v14 = vrot.slane %v4266_v44, 4  ;;  %v4273_v43 = vsel %vm3579_vm11, %v2659_v53, -inf }
 0x2af   : > { %v13127_v36 = vunpack.c.l.b16 %v5458_v29  ;;  %v5478_v32 = vpack.c.bf16 %v4328_v38, %v4328_v38  ;;  %v5479_v26 = vpack.c.bf16 %v4335_v11, %v4335_v11  ;;  %v4255_v27 = vrot.slane %v4254_v61, 2 }
 0x2b0   : > { %v13129_v50 = vunpack.c.l.b16 %v5476_v7  ;;  %v4261_v23 = vmax.f32 %v4259_v45, %v4260_v37  ;;  %v4268_v22 = vmax.f32 %v4266_v44, %v4267_v14  ;;  %v4274_v41 = vrot.slane %v4273_v43, 4 }
 0x2b1   : > { %v13131_v30 = vunpack.c.l.b16 %v5477_v10  ;;  %v13133_v17 = vunpack.c.l.b16 %v5478_v32  ;;  %v4256_v9 = vmax.f32 %v4254_v61, %v4255_v27  ;;  %v2694_v39 = vcombine.high %v2134_v2, %v2134_v2 }
 0x2b2   : > { %v4262_v46 = vrot.slane %v4261_v23, 2  ;;  %v4269_v19 = vrot.slane %v4268_v22, 2  ;;  %v4275_v56 = vmax.f32 %v4273_v43, %v4274_v41  ;;  %v2701_v33 = vrot.slane %v2134_v2, %v12402_v13 }
 0x2b3   : > { %v13136_v29 = vunpack.c.l.b16 %v5479_v26  ;;  %v4257_v52 = vrot.slane %v4256_v9, 1  ;;  %v2708_v49 = vrot.slane %v2694_v39, %v12402_v13  ;;  %v1952_v51 = vadd.f32 %v13012_v54, %v12862_v8 }
 0x2b4   : > { %v4263_v47 = vmax.f32 %v4261_v23, %v4262_v46  ;;  %v4270_v5 = vmax.f32 %v4268_v22, %v4269_v19  ;;  %v4276_v60 = vrot.slane %v4275_v56, 2  ;;  %v2709_v62 = vcombine.high %v2701_v33, %v2701_v33 }
 0x2b5   : > { %15601 = vst [vmem:[#allocation8_spill] sm:$0xff] %v13136_v29  ;;  %v4258_v53 = vmax.f32 %v4256_v9, %v4257_v52  ;;  %v2710_v45 = vcombine.high %v2708_v49, %v2708_v49  ;;  %v4336_v44 = vsel %vm3579_vm11, %v2701_v33, -inf  ;;  %v4350_v38 = vsel %vm3579_vm11, %v2708_v49, -inf  ;;  %v13147_v33 = vpop.f32.mrb[36].mxu0 }
 0x2b6   : > { %v4264_v11 = vrot.slane %v4263_v47, 1  ;;  %v4271_v2 = vrot.slane %v4270_v5, 1  ;;  %v4277_v7 = vmax.f32 %v4275_v56, %v4276_v60  ;;  %v4337_v61 = vrot.slane %v4336_v44, 4 }
 0x2b7   : > { %v5468_v10 = vpack.c.bf16 %v4258_v53, %v4258_v53  ;;  %v4343_v37 = vsel %vm3579_vm11, %v2709_v62, -inf  ;;  %v4351_v14 = vrot.slane %v4350_v38, 4  ;;  %v4357_v8 = vsel %vm3579_vm11, %v2710_v45, -inf }
 0x2b8   : > { %v4265_v43 = vmax.f32 %v4263_v47, %v4264_v11  ;;  %v4272_v32 = vmax.f32 %v4270_v5, %v4271_v2  ;;  %v4278_v26 = vrot.slane %v4277_v7, 1  ;;  %v4338_v27 = vmax.f32 %v4336_v44, %v4337_v61  ;;  %v13149_v47 = vpop.f32.mrb[37].mxu0 }
 0x2b9   : > { %v4344_v23 = vrot.slane %v4343_v37, 4  ;;  %v4352_v22 = vmax.f32 %v4350_v38, %v4351_v14  ;;  %v4358_v41 = vrot.slane %v4357_v8, 4  ;;  %v1973_v9 = vadd.f32 %v13012_v54, %v12898_v59  ;;  %v13151_v38 = vpop.f32.mrb[38].mxu0 }
 0x2ba   : > { %v4279_v39 = vmax.f32 %v4277_v7, %v4278_v26  ;;  %v5469_v46 = vpack.c.bf16 %v4265_v43, %v4265_v43  ;;  %v5470_v19 = vpack.c.bf16 %v4272_v32, %v4272_v32  ;;  %v4339_v56 = vrot.slane %v4338_v27, 2  ;;  %v13153_v61 = vpop.f32.mrb[39].mxu0 }
 0x2bb   : > { %v4345_v52 = vmax.f32 %v4343_v37, %v4344_v23  ;;  %v4353_v49 = vrot.slane %v4352_v22, 2  ;;  %v4359_v60 = vmax.f32 %v4357_v8, %v4358_v41  ;;  %v2132_v62 = vmax.f32 %v1952_v51, 0.0 }
 0x2bc   : > { %v5471_v5 = vpack.c.bf16 %v4279_v39, %v4279_v39  ;;  %v5980_v53 = vunpack.c.l.b16 %v5468_v10  ;;  %v5981_v45 = vunpack.c.l.b16 %v5469_v46  ;;  %v4340_v44 = vmax.f32 %v4338_v27, %v4339_v56 }
 0x2bd   : > { %v4346_v11 = vrot.slane %v4345_v52, 2  ;;  %v4354_v59 = vmax.f32 %v4352_v22, %v4353_v49  ;;  %v4360_v2 = vrot.slane %v4359_v60, 2  ;;  %v2660_v7 = vcombine.high %v2132_v62, %v2132_v62 }
 0x2be   : > { %v5982_v14 = vunpack.c.l.b16 %v5470_v19  ;;  %v5983_v43 = vunpack.c.l.b16 %v5471_v5  ;;  %v4341_v37 = vrot.slane %v4340_v44, 1  ;;  %v2667_v8 = vrot.slane %v2132_v62, %v12402_v13 }
 0x2bf   : > { %v6228_v51 = vsel %vm6140_vm12, %v5981_v45, %v5980_v53  ;;  %v4347_v32 = vmax.f32 %v4345_v52, %v4346_v11  ;;  %v4355_v26 = vrot.slane %v4354_v59, 1  ;;  %v4361_v10 = vmax.f32 %v4359_v60, %v4360_v2 }
 0x2c0   : > { %v4342_v23 = vmax.f32 %v4340_v44, %v4341_v37  ;;  %v2674_v27 = vrot.slane %v2660_v7, %v12402_v13  ;;  %v2675_v41 = vcombine.high %v2667_v8, %v2667_v8  ;;  %v4280_v22 = vsel %vm3579_vm11, %v2667_v8, -inf }
 0x2c1   : > { %v4348_v39 = vrot.slane %v4347_v32, 1  ;;  %v4356_v46 = vmax.f32 %v4354_v59, %v4355_v26  ;;  %v4362_v56 = vrot.slane %v4361_v10, 1  ;;  %v4281_v49 = vrot.slane %v4280_v22, 4 }
 0x2c2   : > { %v5480_v19 = vpack.c.bf16 %v4342_v23, %v4342_v23  ;;  %v2676_v5 = vcombine.high %v2674_v27, %v2674_v27  ;;  %v4287_v21 = vsel %vm3579_vm11, %v2675_v41, -inf  ;;  %v4294_v62 = vsel %vm3579_vm11, %v2674_v27, -inf }
 0x2c3   : > { %v4349_v53 = vmax.f32 %v4347_v32, %v4348_v39  ;;  %v4363_v52 = vmax.f32 %v4361_v10, %v4362_v56  ;;  %v5482_v45 = vpack.c.bf16 %v4356_v46, %v4356_v46  ;;  %v4282_v60 = vmax.f32 %v4280_v22, %v4281_v49 }
 0x2c4   : > { %v6229_v44 = vsel %vm6142_vm13, %v5982_v14, %v6228_v51  ;;  %v4288_v11 = vrot.slane %v4287_v21, 4  ;;  %v4295_v2 = vrot.slane %v4294_v62, 4  ;;  %v4301_v7 = vsel %vm3579_vm11, %v2676_v5, -inf }
 0x2c5   : > { %v5481_v37 = vpack.c.bf16 %v4349_v53, %v4349_v53  ;;  %v5483_v59 = vpack.c.bf16 %v4363_v52, %v4363_v52  ;;  %v13163_v8 = vunpack.c.l.b16 %v5480_v19  ;;  %v4283_v26 = vrot.slane %v4282_v60, 2 }
 0x2c6   : > { %v13165_v23 = vunpack.c.l.b16 %v5482_v45  ;;  %v4289_v41 = vmax.f32 %v4287_v21, %v4288_v11  ;;  %v4296_v57 = vmax.f32 %v4294_v62, %v4295_v2  ;;  %v4302_v27 = vrot.slane %v4301_v7, 4 }
 0x2c7   : > { %15602 = vst [vmem:[#allocation9_spill] sm:$0xff] %v13163_v8  ;;  %v13167_v32 = vunpack.c.l.b16 %v5481_v37  ;;  %v4284_v10 = vmax.f32 %v4282_v60, %v4283_v26  ;;  %v6230_v22 = vsel %vm6144_vm14, %v5983_v43, %v6229_v44  ;;  %v2137_v14 = vmax.f32 %v1973_v9, 0.0 }
 0x2c8   : > { %15603 = vst [vmem:[#allocation10_spill] sm:$0xff] %v13165_v23  ;;  %v4290_v51 = vrot.slane %v4289_v41, 2  ;;  %v4297_v39 = vrot.slane %v4296_v57, 2  ;;  %v4303_v46 = vmax.f32 %v4301_v7, %v4302_v27  ;;  %v1965_v56 = vadd.f32 %v13012_v54, %v12902_v12 }
 0x2c9   : > { %15604 = vst [vmem:[#allocation11_spill] sm:$0xff] %v13167_v32  ;;  %v13172_v49 = vunpack.c.l.b16 %v5483_v59  ;;  %v4285_v19 = vrot.slane %v4284_v10, 1  ;;  %v2745_v5 = vcombine.high %v2137_v14, %v2137_v14  ;;  %v2752_v21 = vrot.slane %v2137_v14, %v12402_v13 }
 0x2ca   : > { %v4291_v62 = vmax.f32 %v4289_v41, %v4290_v51  ;;  %v4298_v53 = vmax.f32 %v4296_v57, %v4297_v39  ;;  %v4304_v52 = vrot.slane %v4303_v46, 2  ;;  %v2135_v45 = vmax.f32 %v1965_v56, 0.0 }
 0x2cb   : > { %v4286_v60 = vmax.f32 %v4284_v10, %v4285_v19  ;;  %v2759_v43 = vrot.slane %v2745_v5, %v12402_v13  ;;  %v2760_v9 = vcombine.high %v2752_v21, %v2752_v21  ;;  %v4420_v44 = vsel %vm3579_vm11, %v2752_v21, -inf }
 0x2cc   : > { %v4292_v11 = vrot.slane %v4291_v62, 1  ;;  %v4299_v2 = vrot.slane %v4298_v53, 1  ;;  %v4305_v7 = vmax.f32 %v4303_v46, %v4304_v52  ;;  %v4421_v12 = vrot.slane %v4420_v44, 4 }
 0x2cd   : > { %v5472_v37 = vpack.c.bf16 %v4286_v60, %v4286_v60  ;;  %v2761_v59 = vcombine.high %v2759_v43, %v2759_v43  ;;  %v4427_v26 = vsel %vm3579_vm11, %v2760_v9, -inf  ;;  %v4434_v27 = vsel %vm3579_vm11, %v2759_v43, -inf }
 0x2ce   : > { %v4293_v41 = vmax.f32 %v4291_v62, %v4292_v11  ;;  %v4300_v57 = vmax.f32 %v4298_v53, %v4299_v2  ;;  %v4306_v14 = vrot.slane %v4305_v7, 1  ;;  %v4422_v51 = vmax.f32 %v4420_v44, %v4421_v12 }
 0x2cf   : > { %v5984_v10 = vunpack.c.l.b16 %v5472_v37  ;;  %v4428_v39 = vrot.slane %v4427_v26, 4  ;;  %v4435_v56 = vrot.slane %v4434_v27, 4  ;;  %v4441_v19 = vsel %vm3579_vm11, %v2761_v59, -inf }
 0x2d0   : > { %v4307_v5 = vmax.f32 %v4305_v7, %v4306_v14  ;;  %v5473_v21 = vpack.c.bf16 %v4293_v41, %v4293_v41  ;;  %v4423_v23 = vrot.slane %v4422_v51, 2  ;;  %v1976_v46 = vadd.f32 %v13012_v54, %v12924_v3 }
 0x2d1   : > { %v6231_v52 = vsel %vm6146_vm15, %v5984_v10, %v6230_v22  ;;  %v4429_v60 = vmax.f32 %v4427_v26, %v4428_v39  ;;  %v4436_v9 = vmax.f32 %v4434_v27, %v4435_v56  ;;  %v4442_v43 = vrot.slane %v4441_v19, 4 }
 0x2d2   : > { %v5474_v62 = vpack.c.bf16 %v4300_v57, %v4300_v57  ;;  %v5475_v53 = vpack.c.bf16 %v4307_v5, %v4307_v5  ;;  %v5985_v11 = vunpack.c.l.b16 %v5473_v21  ;;  %v4424_v44 = vmax.f32 %v4422_v51, %v4423_v23 }
 0x2d3   : > { %v4430_v2 = vrot.slane %v4429_v60, 2  ;;  %v4437_v12 = vrot.slane %v4436_v9, 2  ;;  %v4443_v37 = vmax.f32 %v4441_v19, %v4442_v43  ;;  %v2711_v32 = vcombine.high %v2135_v45, %v2135_v45 }
 0x2d4   : > { %v5987_v59 = vunpack.c.l.b16 %v5475_v53  ;;  %v13184_v7 = vsel %vm6148_vm1, %v5985_v11, %v6231_v52  ;;  %v4425_v41 = vrot.slane %v4424_v44, 1  ;;  %v2718_v3 = vrot.slane %v2135_v45, %v12402_v13 }
 0x2d5   : > { %v4431_v14 = vmax.f32 %v4429_v60, %v4430_v2  ;;  %v4438_v22 = vmax.f32 %v4436_v9, %v4437_v12  ;;  %v4444_v26 = vrot.slane %v4443_v37, 2  ;;  %v2725_v27 = vrot.slane %v2711_v32, %v12402_v13 }
 0x2d6   : > { %v6234_v57 = vsel %vm6152_vm4, %v13129_v50, %v5987_v59  ;;  %v4426_v23 = vmax.f32 %v4424_v44, %v4425_v41  ;;  %v2726_v51 = vcombine.high %v2718_v3, %v2718_v3  ;;  %v4364_v10 = vsel %vm3579_vm11, %v2718_v3, -inf }
 0x2d7   : > { %v6235_v39 = vsel %vm6140_vm12, %v13131_v30, %v6234_v57  ;;  %v4432_v56 = vrot.slane %v4431_v14, 1  ;;  %v4439_v19 = vrot.slane %v4438_v22, 1  ;;  %v4445_v5 = vmax.f32 %v4443_v37, %v4444_v26 }
 0x2d8   : > { %v13195_v45 = vsel %vm6142_vm13, %v13133_v17, %v6235_v39  ;;  %v5492_v21 = vpack.c.bf16 %v4426_v23, %v4426_v23  ;;  %v2727_v52 = vcombine.high %v2725_v27, %v2725_v27  ;;  %v4365_v32 = vrot.slane %v4364_v10, 4 }
 0x2d9   : > { %15605 = vst [vmem:[#allocation12_spill] sm:$0xff] %v13195_v45  ;;  %v4433_v60 = vmax.f32 %v4431_v14, %v4432_v56  ;;  %v4440_v9 = vmax.f32 %v4438_v22, %v4439_v19  ;;  %v4446_v50 = vrot.slane %v4445_v5, 1  ;;  %v4371_v43 = vsel %vm3579_vm11, %v2726_v51, -inf }
 0x2da   : > { %v13198_v53 = vunpack.c.l.b16 %v5474_v62  ;;  %v4366_v11 = vmax.f32 %v4364_v10, %v4365_v32  ;;  %v4372_v44 = vrot.slane %v4371_v43, 4  ;;  %v4378_v30 = vsel %vm3579_vm11, %v2725_v27, -inf }
 0x2db   : > { %v13201_v2 = vmax.f32 %v4445_v5, %v4446_v50  ;;  %v5493_v12 = vpack.c.bf16 %v4433_v60, %v4433_v60  ;;  %v5494_v37 = vpack.c.bf16 %v4440_v9, %v4440_v9  ;;  %v4379_v17 = vrot.slane %v4378_v30, 4 }
 0x2dc   : > { %15606 = vst [vmem:[#allocation15_spill] sm:$0xff] %v13198_v53  ;;  %v4367_v59 = vrot.slane %v4366_v11, 2  ;;  %v4373_v41 = vmax.f32 %v4371_v43, %v4372_v44  ;;  %v4385_v3 = vsel %vm3579_vm11, %v2727_v52, -inf  ;;  %v2138_v14 = vmax.f32 %v1976_v46, 0.0 }
 0x2dd   : > { %v5495_v22 = vpack.c.bf16 %v13201_v2, %v13201_v2  ;;  %v13206_v26 = vunpack.c.l.b16 %v5492_v21  ;;  %v13208_v62 = vunpack.c.l.b16 %v5493_v12  ;;  %v4380_v57 = vmax.f32 %v4378_v30, %v4379_v17 }
 0x2de   : > { %v4368_v23 = vmax.f32 %v4366_v11, %v4367_v59  ;;  %v4374_v27 = vrot.slane %v4373_v41, 2  ;;  %v4386_v51 = vrot.slane %v4385_v3, 4  ;;  %v2762_v10 = vcombine.high %v2138_v14, %v2138_v14 }
 0x2df   : > { %v13210_v39 = vunpack.c.l.b16 %v5494_v37  ;;  %v4381_v56 = vrot.slane %v4380_v57, 2  ;;  %v2769_v19 = vrot.slane %v2138_v14, %v12402_v13  ;;  %v1968_v46 = vadd.f32 %v13012_v54, %v12929_v48 }
 0x2e0   : > { %v4369_v5 = vrot.slane %v4368_v23, 1  ;;  %v4375_v52 = vmax.f32 %v4373_v41, %v4374_v27  ;;  %v4387_v32 = vmax.f32 %v4385_v3, %v4386_v51  ;;  %v2776_v21 = vrot.slane %v2762_v10, %v12402_v13 }
 0x2e1   : > { %v4382_v60 = vmax.f32 %v4380_v57, %v4381_v56  ;;  %v2777_v9 = vcombine.high %v2769_v19, %v2769_v19  ;;  %v4448_v50 = vsel %vm3579_vm11, %v2769_v19, -inf  ;;  %v2136_v43 = vmax.f32 %v1968_v46, 0.0 }
 0x2e2   : > { %v4370_v11 = vmax.f32 %v4368_v23, %v4369_v5  ;;  %v4376_v44 = vrot.slane %v4375_v52, 1  ;;  %v4388_v30 = vrot.slane %v4387_v32, 2  ;;  %v2778_v2 = vcombine.high %v2776_v21, %v2776_v21 }
 0x2e3   : > { %v4383_v12 = vrot.slane %v4382_v60, 1  ;;  %v4449_v37 = vrot.slane %v4448_v50, 4  ;;  %v4455_v17 = vsel %vm3579_vm11, %v2777_v9, -inf  ;;  %v4462_v48 = vsel %vm3579_vm11, %v2776_v21, -inf }
 0x2e4   : > { %v4377_v59 = vmax.f32 %v4375_v52, %v4376_v44  ;;  %v4389_v41 = vmax.f32 %v4387_v32, %v4388_v30  ;;  %v5484_v3 = vpack.c.bf16 %v4370_v11, %v4370_v11  ;;  %v4456_v14 = vrot.slane %v4455_v17, 4 }
 0x2e5   : > { %v4384_v27 = vmax.f32 %v4382_v60, %v4383_v12  ;;  %v4450_v57 = vmax.f32 %v4448_v50, %v4449_v37  ;;  %v4463_v51 = vrot.slane %v4462_v48, 4  ;;  %v4469_v10 = vsel %vm3579_vm11, %v2778_v2, -inf }
 0x2e6   : > { %v4390_v56 = vrot.slane %v4389_v41, 1  ;;  %v5485_v23 = vpack.c.bf16 %v4377_v59, %v4377_v59  ;;  %v5996_v19 = vunpack.c.l.b16 %v5484_v3  ;;  %v4457_v46 = vmax.f32 %v4455_v17, %v4456_v14 }
 0x2e7   : > { %v5486_v5 = vpack.c.bf16 %v4384_v27, %v4384_v27  ;;  %v4451_v8 = vrot.slane %v4450_v57, 2  ;;  %v4464_v29 = vmax.f32 %v4462_v48, %v4463_v51  ;;  %v4470_v45 = vrot.slane %v4469_v10, 4 }
 0x2e8   : > { %v4391_v9 = vmax.f32 %v4389_v41, %v4390_v56  ;;  %v5997_v53 = vunpack.c.l.b16 %v5485_v23  ;;  %v6241_v52 = vsel %vm6152_vm4, %v5996_v19, %v13172_v49  ;;  %v4458_v32 = vrot.slane %v4457_v46, 2  ;;  %v13226_v41 = vpop.f32.mrb[40].mxu0 }
 0x2e9   : > { %v5998_v21 = vunpack.c.l.b16 %v5486_v5  ;;  %v4452_v60 = vmax.f32 %v4450_v57, %v4451_v8  ;;  %v4465_v50 = vrot.slane %v4464_v29, 2  ;;  %v4471_v11 = vmax.f32 %v4469_v10, %v4470_v45 }
 0x2ea   : > { %v5487_v44 = vpack.c.bf16 %v4391_v9, %v4391_v9  ;;  %v6242_v30 = vsel %vm6140_vm12, %v5997_v53, %v6241_v52  ;;  %v4459_v2 = vmax.f32 %v4457_v46, %v4458_v32  ;;  %v2728_v12 = vcombine.high %v2136_v43, %v2136_v43 }
 0x2eb   : > { %v13223_v37 = vunpack.c.l.b16 %v5495_v22  ;;  %v6243_v17 = vsel %vm6142_vm13, %v5998_v21, %v6242_v30  ;;  %v4453_v48 = vrot.slane %v4452_v60, 1  ;;  %v4466_v59 = vmax.f32 %v4464_v29, %v4465_v50 }
 0x2ec   : > { %v4460_v3 = vrot.slane %v4459_v2, 1  ;;  %v4472_v49 = vrot.slane %v4471_v11, 2  ;;  %v2735_v14 = vrot.slane %v2136_v43, %v12402_v13  ;;  %v2742_v8 = vrot.slane %v2728_v12, %v12402_v13 }
 0x2ed   : > { %v5999_v45 = vunpack.c.l.b16 %v5487_v44  ;;  %v4454_v27 = vmax.f32 %v4452_v60, %v4453_v48  ;;  %v4467_v57 = vrot.slane %v4466_v59, 1  ;;  %v6206_v53 = vsel %vm6150_vm5, %v12975_v20, %v12968_v42 }
 0x2ee   : > { %v4461_v22 = vmax.f32 %v4459_v2, %v4460_v3  ;;  %v2743_v51 = vcombine.high %v2735_v14, %v2735_v14  ;;  %v2744_v10 = vcombine.high %v2742_v8, %v2742_v8  ;;  %v4392_v29 = vsel %vm3579_vm11, %v2735_v14, -inf }
 0x2ef   : > { %v4468_v56 = vmax.f32 %v4466_v59, %v4467_v57  ;;  %v5496_v23 = vpack.c.bf16 %v4454_v27, %v4454_v27  ;;  %v4393_v19 = vrot.slane %v4392_v29, 4  ;;  %v4406_v46 = vsel %vm3579_vm11, %v2742_v8, -inf  ;;  %v13257_v57 = vpop.f32.mrb[41].mxu0 }
 0x2f0   : > { %v5497_v43 = vpack.c.bf16 %v4461_v22, %v4461_v22  ;;  %v4399_v5 = vsel %vm3579_vm11, %v2743_v51, -inf  ;;  %v4407_v9 = vrot.slane %v4406_v46, 4  ;;  %v4413_v52 = vsel %vm3579_vm11, %v2744_v10, -inf }
 0x2f1   : > { %v13237_v32 = vmax.f32 %v4471_v11, %v4472_v49  ;;  %v5498_v21 = vpack.c.bf16 %v4468_v56, %v4468_v56  ;;  %v4394_v42 = vmax.f32 %v4392_v29, %v4393_v19  ;;  %v4400_v20 = vrot.slane %v4399_v5, 4 }
 0x2f2   : > { %v13239_v60 = vunpack.c.l.b16 %v5496_v23  ;;  %v4408_v50 = vmax.f32 %v4406_v46, %v4407_v9  ;;  %v4414_v44 = vrot.slane %v4413_v52, 4  ;;  %v6244_v30 = vsel %vm6144_vm14, %v5999_v45, %v6243_v17 }
 0x2f3   : > { %v13242_v2 = vunpack.c.l.b16 %v5497_v43  ;;  %v4395_v12 = vrot.slane %v4394_v42, 2  ;;  %v4401_v48 = vmax.f32 %v4399_v5, %v4400_v20  ;;  %v6210_v59 = vsel %vm6144_vm14, %v12938_v18, %v12981_v35 }
 0x2f4   : > { %v4409_v3 = vrot.slane %v4408_v50, 2  ;;  %v4415_v11 = vmax.f32 %v4413_v52, %v4414_v44  ;;  %v6211_v49 = vsel %vm6146_vm15, %v12946_v15, %v6210_v59  ;;  %v6220_v14 = vsel %vm6150_vm5, %v13127_v36, %v13094_v28 }
 0x2f5   : > { %v4396_v8 = vmax.f32 %v4394_v42, %v4395_v12  ;;  %v4402_v27 = vrot.slane %v4401_v48, 2  ;;  %v6212_v17 = vsel %vm6148_vm1, %v12948_v55, %v6211_v49  ;;  %v6224_v45 = vsel %vm6144_vm14, %v12995_v16, %v13108_v40 }
 0x2f6   : > { %v4410_v18 = vmax.f32 %v4408_v50, %v4409_v3  ;;  %v4416_v35 = vrot.slane %v4415_v11, 2  ;;  %v6213_v15 = vsel %vm6150_vm5, %v12952_v4, %v6212_v17  ;;  %v6225_v22 = vsel %vm6146_vm15, %v13031_v1, %v6224_v45  ;;  %v13274_v1 = vpop.f32.mrb[42].mxu0 }
 0x2f7   : > { %v4397_v28 = vrot.slane %v4396_v8, 1  ;;  %v4403_v36 = vmax.f32 %v4401_v48, %v4402_v27  ;;  %v6226_v51 = vsel %vm6148_vm1, %v13071_v63, %v6225_v22  ;;  %v6369_v55 = vpack.c.b16 %v6213_v15, %v6206_v53 }
 0x2f8   : > { %v4411_v10 = vrot.slane %v4410_v18, 1  ;;  %v4417_v29 = vmax.f32 %v4415_v11, %v4416_v35  ;;  %v6227_v16 = vsel %vm6150_vm5, %v13042_v6, %v6226_v51  ;;  %v4250_v40 = vrot.slane %v13023_v58, 1 }
 0x2f9   : > { %v4398_v56 = vmax.f32 %v4396_v8, %v4397_v28  ;;  %v4404_v23 = vrot.slane %v4403_v36, 1  ;;  %v13268_v19 = vpack.c.b16 %v6227_v16, %v6220_v14  ;;  %v13272_v4 = vsel %vm12825_vm8, 0, %v6369_v55 }
 0x2fa   : > { %15608 = vst [vmem:[#allocation17_spill] sm:$0xff] %v13272_v4  ;;  %v13276_v46 = vunpack.c.l.b16 %v5498_v21  ;;  %v13278_v63 = vmax.f32 %v4410_v18, %v4411_v10  ;;  %v4418_v53 = vrot.slane %v4417_v29, 1  ;;  %v6464_v43 = vshll.u32 %v13272_v4, 16 }
 0x2fb   : > { %15607 = vst [vmem:[#allocation16_spill] sm:$0xff] %v13268_v19  ;;  %v4405_v6 = vmax.f32 %v4403_v36, %v4404_v23  ;;  %v5488_v5 = vpack.c.bf16 %v4398_v56, %v4398_v56  ;;  %v6469_v9 = vshll.u32 %v13268_v19, 16  ;;  %v4251_v52 = vmax.f32 %v13023_v58, %v4250_v40  ;;  %v13315_v56 = vld [vmem:[%s15553_s2] ss:$0 sm:$0xff] }
 0x2fc   : > { %v4419_v42 = vmax.f32 %v4417_v29, %v4418_v53  ;;  %v6462_v20 = vshrl.u32 %v13272_v4, 16  ;;  %v6466_v50 = vrot.slane %v6464_v43, 1  ;;  %v6473_v44 = vshrl.u32 %v13268_v19, 16 }
 0x2fd   : > { %v5489_v12 = vpack.c.bf16 %v4405_v6, %v4405_v6  ;;  %v6000_v21 = vunpack.c.l.b16 %v5488_v5  ;;  %v6471_v48 = vrot.slane %v6469_v9, 1  ;;  %v10981_v59 = vpack.c.bf16 %v4251_v52, %v4251_v52 }
 0x2fe   : > { %v5490_v3 = vpack.c.bf16 %v13278_v63, %v13278_v63  ;;  %v5491_v11 = vpack.c.bf16 %v4419_v42, %v4419_v42  ;;  %v6467_v49 = vor.u32 %v6466_v50, %v6462_v20  ;;  %v1989_v14 = vadd.f32 %v13012_v54, %v13007_v34 }
 0x2ff   : > { %v6001_v8 = vunpack.c.l.b16 %v5489_v12  ;;  %v6245_v58 = vsel %vm6146_vm15, %v6000_v21, %v6244_v30  ;;  %v13292_v27 = vsel %vm12825_vm8, %v10981_v59, 0  ;;  %v6475_v17 = vor.u32 %v6473_v44, %v6471_v48 }
 0x300   : > { %v6003_v45 = vunpack.c.l.b16 %v5491_v11  ;;  %v6472_v18 = vsel %vm610_vm3, %v6467_v49, %v6471_v48  ;;  %v6477_v35 = vshll.u32 %v13292_v27, 16  ;;  %v2141_v15 = vmax.f32 %v1989_v14, 0.0 }
 0x301   : > { %v13297_v22 = vsel %vm6148_vm1, %v6001_v8, %v6245_v58  ;;  %6589 = vrot.lane.b32.xlu0 %v6472_v18, %s11376_s16  ;;  %v6639_v34 = vrot.slane %v13272_v4, 1  ;;  %v6640_v30 = vrot.slane %v13268_v19, 1  ;;  %v1981_v28 = vadd.f32 %v13012_v54, %v13069_v31 }
 0x302   : > { %v6248_v36 = vsel %vm6152_vm4, %v13206_v26, %v6003_v45  ;;  %v6479_v51 = vrot.slane %v6477_v35, 1  ;;  %v2813_v55 = vcombine.high %v2141_v15, %v2141_v15  ;;  %v2820_v10 = vrot.slane %v2141_v15, %v12402_v13  ;;  %v13340_v35 = vpop.f32.mrb[43].mxu0 }
 0x303   : > { %v6249_v29 = vsel %vm6140_vm12, %v13208_v62, %v6248_v36  ;;  %v6641_v16 = vsel %vm963_vm2, %v6639_v34, %v6640_v30  ;;  %v2139_v40 = vmax.f32 %v1981_v28, 0.0  ;;  %v1992_v54 = vadd.f32 %v13315_v56, %v13074_v0 }
 0x304   : > { %v13321_v31 = vsel %vm6142_vm13, %v13210_v39, %v6249_v29  ;;  %v6480_v26 = vsel %vm610_vm3, %v6475_v17, %v6479_v51  ;;  %v2827_v62 = vrot.slane %v2813_v55, %v12402_v13  ;;  %v2828_v23 = vcombine.high %v2820_v10, %v2820_v10 }
 0x305   : > { %6591 = vrot.lane.b32.xlu1 %v6480_v26, %s11376_s16  ;;  %v4532_v53 = vsel %vm3579_vm11, %v2820_v10, -inf  ;;  %6677 = vrot.lane.b32.xlu0 %v6641_v16, %s11375_s15  ;;  %v2779_v43 = vcombine.high %v2139_v40, %v2139_v40  ;;  %v2786_v6 = vrot.slane %v2139_v40, %v12402_v13  ;;  %v13329_v5 = vmax.f32 %v1992_v54, 0.0 }
 0x306   : > { %v2829_v0 = vcombine.high %v2827_v62, %v2827_v62  ;;  %v4533_v9 = vrot.slane %v4532_v53, 4  ;;  %v4539_v39 = vsel %vm3579_vm11, %v2828_v23, -inf  ;;  %v4546_v52 = vsel %vm3579_vm11, %v2827_v62, -inf }
 0x307   : > { %v4540_v42 = vrot.slane %v4539_v39, 4  ;;  %v4547_v20 = vrot.slane %v4546_v52, 4  ;;  %v2793_v50 = vrot.slane %v2779_v43, %v12402_v13  ;;  %v2794_v44 = vcombine.high %v2786_v6, %v2786_v6 }
 0x308   : > { %v4534_v12 = vmax.f32 %v4532_v53, %v4533_v9  ;;  %v4553_v21 = vsel %vm3579_vm11, %v2829_v0, -inf  ;;  %v4476_v48 = vsel %vm3579_vm11, %v2786_v6, -inf  ;;  %v2830_v59 = vcombine.high %v13329_v5, %v13329_v5 }
 0x309   : > { %v4541_v11 = vmax.f32 %v4539_v39, %v4540_v42  ;;  %v4548_v49 = vmax.f32 %v4546_v52, %v4547_v20  ;;  %v4554_v14 = vrot.slane %v4553_v21, 4  ;;  %v2795_v8 = vcombine.high %v2793_v50, %v2793_v50 }
 0x30a   : > { %v4535_v58 = vrot.slane %v4534_v12, 2  ;;  %v4477_v17 = vrot.slane %v4476_v48, 4  ;;  %v4483_v45 = vsel %vm3579_vm11, %v2794_v44, -inf  ;;  %v4490_v18 = vsel %vm3579_vm11, %v2793_v50, -inf }
 0x30b   : > { %v4542_v15 = vrot.slane %v4541_v11, 2  ;;  %v4549_v34 = vrot.slane %v4548_v49, 2  ;;  %v4555_v28 = vmax.f32 %v4553_v21, %v4554_v14  ;;  %v4484_v36 = vrot.slane %v4483_v45, 4 }
 0x30c   : > { %v4536_v51 = vmax.f32 %v4534_v12, %v4535_v58  ;;  %v4478_v55 = vmax.f32 %v4476_v48, %v4477_v17  ;;  %v4491_v10 = vrot.slane %v4490_v18, 4  ;;  %v4497_v29 = vsel %vm3579_vm11, %v2795_v8, -inf }
 0x30d   : > { %v4543_v16 = vmax.f32 %v4541_v11, %v4542_v15  ;;  %v4550_v40 = vmax.f32 %v4548_v49, %v4549_v34  ;;  %v4556_v54 = vrot.slane %v4555_v28, 2  ;;  %v4485_v26 = vmax.f32 %v4483_v45, %v4484_v36 }
 0x30e   : > { %v4537_v62 = vrot.slane %v4536_v51, 1  ;;  %v4479_v23 = vrot.slane %v4478_v55, 2  ;;  %v4492_v53 = vmax.f32 %v4490_v18, %v4491_v10  ;;  %v4498_v43 = vrot.slane %v4497_v29, 4 }
 0x30f   : > { %v4544_v6 = vrot.slane %v4543_v16, 1  ;;  %v4551_v0 = vrot.slane %v4550_v40, 1  ;;  %v4557_v9 = vmax.f32 %v4555_v28, %v4556_v54  ;;  %v4486_v39 = vrot.slane %v4485_v26, 2 }
 0x310   : > { %v4538_v52 = vmax.f32 %v4536_v51, %v4537_v62  ;;  %v4480_v42 = vmax.f32 %v4478_v55, %v4479_v23  ;;  %v4493_v20 = vrot.slane %v4492_v53, 2  ;;  %v4499_v50 = vmax.f32 %v4497_v29, %v4498_v43 }
 0x311   : > { %v4545_v44 = vmax.f32 %v4543_v16, %v4544_v6  ;;  %v4552_v12 = vmax.f32 %v4550_v40, %v4551_v0  ;;  %v4558_v21 = vrot.slane %v4557_v9, 1  ;;  %v4487_v48 = vmax.f32 %v4485_v26, %v4486_v39 }
 0x312   : > { %v5508_v11 = vpack.c.bf16 %v4538_v52, %v4538_v52  ;;  %v4481_v49 = vrot.slane %v4480_v42, 1  ;;  %v4494_v14 = vmax.f32 %v4492_v53, %v4493_v20  ;;  %v4500_v8 = vrot.slane %v4499_v50, 2 }
 0x313   : > { %v4559_v58 = vmax.f32 %v4557_v9, %v4558_v21  ;;  %v5509_v17 = vpack.c.bf16 %v4545_v44, %v4545_v44  ;;  %v5510_v45 = vpack.c.bf16 %v4552_v12, %v4552_v12  ;;  %v4488_v18 = vrot.slane %v4487_v48, 1 }
 0x314   : > { %v13346_v15 = vunpack.c.l.b16 %v5490_v3  ;;  %v4482_v34 = vmax.f32 %v4480_v42, %v4481_v49  ;;  %v4495_v28 = vrot.slane %v4494_v14, 1  ;;  %v4501_v36 = vmax.f32 %v4499_v50, %v4500_v8 }
 0x315   : > { %v5511_v51 = vpack.c.bf16 %v4559_v58, %v4559_v58  ;;  %v13348_v55 = vunpack.c.l.b16 %v5508_v11  ;;  %v13350_v10 = vunpack.c.l.b16 %v5509_v17  ;;  %v4489_v29 = vmax.f32 %v4487_v48, %v4488_v18 }
 0x316   : > { %v4496_v16 = vmax.f32 %v4494_v14, %v4495_v28  ;;  %v4502_v40 = vrot.slane %v4501_v36, 1  ;;  %v5500_v54 = vpack.c.bf16 %v4482_v34, %v4482_v34  ;;  %v2837_v26 = vrot.slane %v13329_v5, %v12402_v13 }
 0x317   : > { %v13354_v62 = vunpack.c.l.b16 %v5510_v45  ;;  %v5501_v63 = vpack.c.bf16 %v4489_v29, %v4489_v29  ;;  %v2844_v3 = vrot.slane %v2830_v59, %v12402_v13  ;;  %v6642_v23 = vrot.slane %v13292_v27, 1  ;;  %v11286_v29 = vld [vmem:[%s15554_s3] sm:$0xff]  }
 0x318   : > { %v4503_v53 = vmax.f32 %v4501_v36, %v4502_v40  ;;  %v5502_v43 = vpack.c.bf16 %v4496_v16, %v4496_v16  ;;  %v6012_v6 = vunpack.c.l.b16 %v5500_v54  ;;  %v2845_v0 = vcombine.high %v2837_v26, %v2837_v26  ;;  %v13377_v16 = vpop.f32.mrb[44].mxu0  ;;  %11138 = vmatprep.subr.bf16.mxu1 %v11286_v29 }
 0x319   : > { %v6013_v9 = vunpack.c.l.b16 %v5501_v63  ;;  %v2846_v39 = vcombine.high %v2844_v3, %v2844_v3  ;;  %v4560_v52 = vsel %vm3579_vm11, %v2837_v26, -inf  ;;  %v4574_v42 = vsel %vm3579_vm11, %v2844_v3, -inf  ;;  %11139 = vmatpush3.bf16.msra.mxu1 %v11286_v29 }
 0x31a   : > { %v5503_v20 = vpack.c.bf16 %v4503_v53, %v4503_v53  ;;  %v6014_v50 = vunpack.c.l.b16 %v5502_v43  ;;  %v4561_v5 = vrot.slane %v4560_v52, 4  ;;  %v4567_v44 = vsel %vm3579_vm11, %v2845_v0, -inf }
 0x31b   : > { %v6255_v12 = vsel %vm6140_vm12, %v6013_v9, %v6012_v6  ;;  %v4568_v59 = vrot.slane %v4567_v44, 4  ;;  %v4575_v21 = vrot.slane %v4574_v42, 4  ;;  %v4581_v27 = vsel %vm3579_vm11, %v2846_v39, -inf }
 0x31c   : > { %v6015_v48 = vunpack.c.l.b16 %v5503_v20  ;;  %v6256_v11 = vsel %vm6142_vm13, %v6014_v50, %v6255_v12  ;;  %v4562_v49 = vmax.f32 %v4560_v52, %v4561_v5  ;;  %v4582_v14 = vrot.slane %v4581_v27, 4 }
 0x31d   : > { %v4569_v8 = vmax.f32 %v4567_v44, %v4568_v59  ;;  %v4576_v58 = vmax.f32 %v4574_v42, %v4575_v21  ;;  %v6643_v17 = vsel %vm963_vm2, %v6640_v30, %v6642_v23  ;;  %v1984_v45 = vadd.f32 %v13315_v56, %v13119_v25 }
 0x31e   : > { %v13369_v18 = vunpack.c.l.b16 %v5511_v51  ;;  %v4563_v34 = vrot.slane %v4562_v49, 2  ;;  %v4583_v28 = vmax.f32 %v4581_v27, %v4582_v14  ;;  %6679 = vrot.lane.b32.xlu1 %v6643_v17, %s11375_s15  ;;  %v2005_v36 = vadd.f32 %v13315_v56, %v13147_v33  ;;  %v13382_v51 = vpop.f32.mrb[45].mxu0 }
 0x31f   : > { %v4570_v40 = vrot.slane %v4569_v8, 2  ;;  %v4577_v30 = vrot.slane %v4576_v58, 2  ;;  %v2140_v54 = vmax.f32 %v1984_v45, 0.0  ;;  %v13380_v25 = vsel %vm6144_vm14, %v6015_v48, %v6256_v11  ;;  %v13391_v44 = vpop.f32.mrb[46].mxu0 }
 0x320   : > { %v4564_v26 = vmax.f32 %v4562_v49, %v4563_v34  ;;  %v4584_v63 = vrot.slane %v4583_v28, 2  ;;  %v2145_v3 = vmax.f32 %v2005_v36, 0.0  ;;  %v13386_v33 = vadd.f32 %v13315_v56, %v13149_v47  ;;  %v13395_v27 = vpop.f32.mrb[47].mxu0 }
 0x321   : > { %v4571_v23 = vmax.f32 %v4569_v8, %v4570_v40  ;;  %v4578_v53 = vmax.f32 %v4576_v58, %v4577_v30  ;;  %v2796_v43 = vcombine.high %v2140_v54, %v2140_v54  ;;  %v2803_v6 = vrot.slane %v2140_v54, %v12402_v13 }
 0x322   : > { %v4565_v0 = vrot.slane %v4564_v26, 1  ;;  %v4585_v9 = vmax.f32 %v4583_v28, %v4584_v63  ;;  %v2881_v39 = vcombine.high %v2145_v3, %v2145_v3  ;;  %v2888_v52 = vrot.slane %v2145_v3, %v12402_v13 }
 0x323   : > { %v4572_v42 = vrot.slane %v4571_v23, 1  ;;  %v4579_v20 = vrot.slane %v4578_v53, 1  ;;  %v2810_v50 = vrot.slane %v2796_v43, %v12402_v13  ;;  %v2811_v5 = vcombine.high %v2803_v6, %v2803_v6 }
 0x324   : > { %v4566_v47 = vmax.f32 %v4564_v26, %v4565_v0  ;;  %v4586_v12 = vrot.slane %v4585_v9, 1  ;;  %v4504_v59 = vsel %vm3579_vm11, %v2803_v6, -inf  ;;  %v2895_v21 = vrot.slane %v2881_v39, %v12402_v13 }
 0x325   : > { %v4573_v48 = vmax.f32 %v4571_v23, %v4572_v42  ;;  %v4580_v11 = vmax.f32 %v4578_v53, %v4579_v20  ;;  %v2812_v49 = vcombine.high %v2810_v50, %v2810_v50  ;;  %v4505_v14 = vrot.slane %v4504_v59, 4 }
 0x326   : > { %v4587_v8 = vmax.f32 %v4585_v9, %v4586_v12  ;;  %v5512_v58 = vpack.c.bf16 %v4566_v47, %v4566_v47  ;;  %v4511_v17 = vsel %vm3579_vm11, %v2811_v5, -inf  ;;  %v4518_v45 = vsel %vm3579_vm11, %v2810_v50, -inf }
 0x327   : > { %v5513_v34 = vpack.c.bf16 %v4573_v48, %v4573_v48  ;;  %v5514_v28 = vpack.c.bf16 %v4580_v11, %v4580_v11  ;;  %v4506_v36 = vmax.f32 %v4504_v59, %v4505_v14  ;;  %v4512_v29 = vrot.slane %v4511_v17, 4 }
 0x328   : > { %v5515_v40 = vpack.c.bf16 %v4587_v8, %v4587_v8  ;;  %v4519_v30 = vrot.slane %v4518_v45, 4  ;;  %v4525_v54 = vsel %vm3579_vm11, %v2812_v49, -inf  ;;  %v13402_v26 = vadd.f32 %v13315_v56, %v13151_v38 }
 0x329   : > { %v13404_v63 = vunpack.c.l.b16 %v5512_v58  ;;  %v13406_v3 = vunpack.c.l.b16 %v5513_v34  ;;  %v4507_v23 = vrot.slane %v4506_v36, 2  ;;  %v4513_v53 = vmax.f32 %v4511_v17, %v4512_v29 }
 0x32a   : > { %v13408_v43 = vunpack.c.l.b16 %v5514_v28  ;;  %v4520_v6 = vmax.f32 %v4518_v45, %v4519_v30  ;;  %v4526_v0 = vrot.slane %v4525_v54, 4  ;;  %v2896_v9 = vcombine.high %v2888_v52, %v2888_v52 }
 0x32b   : > { %15609 = vst [vmem:[#allocation18_spill] sm:$0xff] %v13406_v3  ;;  %v4508_v39 = vmax.f32 %v4506_v36, %v4507_v23  ;;  %v4514_v42 = vrot.slane %v4513_v53, 2  ;;  %v2897_v20 = vcombine.high %v2895_v21, %v2895_v21  ;;  %v4644_v50 = vsel %vm3579_vm11, %v2888_v52, -inf }
 0x32c   : > { %15610 = vst [vmem:[#allocation19_spill] sm:$0xff] %v13408_v43  ;;  %v4521_v5 = vrot.slane %v4520_v6, 2  ;;  %v4527_v47 = vmax.f32 %v4525_v54, %v4526_v0  ;;  %v4645_v38 = vrot.slane %v4644_v50, 4  ;;  %v4651_v12 = vsel %vm3579_vm11, %v2896_v9, -inf }
 0x32d   : > { %v4509_v59 = vrot.slane %v4508_v39, 1  ;;  %v4515_v48 = vmax.f32 %v4513_v53, %v4514_v42  ;;  %v4652_v11 = vrot.slane %v4651_v12, 4  ;;  %v4658_v49 = vsel %vm3579_vm11, %v2895_v21, -inf }
 0x32e   : > { %v4522_v14 = vmax.f32 %v4520_v6, %v4521_v5  ;;  %v4528_v8 = vrot.slane %v4527_v47, 2  ;;  %v4646_v58 = vmax.f32 %v4644_v50, %v4645_v38  ;;  %v4659_v17 = vrot.slane %v4658_v49, 4 }
 0x32f   : > { %v4510_v45 = vmax.f32 %v4508_v39, %v4509_v59  ;;  %v4516_v34 = vrot.slane %v4515_v48, 1  ;;  %v4653_v28 = vmax.f32 %v4651_v12, %v4652_v11  ;;  %v4665_v36 = vsel %vm3579_vm11, %v2897_v20, -inf }
 0x330   : > { %v4523_v52 = vrot.slane %v4522_v14, 1  ;;  %v4529_v29 = vmax.f32 %v4527_v47, %v4528_v8  ;;  %v4647_v30 = vrot.slane %v4646_v58, 2  ;;  %v4660_v54 = vmax.f32 %v4658_v49, %v4659_v17 }
 0x331   : > { %v4517_v23 = vmax.f32 %v4515_v48, %v4516_v34  ;;  %v5504_v0 = vpack.c.bf16 %v4510_v45, %v4510_v45  ;;  %v4654_v9 = vrot.slane %v4653_v28, 2  ;;  %v4666_v53 = vrot.slane %v4665_v36, 4 }
 0x332   : > { %v4524_v42 = vmax.f32 %v4522_v14, %v4523_v52  ;;  %v4530_v19 = vrot.slane %v4529_v29, 1  ;;  %v4648_v21 = vmax.f32 %v4646_v58, %v4647_v30  ;;  %v4661_v6 = vrot.slane %v4660_v54, 2 }
 0x333   : > { %v5505_v5 = vpack.c.bf16 %v4517_v23, %v4517_v23  ;;  %v6016_v50 = vunpack.c.l.b16 %v5504_v0  ;;  %v4655_v38 = vmax.f32 %v4653_v28, %v4654_v9  ;;  %v4667_v39 = vmax.f32 %v4665_v36, %v4666_v53 }
 0x334   : > { %v13414_v59 = vunpack.c.l.b16 %v5515_v40  ;;  %v4531_v12 = vmax.f32 %v4529_v29, %v4530_v19  ;;  %v4649_v20 = vrot.slane %v4648_v21, 1  ;;  %v4662_v11 = vmax.f32 %v4660_v54, %v4661_v6 }
 0x335   : > { %v6017_v47 = vunpack.c.l.b16 %v5505_v5  ;;  %v6258_v48 = vsel %vm6146_vm15, %v6016_v50, %v13380_v25  ;;  %v4656_v49 = vrot.slane %v4655_v38, 1  ;;  %v4668_v8 = vrot.slane %v4667_v39, 2 }
 0x336   : > { %v5506_v17 = vpack.c.bf16 %v4524_v42, %v4524_v42  ;;  %v5507_v14 = vpack.c.bf16 %v4531_v12, %v4531_v12  ;;  %v4650_v45 = vmax.f32 %v4648_v21, %v4649_v20  ;;  %v4663_v58 = vrot.slane %v4662_v11, 1 }
 0x337   : > { %v13419_v34 = vsel %vm6148_vm1, %v6017_v47, %v6258_v48  ;;  %v4657_v28 = vmax.f32 %v4655_v38, %v4656_v49  ;;  %v4669_v36 = vmax.f32 %v4667_v39, %v4668_v8  ;;  %v2143_v40 = vmax.f32 %v13386_v33, 0.0 }
 0x338   : > { %v6019_v19 = vunpack.c.l.b16 %v5507_v14  ;;  %v4664_v52 = vmax.f32 %v4662_v11, %v4663_v58  ;;  %v5524_v29 = vpack.c.bf16 %v4650_v45, %v4650_v45  ;;  %v2146_v30 = vmax.f32 %v13402_v26, 0.0 }
 0x339   : > { %v4670_v54 = vrot.slane %v4669_v36, 1  ;;  %v5525_v25 = vpack.c.bf16 %v4657_v28, %v4657_v28  ;;  %v2847_v23 = vcombine.high %v2143_v40, %v2143_v40  ;;  %v2854_v0 = vrot.slane %v2143_v40, %v12402_v13 }
 0x33a   : > { %v13424_v9 = vunpack.c.l.b16 %v5506_v17  ;;  %v6261_v53 = vsel %vm6152_vm4, %v13348_v55, %v6019_v19  ;;  %v5526_v42 = vpack.c.bf16 %v4664_v52, %v4664_v52  ;;  %v2898_v21 = vcombine.high %v2146_v30, %v2146_v30 }
 0x33b   : > { %v6262_v33 = vsel %vm6140_vm12, %v13350_v10, %v6261_v53  ;;  %v13430_v6 = vmax.f32 %v4669_v36, %v4670_v54  ;;  %v13432_v5 = vunpack.c.l.b16 %v5524_v29  ;;  %v2861_v26 = vrot.slane %v2847_v23, %v12402_v13 }
 0x33c   : > { %v13437_v50 = vsel %vm6142_vm13, %v13354_v62, %v6262_v33  ;;  %v13439_v38 = vunpack.c.l.b16 %v5525_v25  ;;  %v2862_v39 = vcombine.high %v2854_v0, %v2854_v0  ;;  %v4588_v55 = vsel %vm3579_vm11, %v2854_v0, -inf }
 0x33d   : > { %v13442_v12 = vunpack.c.l.b16 %v5526_v42  ;;  %v2863_v20 = vcombine.high %v2861_v26, %v2861_v26  ;;  %v4589_v11 = vrot.slane %v4588_v55, 4  ;;  %v4602_v10 = vsel %vm3579_vm11, %v2861_v26, -inf }
 0x33e   : > { %v4595_v47 = vsel %vm3579_vm11, %v2862_v39, -inf  ;;  %v4603_v48 = vrot.slane %v4602_v10, 4  ;;  %v2905_v49 = vrot.slane %v2146_v30, %v12402_v13  ;;  %v2912_v8 = vrot.slane %v2898_v21, %v12402_v13 }
 0x33f   : > { %v5527_v62 = vpack.c.bf16 %v13430_v6, %v13430_v6  ;;  %v4590_v17 = vmax.f32 %v4588_v55, %v4589_v11  ;;  %v4596_v14 = vrot.slane %v4595_v47, 4  ;;  %v4609_v45 = vsel %vm3579_vm11, %v2863_v20, -inf }
 0x340   : > { %v4604_v58 = vmax.f32 %v4602_v10, %v4603_v48  ;;  %v4610_v28 = vrot.slane %v4609_v45, 4  ;;  %v2913_v36 = vcombine.high %v2905_v49, %v2905_v49  ;;  %v2914_v40 = vcombine.high %v2912_v8, %v2912_v8 }
 0x341   : > { %v4591_v19 = vrot.slane %v4590_v17, 2  ;;  %v4597_v52 = vmax.f32 %v4595_v47, %v4596_v14  ;;  %v4672_v29 = vsel %vm3579_vm11, %v2905_v49, -inf  ;;  %v4686_v54 = vsel %vm3579_vm11, %v2912_v8, -inf }
 0x342   : > { %v4605_v30 = vrot.slane %v4604_v58, 2  ;;  %v4611_v25 = vmax.f32 %v4609_v45, %v4610_v28  ;;  %v4673_v23 = vrot.slane %v4672_v29, 4  ;;  %v4679_v0 = vsel %vm3579_vm11, %v2913_v36, -inf }
 0x343   : > { %v4592_v53 = vmax.f32 %v4590_v17, %v4591_v19  ;;  %v4598_v42 = vrot.slane %v4597_v52, 2  ;;  %v4680_v21 = vrot.slane %v4679_v0, 4  ;;  %v4687_v33 = vrot.slane %v4686_v54, 4 }
 0x344   : > { %v4606_v6 = vmax.f32 %v4604_v58, %v4605_v30  ;;  %v4612_v26 = vrot.slane %v4611_v25, 2  ;;  %v4674_v39 = vmax.f32 %v4672_v29, %v4673_v23  ;;  %v4693_v55 = vsel %vm3579_vm11, %v2914_v40, -inf }
 0x345   : > { %v4593_v20 = vrot.slane %v4592_v53, 1  ;;  %v4599_v11 = vmax.f32 %v4597_v52, %v4598_v42  ;;  %v4681_v10 = vmax.f32 %v4679_v0, %v4680_v21  ;;  %v4688_v47 = vmax.f32 %v4686_v54, %v4687_v33 }
 0x346   : > { %v4607_v48 = vrot.slane %v4606_v6, 1  ;;  %v4613_v49 = vmax.f32 %v4611_v25, %v4612_v26  ;;  %v4675_v8 = vrot.slane %v4674_v39, 2  ;;  %v4694_v14 = vrot.slane %v4693_v55, 4 }
 0x347   : > { %v4594_v45 = vmax.f32 %v4592_v53, %v4593_v20  ;;  %v4600_v28 = vrot.slane %v4599_v11, 1  ;;  %v4682_v36 = vrot.slane %v4681_v10, 2  ;;  %v4689_v17 = vrot.slane %v4688_v47, 2 }
 0x348   : > { %v4608_v19 = vmax.f32 %v4606_v6, %v4607_v48  ;;  %v4614_v4 = vrot.slane %v4613_v49, 1  ;;  %v4676_v43 = vmax.f32 %v4674_v39, %v4675_v8  ;;  %v4695_v58 = vmax.f32 %v4693_v55, %v4694_v14  ;;  %v13457_v48 = vpop.f32.mrb[48].mxu0 }
 0x349   : > { %v4601_v30 = vmax.f32 %v4599_v11, %v4600_v28  ;;  %v5516_v29 = vpack.c.bf16 %v4594_v45, %v4594_v45  ;;  %v4683_v23 = vmax.f32 %v4681_v10, %v4682_v36  ;;  %v4690_v40 = vmax.f32 %v4688_v47, %v4689_v17  ;;  %v15612_v45 = vld [vmem:[#allocation12_spill] sm:$0xff] }
 0x34a   : > { %v4615_v3 = vmax.f32 %v4613_v49, %v4614_v4  ;;  %v5518_v52 = vpack.c.bf16 %v4608_v19, %v4608_v19  ;;  %v4677_v0 = vrot.slane %v4676_v43, 1  ;;  %v4696_v54 = vrot.slane %v4695_v58, 2  ;;  %v15613_v28 = vld [vmem:[#allocation8_spill] sm:$0xff] }
 0x34b   : > { %v5517_v42 = vpack.c.bf16 %v4601_v30, %v4601_v30  ;;  %v6028_v25 = vunpack.c.l.b16 %v5516_v29  ;;  %v4684_v21 = vrot.slane %v4683_v23, 1  ;;  %v4691_v33 = vrot.slane %v4690_v40, 1 }
 0x34c   : > { %v13455_v53 = vunpack.c.l.b16 %v5527_v62  ;;  %v5519_v26 = vpack.c.bf16 %v4615_v3, %v4615_v3  ;;  %v6030_v20 = vunpack.c.l.b16 %v5518_v52  ;;  %v4678_v6 = vmax.f32 %v4676_v43, %v4677_v0  ;;  %v15611_v62 = vld [vmem:[#allocation15_spill] sm:$0xff] }
 0x34d   : > { %v6029_v39 = vunpack.c.l.b16 %v5517_v42  ;;  %v6268_v55 = vsel %vm6152_vm4, %v6028_v25, %v13414_v59  ;;  %v4685_v11 = vmax.f32 %v4683_v23, %v4684_v21  ;;  %v13461_v4 = vmax.f32 %v4690_v40, %v4691_v33  ;;  %v15615_v23 = vld [vmem:[#allocation11_spill] sm:$0xff] }
 0x34e   : > { %v6031_v10 = vunpack.c.l.b16 %v5519_v26  ;;  %v5528_v47 = vpack.c.bf16 %v4678_v6, %v4678_v6  ;;  %v2000_v49 = vadd.f32 %v13315_v56, %v13153_v61  ;;  %v6233_v3 = vsel %vm6150_vm5, %v15611_v62, %v13184_v7  ;;  %v15614_v61 = vld [vmem:[#allocation9_spill] sm:$0xff] }
 0x34f   : > { %v6269_v43 = vsel %vm6140_vm12, %v6029_v39, %v6268_v55  ;;  %v13469_v8 = vmax.f32 %v4695_v58, %v4696_v54  ;;  %v5529_v14 = vpack.c.bf16 %v4685_v11, %v4685_v11  ;;  %v6237_v59 = vsel %vm6144_vm14, %v15613_v28, %v15612_v45  ;;  %v15616_v54 = vld [vmem:[#allocation10_spill] sm:$0xff] }
 0x350   : > { %v6270_v36 = vsel %vm6142_vm13, %v6030_v20, %v6269_v43  ;;  %v5530_v17 = vpack.c.bf16 %v13461_v4, %v13461_v4  ;;  %v2144_v19 = vmax.f32 %v2000_v49, 0.0  ;;  %v6238_v30 = vsel %vm6146_vm15, %v15614_v61, %v6237_v59 }
 0x351   : > { %v13479_v29 = vunpack.c.l.b16 %v5528_v47  ;;  %v13481_v7 = vunpack.c.l.b16 %v5529_v14  ;;  %v13484_v58 = vsel %vm6144_vm14, %v6031_v10, %v6270_v36  ;;  %v6239_v40 = vsel %vm6148_vm1, %v15615_v23, %v6238_v30 }
 0x352   : > { %v2864_v52 = vcombine.high %v2144_v19, %v2144_v19  ;;  %v2871_v0 = vrot.slane %v2144_v19, %v12402_v13  ;;  %v6240_v42 = vsel %vm6150_vm5, %v15616_v54, %v6239_v40  ;;  %v6247_v25 = vsel %vm6150_vm5, %v13346_v15, %v13297_v22 }
 0x353   : > { %v6251_v21 = vsel %vm6144_vm14, %v13223_v37, %v13321_v31  ;;  %v6372_v33 = vpack.c.b16 %v6240_v42, %v6233_v3  ;;  %v4474_v26 = vrot.slane %v13237_v32, 1  ;;  %v2021_v20 = vadd.f32 %v13315_v56, %v13226_v41 }
 0x354   : > { %v2878_v6 = vrot.slane %v2864_v52, %v12402_v13  ;;  %v2879_v39 = vcombine.high %v2871_v0, %v2871_v0  ;;  %v4616_v55 = vsel %vm3579_vm11, %v2871_v0, -inf  ;;  %v6252_v11 = vsel %vm6146_vm15, %v13239_v60, %v6251_v21 }
 0x355   : > { %v4617_v10 = vrot.slane %v4616_v55, 4  ;;  %v6253_v22 = vsel %vm6148_vm1, %v13242_v2, %v6252_v11  ;;  %v13508_v37 = vsel %vm12825_vm8, 0, %v6372_v33  ;;  %v4475_v31 = vmax.f32 %v13237_v32, %v4474_v26  ;;  %v13527_v26 = vpop.f32.mrb[49].mxu0 }
 0x356   : > { %15617 = vst [vmem:[#allocation15_spill] sm:$0xff] %v13508_v37  ;;  %v2880_v15 = vcombine.high %v2878_v6, %v2878_v6  ;;  %v4623_v41 = vsel %vm3579_vm11, %v2879_v39, -inf  ;;  %v4630_v47 = vsel %vm3579_vm11, %v2878_v6, -inf  ;;  %v6254_v49 = vsel %vm6150_vm5, %v13276_v46, %v6253_v22 }
 0x357   : > { %v4618_v62 = vmax.f32 %v4616_v55, %v4617_v10  ;;  %v4624_v60 = vrot.slane %v4623_v41, 4  ;;  %v4631_v3 = vrot.slane %v4630_v47, 4  ;;  %v13515_v43 = vpack.c.b16 %v6254_v49, %v6247_v25 }
 0x358   : > { %v4637_v2 = vsel %vm3579_vm11, %v2880_v15, -inf  ;;  %v6482_v14 = vshrl.u32 %v13508_v37, 16  ;;  %v6484_v45 = vshll.u32 %v13508_v37, 16  ;;  %v10982_v32 = vpack.c.bf16 %v4475_v31, %v4475_v31 }
 0x359   : > { %15618 = vst [vmem:[#allocation12_spill] sm:$0xff] %v13515_v43  ;;  %v4619_v28 = vrot.slane %v4618_v62, 2  ;;  %v4625_v59 = vmax.f32 %v4623_v41, %v4624_v60  ;;  %v4632_v36 = vmax.f32 %v4630_v47, %v4631_v3  ;;  %v4638_v19 = vrot.slane %v4637_v2, 4  ;;  %v13530_v41 = vpop.f32.mrb[50].mxu0 }
 0x35a   : > { %v6486_v61 = vrot.slane %v6484_v45, 1  ;;  %v6489_v30 = vshll.u32 %v13515_v43, 16  ;;  %v13523_v46 = vsel %vm12825_vm8, %v10982_v32, 0  ;;  %v6493_v23 = vshrl.u32 %v13515_v43, 16 }
 0x35b   : > { %v4620_v40 = vmax.f32 %v4618_v62, %v4619_v28  ;;  %v4626_v52 = vrot.slane %v4625_v59, 2  ;;  %v4633_v0 = vrot.slane %v4632_v36, 2  ;;  %v4639_v54 = vmax.f32 %v4637_v2, %v4638_v19 }
 0x35c   : > { %v6487_v42 = vor.u32 %v6486_v61, %v6482_v14  ;;  %v6491_v25 = vrot.slane %v6489_v30, 1  ;;  %v6497_v21 = vshll.u32 %v13523_v46, 16  ;;  %v2149_v33 = vmax.f32 %v2021_v20, 0.0 }
 0x35d   : > { %v4621_v6 = vrot.slane %v4620_v40, 1  ;;  %v4627_v39 = vmax.f32 %v4625_v59, %v4626_v52  ;;  %v4634_v55 = vmax.f32 %v4632_v36, %v4633_v0  ;;  %v4640_v11 = vrot.slane %v4639_v54, 2 }
 0x35e   : > { %v6492_v10 = vsel %vm610_vm3, %v6487_v42, %v6491_v25  ;;  %v6495_v22 = vor.u32 %v6493_v23, %v6491_v25  ;;  %v6499_v31 = vrot.slane %v6497_v21, 1  ;;  %v2949_v15 = vcombine.high %v2149_v33, %v2149_v33 }
 0x35f   : > { %v4622_v47 = vmax.f32 %v4620_v40, %v4621_v6  ;;  %v4628_v49 = vrot.slane %v4627_v39, 1  ;;  %v4635_v62 = vrot.slane %v4634_v55, 1  ;;  %v4641_v60 = vmax.f32 %v4639_v54, %v4640_v11  ;;  %6593 = vrot.lane.b32.xlu0 %v6492_v10, %s11376_s16 }
 0x360   : > { %v13536_v20 = vunpack.c.l.b16 %v5530_v17  ;;  %v6500_v3 = vsel %vm610_vm3, %v6495_v22, %v6499_v31  ;;  %v2956_v2 = vrot.slane %v2149_v33, %v12402_v13  ;;  %v2963_v14 = vrot.slane %v2949_v15, %v12402_v13 }
 0x361   : > { %v4629_v45 = vmax.f32 %v4627_v39, %v4628_v49  ;;  %v13541_v32 = vmax.f32 %v4634_v55, %v4635_v62  ;;  %v4642_v28 = vrot.slane %v4641_v60, 1  ;;  %v5520_v59 = vpack.c.bf16 %v4622_v47, %v4622_v47  ;;  %6595 = vrot.lane.b32.xlu1 %v6500_v3, %s11376_s16  ;;  %v13553_v39 = vpop.f32.mrb[51].mxu0 }
 0x362   : > { %v2964_v36 = vcombine.high %v2956_v2, %v2956_v2  ;;  %v2965_v19 = vcombine.high %v2963_v14, %v2963_v14  ;;  %v4756_v61 = vsel %vm3579_vm11, %v2956_v2, -inf  ;;  %v4770_v4 = vsel %vm3579_vm11, %v2963_v14, -inf }
 0x363   : > { %v4643_v17 = vmax.f32 %v4641_v60, %v4642_v28  ;;  %v5521_v30 = vpack.c.bf16 %v4629_v45, %v4629_v45  ;;  %v6032_v23 = vunpack.c.l.b16 %v5520_v59  ;;  %v6644_v40 = vrot.slane %v13508_v37, 1 }
 0x364   : > { %v4757_v52 = vrot.slane %v4756_v61, 4  ;;  %v4763_v0 = vsel %vm3579_vm11, %v2964_v36, -inf  ;;  %v4771_v54 = vrot.slane %v4770_v4, 4  ;;  %v4777_v42 = vsel %vm3579_vm11, %v2965_v19, -inf }
 0x365   : > { %v5522_v25 = vpack.c.bf16 %v13541_v32, %v13541_v32  ;;  %v5523_v21 = vpack.c.bf16 %v4643_v17, %v4643_v17  ;;  %v6033_v33 = vunpack.c.l.b16 %v5521_v30  ;;  %v6272_v6 = vsel %vm6146_vm15, %v6032_v23, %v13484_v58 }
 0x366   : > { %v4758_v55 = vmax.f32 %v4756_v61, %v4757_v52  ;;  %v4764_v11 = vrot.slane %v4763_v0, 4  ;;  %v4772_v10 = vmax.f32 %v4770_v4, %v4771_v54  ;;  %v4778_v22 = vrot.slane %v4777_v42, 4 }
 0x367   : > { %v6035_v31 = vunpack.c.l.b16 %v5523_v21  ;;  %v13556_v15 = vsel %vm6148_vm1, %v6033_v33, %v6272_v6  ;;  %v15570_v47 = vrot.slane %v13515_v43, 1  ;;  %v2013_v49 = vadd.f32 %v13315_v56, %v13257_v57 }
 0x368   : > { %v4759_v62 = vrot.slane %v4758_v55, 2  ;;  %v4765_v60 = vmax.f32 %v4763_v0, %v4764_v11  ;;  %v4773_v3 = vrot.slane %v4772_v10, 2  ;;  %v4779_v2 = vmax.f32 %v4777_v42, %v4778_v22 }
 0x369   : > { %v6275_v58 = vsel %vm6152_vm4, %v13432_v5, %v6035_v31  ;;  %v6646_v14 = vsel %vm963_vm2, %v6644_v40, %v15570_v47  ;;  %v2147_v45 = vmax.f32 %v2013_v49, 0.0  ;;  %v2024_v32 = vadd.f32 %v13315_v56, %v13274_v1 }
 0x36a   : > { %v6276_v28 = vsel %vm6140_vm12, %v13439_v38, %v6275_v58  ;;  %v4760_v59 = vmax.f32 %v4758_v55, %v4759_v62  ;;  %v4766_v57 = vrot.slane %v4765_v60, 2  ;;  %v4774_v36 = vmax.f32 %v4772_v10, %v4773_v3  ;;  %6681 = vrot.lane.b32.xlu0 %v6646_v14, %s11375_s15 }
 0x36b   : > { %v13573_v19 = vsel %vm6142_vm13, %v13442_v12, %v6276_v28  ;;  %v4780_v5 = vrot.slane %v4779_v2, 2  ;;  %v2915_v61 = vcombine.high %v2147_v45, %v2147_v45  ;;  %v2922_v4 = vrot.slane %v2147_v45, %v12402_v13 }
 0x36c   : > { %v4761_v17 = vrot.slane %v4760_v59, 1  ;;  %v4767_v30 = vmax.f32 %v4765_v60, %v4766_v57  ;;  %v4775_v23 = vrot.slane %v4774_v36, 1  ;;  %v2150_v1 = vmax.f32 %v2024_v32, 0.0  ;;  %v13587_v32 = vpop.f32.mrb[52].mxu0 }
 0x36d   : > { %v4781_v56 = vmax.f32 %v4779_v2, %v4780_v5  ;;  %v2929_v38 = vrot.slane %v2915_v61, %v12402_v13  ;;  %v2930_v40 = vcombine.high %v2922_v4, %v2922_v4  ;;  %v4700_v52 = vsel %vm3579_vm11, %v2922_v4, -inf  ;;  %v13591_v5 = vpop.f32.mrb[53].mxu0 }
 0x36e   : > { %v4762_v0 = vmax.f32 %v4760_v59, %v4761_v17  ;;  %v4768_v54 = vrot.slane %v4767_v30, 1  ;;  %v4776_v42 = vmax.f32 %v4774_v36, %v4775_v23  ;;  %v4701_v21 = vrot.slane %v4700_v52, 4  ;;  %15619 = vst [vmem:[#allocation8_spill] sm:$0xff] %v13591_v5 }
 0x36f   : > { %v4782_v12 = vrot.slane %v4781_v56, 1  ;;  %v2931_v33 = vcombine.high %v2929_v38, %v2929_v38  ;;  %v4707_v6 = vsel %vm3579_vm11, %v2930_v40, -inf  ;;  %v4714_v55 = vsel %vm3579_vm11, %v2929_v38, -inf }
 0x370   : > { %v4769_v11 = vmax.f32 %v4767_v30, %v4768_v54  ;;  %v5540_v10 = vpack.c.bf16 %v4762_v0, %v4762_v0  ;;  %v5542_v22 = vpack.c.bf16 %v4776_v42, %v4776_v42  ;;  %v4702_v31 = vmax.f32 %v4700_v52, %v4701_v21 }
 0x371   : > { %v13580_v49 = vmax.f32 %v4781_v56, %v4782_v12  ;;  %v4708_v62 = vrot.slane %v4707_v6, 4  ;;  %v4715_v60 = vrot.slane %v4714_v55, 4  ;;  %v4721_v3 = vsel %vm3579_vm11, %v2931_v33, -inf }
 0x372   : > { %v13583_v2 = vunpack.c.l.b16 %v5522_v25  ;;  %v5541_v58 = vpack.c.bf16 %v4769_v11, %v4769_v11  ;;  %v13585_v14 = vunpack.c.l.b16 %v5540_v10  ;;  %v4703_v45 = vrot.slane %v4702_v31, 2  ;;  %v13602_v10 = vpop.f32.mrb[54].mxu0 }
 0x373   : > { %v13589_v28 = vunpack.c.l.b16 %v5542_v22  ;;  %v4709_v59 = vmax.f32 %v4707_v6, %v4708_v62  ;;  %v4716_v57 = vmax.f32 %v4714_v55, %v4715_v60  ;;  %v4722_v36 = vrot.slane %v4721_v3, 4  ;;  %15620 = vst [vmem:[#allocation9_spill] sm:$0xff] %v13602_v10 }
 0x374   : > { %v4704_v4 = vmax.f32 %v4702_v31, %v4703_v45  ;;  %v2966_v17 = vcombine.high %v2150_v1, %v2150_v1  ;;  %v2973_v25 = vrot.slane %v2150_v1, %v12402_v13  ;;  %v13596_v30 = vunpack.c.l.b16 %v5541_v58 }
 0x375   : > { %v4710_v23 = vrot.slane %v4709_v59, 2  ;;  %v4717_v56 = vrot.slane %v4716_v57, 2  ;;  %v4723_v38 = vmax.f32 %v4721_v3, %v4722_v36  ;;  %vm6784_vm10 = vcmask 195584  }
 0x376   : > { %v4705_v40 = vrot.slane %v4704_v4, 1  ;;  %v2980_v52 = vrot.slane %v2966_v17, %v12402_v13  ;;  %v2981_v0 = vcombine.high %v2973_v25, %v2973_v25  ;;  %v4784_v54 = vsel %vm3579_vm11, %v2973_v25, -inf }
 0x377   : > { %v4711_v42 = vmax.f32 %v4709_v59, %v4710_v23  ;;  %v4718_v21 = vmax.f32 %v4716_v57, %v4717_v56  ;;  %v4724_v12 = vrot.slane %v4723_v38, 2  ;;  %v4785_v33 = vrot.slane %v4784_v54, 4 }
 0x378   : > { %v4706_v6 = vmax.f32 %v4704_v4, %v4705_v40  ;;  %v2982_v55 = vcombine.high %v2980_v52, %v2980_v52  ;;  %v4791_v11 = vsel %vm3579_vm11, %v2981_v0, -inf  ;;  %v4798_v1 = vsel %vm3579_vm11, %v2980_v52, -inf }
 0x379   : > { %v4712_v22 = vrot.slane %v4711_v42, 1  ;;  %v4719_v31 = vrot.slane %v4718_v21, 1  ;;  %v4725_v62 = vmax.f32 %v4723_v38, %v4724_v12  ;;  %v4786_v60 = vmax.f32 %v4784_v54, %v4785_v33 }
 0x37a   : > { %v5532_v3 = vpack.c.bf16 %v4706_v6, %v4706_v6  ;;  %v4792_v58 = vrot.slane %v4791_v11, 4  ;;  %v4799_v45 = vrot.slane %v4798_v1, 4  ;;  %v4805_v59 = vsel %vm3579_vm11, %v2982_v55, -inf }
 0x37b   : > { %v4713_v57 = vmax.f32 %v4711_v42, %v4712_v22  ;;  %v4720_v36 = vmax.f32 %v4718_v21, %v4719_v31  ;;  %v4726_v17 = vrot.slane %v4725_v62, 1  ;;  %v4787_v4 = vrot.slane %v4786_v60, 2 }
 0x37c   : > { %v6044_v25 = vunpack.c.l.b16 %v5532_v3  ;;  %v4793_v23 = vmax.f32 %v4791_v11, %v4792_v58  ;;  %v4800_v56 = vmax.f32 %v4798_v1, %v4799_v45  ;;  %v4806_v40 = vrot.slane %v4805_v59, 4 }
 0x37d   : > { %v4727_v52 = vmax.f32 %v4725_v62, %v4726_v17  ;;  %v5533_v0 = vpack.c.bf16 %v4713_v57, %v4713_v57  ;;  %v5534_v61 = vpack.c.bf16 %v4720_v36, %v4720_v36  ;;  %v4788_v47 = vmax.f32 %v4786_v60, %v4787_v4  ;;  %v6582_v57 = vpop.permute.xlu0 %6581 }
 0x37e   : > { %v4794_v37 = vrot.slane %v4793_v23, 2  ;;  %v4801_v38 = vrot.slane %v4800_v56, 2  ;;  %v4807_v54 = vmax.f32 %v4805_v59, %v4806_v40  ;;  %v6647_v12 = vrot.slane %v13523_v46, 1  ;;  %v13614_v46 = vld [vmem:[%s15553_s2] ss:$0 sm:$0xff] }
 0x37f   : > { %v5535_v33 = vpack.c.bf16 %v4727_v52, %v4727_v52  ;;  %v6045_v6 = vunpack.c.l.b16 %v5533_v0  ;;  %v6046_v55 = vunpack.c.l.b16 %v5534_v61  ;;  %v4789_v42 = vrot.slane %v4788_v47, 1  ;;  %v6584_v52 = vpop.permute.xlu1 %6583 }
 0x380   : > { %v4795_v21 = vmax.f32 %v4793_v23, %v4794_v37  ;;  %v4802_v22 = vmax.f32 %v4800_v56, %v4801_v38  ;;  %v4808_v31 = vrot.slane %v4807_v54, 2  ;;  %v15621_v11 = vrot.slane %v13515_v43, 1 }
 0x381   : > { %v6047_v62 = vunpack.c.l.b16 %v5535_v33  ;;  %v6282_v3 = vsel %vm6140_vm12, %v6045_v6, %v6044_v25  ;;  %v4790_v60 = vmax.f32 %v4788_v47, %v4789_v42  ;;  %v2016_v37 = vadd.f32 %v13614_v46, %v13340_v35 }
 0x382   : > { %v6648_v1 = vsel %vm963_vm2, %v15621_v11, %v6647_v12  ;;  %v6283_v61 = vsel %vm6142_vm13, %v6046_v55, %v6282_v3  ;;  %v4796_v58 = vrot.slane %v4795_v21, 1  ;;  %v4803_v45 = vrot.slane %v4802_v22, 1 }
 0x383   : > { %6683 = vrot.lane.b32.xlu1 %v6648_v1, %s11375_s15  ;;  %v4809_v59 = vmax.f32 %v4807_v54, %v4808_v31  ;;  %v15622_v36 = vpack.c.bf16 %v13580_v49, %v13580_v49  ;;  %v5544_v17 = vpack.c.bf16 %v4790_v60, %v4790_v60  ;;  %v2148_v4 = vmax.f32 %v2016_v37, 0.0  ;;  %v15625_v49 = vld [vmem:[#allocation14_spill] sm:$0xff]  ;;  %v13642_v1 = vpop.f32.mrb[55].mxu0 }
 0x384   : > { %v13625_v25 = vsel %vm6144_vm14, %v6047_v62, %v6283_v61  ;;  %v4797_v23 = vmax.f32 %v4795_v21, %v4796_v58  ;;  %v4804_v56 = vmax.f32 %v4802_v22, %v4803_v45  ;;  %v2037_v35 = vadd.f32 %v13614_v46, %v13377_v16  ;;  %v15626_v16 = vld [vmem:[#allocation13_spill] sm:$0xff]  ;;  %15627 = vst [vmem:[#allocation14_spill] sm:$0xff] %v13642_v1 }
 0x385   : > { %v13622_v47 = vunpack.c.l.b16 %v15622_v36  ;;  %v4810_v40 = vrot.slane %v4809_v59, 1  ;;  %v13629_v0 = vunpack.c.l.b16 %v5544_v17  ;;  %v2932_v38 = vcombine.high %v2148_v4, %v2148_v4 }
 0x386   : > { %v2939_v54 = vrot.slane %v2148_v4, %v12402_v13  ;;  %v13634_v12 = vsel %vm1535_vm7, %v15625_v49, %v6582_v57  ;;  %v5545_v6 = vpack.c.bf16 %v4797_v23, %v4797_v23  ;;  %v5546_v55 = vpack.c.bf16 %v4804_v56, %v4804_v56 }
 0x387   : > { %15623 = vst [vmem:[#allocation11_spill] sm:$0xff] %v13622_v47  ;;  %15624 = vst [vmem:[#allocation10_spill] sm:$0xff] %v13629_v0  ;;  %v4811_v33 = vmax.f32 %v4809_v59, %v4810_v40  ;;  %v2153_v42 = vmax.f32 %v2037_v35, 0.0  ;;  %v2946_v21 = vrot.slane %v2932_v38, %v12402_v13  ;;  %v13640_v11 = vsel %vm1535_vm7, %v15626_v16, %v6584_v52 }
 0x388   : > { %v2947_v22 = vcombine.high %v2939_v54, %v2939_v54  ;;  %v4728_v31 = vsel %vm3579_vm11, %v2939_v54, -inf  ;;  %v13644_v3 = vunpack.c.l.b16 %v5545_v6  ;;  %v2029_v37 = vadd.f32 %v13614_v46, %v13382_v51 }
 0x389   : > { %v5547_v62 = vpack.c.bf16 %v4811_v33, %v4811_v33  ;;  %v4729_v60 = vrot.slane %v4728_v31, 4  ;;  %v2948_v61 = vcombine.high %v2946_v21, %v2946_v21  ;;  %v4742_v45 = vsel %vm3579_vm11, %v2946_v21, -inf }
 0x38a   : > { %15628 = vst [vmem:[#allocation13_spill] sm:$0xff] %v13644_v3  ;;  %v4735_v58 = vsel %vm3579_vm11, %v2947_v22, -inf  ;;  %v3017_v59 = vcombine.high %v2153_v42, %v2153_v42  ;;  %v13650_v57 = vunpack.c.l.b16 %v5546_v55  ;;  %v4743_v4 = vrot.slane %v4742_v45, 4 }
 0x38b   : > { %v4730_v36 = vmax.f32 %v4728_v31, %v4729_v60  ;;  %v4736_v17 = vrot.slane %v4735_v58, 4  ;;  %v13652_v23 = vunpack.c.l.b16 %v5547_v62  ;;  %v4749_v56 = vsel %vm3579_vm11, %v2948_v61, -inf }
 0x38c   : > { %15629 = vst [vmem:[#allocation20_spill] sm:$0xff] %v13650_v57  ;;  %v3024_v40 = vrot.slane %v2153_v42, %v12402_v13  ;;  %v3031_v35 = vrot.slane %v3017_v59, %v12402_v13  ;;  %v4744_v38 = vmax.f32 %v4742_v45, %v4743_v4  ;;  %v4750_v54 = vrot.slane %v4749_v56, 4 }
 0x38d   : > { %v4731_v51 = vrot.slane %v4730_v36, 2  ;;  %v4737_v52 = vmax.f32 %v4735_v58, %v4736_v17  ;;  %vm9383_vm6 = vcmask 392192  }
 0x38e   : > { %v3032_v49 = vcombine.high %v3024_v40, %v3024_v40  ;;  %v3033_v33 = vcombine.high %v3031_v35, %v3031_v35  ;;  %v4868_v6 = vsel %vm3579_vm11, %v3024_v40, -inf  ;;  %v4882_v55 = vsel %vm3579_vm11, %v3031_v35, -inf }
 0x38f   : > { %v4732_v21 = vmax.f32 %v4730_v36, %v4731_v51  ;;  %v4738_v22 = vrot.slane %v4737_v52, 2  ;;  %v4745_v31 = vrot.slane %v4744_v38, 2  ;;  %v4751_v16 = vmax.f32 %v4749_v56, %v4750_v54 }
 0x390   : > { %v4869_v62 = vrot.slane %v4868_v6, 4  ;;  %v4875_v60 = vsel %vm3579_vm11, %v3032_v49, -inf  ;;  %v4883_v42 = vrot.slane %v4882_v55, 4  ;;  %v4889_v61 = vsel %vm3579_vm11, %v3033_v33, -inf }
 0x391   : > { %v4733_v59 = vrot.slane %v4732_v21, 1  ;;  %v4739_v58 = vmax.f32 %v4737_v52, %v4738_v22  ;;  %v4746_v45 = vmax.f32 %v4744_v38, %v4745_v31  ;;  %v4752_v17 = vrot.slane %v4751_v16, 2 }
 0x392   : > { %v4870_v4 = vmax.f32 %v4868_v6, %v4869_v62  ;;  %v4876_v43 = vrot.slane %v4875_v60, 4  ;;  %v4884_v57 = vmax.f32 %v4882_v55, %v4883_v42  ;;  %v4890_v40 = vrot.slane %v4889_v61, 4 }
 0x393   : > { %v4734_v3 = vmax.f32 %v4732_v21, %v4733_v59  ;;  %v4740_v35 = vrot.slane %v4739_v58, 1  ;;  %v4747_v36 = vrot.slane %v4746_v45, 1  ;;  %v4753_v51 = vmax.f32 %v4751_v16, %v4752_v17 }
 0x394   : > { %v4871_v0 = vrot.slane %v4870_v4, 2  ;;  %v4877_v56 = vmax.f32 %v4875_v60, %v4876_v43  ;;  %v4885_v54 = vrot.slane %v4884_v57, 2  ;;  %v4891_v47 = vmax.f32 %v4889_v61, %v4890_v40 }
 0x395   : > { %v4741_v49 = vmax.f32 %v4739_v58, %v4740_v35  ;;  %v4748_v1 = vmax.f32 %v4746_v45, %v4747_v36  ;;  %v4754_v10 = vrot.slane %v4753_v51, 1  ;;  %v5536_v33 = vpack.c.bf16 %v4734_v3, %v4734_v3 }
 0x396   : > { %v4872_v5 = vmax.f32 %v4870_v4, %v4871_v0  ;;  %v4878_v52 = vrot.slane %v4877_v56, 2  ;;  %v4886_v38 = vmax.f32 %v4884_v57, %v4885_v54  ;;  %v4892_v22 = vrot.slane %v4891_v47, 2 }
 0x397   : > { %v4755_v6 = vmax.f32 %v4753_v51, %v4754_v10  ;;  %v5537_v31 = vpack.c.bf16 %v4741_v49, %v4741_v49  ;;  %v6048_v55 = vunpack.c.l.b16 %v5536_v33  ;;  %v2151_v62 = vmax.f32 %v2029_v37, 0.0 }
 0x398   : > { %v4873_v21 = vrot.slane %v4872_v5, 1  ;;  %v4879_v42 = vmax.f32 %v4877_v56, %v4878_v52  ;;  %v4887_v59 = vrot.slane %v4886_v38, 1  ;;  %v4893_v16 = vmax.f32 %v4891_v47, %v4892_v22 }
 0x399   : > { %v5538_v17 = vpack.c.bf16 %v4748_v1, %v4748_v1  ;;  %v5539_v43 = vpack.c.bf16 %v4755_v6, %v4755_v6  ;;  %v6049_v60 = vunpack.c.l.b16 %v5537_v31  ;;  %v6285_v61 = vsel %vm6146_vm15, %v6048_v55, %v13625_v25  ;;  %v11287_v6 = vld [vmem:[%s15554_s3 + $0x8] ss:$0 sps:$4 sm:$0xff]  }
 0x39a   : > { %v4874_v58 = vmax.f32 %v4872_v5, %v4873_v21  ;;  %v4880_v3 = vrot.slane %v4879_v42, 1  ;;  %v4888_v0 = vmax.f32 %v4886_v38, %v4887_v59  ;;  %v4894_v45 = vrot.slane %v4893_v16, 1  ;;  %11230 = vmatprep.subr.msk.bf16.mxu1 %vm6817_vm0, %v11287_v6 }
 0x39b   : > { %v6051_v57 = vunpack.c.l.b16 %v5539_v43  ;;  %v13664_v10 = vsel %vm6148_vm1, %v6049_v60, %v6285_v61  ;;  %v2983_v4 = vcombine.high %v2151_v62, %v2151_v62  ;;  %v2990_v37 = vrot.slane %v2151_v62, %v12402_v13  ;;  %v6670_v60 = vpop.permute.xlu0 %6669 }
 0x39c   : > { %v4881_v40 = vmax.f32 %v4879_v42, %v4880_v3  ;;  %v4895_v35 = vmax.f32 %v4893_v16, %v4894_v45  ;;  %v5556_v47 = vpack.c.bf16 %v4874_v58, %v4874_v58  ;;  %v5558_v1 = vpack.c.bf16 %v4888_v0, %v4888_v0 }
 0x39d   : > { %v6288_v36 = vsel %vm6152_vm4, %v13585_v14, %v6051_v57  ;;  %v2997_v25 = vrot.slane %v2983_v4, %v12402_v13  ;;  %v2998_v5 = vcombine.high %v2990_v37, %v2990_v37  ;;  %v4812_v51 = vsel %vm3579_vm11, %v2990_v37, -inf }
 0x39e   : > { %v13671_v56 = vunpack.c.l.b16 %v5538_v17  ;;  %v6289_v54 = vsel %vm6140_vm12, %v13596_v30, %v6288_v36  ;;  %v5557_v49 = vpack.c.bf16 %v4881_v40, %v4881_v40  ;;  %v5559_v33 = vpack.c.bf16 %v4895_v35, %v4895_v35 }
 0x39f   : > { %v13677_v52 = vsel %vm6142_vm13, %v13589_v28, %v6289_v54  ;;  %v13679_v38 = vunpack.c.l.b16 %v5556_v47  ;;  %v2999_v22 = vcombine.high %v2997_v25, %v2997_v25  ;;  %v4813_v14 = vrot.slane %v4812_v51, 4 }
 0x3a0   : > { %v13684_v31 = vunpack.c.l.b16 %v5557_v49  ;;  %v13686_v55 = vunpack.c.l.b16 %v5558_v1  ;;  %v4819_v30 = vsel %vm3579_vm11, %v2998_v5, -inf  ;;  %v4826_v62 = vsel %vm3579_vm11, %v2997_v25, -inf }
 0x3a1   : > { %v4814_v21 = vmax.f32 %v4812_v51, %v4813_v14  ;;  %v4820_v42 = vrot.slane %v4819_v30, 4  ;;  %v4827_v28 = vrot.slane %v4826_v62, 4  ;;  %v4833_v59 = vsel %vm3579_vm11, %v2999_v22, -inf }
 0x3a2   : > { %v4834_v16 = vrot.slane %v4833_v59, 4  ;;  %v2040_v17 = vadd.f32 %v13614_v46, %v13391_v44  ;;  %v2032_v43 = vadd.f32 %v13614_v46, %v13395_v27  ;;  %v13695_v61 = vunpack.c.l.b16 %v5559_v33 }
 0x3a3   : > { %v4815_v58 = vrot.slane %v4814_v21, 2  ;;  %v4821_v3 = vmax.f32 %v4819_v30, %v4820_v42  ;;  %v4828_v0 = vmax.f32 %v4826_v62, %v4827_v28  ;;  %v6819_v37 = vsel %vm6817_vm0, %v11287_v6, 0 }
 0x3a4   : > { %v4835_v45 = vmax.f32 %v4833_v59, %v4834_v16  ;;  %v2154_v57 = vmax.f32 %v2040_v17, 0.0  ;;  %v2152_v4 = vmax.f32 %v2032_v43, 0.0  ;;  %v13699_v44 = vsel %vm1665_vm9, %v13634_v12, %v6670_v60  ;;  %11141 = vmatpush3.bf16.msra.mxu1 %v6819_v37 }
 0x3a5   : > { %v4816_v40 = vmax.f32 %v4814_v21, %v4815_v58  ;;  %v4822_v35 = vrot.slane %v4821_v3, 2  ;;  %v4829_v47 = vrot.slane %v4828_v0, 2  ;;  %11142 = vmatprep.mubr.msk.bf16.mxu1 %vm6784_vm10, %v13699_v44  ;;  %v6278_v44 = vsel %vm6144_vm14, %v13455_v53, %v13573_v19 }
 0x3a6   : > { %v4836_v27 = vrot.slane %v4835_v45, 2  ;;  %v3034_v1 = vcombine.high %v2154_v57, %v2154_v57  ;;  %v3041_v36 = vrot.slane %v2154_v57, %v12402_v13  ;;  %v3000_v25 = vcombine.high %v2152_v4, %v2152_v4 }
 0x3a7   : > { %v4817_v5 = vrot.slane %v4816_v40, 1  ;;  %v4823_v51 = vmax.f32 %v4821_v3, %v4822_v35  ;;  %v4830_v54 = vmax.f32 %v4828_v0, %v4829_v47  ;;  %v3007_v49 = vrot.slane %v2152_v4, %v12402_v13 }
 0x3a8   : > { %v4837_v33 = vmax.f32 %v4835_v45, %v4836_v27  ;;  %v3048_v22 = vrot.slane %v3034_v1, %v12402_v13  ;;  %v3049_v14 = vcombine.high %v3041_v36, %v3041_v36  ;;  %v4896_v6 = vsel %vm3579_vm11, %v3041_v36, -inf }
 0x3a9   : > { %v4818_v30 = vmax.f32 %v4816_v40, %v4817_v5  ;;  %v4824_v12 = vrot.slane %v4823_v51, 1  ;;  %v4831_v62 = vrot.slane %v4830_v54, 1  ;;  %v4897_v21 = vrot.slane %v4896_v6, 4 }
 0x3aa   : > { %v4838_v42 = vrot.slane %v4837_v33, 1  ;;  %v3050_v28 = vcombine.high %v3048_v22, %v3048_v22  ;;  %v4903_v59 = vsel %vm3579_vm11, %v3049_v14, -inf  ;;  %v4910_v16 = vsel %vm3579_vm11, %v3048_v22, -inf }
 0x3ab   : > { %v4825_v17 = vmax.f32 %v4823_v51, %v4824_v12  ;;  %v4832_v43 = vmax.f32 %v4830_v54, %v4831_v62  ;;  %v5548_v60 = vpack.c.bf16 %v4818_v30, %v4818_v30  ;;  %v4898_v58 = vmax.f32 %v4896_v6, %v4897_v21 }
 0x3ac   : > { %v4839_v3 = vmax.f32 %v4837_v33, %v4838_v42  ;;  %v4904_v0 = vrot.slane %v4903_v59, 4  ;;  %v4911_v45 = vrot.slane %v4910_v16, 4  ;;  %v4917_v57 = vsel %vm3579_vm11, %v3050_v28, -inf  ;;  %v6672_v28 = vpop.permute.xlu1 %6671 }
 0x3ad   : > { %v5549_v4 = vpack.c.bf16 %v4825_v17, %v4825_v17  ;;  %v5550_v37 = vpack.c.bf16 %v4832_v43, %v4832_v43  ;;  %v6060_v40 = vunpack.c.l.b16 %v5548_v60  ;;  %v4899_v35 = vrot.slane %v4898_v58, 2 }
 0x3ae   : > { %v5551_v47 = vpack.c.bf16 %v4839_v3, %v4839_v3  ;;  %v4905_v27 = vmax.f32 %v4903_v59, %v4904_v0  ;;  %v4912_v1 = vmax.f32 %v4910_v16, %v4911_v45  ;;  %v4918_v36 = vrot.slane %v4917_v57, 4 }
 0x3af   : > { %v6061_v5 = vunpack.c.l.b16 %v5549_v4  ;;  %v6062_v14 = vunpack.c.l.b16 %v5550_v37  ;;  %v6295_v51 = vsel %vm6152_vm4, %v6060_v40, %v13652_v23  ;;  %v4900_v54 = vmax.f32 %v4898_v58, %v4899_v35 }
 0x3b0   : > { %v6063_v22 = vunpack.c.l.b16 %v5551_v47  ;;  %v4906_v33 = vrot.slane %v4905_v27, 2  ;;  %v4913_v6 = vrot.slane %v4912_v1, 2  ;;  %v4919_v30 = vmax.f32 %v4917_v57, %v4918_v36 }
 0x3b1   : > { %v6296_v12 = vsel %vm6140_vm12, %v6061_v5, %v6295_v51  ;;  %v4901_v62 = vrot.slane %v4900_v54, 1  ;;  %v3014_v21 = vrot.slane %v3000_v25, %v12402_v13  ;;  %v3015_v42 = vcombine.high %v3007_v49, %v3007_v49  ;;  %v13717_v25 = vpop.f32.mrb[56].mxu0 }
 0x3b2   : > { %v6297_v59 = vsel %vm6142_vm13, %v6062_v14, %v6296_v12  ;;  %v4907_v16 = vmax.f32 %v4905_v27, %v4906_v33  ;;  %v4914_v17 = vmax.f32 %v4912_v1, %v4913_v6  ;;  %v4920_v43 = vrot.slane %v4919_v30, 2 }
 0x3b3   : > { %v4902_v60 = vmax.f32 %v4900_v54, %v4901_v62  ;;  %v3016_v3 = vcombine.high %v3014_v21, %v3014_v21  ;;  %v4840_v23 = vsel %vm3579_vm11, %v3007_v49, -inf  ;;  %v4847_v58 = vsel %vm3579_vm11, %v3015_v42, -inf }
 0x3b4   : > { %v4908_v0 = vrot.slane %v4907_v16, 1  ;;  %v4915_v45 = vrot.slane %v4914_v17, 1  ;;  %v4841_v57 = vrot.slane %v4840_v23, 4  ;;  %v6736_v4 = vsel %vm1665_vm9, %v13640_v11, %v6672_v28 }
 0x3b5   : > { %v5560_v37 = vpack.c.bf16 %v4902_v60, %v4902_v60  ;;  %v4848_v40 = vrot.slane %v4847_v58, 4  ;;  %v4854_v35 = vsel %vm3579_vm11, %v3014_v21, -inf  ;;  %v4861_v47 = vsel %vm3579_vm11, %v3016_v3, -inf  ;;  %11143 = vmatmul.mubr.msk.bf16.vlgmr.msra.gmra.mrb[4].mxu1 %vm6784_vm10, %v6736_v4 }
 0x3b6   : > { %v4909_v27 = vmax.f32 %v4907_v16, %v4908_v0  ;;  %v4916_v1 = vmax.f32 %v4914_v17, %v4915_v45  ;;  %v4842_v36 = vmax.f32 %v4840_v23, %v4841_v57  ;;  %v4855_v49 = vrot.slane %v4854_v35, 4  ;;  %v15630_v0 = vld [vmem:[#allocation18_spill] sm:$0xff] }
 0x3b7   : > { %v13721_v5 = vmax.f32 %v4919_v30, %v4920_v43  ;;  %v4849_v14 = vmax.f32 %v4847_v58, %v4848_v40  ;;  %v4862_v51 = vrot.slane %v4861_v47, 4  ;;  %v6298_v54 = vsel %vm6144_vm14, %v6063_v22, %v6297_v59 }
 0x3b8   : > { %v5561_v33 = vpack.c.bf16 %v4909_v27, %v4909_v27  ;;  %v13724_v11 = vunpack.c.l.b16 %v5560_v37  ;;  %v4843_v6 = vrot.slane %v4842_v36, 2  ;;  %v4856_v12 = vmax.f32 %v4854_v35, %v4855_v49 }
 0x3b9   : > { %v4850_v62 = vrot.slane %v4849_v14, 2  ;;  %v4863_v42 = vmax.f32 %v4861_v47, %v4862_v51  ;;  %v6260_v21 = vsel %vm6150_vm5, %v13424_v9, %v13419_v34  ;;  %v5562_v28 = vpack.c.bf16 %v4916_v1, %v4916_v1 }
 0x3ba   : > { %v13729_v16 = vunpack.c.l.b16 %v5561_v33  ;;  %v4844_v30 = vmax.f32 %v4842_v36, %v4843_v6  ;;  %v4857_v17 = vrot.slane %v4856_v12, 2  ;;  %v6264_v43 = vsel %vm6144_vm14, %v13369_v18, %v13437_v50 }
 0x3bb   : > { %v4851_v22 = vmax.f32 %v4849_v14, %v4850_v62  ;;  %v4864_v59 = vrot.slane %v4863_v42, 2  ;;  %v6274_v34 = vsel %vm6150_vm5, %v13583_v2, %v13556_v15  ;;  %v6265_v3 = vsel %vm6146_vm15, %v13404_v63, %v6264_v43  ;;  %v15631_v15 = vld [vmem:[#allocation19_spill] sm:$0xff] }
 0x3bc   : > { %v4845_v9 = vrot.slane %v4844_v30, 1  ;;  %v4858_v60 = vmax.f32 %v4856_v12, %v4857_v17  ;;  %v6266_v45 = vsel %vm6148_vm1, %v15630_v0, %v6265_v3  ;;  %v6279_v18 = vsel %vm6146_vm15, %v13479_v29, %v6278_v44 }
 0x3bd   : > { %v4852_v23 = vrot.slane %v4851_v22, 1  ;;  %v4865_v58 = vmax.f32 %v4863_v42, %v4864_v59  ;;  %v6267_v2 = vsel %vm6150_vm5, %v15631_v15, %v6266_v45  ;;  %v6280_v63 = vsel %vm6148_vm1, %v13481_v7, %v6279_v18  ;;  %v13769_v42 = vpop.f32.mrb[57].mxu0 }
 0x3be   : > { %v4846_v50 = vmax.f32 %v4844_v30, %v4845_v9  ;;  %v4859_v57 = vrot.slane %v4858_v60, 1  ;;  %v6281_v53 = vsel %vm6150_vm5, %v13536_v20, %v6280_v63  ;;  %v6375_v19 = vpack.c.b16 %v6267_v2, %v6260_v21 }
 0x3bf   : > { %v4853_v4 = vmax.f32 %v4851_v22, %v4852_v23  ;;  %v4866_v37 = vrot.slane %v4865_v58, 1  ;;  %v13755_v47 = vpack.c.b16 %v6281_v53, %v6274_v34  ;;  %v4698_v29 = vrot.slane %v13469_v8, 1 }
 0x3c0   : > { %v4860_v40 = vmax.f32 %v4858_v60, %v4859_v57  ;;  %v5552_v35 = vpack.c.bf16 %v4846_v50, %v4846_v50  ;;  %v13758_v27 = vunpack.c.l.b16 %v5562_v28  ;;  %v13762_v49 = vsel %vm12825_vm8, 0, %v6375_v19 }
 0x3c1   : > { %15632 = vst [vmem:[#allocation18_spill] sm:$0xff] %v13755_v47  ;;  %v4867_v1 = vmax.f32 %v4865_v58, %v4866_v37  ;;  %v5553_v36 = vpack.c.bf16 %v4853_v4, %v4853_v4  ;;  %15633 = vst [vmem:[#allocation19_spill] sm:$0xff] %v13762_v49  ;;  %v6504_v51 = vshll.u32 %v13762_v49, 16  ;;  %v2053_v20 = vadd.f32 %v13614_v46, %v13457_v48  ;;  %v13787_v58 = vpop.f32.mrb[58].mxu0 }
 0x3c2   : > { %v5554_v7 = vpack.c.bf16 %v4860_v40, %v4860_v40  ;;  %v6064_v14 = vunpack.c.l.b16 %v5552_v35  ;;  %v6509_v12 = vshll.u32 %v13755_v47, 16  ;;  %v4699_v62 = vmax.f32 %v13469_v8, %v4698_v29 }
 0x3c3   : > { %v5555_v33 = vpack.c.bf16 %v4867_v1, %v4867_v1  ;;  %v6065_v6 = vunpack.c.l.b16 %v5553_v36  ;;  %v6502_v28 = vshrl.u32 %v13762_v49, 16  ;;  %v6506_v30 = vrot.slane %v6504_v51, 1  ;;  %v13813_v36 = vpop.f32.mrb[59].mxu0 }
 0x3c4   : > { %v6299_v21 = vsel %vm6146_vm15, %v6064_v14, %v6298_v54  ;;  %v6513_v17 = vshrl.u32 %v13755_v47, 16  ;;  %v6511_v48 = vrot.slane %v6509_v12, 1  ;;  %v10983_v43 = vpack.c.bf16 %v4699_v62, %v4699_v62  ;;  %v13821_v62 = vpop.f32.mrb[0].mxu1 }
 0x3c5   : > { %v6067_v22 = vunpack.c.l.b16 %v5555_v33  ;;  %v13775_v59 = vsel %vm6148_vm1, %v6065_v6, %v6299_v21  ;;  %v6507_v34 = vor.u32 %v6506_v30, %v6502_v28  ;;  %v2157_v9 = vmax.f32 %v2053_v20, 0.0 }
 0x3c6   : > { %v6649_v60 = vrot.slane %v13762_v49, 1  ;;  %v6650_v8 = vrot.slane %v13755_v47, 1  ;;  %v13783_v3 = vsel %vm12825_vm8, %v10983_v43, 0  ;;  %v6515_v44 = vor.u32 %v6513_v17, %v6511_v48 }
 0x3c7   : > { %v6302_v54 = vsel %vm6152_vm4, %v13679_v38, %v6067_v22  ;;  %v2045_v23 = vadd.f32 %v13614_v46, %v13527_v26  ;;  %v6512_v45 = vsel %vm610_vm3, %v6507_v34, %v6511_v48  ;;  %v6517_v18 = vshll.u32 %v13783_v3, 16 }
 0x3c8   : > { %v6303_v0 = vsel %vm6140_vm12, %v13684_v31, %v6302_v54  ;;  %v3085_v50 = vcombine.high %v2157_v9, %v2157_v9  ;;  %v13793_v57 = vunpack.c.l.b16 %v5554_v7  ;;  %6597 = vrot.lane.b32.xlu0 %v6512_v45, %s11376_s16  ;;  %v3092_v26 = vrot.slane %v2157_v9, %v12402_v13 }
 0x3c9   : > { %v13797_v38 = vsel %vm6142_vm13, %v13686_v55, %v6303_v0  ;;  %v2155_v15 = vmax.f32 %v2045_v23, 0.0  ;;  %v6519_v2 = vrot.slane %v6517_v18, 1  ;;  %v6651_v31 = vsel %vm963_vm2, %v6649_v60, %v6650_v8 }
 0x3ca   : > { %v3099_v63 = vrot.slane %v3085_v50, %v12402_v13  ;;  %v13807_v4 = vadd.f32 %v13614_v46, %v13530_v41  ;;  %v3100_v37 = vcombine.high %v3092_v26, %v3092_v26  ;;  %v4980_v55 = vsel %vm3579_vm11, %v3092_v26, -inf }
 0x3cb   : > { %v3051_v53 = vcombine.high %v2155_v15, %v2155_v15  ;;  %v3058_v19 = vrot.slane %v2155_v15, %v12402_v13  ;;  %v6520_v40 = vsel %vm610_vm3, %v6515_v44, %v6519_v2  ;;  %v4981_v29 = vrot.slane %v4980_v55, 4 }
 0x3cc   : > { %v3101_v35 = vcombine.high %v3099_v63, %v3099_v63  ;;  %v4994_v1 = vsel %vm3579_vm11, %v3099_v63, -inf  ;;  %6599 = vrot.lane.b32.xlu1 %v6520_v40, %s11376_s16  ;;  %v4987_v7 = vsel %vm3579_vm11, %v3100_v37, -inf  ;;  %6685 = vrot.lane.b32.xlu0 %v6651_v31, %s11375_s15 }
 0x3cd   : > { %v4995_v41 = vrot.slane %v4994_v1, 4  ;;  %v3065_v14 = vrot.slane %v3051_v53, %v12402_v13  ;;  %v3066_v51 = vcombine.high %v3058_v19, %v3058_v19  ;;  %v4982_v20 = vmax.f32 %v4980_v55, %v4981_v29  ;;  %v13826_v29 = vpop.f32.mrb[1].mxu1 }
 0x3ce   : > { %v4988_v33 = vrot.slane %v4987_v7, 4  ;;  %v5001_v6 = vsel %vm3579_vm11, %v3101_v35, -inf  ;;  %v4924_v12 = vsel %vm3579_vm11, %v3058_v19, -inf }
 0x3cf   : > { %v4996_v21 = vmax.f32 %v4994_v1, %v4995_v41  ;;  %v5002_v28 = vrot.slane %v5001_v6, 4  ;;  %v3067_v30 = vcombine.high %v3065_v14, %v3065_v14  ;;  %v4925_v17 = vrot.slane %v4924_v12, 4 }
 0x3d0   : > { %v4983_v22 = vrot.slane %v4982_v20, 2  ;;  %v4989_v48 = vmax.f32 %v4987_v7, %v4988_v33  ;;  %v4931_v43 = vsel %vm3579_vm11, %v3066_v51, -inf  ;;  %v4938_v34 = vsel %vm3579_vm11, %v3065_v14, -inf }
 0x3d1   : > { %v4997_v9 = vrot.slane %v4996_v21, 2  ;;  %v5003_v60 = vmax.f32 %v5001_v6, %v5002_v28  ;;  %v4926_v54 = vmax.f32 %v4924_v12, %v4925_v17  ;;  %v4932_v44 = vrot.slane %v4931_v43, 4 }
 0x3d2   : > { %v4984_v23 = vmax.f32 %v4982_v20, %v4983_v22  ;;  %v4990_v0 = vrot.slane %v4989_v48, 2  ;;  %v4939_v45 = vrot.slane %v4938_v34, 4  ;;  %v4945_v18 = vsel %vm3579_vm11, %v3067_v30, -inf }
 0x3d3   : > { %v4998_v50 = vmax.f32 %v4996_v21, %v4997_v9  ;;  %v5004_v26 = vrot.slane %v5003_v60, 2  ;;  %v4927_v15 = vrot.slane %v4926_v54, 2  ;;  %v4933_v2 = vmax.f32 %v4931_v43, %v4932_v44 }
 0x3d4   : > { %v4985_v63 = vrot.slane %v4984_v23, 1  ;;  %v4991_v31 = vmax.f32 %v4989_v48, %v4990_v0  ;;  %v4940_v37 = vmax.f32 %v4938_v34, %v4939_v45  ;;  %v4946_v55 = vrot.slane %v4945_v18, 4 }
 0x3d5   : > { %v4999_v53 = vrot.slane %v4998_v50, 1  ;;  %v5005_v19 = vmax.f32 %v5003_v60, %v5004_v26  ;;  %v4928_v40 = vmax.f32 %v4926_v54, %v4927_v15  ;;  %v4934_v35 = vrot.slane %v4933_v2, 2 }
 0x3d6   : > { %v4986_v1 = vmax.f32 %v4984_v23, %v4985_v63  ;;  %v4992_v7 = vrot.slane %v4991_v31, 1  ;;  %v4941_v41 = vrot.slane %v4940_v37, 2  ;;  %v4947_v14 = vmax.f32 %v4945_v18, %v4946_v55  ;;  %v13831_v18 = vpop.f32.mrb[2].mxu1  ;;  %v6586_v55 = vpop.permute.xlu0 %6585 }
 0x3d7   : > { %v5000_v51 = vmax.f32 %v4998_v50, %v4999_v53  ;;  %v5006_v20 = vrot.slane %v5005_v19, 1  ;;  %v4929_v33 = vrot.slane %v4928_v40, 1  ;;  %v4935_v6 = vmax.f32 %v4933_v2, %v4934_v35 }
 0x3d8   : > { %v4993_v12 = vmax.f32 %v4991_v31, %v4992_v7  ;;  %v5572_v21 = vpack.c.bf16 %v4986_v1, %v4986_v1  ;;  %v4942_v28 = vmax.f32 %v4940_v37, %v4941_v41  ;;  %v4948_v30 = vrot.slane %v4947_v14, 2 }
 0x3d9   : > { %v5007_v17 = vmax.f32 %v5005_v19, %v5006_v20  ;;  %v5574_v22 = vpack.c.bf16 %v5000_v51, %v5000_v51  ;;  %v4930_v48 = vmax.f32 %v4928_v40, %v4929_v33  ;;  %v4936_v43 = vrot.slane %v4935_v6, 1  ;;  %v15634_v20 = vld [vmem:[#allocation6_spill] sm:$0xff] }
 0x3da   : > { %v5573_v34 = vpack.c.bf16 %v4993_v12, %v4993_v12  ;;  %v4943_v9 = vrot.slane %v4942_v28, 1  ;;  %v4949_v60 = vmax.f32 %v4947_v14, %v4948_v30  ;;  %v6652_v54 = vrot.slane %v13783_v3, 1 }
 0x3db   : > { %v5575_v44 = vpack.c.bf16 %v5007_v17, %v5007_v17  ;;  %v13829_v23 = vunpack.c.l.b16 %v5572_v21  ;;  %v4937_v0 = vmax.f32 %v4935_v6, %v4936_v43  ;;  %v5564_v45 = vpack.c.bf16 %v4930_v48, %v4930_v48 }
 0x3dc   : > { %v13833_v50 = vunpack.c.l.b16 %v5574_v22  ;;  %v4944_v26 = vmax.f32 %v4942_v28, %v4943_v9  ;;  %v4950_v15 = vrot.slane %v4949_v60, 1  ;;  %v2158_v2 = vmax.f32 %v13807_v4, 0.0 }
 0x3dd   : > { %v13836_v63 = vunpack.c.l.b16 %v5573_v34  ;;  %v13838_v31 = vunpack.c.l.b16 %v5575_v44  ;;  %v5565_v37 = vpack.c.bf16 %v4937_v0, %v4937_v0  ;;  %v6653_v3 = vsel %vm963_vm2, %v6650_v8, %v6652_v54 }
 0x3de   : > { %v4951_v53 = vmax.f32 %v4949_v60, %v4950_v15  ;;  %v5566_v19 = vpack.c.bf16 %v4944_v26, %v4944_v26  ;;  %v3102_v40 = vcombine.high %v2158_v2, %v2158_v2  ;;  %v3109_v35 = vrot.slane %v2158_v2, %v12402_v13  ;;  %6687 = vrot.lane.b32.xlu1 %v6653_v3, %s11375_s15 }
 0x3df   : > { %v6076_v1 = vunpack.c.l.b16 %v5564_v45  ;;  %v6077_v7 = vunpack.c.l.b16 %v5565_v37  ;;  %v2048_v4 = vadd.f32 %v13614_v46, %v13553_v39  ;;  %v2069_v41 = vadd.f32 %v13614_v46, %v13587_v32 }
 0x3e0   : > { %v5567_v14 = vpack.c.bf16 %v4951_v53, %v4951_v53  ;;  %v3116_v51 = vrot.slane %v3102_v40, %v12402_v13  ;;  %v3117_v8 = vcombine.high %v3109_v35, %v3109_v35  ;;  %v13852_v33 = vsel %vm1535_vm7, %v15634_v20, %v6586_v55 }
 0x3e1   : > { %v6078_v6 = vunpack.c.l.b16 %v5566_v19  ;;  %v6309_v12 = vsel %vm6140_vm12, %v6077_v7, %v6076_v1  ;;  %v5008_v21 = vsel %vm3579_vm11, %v3109_v35, -inf  ;;  %v2156_v28 = vmax.f32 %v2048_v4, 0.0 }
 0x3e2   : > { %v13856_v30 = vunpack.c.l.b16 %v5567_v14  ;;  %v3118_v39 = vcombine.high %v3116_v51, %v3116_v51  ;;  %v5009_v17 = vrot.slane %v5008_v21, 4  ;;  %v13858_v22 = vmax.f32 %v2069_v41, 0.0 }
 0x3e3   : > { %v5015_v32 = vsel %vm3579_vm11, %v3117_v8, -inf  ;;  %v5022_v48 = vsel %vm3579_vm11, %v3116_v51, -inf  ;;  %v3068_v43 = vcombine.high %v2156_v28, %v2156_v28  ;;  %v3075_v34 = vrot.slane %v2156_v28, %v12402_v13 }
 0x3e4   : > { %v5010_v9 = vmax.f32 %v5008_v21, %v5009_v17  ;;  %v5016_v60 = vrot.slane %v5015_v32, 4  ;;  %v5023_v54 = vrot.slane %v5022_v48, 4  ;;  %v5029_v44 = vsel %vm3579_vm11, %v3118_v39, -inf }
 0x3e5   : > { %v5030_v0 = vrot.slane %v5029_v44, 4  ;;  %v3082_v45 = vrot.slane %v3068_v43, %v12402_v13  ;;  %v3083_v26 = vcombine.high %v3075_v34, %v3075_v34  ;;  %v4952_v15 = vsel %vm3579_vm11, %v3075_v34, -inf }
 0x3e6   : > { %v5011_v2 = vrot.slane %v5010_v9, 2  ;;  %v5017_v37 = vmax.f32 %v5015_v32, %v5016_v60  ;;  %v5024_v3 = vmax.f32 %v5022_v48, %v5023_v54  ;;  %v4953_v55 = vrot.slane %v4952_v15, 4  ;;  %v13869_v32 = vpop.f32.mrb[3].mxu1 }
 0x3e7   : > { %v5031_v53 = vmax.f32 %v5029_v44, %v5030_v0  ;;  %v3084_v19 = vcombine.high %v3082_v45, %v3082_v45  ;;  %v4959_v40 = vsel %vm3579_vm11, %v3083_v26, -inf  ;;  %v4966_v35 = vsel %vm3579_vm11, %v3082_v45, -inf }
 0x3e8   : > { %v5012_v1 = vmax.f32 %v5010_v9, %v5011_v2  ;;  %v5018_v7 = vrot.slane %v5017_v37, 2  ;;  %v5025_v4 = vrot.slane %v5024_v3, 2  ;;  %v4954_v41 = vmax.f32 %v4952_v15, %v4953_v55 }
 0x3e9   : > { %v5032_v14 = vrot.slane %v5031_v53, 2  ;;  %v4960_v51 = vrot.slane %v4959_v40, 4  ;;  %v4967_v8 = vrot.slane %v4966_v35, 4  ;;  %v4973_v20 = vsel %vm3579_vm11, %v3084_v19, -inf }
 0x3ea   : > { %v5013_v21 = vrot.slane %v5012_v1, 1  ;;  %v5019_v28 = vmax.f32 %v5017_v37, %v5018_v7  ;;  %v5026_v39 = vmax.f32 %v5024_v3, %v5025_v4  ;;  %v4955_v17 = vrot.slane %v4954_v41, 2 }
 0x3eb   : > { %v5033_v48 = vmax.f32 %v5031_v53, %v5032_v14  ;;  %v4961_v43 = vmax.f32 %v4959_v40, %v4960_v51  ;;  %v4968_v34 = vmax.f32 %v4966_v35, %v4967_v8  ;;  %v4974_v60 = vrot.slane %v4973_v20, 4 }
 0x3ec   : > { %v5014_v54 = vmax.f32 %v5012_v1, %v5013_v21  ;;  %v5020_v9 = vrot.slane %v5019_v28, 1  ;;  %v5027_v44 = vrot.slane %v5026_v39, 1  ;;  %v4956_v0 = vmax.f32 %v4954_v41, %v4955_v17  ;;  %v6588_v17 = vpop.permute.xlu1 %6587 }
 0x3ed   : > { %v5034_v45 = vrot.slane %v5033_v48, 1  ;;  %v4962_v26 = vrot.slane %v4961_v43, 2  ;;  %v4969_v15 = vrot.slane %v4968_v34, 2  ;;  %v4975_v2 = vmax.f32 %v4973_v20, %v4974_v60 }
 0x3ee   : > { %v5021_v55 = vmax.f32 %v5019_v28, %v5020_v9  ;;  %v5028_v19 = vmax.f32 %v5026_v39, %v5027_v44  ;;  %v5576_v47 = vpack.c.bf16 %v5014_v54, %v5014_v54  ;;  %v4957_v37 = vrot.slane %v4956_v0, 1  ;;  %v15635_v44 = vld [vmem:[#allocation7_spill] sm:$0xff] }
 0x3ef   : > { %v5035_v3 = vmax.f32 %v5033_v48, %v5034_v45  ;;  %v4963_v7 = vmax.f32 %v4961_v43, %v4962_v26  ;;  %v4970_v4 = vmax.f32 %v4968_v34, %v4969_v15  ;;  %v4976_v49 = vrot.slane %v4975_v2, 2  ;;  %v15636_v45 = vld [vmem:[#allocation8_spill] sm:$0xff] }
 0x3f0   : > { %v6310_v53 = vsel %vm6142_vm13, %v6078_v6, %v6309_v12  ;;  %v5577_v40 = vpack.c.bf16 %v5021_v55, %v5021_v55  ;;  %v5578_v35 = vpack.c.bf16 %v5028_v19, %v5028_v19  ;;  %v4958_v1 = vmax.f32 %v4956_v0, %v4957_v37 }
 0x3f1   : > { %v5579_v14 = vpack.c.bf16 %v5035_v3, %v5035_v3  ;;  %v4964_v51 = vrot.slane %v4963_v7, 1  ;;  %v4971_v41 = vrot.slane %v4970_v4, 1  ;;  %v4977_v8 = vmax.f32 %v4975_v2, %v4976_v49 }
 0x3f2   : > { %v13872_v21 = vunpack.c.l.b16 %v5576_v47  ;;  %v13874_v20 = vunpack.c.l.b16 %v5577_v40  ;;  %v13876_v28 = vunpack.c.l.b16 %v5578_v35  ;;  %v5568_v39 = vpack.c.bf16 %v4958_v1, %v4958_v1 }
 0x3f3   : > { %v4965_v48 = vmax.f32 %v4963_v7, %v4964_v51  ;;  %v13878_v43 = vmax.f32 %v4970_v4, %v4971_v41  ;;  %v4978_v34 = vrot.slane %v4977_v8, 1  ;;  %v6311_v6 = vsel %vm6144_vm14, %v13856_v30, %v6310_v53 }
 0x3f4   : > { %v13882_v12 = vunpack.c.l.b16 %v5579_v14  ;;  %v6080_v60 = vunpack.c.l.b16 %v5568_v39  ;;  %v3153_v47 = vcombine.high %v13858_v22, %v13858_v22  ;;  %v3160_v49 = vrot.slane %v13858_v22, %v12402_v13 }
 0x3f5   : > { %v4979_v54 = vmax.f32 %v4977_v8, %v4978_v34  ;;  %v5569_v9 = vpack.c.bf16 %v4965_v48, %v4965_v48  ;;  %v13890_v0 = vsel %vm1535_vm7, %v15635_v44, %v6588_v17  ;;  %v2061_v26 = vadd.f32 %v13614_v46, %v15636_v45 }
 0x3f6   : > { %v6312_v30 = vsel %vm6146_vm15, %v6080_v60, %v6311_v6  ;;  %v3167_v15 = vrot.slane %v3153_v47, %v12402_v13  ;;  %v3168_v2 = vcombine.high %v3160_v49, %v3160_v49  ;;  %v5092_v55 = vsel %vm3579_vm11, %v3160_v49, -inf }
 0x3f7   : > { %v5570_v19 = vpack.c.bf16 %v13878_v43, %v13878_v43  ;;  %v5571_v22 = vpack.c.bf16 %v4979_v54, %v4979_v54  ;;  %v6081_v37 = vunpack.c.l.b16 %v5569_v9  ;;  %v5093_v3 = vrot.slane %v5092_v55, 4 }
 0x3f8   : > { %v3169_v7 = vcombine.high %v3167_v15, %v3167_v15  ;;  %v5099_v4 = vsel %vm3579_vm11, %v3168_v2, -inf  ;;  %v5106_v53 = vsel %vm3579_vm11, %v3167_v15, -inf  ;;  %v2159_v40 = vmax.f32 %v2061_v26, 0.0 }
 0x3f9   : > { %v6083_v46 = vunpack.c.l.b16 %v5571_v22  ;;  %v13902_v35 = vsel %vm6148_vm1, %v6081_v37, %v6312_v30  ;;  %v5094_v1 = vmax.f32 %v5092_v55, %v5093_v3  ;;  %v5100_v14 = vrot.slane %v5099_v4, 4 }
 0x3fa   : > { %v5107_v51 = vrot.slane %v5106_v53, 4  ;;  %v5113_v41 = vsel %vm3579_vm11, %v3169_v7, -inf  ;;  %v3119_v8 = vcombine.high %v2159_v40, %v2159_v40  ;;  %v3126_v39 = vrot.slane %v2159_v40, %v12402_v13 }
 0x3fb   : > { %v6315_v17 = vsel %vm6152_vm4, %v13829_v23, %v6083_v46  ;;  %v5095_v48 = vrot.slane %v5094_v1, 2  ;;  %v5101_v43 = vmax.f32 %v5099_v4, %v5100_v14  ;;  %v5114_v34 = vrot.slane %v5113_v41, 4 }
 0x3fc   : > { %v6316_v6 = vsel %vm6140_vm12, %v13836_v63, %v6315_v17  ;;  %v5108_v60 = vmax.f32 %v5106_v53, %v5107_v51  ;;  %v3133_v47 = vrot.slane %v3119_v8, %v12402_v13  ;;  %v3134_v49 = vcombine.high %v3126_v39, %v3126_v39 }
 0x3fd   : > { %v13913_v54 = vsel %vm6142_vm13, %v13833_v50, %v6316_v6  ;;  %v5096_v9 = vmax.f32 %v5094_v1, %v5095_v48  ;;  %v5102_v44 = vrot.slane %v5101_v43, 2  ;;  %v5115_v45 = vmax.f32 %v5113_v41, %v5114_v34 }
 0x3fe   : > { %v5109_v26 = vrot.slane %v5108_v60, 2  ;;  %v3135_v30 = vcombine.high %v3133_v47, %v3133_v47  ;;  %v5036_v23 = vsel %vm3579_vm11, %v3126_v39, -inf  ;;  %v5043_v15 = vsel %vm3579_vm11, %v3134_v49, -inf }
 0x3ff   : > { %v5097_v2 = vrot.slane %v5096_v9, 1  ;;  %v5103_v55 = vmax.f32 %v5101_v43, %v5102_v44  ;;  %v5116_v63 = vrot.slane %v5115_v45, 2  ;;  %v5037_v22 = vrot.slane %v5036_v23, 4 }
 0x400   : > { %v5110_v37 = vmax.f32 %v5108_v60, %v5109_v26  ;;  %v5044_v3 = vrot.slane %v5043_v15, 4  ;;  %v5050_v7 = vsel %vm3579_vm11, %v3133_v47, -inf  ;;  %v5057_v50 = vsel %vm3579_vm11, %v3135_v30, -inf }
 0x401   : > { %v5098_v4 = vmax.f32 %v5096_v9, %v5097_v2  ;;  %v5104_v53 = vrot.slane %v5103_v55, 1  ;;  %v5117_v40 = vmax.f32 %v5115_v45, %v5116_v63  ;;  %v5038_v46 = vmax.f32 %v5036_v23, %v5037_v22  ;;  %v13930_v63 = vld [vmem:[%s15553_s2] ss:$0 sm:$0xff] }
 0x402   : > { %v5111_v1 = vrot.slane %v5110_v37, 1  ;;  %v5045_v14 = vmax.f32 %v5043_v15, %v5044_v3  ;;  %v5051_v51 = vrot.slane %v5050_v7, 4  ;;  %v5058_v41 = vrot.slane %v5057_v50, 4 }
 0x403   : > { %v5105_v8 = vmax.f32 %v5103_v55, %v5104_v53  ;;  %v5118_v39 = vrot.slane %v5117_v40, 1  ;;  %v5588_v17 = vpack.c.bf16 %v5098_v4, %v5098_v4  ;;  %v5039_v48 = vrot.slane %v5038_v46, 2 }
 0x404   : > { %v5112_v43 = vmax.f32 %v5110_v37, %v5111_v1  ;;  %v5046_v34 = vrot.slane %v5045_v14, 2  ;;  %v5052_v6 = vmax.f32 %v5050_v7, %v5051_v51  ;;  %v5059_v60 = vmax.f32 %v5057_v50, %v5058_v41  ;;  %v6674_v37 = vpop.permute.xlu0 %6673  ;;  %v15638_v1 = vld [vmem:[#allocation14_spill] sm:$0xff]  ;;  %v6676_v51 = vpop.permute.xlu1 %6675 }
 0x405   : > { %v13919_v49 = vunpack.c.l.b16 %v5570_v19  ;;  %v13921_v47 = vmax.f32 %v5117_v40, %v5118_v39  ;;  %v5589_v9 = vpack.c.bf16 %v5105_v8, %v5105_v8  ;;  %v5040_v44 = vmax.f32 %v5038_v46, %v5039_v48  ;;  %v15637_v19 = vld [vmem:[#allocation9_spill] sm:$0xff] }
 0x406   : > { %v5590_v45 = vpack.c.bf16 %v5112_v43, %v5112_v43  ;;  %v5047_v26 = vmax.f32 %v5045_v14, %v5046_v34  ;;  %v5053_v30 = vrot.slane %v5052_v6, 2  ;;  %v5060_v23 = vrot.slane %v5059_v60, 2 }
 0x407   : > { %v5591_v15 = vpack.c.bf16 %v13921_v47, %v13921_v47  ;;  %v13925_v2 = vunpack.c.l.b16 %v5588_v17  ;;  %v5041_v55 = vrot.slane %v5040_v44, 1  ;;  %v2072_v22 = vadd.f32 %v13930_v63, %v15637_v19 }
 0x408   : > { %v13934_v3 = vunpack.c.l.b16 %v5589_v9  ;;  %v5048_v7 = vrot.slane %v5047_v26, 1  ;;  %v5054_v50 = vmax.f32 %v5052_v6, %v5053_v30  ;;  %v5061_v4 = vmax.f32 %v5059_v60, %v5060_v23 }
 0x409   : > { %v13936_v53 = vunpack.c.l.b16 %v5590_v45  ;;  %v5042_v40 = vmax.f32 %v5040_v44, %v5041_v55  ;;  %v2162_v46 = vmax.f32 %v2072_v22, 0.0  ;;  %v2064_v14 = vadd.f32 %v13930_v63, %v15638_v1 }
 0x40a   : > { %v5049_v41 = vmax.f32 %v5047_v26, %v5048_v7  ;;  %v5055_v8 = vrot.slane %v5054_v50, 1  ;;  %v5062_v39 = vrot.slane %v5061_v4, 1  ;;  %v6738_v17 = vsel %vm1665_vm9, %v13852_v33, %v6674_v37 }
 0x40b   : > { %v5580_v48 = vpack.c.bf16 %v5042_v40, %v5042_v40  ;;  %v3170_v43 = vcombine.high %v2162_v46, %v2162_v46  ;;  %v3177_v34 = vrot.slane %v2162_v46, %v12402_v13  ;;  %v2160_v6 = vmax.f32 %v2064_v14, 0.0  ;;  %11146 = vmatprep.mubr.msk.bf16.mxu1 %vm6784_vm10, %v6738_v17 }
 0x40c   : > { %v5056_v60 = vmax.f32 %v5054_v50, %v5055_v8  ;;  %v5063_v9 = vmax.f32 %v5061_v4, %v5062_v39  ;;  %v5581_v44 = vpack.c.bf16 %v5049_v41, %v5049_v41  ;;  %v6740_v45 = vsel %vm1665_vm9, %v13890_v0, %v6676_v51 }
 0x40d   : > { %v6092_v30 = vunpack.c.l.b16 %v5580_v48  ;;  %v3184_v26 = vrot.slane %v3170_v43, %v12402_v13  ;;  %v3185_v23 = vcombine.high %v3177_v34, %v3177_v34  ;;  %v5120_v55 = vsel %vm3579_vm11, %v3177_v34, -inf  ;;  %11147 = vmatmul.mubr.msk.bf16.gmra.mrb[8].mxu1 %vm6784_vm10, %v6740_v45 }
 0x40e   : > { %v5582_v33 = vpack.c.bf16 %v5056_v60, %v5056_v60  ;;  %v5583_v19 = vpack.c.bf16 %v5063_v9, %v5063_v9  ;;  %v6093_v22 = vunpack.c.l.b16 %v5581_v44  ;;  %v5121_v37 = vrot.slane %v5120_v55, 4 }
 0x40f   : > { %v6322_v7 = vsel %vm6152_vm4, %v6092_v30, %v13882_v12  ;;  %v3186_v50 = vcombine.high %v3184_v26, %v3184_v26  ;;  %v5127_v4 = vsel %vm3579_vm11, %v3185_v23, -inf  ;;  %v5134_v0 = vsel %vm3579_vm11, %v3184_v26, -inf }
 0x410   : > { %v6094_v40 = vunpack.c.l.b16 %v5582_v33  ;;  %v6095_v46 = vunpack.c.l.b16 %v5583_v19  ;;  %v6323_v1 = vsel %vm6140_vm12, %v6093_v22, %v6322_v7  ;;  %v5122_v14 = vmax.f32 %v5120_v55, %v5121_v37 }
 0x411   : > { %v5128_v51 = vrot.slane %v5127_v4, 4  ;;  %v5135_v41 = vrot.slane %v5134_v0, 4  ;;  %v5141_v8 = vsel %vm3579_vm11, %v3186_v50, -inf  ;;  %v3136_v39 = vcombine.high %v2160_v6, %v2160_v6 }
 0x412   : > { %v6324_v17 = vsel %vm6142_vm13, %v6094_v40, %v6323_v1  ;;  %v5123_v48 = vrot.slane %v5122_v14, 2  ;;  %v5142_v43 = vrot.slane %v5141_v8, 4  ;;  %v3143_v12 = vrot.slane %v2160_v6, %v12402_v13 }
 0x413   : > { %v5129_v34 = vmax.f32 %v5127_v4, %v5128_v51  ;;  %v5136_v60 = vmax.f32 %v5134_v0, %v5135_v41  ;;  %v3150_v9 = vrot.slane %v3136_v39, %v12402_v13  ;;  %v13959_v44 = vsel %vm6144_vm14, %v6095_v46, %v6324_v17 }
 0x414   : > { %v5124_v45 = vmax.f32 %v5122_v14, %v5123_v48  ;;  %v5143_v30 = vmax.f32 %v5141_v8, %v5142_v43  ;;  %v3151_v26 = vcombine.high %v3143_v12, %v3143_v12  ;;  %v5064_v23 = vsel %vm3579_vm11, %v3143_v12, -inf }
 0x415   : > { %v5130_v55 = vrot.slane %v5129_v34, 2  ;;  %v5137_v33 = vrot.slane %v5136_v60, 2  ;;  %v3152_v19 = vcombine.high %v3150_v9, %v3150_v9  ;;  %v5065_v22 = vrot.slane %v5064_v23, 4 }
 0x416   : > { %v13965_v6 = vunpack.c.l.b16 %v5591_v15  ;;  %v5125_v37 = vrot.slane %v5124_v45, 1  ;;  %v5071_v7 = vsel %vm3579_vm11, %v3151_v26, -inf  ;;  %v5078_v50 = vsel %vm3579_vm11, %v3150_v9, -inf }
 0x417   : > { %v5131_v4 = vmax.f32 %v5129_v34, %v5130_v55  ;;  %v5138_v0 = vmax.f32 %v5136_v60, %v5137_v33  ;;  %v5066_v40 = vmax.f32 %v5064_v23, %v5065_v22  ;;  %v5072_v46 = vrot.slane %v5071_v7, 4  ;;  %v15639_v33 = vld [vmem:[#allocation11_spill] sm:$0xff] }
 0x418   : > { %v5126_v1 = vmax.f32 %v5124_v45, %v5125_v37  ;;  %v5144_v14 = vrot.slane %v5143_v30, 2  ;;  %v5079_v51 = vrot.slane %v5078_v50, 4  ;;  %v5085_v41 = vsel %vm3579_vm11, %v3152_v19, -inf }
 0x419   : > { %v5132_v8 = vrot.slane %v5131_v4, 1  ;;  %v5139_v39 = vrot.slane %v5138_v0, 1  ;;  %v5067_v17 = vrot.slane %v5066_v40, 2  ;;  %v5073_v47 = vmax.f32 %v5071_v7, %v5072_v46 }
 0x41a   : > { %v5592_v15 = vpack.c.bf16 %v5126_v1, %v5126_v1  ;;  %v5080_v48 = vmax.f32 %v5078_v50, %v5079_v51  ;;  %v5086_v43 = vrot.slane %v5085_v41, 4  ;;  %v6287_v12 = vsel %vm6150_vm5, %v13671_v56, %v13664_v10  ;;  %v15640_v10 = vld [vmem:[#allocation10_spill] sm:$0xff] }
 0x41b   : > { %v5133_v34 = vmax.f32 %v5131_v4, %v5132_v8  ;;  %v5140_v60 = vmax.f32 %v5138_v0, %v5139_v39  ;;  %v5068_v9 = vmax.f32 %v5066_v40, %v5067_v17  ;;  %v5074_v26 = vrot.slane %v5073_v47, 2 }
 0x41c   : > { %v13973_v45 = vmax.f32 %v5143_v30, %v5144_v14  ;;  %v5081_v23 = vrot.slane %v5080_v48, 2  ;;  %v5087_v55 = vmax.f32 %v5085_v41, %v5086_v43  ;;  %v6291_v19 = vsel %vm6144_vm14, %v15639_v33, %v13677_v52  ;;  %v15641_v41 = vld [vmem:[#allocation13_spill] sm:$0xff] }
 0x41d   : > { %v5593_v22 = vpack.c.bf16 %v5133_v34, %v5133_v34  ;;  %v13978_v37 = vunpack.c.l.b16 %v5592_v15  ;;  %v5069_v7 = vrot.slane %v5068_v9, 1  ;;  %v5075_v50 = vmax.f32 %v5073_v47, %v5074_v26  ;;  %v15642_v15 = vld [vmem:[#allocation20_spill] sm:$0xff] }
 0x41e   : > { %v5082_v46 = vmax.f32 %v5080_v48, %v5081_v23  ;;  %v5088_v1 = vrot.slane %v5087_v55, 2  ;;  %v6292_v56 = vsel %vm6146_vm15, %v15640_v10, %v6291_v19  ;;  %v6301_v30 = vsel %vm6150_vm5, %v13793_v57, %v13775_v59 }
 0x41f   : > { %v5594_v4 = vpack.c.bf16 %v5140_v60, %v5140_v60  ;;  %v13985_v0 = vunpack.c.l.b16 %v5593_v22  ;;  %v5070_v40 = vmax.f32 %v5068_v9, %v5069_v7  ;;  %v5076_v14 = vrot.slane %v5075_v50, 1 }
 0x420   : > { %v5083_v52 = vrot.slane %v5082_v46, 1  ;;  %v5089_v51 = vmax.f32 %v5087_v55, %v5088_v1  ;;  %v6293_v8 = vsel %vm6148_vm1, %v15641_v41, %v6292_v56  ;;  %v6305_v39 = vsel %vm6144_vm14, %v13695_v61, %v13797_v38 }
 0x421   : > { %v5077_v17 = vmax.f32 %v5075_v50, %v5076_v14  ;;  %v5584_v47 = vpack.c.bf16 %v5070_v40, %v5070_v40  ;;  %v6294_v48 = vsel %vm6150_vm5, %v15642_v15, %v6293_v8  ;;  %v6306_v59 = vsel %vm6146_vm15, %v13724_v11, %v6305_v39 }
 0x422   : > { %v5084_v57 = vmax.f32 %v5082_v46, %v5083_v52  ;;  %v5090_v43 = vrot.slane %v5089_v51, 1  ;;  %v6307_v34 = vsel %vm6148_vm1, %v13729_v16, %v6306_v59  ;;  %v6378_v60 = vpack.c.b16 %v6294_v48, %v6287_v12 }
 0x423   : > { %v5585_v9 = vpack.c.bf16 %v5077_v17, %v5077_v17  ;;  %v6096_v26 = vunpack.c.l.b16 %v5584_v47  ;;  %v6308_v23 = vsel %vm6150_vm5, %v13758_v27, %v6307_v34  ;;  %v4922_v61 = vrot.slane %v13721_v5, 1 }
 0x424   : > { %v5091_v38 = vmax.f32 %v5089_v51, %v5090_v43  ;;  %v5586_v55 = vpack.c.bf16 %v5084_v57, %v5084_v57  ;;  %v14001_v33 = vpack.c.b16 %v6308_v23, %v6301_v30  ;;  %v14005_v11 = vsel %vm12825_vm8, 0, %v6378_v60  ;;  %v6590_v43 = vpop.permute.xlu0 %6589 }
 0x425   : > { %v14007_v19 = vunpack.c.l.b16 %v5594_v4  ;;  %v6097_v22 = vunpack.c.l.b16 %v5585_v9  ;;  %v6326_v16 = vsel %vm6146_vm15, %v6096_v26, %v13959_v44  ;;  %v6524_v12 = vshll.u32 %v14005_v11, 16 }
 0x426   : > { %15643 = vst [vmem:[#allocation6_spill] sm:$0xff] %v14001_v33  ;;  %v5587_v7 = vpack.c.bf16 %v5091_v38, %v5091_v38  ;;  %v6522_v27 = vshrl.u32 %v14005_v11, 16  ;;  %v6529_v50 = vshll.u32 %v14001_v33, 16  ;;  %v4923_v46 = vmax.f32 %v13721_v5, %v4922_v61 }
 0x427   : > { %v14015_v1 = vunpack.c.l.b16 %v5586_v55  ;;  %v14018_v10 = vsel %vm6148_vm1, %v6097_v22, %v6326_v16  ;;  %v6526_v56 = vrot.slane %v6524_v12, 1  ;;  %v6533_v30 = vshrl.u32 %v14001_v33, 16  ;;  %v15644_v16 = vld [vmem:[#allocation17_spill] sm:$0xff] }
 0x428   : > { %v6099_v4 = vunpack.c.l.b16 %v5587_v7  ;;  %v6531_v40 = vrot.slane %v6529_v50, 1  ;;  %v10984_v44 = vpack.c.bf16 %v4923_v46, %v4923_v46  ;;  %v6655_v14 = vrot.slane %v14001_v33, 1 }
 0x429   : > { %v6527_v52 = vor.u32 %v6526_v56, %v6522_v27  ;;  %v2085_v51 = vadd.f32 %v13930_v63, %v13717_v25  ;;  %v2077_v5 = vadd.f32 %v13930_v63, %v13769_v42  ;;  %v2088_v41 = vadd.f32 %v13930_v63, %v13787_v58 }
 0x42a   : > { %v6329_v8 = vsel %vm6152_vm4, %v13925_v2, %v6099_v4  ;;  %v6418_v39 = vsel %vm12825_vm8, %v10984_v44, 0  ;;  %v6535_v17 = vor.u32 %v6533_v30, %v6531_v40  ;;  %v6654_v47 = vrot.slane %v14005_v11, 1 }
 0x42b   : > { %v6330_v15 = vsel %vm6140_vm12, %v13934_v3, %v6329_v8  ;;  %v6532_v25 = vsel %vm610_vm3, %v6527_v52, %v6531_v40  ;;  %v6537_v48 = vshll.u32 %v6418_v39, 16  ;;  %v6657_v59 = vrot.slane %v6418_v39, 1 }
 0x42c   : > { %v14038_v42 = vsel %vm6142_vm13, %v13936_v53, %v6330_v15  ;;  %6601 = vrot.lane.b32.xlu0 %v6532_v25, %s11376_s16  ;;  %v2165_v58 = vmax.f32 %v2085_v51, 0.0  ;;  %v2163_v2 = vmax.f32 %v2077_v5, 0.0  ;;  %v14041_v57 = vmax.f32 %v2088_v41, 0.0 }
 0x42d   : > { %v6539_v34 = vrot.slane %v6537_v48, 1  ;;  %v6656_v60 = vsel %vm963_vm2, %v6654_v47, %v6655_v14  ;;  %v6658_v3 = vsel %vm963_vm2, %v6655_v14, %v6657_v59  ;;  %v2080_v9 = vadd.f32 %v13930_v63, %v13813_v36 }
 0x42e   : > { %v3221_v26 = vcombine.high %v2165_v58, %v2165_v58  ;;  %v3228_v23 = vrot.slane %v2165_v58, %v12402_v13  ;;  %v3187_v53 = vcombine.high %v2163_v2, %v2163_v2  ;;  %v3194_v61 = vrot.slane %v2163_v2, %v12402_v13 }
 0x42f   : > { %v6540_v38 = vsel %vm610_vm3, %v6535_v17, %v6539_v34  ;;  %v3238_v55 = vcombine.high %v14041_v57, %v14041_v57  ;;  %v14054_v22 = vrot.slane %v14041_v57, %v12402_v13  ;;  %v14058_v12 = vsel %vm1535_vm7, %v15644_v16, %v6590_v43 }
 0x430   : > { %6603 = vrot.lane.b32.xlu1 %v6540_v38, %s11376_s16  ;;  %6689 = vrot.lane.b32.xlu0 %v6656_v60, %s11375_s15  ;;  %v3235_v36 = vrot.slane %v3221_v26, %v12402_v13  ;;  %v3236_v7 = vcombine.high %v3228_v23, %v3228_v23  ;;  %v5204_v27 = vsel %vm3579_vm11, %v3228_v23, -inf  ;;  %v3201_v50 = vrot.slane %v3187_v53, %v12402_v13 }
 0x431   : > { %v5205_v46 = vrot.slane %v5204_v27, 4  ;;  %v3202_v56 = vcombine.high %v3194_v61, %v3194_v61  ;;  %v5148_v30 = vsel %vm3579_vm11, %v3194_v61, -inf  ;;  %v14066_v4 = vmax.f32 %v2080_v9, 0.0 }
 0x432   : > { %v3237_v40 = vcombine.high %v3235_v36, %v3235_v36  ;;  %v5211_v44 = vsel %vm3579_vm11, %v3236_v7, -inf  ;;  %v5218_v14 = vsel %vm3579_vm11, %v3235_v36, -inf  ;;  %v3203_v52 = vcombine.high %v3201_v50, %v3201_v50 }
 0x433   : > { %v5206_v51 = vmax.f32 %v5204_v27, %v5205_v46  ;;  %v5212_v5 = vrot.slane %v5211_v44, 4  ;;  %v5219_v41 = vrot.slane %v5218_v14, 4  ;;  %v5149_v8 = vrot.slane %v5148_v30, 4 }
 0x434   : > { %6691 = vrot.lane.b32.xlu1 %v6658_v3, %s11375_s15  ;;  %v5225_v39 = vsel %vm3579_vm11, %v3237_v40, -inf  ;;  %v5155_v17 = vsel %vm3579_vm11, %v3202_v56, -inf  ;;  %v5162_v47 = vsel %vm3579_vm11, %v3201_v50, -inf  ;;  %v5169_v15 = vsel %vm3579_vm11, %v3203_v52, -inf }
 0x435   : > { %v5207_v25 = vrot.slane %v5206_v51, 2  ;;  %v5213_v48 = vmax.f32 %v5211_v44, %v5212_v5  ;;  %v5220_v59 = vmax.f32 %v5218_v14, %v5219_v41  ;;  %v5226_v58 = vrot.slane %v5225_v39, 4 }
 0x436   : > { %v5150_v2 = vmax.f32 %v5148_v30, %v5149_v8  ;;  %v5156_v43 = vrot.slane %v5155_v17, 4  ;;  %v5163_v34 = vrot.slane %v5162_v47, 4  ;;  %v5170_v60 = vrot.slane %v5169_v15, 4 }
 0x437   : > { %v5208_v9 = vmax.f32 %v5206_v51, %v5207_v25  ;;  %v5214_v26 = vrot.slane %v5213_v48, 2  ;;  %v5221_v23 = vrot.slane %v5220_v59, 2  ;;  %v5227_v3 = vmax.f32 %v5225_v39, %v5226_v58 }
 0x438   : > { %v5151_v53 = vrot.slane %v5150_v2, 2  ;;  %v5157_v61 = vmax.f32 %v5155_v17, %v5156_v43  ;;  %v5164_v38 = vmax.f32 %v5162_v47, %v5163_v34  ;;  %v5171_v16 = vmax.f32 %v5169_v15, %v5170_v60 }
 0x439   : > { %v5209_v36 = vrot.slane %v5208_v9, 1  ;;  %v5215_v7 = vmax.f32 %v5213_v48, %v5214_v26  ;;  %v5222_v27 = vmax.f32 %v5220_v59, %v5221_v23  ;;  %v5228_v50 = vrot.slane %v5227_v3, 2 }
 0x43a   : > { %v5152_v46 = vmax.f32 %v5150_v2, %v5151_v53  ;;  %v5158_v56 = vrot.slane %v5157_v61, 2  ;;  %v5165_v40 = vrot.slane %v5164_v38, 2  ;;  %v5172_v44 = vrot.slane %v5171_v16, 2 }
 0x43b   : > { %v5210_v30 = vmax.f32 %v5208_v9, %v5209_v36  ;;  %v5216_v14 = vrot.slane %v5215_v7, 1  ;;  %v5223_v52 = vrot.slane %v5222_v27, 1  ;;  %v5229_v5 = vmax.f32 %v5227_v3, %v5228_v50 }
 0x43c   : > { %v5153_v51 = vrot.slane %v5152_v46, 1  ;;  %v5159_v41 = vmax.f32 %v5157_v61, %v5158_v56  ;;  %v5166_v8 = vmax.f32 %v5164_v38, %v5165_v40  ;;  %v5173_v39 = vmax.f32 %v5171_v16, %v5172_v44 }
 0x43d   : > { %v5217_v25 = vmax.f32 %v5215_v7, %v5216_v14  ;;  %v5224_v17 = vmax.f32 %v5222_v27, %v5223_v52  ;;  %v5230_v47 = vrot.slane %v5229_v5, 1  ;;  %v5604_v15 = vpack.c.bf16 %v5210_v30, %v5210_v30 }
 0x43e   : > { %v5154_v58 = vmax.f32 %v5152_v46, %v5153_v51  ;;  %v5160_v48 = vrot.slane %v5159_v41, 1  ;;  %v5167_v59 = vrot.slane %v5166_v8, 1  ;;  %v5174_v43 = vrot.slane %v5173_v39, 1 }
 0x43f   : > { %v5231_v2 = vmax.f32 %v5229_v5, %v5230_v47  ;;  %v5605_v34 = vpack.c.bf16 %v5217_v25, %v5217_v25  ;;  %v5606_v60 = vpack.c.bf16 %v5224_v17, %v5224_v17  ;;  %v3252_v9 = vrot.slane %v3238_v55, %v12402_v13 }
 0x440   : > { %v5161_v26 = vmax.f32 %v5159_v41, %v5160_v48  ;;  %v5168_v23 = vmax.f32 %v5166_v8, %v5167_v59  ;;  %v5175_v3 = vmax.f32 %v5173_v39, %v5174_v43  ;;  %v5596_v53 = vpack.c.bf16 %v5154_v58, %v5154_v58 }
 0x441   : > { %v5607_v61 = vpack.c.bf16 %v5231_v2, %v5231_v2  ;;  %v14079_v38 = vunpack.c.l.b16 %v5604_v15  ;;  %v14081_v16 = vunpack.c.l.b16 %v5605_v34  ;;  %v3253_v36 = vcombine.high %v14054_v22, %v14054_v22 }
 0x442   : > { %v14085_v7 = vunpack.c.l.b16 %v5606_v60  ;;  %v5597_v27 = vpack.c.bf16 %v5161_v26, %v5161_v26  ;;  %v5598_v50 = vpack.c.bf16 %v5168_v23, %v5168_v23  ;;  %v5599_v46 = vpack.c.bf16 %v5175_v3, %v5175_v3 }
 0x443   : > { %v6108_v56 = vunpack.c.l.b16 %v5596_v53  ;;  %v3254_v57 = vcombine.high %v3252_v9, %v3252_v9  ;;  %v5232_v55 = vsel %vm3579_vm11, %v14054_v22, -inf  ;;  %v5239_v40 = vsel %vm3579_vm11, %v3253_v36, -inf }
 0x444   : > { %v14090_v44 = vunpack.c.l.b16 %v5607_v61  ;;  %v6109_v30 = vunpack.c.l.b16 %v5597_v27  ;;  %v6110_v14 = vunpack.c.l.b16 %v5598_v50  ;;  %v5233_v52 = vrot.slane %v5232_v55, 4 }
 0x445   : > { %v5240_v5 = vrot.slane %v5239_v40, 4  ;;  %v5246_v51 = vsel %vm3579_vm11, %v3252_v9, -inf  ;;  %v5253_v41 = vsel %vm3579_vm11, %v3254_v57, -inf  ;;  %v3204_v8 = vcombine.high %v14066_v4, %v14066_v4 }
 0x446   : > { %v6336_v39 = vsel %vm6140_vm12, %v6109_v30, %v6108_v56  ;;  %v5234_v25 = vmax.f32 %v5232_v55, %v5233_v52  ;;  %v5247_v17 = vrot.slane %v5246_v51, 4  ;;  %v5254_v22 = vrot.slane %v5253_v41, 4 }
 0x447   : > { %v6111_v47 = vunpack.c.l.b16 %v5599_v46  ;;  %v5241_v15 = vmax.f32 %v5239_v40, %v5240_v5  ;;  %v3211_v58 = vrot.slane %v14066_v4, %v12402_v13  ;;  %v3218_v48 = vrot.slane %v3204_v8, %v12402_v13 }
 0x448   : > { %v6337_v59 = vsel %vm6142_vm13, %v6110_v14, %v6336_v39  ;;  %v5235_v43 = vrot.slane %v5234_v25, 2  ;;  %v5248_v2 = vmax.f32 %v5246_v51, %v5247_v17  ;;  %v5255_v34 = vmax.f32 %v5253_v41, %v5254_v22 }
 0x449   : > { %v5242_v60 = vrot.slane %v5241_v15, 2  ;;  %v3219_v9 = vcombine.high %v3211_v58, %v3211_v58  ;;  %v3220_v26 = vcombine.high %v3218_v48, %v3218_v48  ;;  %v5176_v23 = vsel %vm3579_vm11, %v3211_v58, -inf }
 0x44a   : > { %v5236_v3 = vmax.f32 %v5234_v25, %v5235_v43  ;;  %v5249_v53 = vrot.slane %v5248_v2, 2  ;;  %v5256_v61 = vrot.slane %v5255_v34, 2  ;;  %v5177_v36 = vrot.slane %v5176_v23, 4 }
 0x44b   : > { %v5243_v27 = vmax.f32 %v5241_v15, %v5242_v60  ;;  %v5183_v50 = vsel %vm3579_vm11, %v3219_v9, -inf  ;;  %v5190_v4 = vsel %vm3579_vm11, %v3218_v48, -inf  ;;  %v5197_v46 = vsel %vm3579_vm11, %v3220_v26, -inf }
 0x44c   : > { %v5237_v56 = vrot.slane %v5236_v3, 1  ;;  %v5250_v57 = vmax.f32 %v5248_v2, %v5249_v53  ;;  %v5257_v55 = vmax.f32 %v5255_v34, %v5256_v61  ;;  %v5178_v40 = vmax.f32 %v5176_v23, %v5177_v36 }
 0x44d   : > { %v5244_v30 = vrot.slane %v5243_v27, 1  ;;  %v5184_v14 = vrot.slane %v5183_v50, 4  ;;  %v5191_v52 = vrot.slane %v5190_v4, 4  ;;  %v5198_v5 = vrot.slane %v5197_v46, 4 }
 0x44e   : > { %v5238_v51 = vmax.f32 %v5236_v3, %v5237_v56  ;;  %v5251_v41 = vrot.slane %v5250_v57, 1  ;;  %v5258_v8 = vrot.slane %v5257_v55, 1  ;;  %v5179_v39 = vrot.slane %v5178_v40, 2 }
 0x44f   : > { %v5245_v25 = vmax.f32 %v5243_v27, %v5244_v30  ;;  %v5185_v17 = vmax.f32 %v5183_v50, %v5184_v14  ;;  %v5192_v22 = vmax.f32 %v5190_v4, %v5191_v52  ;;  %v5199_v15 = vmax.f32 %v5197_v46, %v5198_v5  ;;  %v6592_v4 = vpop.permute.xlu1 %6591 }
 0x450   : > { %v5252_v58 = vmax.f32 %v5250_v57, %v5251_v41  ;;  %v5259_v48 = vmax.f32 %v5257_v55, %v5258_v8  ;;  %v5608_v43 = vpack.c.bf16 %v5238_v51, %v5238_v51  ;;  %v5180_v60 = vmax.f32 %v5178_v40, %v5179_v39  ;;  %v15645_v51 = vld [vmem:[#allocation16_spill] sm:$0xff] }
 0x451   : > { %v5609_v9 = vpack.c.bf16 %v5245_v25, %v5245_v25  ;;  %v5186_v2 = vrot.slane %v5185_v17, 2  ;;  %v5193_v34 = vrot.slane %v5192_v22, 2  ;;  %v5200_v26 = vrot.slane %v5199_v15, 2 }
 0x452   : > { %v5610_v23 = vpack.c.bf16 %v5252_v58, %v5252_v58  ;;  %v5611_v53 = vpack.c.bf16 %v5259_v48, %v5259_v48  ;;  %v5181_v61 = vrot.slane %v5180_v60, 1  ;;  %v6338_v3 = vsel %vm6144_vm14, %v6111_v47, %v6337_v59 }
 0x453   : > { %v14106_v36 = vunpack.c.l.b16 %v5608_v43  ;;  %v5187_v56 = vmax.f32 %v5185_v17, %v5186_v2  ;;  %v5194_v27 = vmax.f32 %v5192_v22, %v5193_v34  ;;  %v5201_v50 = vmax.f32 %v5199_v15, %v5200_v26 }
 0x454   : > { %v14108_v46 = vunpack.c.l.b16 %v5609_v9  ;;  %v14110_v57 = vunpack.c.l.b16 %v5610_v23  ;;  %v5182_v55 = vmax.f32 %v5180_v60, %v5181_v61  ;;  %v2101_v40 = vadd.f32 %v13930_v63, %v13821_v62 }
 0x455   : > { %v14114_v30 = vunpack.c.l.b16 %v5611_v53  ;;  %v5188_v14 = vrot.slane %v5187_v56, 1  ;;  %v5195_v52 = vrot.slane %v5194_v27, 1  ;;  %v5202_v5 = vrot.slane %v5201_v50, 1 }
 0x456   : > { %v5600_v47 = vpack.c.bf16 %v5182_v55, %v5182_v55  ;;  %v2169_v59 = vmax.f32 %v2101_v40, 0.0  ;;  %v14118_v41 = vsel %vm1535_vm7, %v15645_v51, %v6592_v4  ;;  %v2093_v8 = vadd.f32 %v13930_v63, %v13826_v29 }
 0x457   : > { %v5189_v39 = vmax.f32 %v5187_v56, %v5188_v14  ;;  %v14122_v25 = vmax.f32 %v5194_v27, %v5195_v52  ;;  %v5203_v17 = vmax.f32 %v5201_v50, %v5202_v5  ;;  %v2104_v62 = vadd.f32 %v13930_v63, %v13831_v18 }
 0x458   : > { %v6112_v22 = vunpack.c.l.b16 %v5600_v47  ;;  %v3289_v15 = vcombine.high %v2169_v59, %v2169_v59  ;;  %v3296_v58 = vrot.slane %v2169_v59, %v12402_v13  ;;  %v2167_v48 = vmax.f32 %v2093_v8, 0.0 }
 0x459   : > { %v5601_v43 = vpack.c.bf16 %v5189_v39, %v5189_v39  ;;  %v5602_v60 = vpack.c.bf16 %v14122_v25, %v14122_v25  ;;  %v5603_v9 = vpack.c.bf16 %v5203_v17, %v5203_v17  ;;  %v14131_v29 = vadd.f32 %v13930_v63, %v13869_v32 }
 0x45a   : > { %v6339_v2 = vsel %vm6146_vm15, %v6112_v22, %v6338_v3  ;;  %v3303_v34 = vrot.slane %v3289_v15, %v12402_v13  ;;  %v3304_v26 = vcombine.high %v3296_v58, %v3296_v58  ;;  %v5316_v18 = vsel %vm3579_vm11, %v3296_v58, -inf }
 0x45b   : > { %v6113_v23 = vunpack.c.l.b16 %v5601_v43  ;;  %v6115_v53 = vunpack.c.l.b16 %v5603_v9  ;;  %v5317_v61 = vrot.slane %v5316_v18, 4  ;;  %v14136_v56 = vmax.f32 %v2104_v62, 0.0 }
 0x45c   : > { %v3305_v27 = vcombine.high %v3303_v34, %v3303_v34  ;;  %v5323_v50 = vsel %vm3579_vm11, %v3304_v26, -inf  ;;  %v5330_v4 = vsel %vm3579_vm11, %v3303_v34, -inf  ;;  %v3255_v55 = vcombine.high %v2167_v48, %v2167_v48 }
 0x45d   : > { %v14141_v32 = vsel %vm6148_vm1, %v6113_v23, %v6339_v2  ;;  %v6342_v63 = vsel %vm6152_vm4, %v14079_v38, %v6115_v53  ;;  %v5318_v3 = vmax.f32 %v5316_v18, %v5317_v61  ;;  %v5324_v40 = vrot.slane %v5323_v50, 4 }
 0x45e   : > { %v6343_v14 = vsel %vm6140_vm12, %v14081_v16, %v6342_v63  ;;  %v5331_v52 = vrot.slane %v5330_v4, 4  ;;  %v5337_v5 = vsel %vm3579_vm11, %v3305_v27, -inf  ;;  %v3262_v47 = vrot.slane %v2167_v48, %v12402_v13 }
 0x45f   : > { %v14151_v59 = vsel %vm6142_vm13, %v14085_v7, %v6343_v14  ;;  %v5319_v51 = vrot.slane %v5318_v3, 2  ;;  %v5325_v8 = vmax.f32 %v5323_v50, %v5324_v40  ;;  %v5338_v39 = vrot.slane %v5337_v5, 4 }
 0x460   : > { %v5332_v17 = vmax.f32 %v5330_v4, %v5331_v52  ;;  %v3269_v38 = vrot.slane %v3255_v55, %v12402_v13  ;;  %v3270_v62 = vcombine.high %v3262_v47, %v3262_v47  ;;  %v5260_v22 = vsel %vm3579_vm11, %v3262_v47, -inf }
 0x461   : > { %v5320_v15 = vmax.f32 %v5318_v3, %v5319_v51  ;;  %v5326_v16 = vrot.slane %v5325_v8, 2  ;;  %v5339_v58 = vmax.f32 %v5337_v5, %v5338_v39  ;;  %v5261_v43 = vrot.slane %v5260_v22, 4 }
 0x462   : > { %v5333_v9 = vrot.slane %v5332_v17, 2  ;;  %v3271_v2 = vcombine.high %v3269_v38, %v3269_v38  ;;  %v5267_v48 = vsel %vm3579_vm11, %v3270_v62, -inf  ;;  %v5274_v7 = vsel %vm3579_vm11, %v3269_v38, -inf }
 0x463   : > { %v5321_v34 = vrot.slane %v5320_v15, 1  ;;  %v5327_v26 = vmax.f32 %v5325_v8, %v5326_v16  ;;  %v5340_v18 = vrot.slane %v5339_v58, 2  ;;  %v5262_v23 = vmax.f32 %v5260_v22, %v5261_v43 }
 0x464   : > { %v5334_v53 = vmax.f32 %v5332_v17, %v5333_v9  ;;  %v5268_v61 = vrot.slane %v5267_v48, 4  ;;  %v5275_v27 = vrot.slane %v5274_v7, 4  ;;  %v5281_v50 = vsel %vm3579_vm11, %v3271_v2, -inf }
 0x465   : > { %v5322_v4 = vmax.f32 %v5320_v15, %v5321_v34  ;;  %v5328_v55 = vrot.slane %v5327_v26, 1  ;;  %v5341_v63 = vmax.f32 %v5339_v58, %v5340_v18  ;;  %v5263_v3 = vrot.slane %v5262_v23, 2 }
 0x466   : > { %v5335_v40 = vrot.slane %v5334_v53, 1  ;;  %v5269_v14 = vmax.f32 %v5267_v48, %v5268_v61  ;;  %v5276_v52 = vmax.f32 %v5274_v7, %v5275_v27  ;;  %v5282_v5 = vrot.slane %v5281_v50, 4 }
 0x467   : > { %v5329_v47 = vmax.f32 %v5327_v26, %v5328_v55  ;;  %v5342_v51 = vrot.slane %v5341_v63, 1  ;;  %v5620_v39 = vpack.c.bf16 %v5322_v4, %v5322_v4  ;;  %v5264_v38 = vmax.f32 %v5262_v23, %v5263_v3 }
 0x468   : > { %v5336_v8 = vmax.f32 %v5334_v53, %v5335_v40  ;;  %v5270_v62 = vrot.slane %v5269_v14, 2  ;;  %v5277_v22 = vrot.slane %v5276_v52, 2  ;;  %v5283_v17 = vmax.f32 %v5281_v50, %v5282_v5 }
 0x469   : > { %v14161_v16 = vunpack.c.l.b16 %v5602_v60  ;;  %v5343_v15 = vmax.f32 %v5341_v63, %v5342_v51  ;;  %v5621_v58 = vpack.c.bf16 %v5329_v47, %v5329_v47  ;;  %v5265_v43 = vrot.slane %v5264_v38, 1 }
 0x46a   : > { %v5622_v9 = vpack.c.bf16 %v5336_v8, %v5336_v8  ;;  %v5271_v2 = vmax.f32 %v5269_v14, %v5270_v62  ;;  %v5278_v48 = vmax.f32 %v5276_v52, %v5277_v22  ;;  %v5284_v7 = vrot.slane %v5283_v17, 2 }
 0x46b   : > { %v5623_v34 = vpack.c.bf16 %v5343_v15, %v5343_v15  ;;  %v14163_v26 = vunpack.c.l.b16 %v5620_v39  ;;  %v5266_v18 = vmax.f32 %v5264_v38, %v5265_v43  ;;  %v3306_v23 = vcombine.high %v14136_v56, %v14136_v56 }
 0x46c   : > { %v14167_v53 = vunpack.c.l.b16 %v5621_v58  ;;  %v5272_v61 = vrot.slane %v5271_v2, 1  ;;  %v5279_v25 = vrot.slane %v5278_v48, 1  ;;  %v5285_v60 = vmax.f32 %v5283_v17, %v5284_v7 }
 0x46d   : > { %v14169_v27 = vunpack.c.l.b16 %v5622_v9  ;;  %v5612_v50 = vpack.c.bf16 %v5266_v18, %v5266_v18  ;;  %v3313_v4 = vrot.slane %v14136_v56, %v12402_v13  ;;  %v3320_v55 = vrot.slane %v3306_v23, %v12402_v13 }
 0x46e   : > { %v5273_v63 = vmax.f32 %v5271_v2, %v5272_v61  ;;  %v5280_v3 = vmax.f32 %v5278_v48, %v5279_v25  ;;  %v5286_v40 = vrot.slane %v5285_v60, 1  ;;  %v2168_v14 = vmax.f32 %v14131_v29, 0.0 }
 0x46f   : > { %v6124_v52 = vunpack.c.l.b16 %v5612_v50  ;;  %v3321_v5 = vcombine.high %v3313_v4, %v3313_v4  ;;  %v3322_v47 = vcombine.high %v3320_v55, %v3320_v55  ;;  %v5344_v51 = vsel %vm3579_vm11, %v3313_v4, -inf }
 0x470   : > { %v5287_v39 = vmax.f32 %v5285_v60, %v5286_v40  ;;  %v5613_v38 = vpack.c.bf16 %v5273_v63, %v5273_v63  ;;  %v5614_v8 = vpack.c.bf16 %v5280_v3, %v5280_v3  ;;  %v5345_v62 = vrot.slane %v5344_v51, 4 }
 0x471   : > { %v6349_v22 = vsel %vm6152_vm4, %v6124_v52, %v14114_v30  ;;  %v5351_v56 = vsel %vm3579_vm11, %v3321_v5, -inf  ;;  %v5358_v17 = vsel %vm3579_vm11, %v3320_v55, -inf  ;;  %v5365_v15 = vsel %vm3579_vm11, %v3322_v47, -inf }
 0x472   : > { %v5615_v58 = vpack.c.bf16 %v5287_v39, %v5287_v39  ;;  %v6125_v29 = vunpack.c.l.b16 %v5613_v38  ;;  %v6126_v43 = vunpack.c.l.b16 %v5614_v8  ;;  %v5346_v9 = vmax.f32 %v5344_v51, %v5345_v62 }
 0x473   : > { %v5352_v2 = vrot.slane %v5351_v56, 4  ;;  %v5359_v48 = vrot.slane %v5358_v17, 4  ;;  %v5366_v7 = vrot.slane %v5365_v15, 4  ;;  %v3272_v18 = vcombine.high %v2168_v14, %v2168_v14 }
 0x474   : > { %v14181_v23 = vunpack.c.l.b16 %v5623_v34  ;;  %v6350_v61 = vsel %vm6140_vm12, %v6125_v29, %v6349_v22  ;;  %v5347_v25 = vrot.slane %v5346_v9, 2  ;;  %v3279_v30 = vrot.slane %v2168_v14, %v12402_v13 }
 0x475   : > { %v6351_v60 = vsel %vm6142_vm13, %v6126_v43, %v6350_v61  ;;  %v5353_v50 = vmax.f32 %v5351_v56, %v5352_v2  ;;  %v5360_v4 = vmax.f32 %v5358_v17, %v5359_v48  ;;  %v5367_v55 = vmax.f32 %v5365_v15, %v5366_v7 }
 0x476   : > { %v5348_v63 = vmax.f32 %v5346_v9, %v5347_v25  ;;  %v3286_v3 = vrot.slane %v3272_v18, %v12402_v13  ;;  %v3287_v40 = vcombine.high %v3279_v30, %v3279_v30  ;;  %v5288_v52 = vsel %vm3579_vm11, %v3279_v30, -inf  ;;  %v6678_v18 = vpop.permute.xlu0 %6677 }
 0x477   : > { %v6127_v5 = vunpack.c.l.b16 %v5615_v58  ;;  %v5354_v47 = vrot.slane %v5353_v50, 2  ;;  %v5361_v34 = vrot.slane %v5360_v4, 2  ;;  %v5289_v51 = vrot.slane %v5288_v52, 4 }
 0x478   : > { %v5349_v39 = vrot.slane %v5348_v63, 1  ;;  %v3288_v38 = vcombine.high %v3286_v3, %v3286_v3  ;;  %v5295_v8 = vsel %vm3579_vm11, %v3287_v40, -inf  ;;  %v5302_v14 = vsel %vm3579_vm11, %v3286_v3, -inf }
 0x479   : > { %v5355_v62 = vmax.f32 %v5353_v50, %v5354_v47  ;;  %v5362_v22 = vmax.f32 %v5360_v4, %v5361_v34  ;;  %v5368_v56 = vrot.slane %v5367_v55, 2  ;;  %v5290_v17 = vmax.f32 %v5288_v52, %v5289_v51  ;;  %v6680_v52 = vpop.permute.xlu1 %6679 }
 0x47a   : > { %v5350_v15 = vmax.f32 %v5348_v63, %v5349_v39  ;;  %v5296_v29 = vrot.slane %v5295_v8, 4  ;;  %v5303_v43 = vrot.slane %v5302_v14, 4  ;;  %v5309_v9 = vsel %vm3579_vm11, %v3288_v38, -inf }
 0x47b   : > { %v5356_v2 = vrot.slane %v5355_v62, 1  ;;  %v5363_v58 = vrot.slane %v5362_v22, 1  ;;  %v5291_v48 = vrot.slane %v5290_v17, 2  ;;  %v5310_v7 = vrot.slane %v5309_v9, 4 }
 0x47c   : > { %v5624_v61 = vpack.c.bf16 %v5350_v15, %v5350_v15  ;;  %v5297_v25 = vmax.f32 %v5295_v8, %v5296_v29  ;;  %v5304_v30 = vmax.f32 %v5302_v14, %v5303_v43  ;;  %v6352_v40 = vsel %vm6144_vm14, %v6127_v5, %v6351_v60 }
 0x47d   : > { %v5357_v3 = vmax.f32 %v5355_v62, %v5356_v2  ;;  %v5364_v50 = vmax.f32 %v5362_v22, %v5363_v58  ;;  %v5292_v4 = vmax.f32 %v5290_v17, %v5291_v48  ;;  %v5311_v47 = vmax.f32 %v5309_v9, %v5310_v7  ;;  %v6594_v62 = vpop.permute.xlu0 %6593  ;;  %v6596_v29 = vpop.permute.xlu1 %6595 }
 0x47e   : > { %v14192_v63 = vmax.f32 %v5367_v55, %v5368_v56  ;;  %v5298_v34 = vrot.slane %v5297_v25, 2  ;;  %v5305_v51 = vrot.slane %v5304_v30, 2  ;;  %v6742_v39 = vsel %vm1665_vm9, %v14058_v12, %v6678_v18 }
 0x47f   : > { %v5625_v38 = vpack.c.bf16 %v5357_v3, %v5357_v3  ;;  %v14196_v33 = vunpack.c.l.b16 %v5624_v61  ;;  %v5293_v15 = vrot.slane %v5292_v4, 1  ;;  %v5312_v8 = vrot.slane %v5311_v47, 2  ;;  %11150 = vmatprep.mubr.msk.bf16.mxu1 %vm6784_vm10, %v6742_v39 }
 0x480   : > { %v5299_v60 = vmax.f32 %v5297_v25, %v5298_v34  ;;  %v5306_v5 = vmax.f32 %v5304_v30, %v5305_v51  ;;  %v6744_v14 = vsel %vm1665_vm9, %v14118_v41, %v6680_v52  ;;  %v6314_v55 = vsel %vm6150_vm5, %v13919_v49, %v13902_v35 }
 0x481   : > { %v5626_v22 = vpack.c.bf16 %v5364_v50, %v5364_v50  ;;  %v14204_v56 = vunpack.c.l.b16 %v5625_v38  ;;  %v5294_v12 = vmax.f32 %v5292_v4, %v5293_v15  ;;  %v5313_v17 = vmax.f32 %v5311_v47, %v5312_v8  ;;  %11151 = vmatmul.mubr.msk.bf16.gmra.mrb[12].mxu1 %vm6784_vm10, %v6744_v14  ;;  %v6682_v3 = vpop.permute.xlu0 %6681  ;;  %v6684_v47 = vpop.permute.xlu1 %6683  ;;  %v15646_v38 = vld [vmem:[#allocation15_spill] sm:$0xff] }
 0x482   : > { %v5300_v43 = vrot.slane %v5299_v60, 1  ;;  %v5307_v9 = vrot.slane %v5306_v5, 1  ;;  %v6318_v2 = vsel %vm6144_vm14, %v13838_v31, %v13913_v54  ;;  %v6328_v41 = vsel %vm6150_vm5, %v14015_v1, %v14018_v10 }
 0x483   : > { %v5314_v35 = vrot.slane %v5313_v17, 1  ;;  %v5616_v49 = vpack.c.bf16 %v5294_v12, %v5294_v12  ;;  %v6319_v58 = vsel %vm6146_vm15, %v13872_v21, %v6318_v2  ;;  %v6332_v48 = vsel %vm6144_vm14, %v13965_v6, %v14038_v42 }
 0x484   : > { %v5301_v7 = vmax.f32 %v5299_v60, %v5300_v43  ;;  %v5308_v18 = vmax.f32 %v5306_v5, %v5307_v9  ;;  %v6320_v61 = vsel %vm6148_vm1, %v13874_v20, %v6319_v58  ;;  %v6333_v31 = vsel %vm6146_vm15, %v13978_v37, %v6332_v48  ;;  %v15647_v58 = vld [vmem:[#allocation12_spill] sm:$0xff] }
 0x485   : > { %v5315_v54 = vmax.f32 %v5313_v17, %v5314_v35  ;;  %v6128_v25 = vunpack.c.l.b16 %v5616_v49  ;;  %v6321_v1 = vsel %vm6150_vm5, %v13876_v28, %v6320_v61  ;;  %v6334_v21 = vsel %vm6148_vm1, %v13985_v0, %v6333_v31  ;;  %v6598_v14 = vpop.permute.xlu0 %6597  ;;  %v6600_v43 = vpop.permute.xlu1 %6599 }
 0x486   : > { %v5617_v10 = vpack.c.bf16 %v5301_v7, %v5301_v7  ;;  %v5618_v30 = vpack.c.bf16 %v5308_v18, %v5308_v18  ;;  %v6335_v6 = vsel %vm6150_vm5, %v14007_v19, %v6334_v21  ;;  %v6381_v42 = vpack.c.b16 %v6321_v1, %v6314_v55 }
 0x487   : > { %v5619_v50 = vpack.c.bf16 %v5315_v54, %v5315_v54  ;;  %v6353_v20 = vsel %vm6146_vm15, %v6128_v25, %v6352_v40  ;;  %v14229_v4 = vpack.c.b16 %v6335_v6, %v6328_v41  ;;  %v5146_v37 = vrot.slane %v13973_v45, 1 }
 0x488   : > { %v6138_v52 = vunpack.c.l.b16 %v5626_v22  ;;  %v6129_v28 = vunpack.c.l.b16 %v5617_v10  ;;  %v6130_v34 = vunpack.c.l.b16 %v5618_v30  ;;  %v14234_v0 = vsel %vm12825_vm8, 0, %v6381_v42  ;;  %v11144_v18 = vpop.f32.mrb[4].mxu1 }
 0x489   : > { %v6131_v51 = vunpack.c.l.b16 %v5619_v50  ;;  %v6544_v19 = vshll.u32 %v14234_v0, 16  ;;  %v6549_v39 = vshll.u32 %v14229_v4, 16  ;;  %v6714_v40 = vsel %vm1535_vm7, %v15646_v38, %v6594_v62  ;;  %v6855_v25 = vpop.f32.mrb[5].mxu1  ;;  %v6686_v1 = vpop.permute.xlu0 %6685 }
 0x48a   : > { %v6354_v15 = vsel %vm6148_vm1, %v6129_v28, %v6353_v20  ;;  %v6542_v8 = vshrl.u32 %v14234_v0, 16  ;;  %v5147_v60 = vmax.f32 %v13973_v45, %v5146_v37  ;;  %v6553_v5 = vshrl.u32 %v14229_v4, 16  ;;  %v14277_v21 = vpop.f32.mrb[6].mxu1  ;;  %v6688_v42 = vpop.permute.xlu1 %6687  ;;  %v15648_v20 = vld [vmem:[#allocation19_spill] sm:$0xff]  ;;  %v15649_v28 = vld [vmem:[#allocation18_spill] sm:$0xff] }
 0x48b   : > { %v6356_v55 = vsel %vm6152_vm4, %v14163_v26, %v6131_v51  ;;  %v6546_v22 = vrot.slane %v6544_v19, 1  ;;  %v6551_v12 = vrot.slane %v6549_v39, 1  ;;  %v6660_v17 = vrot.slane %v14229_v4, 1 }
 0x48c   : > { %v6357_v62 = vsel %vm6140_vm12, %v14167_v53, %v6356_v55  ;;  %v10985_v9 = vpack.c.bf16 %v5147_v60, %v5147_v60  ;;  %v6659_v2 = vrot.slane %v14234_v0, 1  ;;  %v6746_v41 = vsel %vm1665_vm9, %v6714_v40, %v6682_v3 }
 0x48d   : > { %v6358_v45 = vsel %vm6142_vm13, %v14169_v27, %v6357_v62  ;;  %v6547_v35 = vor.u32 %v6546_v22, %v6542_v8  ;;  %v6555_v49 = vor.u32 %v6553_v5, %v6551_v12  ;;  %v6716_v26 = vsel %vm1535_vm7, %v15647_v58, %v6596_v29  ;;  %11154 = vmatprep.mubr.msk.bf16.mxu1 %vm6784_vm10, %v6746_v41 }
 0x48e   : > { %v6419_v48 = vsel %vm12825_vm8, %v10985_v9, 0  ;;  %v6748_v53 = vsel %vm1665_vm9, %v6716_v26, %v6684_v47  ;;  %v6341_v7 = vsel %vm6150_vm5, %v14161_v16, %v14141_v32  ;;  %v6345_v27 = vsel %vm6144_vm14, %v14090_v44, %v14151_v59  ;;  %v14293_v47 = vld [vmem:[%s15555_s4] ss:$0 sm:$0xff] }
 0x48f   : > { %v6552_v61 = vsel %vm610_vm3, %v6547_v35, %v6551_v12  ;;  %v6557_v31 = vshll.u32 %v6419_v48, 16  ;;  %v6661_v29 = vsel %vm963_vm2, %v6659_v2, %v6660_v17  ;;  %11155 = vmatmul.mubr.msk.bf16.gmra.mrb[16].mxu1 %vm6784_vm10, %v6748_v53  ;;  %v6346_v54 = vsel %vm6146_vm15, %v14106_v36, %v6345_v27 }
 0x490   : > { %6605 = vrot.lane.b32.xlu0 %v6552_v61, %s11376_s16  ;;  %v6347_v32 = vsel %vm6148_vm1, %v14108_v46, %v6346_v54  ;;  %v6355_v16 = vsel %vm6150_vm5, %v6130_v34, %v6354_v15  ;;  %v6359_v44 = vsel %vm6144_vm14, %v14181_v23, %v6358_v45  ;;  %v5370_v59 = vrot.slane %v14192_v63, 1  ;;  %v14283_v46 = vpop.f32.mrb[7].mxu1 }
 0x491   : > { %v6559_v10 = vrot.slane %v6557_v31, 1  ;;  %v6662_v30 = vrot.slane %v6419_v48, 1  ;;  %v6348_v36 = vsel %vm6150_vm5, %v14110_v57, %v6347_v32  ;;  %v6360_v6 = vsel %vm6146_vm15, %v14196_v33, %v6359_v44 }
 0x492   : > { %v6361_v3 = vsel %vm6148_vm1, %v14204_v56, %v6360_v6  ;;  %v6384_v23 = vpack.c.b16 %v6348_v36, %v6341_v7  ;;  %v5371_v50 = vmax.f32 %v14192_v63, %v5370_v59  ;;  %v6718_v37 = vsel %vm1535_vm7, %v15648_v20, %v6598_v14 }
 0x493   : > { %v6560_v57 = vsel %vm610_vm3, %v6555_v49, %v6559_v10  ;;  %v6362_v33 = vsel %vm6150_vm5, %v6138_v52, %v6361_v3  ;;  %v6720_v34 = vsel %vm1535_vm7, %v15649_v28, %v6600_v43  ;;  %v6750_v56 = vsel %vm1665_vm9, %v6718_v37, %v6686_v1 }
 0x494   : > { %6607 = vrot.lane.b32.xlu1 %v6560_v57, %s11376_s16  ;;  %6693 = vrot.lane.b32.xlu0 %v6661_v29, %s11375_s15  ;;  %v14302_v63 = vpack.c.b16 %v6362_v33, %v6355_v16  ;;  %v14306_v51 = vsel %vm12825_vm8, 0, %v6384_v23  ;;  %v10986_v19 = vpack.c.bf16 %v5371_v50, %v5371_v50  ;;  %v6752_v39 = vsel %vm1665_vm9, %v6720_v34, %v6688_v42 }
 0x495   : > { %v6564_v52 = vshll.u32 %v14306_v51, 16  ;;  %11158 = vmatprep.mubr.msk.bf16.mxu1 %vm6784_vm10, %v6750_v56  ;;  %v6864_v38 = vadd.f32 %v11144_v18, %v14293_v47  ;;  %v6663_v40 = vsel %vm963_vm2, %v6660_v17, %v6662_v30  ;;  %v6562_v60 = vshrl.u32 %v14306_v51, 16 }
 0x496   : > { %v6569_v15 = vshll.u32 %v14302_v63, 16  ;;  %v6420_v8 = vsel %vm12825_vm8, %v10986_v19, 0  ;;  %v6573_v12 = vshrl.u32 %v14302_v63, 16  ;;  %v6856_v43 = vadd.f32 %v14293_v47, %v6855_v25  ;;  %v15650_v19 = vld [vmem:[#allocation6_spill] sm:$0xff] }
 0x497   : > { %v6566_v5 = vrot.slane %v6564_v52, 1  ;;  %v6577_v14 = vshll.u32 %v6420_v8, 16  ;;  %11159 = vmatmul.mubr.msk.bf16.gmra.mrb[20].mxu1 %vm6784_vm10, %v6752_v39  ;;  %v6984_v55 = vmax.f32 %v6864_v38, 0.0  ;;  %v6665_v49 = vrot.slane %v14302_v63, 1 }
 0x498   : > { %6695 = vrot.lane.b32.xlu1 %v6663_v40, %s11375_s15  ;;  %v6571_v22 = vrot.slane %v6569_v15, 1  ;;  %v6982_v45 = vmax.f32 %v6856_v43, 0.0  ;;  %vm7718_vm11 = vcmask 123904   ;;  %v6664_v53 = vrot.slane %v14306_v51, 1 }
 0x499   : > { %v6567_v17 = vor.u32 %v6566_v5, %v6562_v60  ;;  %v7080_v62 = vcombine.high %v6984_v55, %v6984_v55  ;;  %v6579_v2 = vrot.slane %v6577_v14, 1  ;;  %v7087_v41 = vrot.slane %v6984_v55, %v12402_v13 }
 0x49a   : > { %v6575_v9 = vor.u32 %v6573_v12, %v6571_v22  ;;  %v7046_v48 = vcombine.high %v6982_v45, %v6982_v45  ;;  %v7053_v7 = vrot.slane %v6982_v45, %v12402_v13  ;;  %v6667_v27 = vrot.slane %v6420_v8, 1 }
 0x49b   : > { %v6572_v35 = vsel %vm610_vm3, %v6567_v17, %v6571_v22  ;;  %v7094_v26 = vrot.slane %v7080_v62, %v12402_v13  ;;  %v7775_v61 = vsel %vm7718_vm11, %v7087_v41, -inf  ;;  %v6666_v29 = vsel %vm963_vm2, %v6664_v53, %v6665_v49 }
 0x49c   : > { %6609 = vrot.lane.b32.xlu0 %v6572_v35, %s11376_s16  ;;  %v6580_v58 = vsel %vm610_vm3, %v6575_v9, %v6579_v2  ;;  %v7060_v31 = vrot.slane %v7046_v48, %v12402_v13  ;;  %v6668_v54 = vsel %vm963_vm2, %v6665_v49, %v6667_v27  ;;  %v7095_v25 = vcombine.high %v7087_v41, %v7087_v41 }
 0x49d   : > { %6611 = vrot.lane.b32.xlu1 %v6580_v58, %s11376_s16  ;;  %v7096_v32 = vcombine.high %v7094_v26, %v7094_v26  ;;  %v7061_v16 = vcombine.high %v7053_v7, %v7053_v7  ;;  %v7776_v59 = vrot.slane %v7775_v61, 4  ;;  %v7789_v1 = vsel %vm7718_vm11, %v7094_v26, -inf  ;;  %s11380_s16 = smov 32  }
 0x49e   : > { %v6602_v18 = vpop.permute.xlu0 %6601  ;;  %v7719_v10 = vsel %vm7718_vm11, %v7053_v7, -inf  ;;  %v7062_v6 = vcombine.high %v7060_v31, %v7060_v31  ;;  %v7733_v23 = vsel %vm7718_vm11, %v7060_v31, -inf  ;;  %v7782_v20 = vsel %vm7718_vm11, %v7095_v25, -inf }
 0x49f   : > { %v6722_v44 = vsel %vm1535_vm7, %v14005_v11, %v6602_v18  ;;  %v7720_v42 = vrot.slane %v7719_v10, 4  ;;  %v7726_v3 = vsel %vm7718_vm11, %v7061_v16, -inf  ;;  %v7790_v11 = vrot.slane %v7789_v1, 4 }
 0x4a0   : > { %6697 = vrot.lane.b32.xlu0 %v6666_v29, %s11375_s15  ;;  %v7727_v57 = vrot.slane %v7726_v3, 4  ;;  %v7777_v33 = vmax.f32 %v7775_v61, %v7776_v59  ;;  %v7796_v28 = vsel %vm7718_vm11, %v7096_v32, -inf  ;;  %v7734_v34 = vrot.slane %v7733_v23, 4 }
 0x4a1   : > { %6699 = vrot.lane.b32.xlu1 %v6668_v54, %s11375_s15  ;;  %v7721_v37 = vmax.f32 %v7719_v10, %v7720_v42  ;;  %v6867_v56 = vadd.f32 %v14277_v21, %v14293_v47  ;;  %v7740_v15 = vsel %vm7718_vm11, %v7062_v6, -inf  ;;  %v7783_v60 = vrot.slane %v7782_v20, 4 }
 0x4a2   : > { %v6604_v30 = vpop.permute.xlu1 %6603  ;;  %v6690_v36 = vpop.permute.xlu0 %6689  ;;  %v7728_v40 = vmax.f32 %v7726_v3, %v7727_v57  ;;  %v7735_v5 = vmax.f32 %v7733_v23, %v7734_v34  ;;  %v7791_v14 = vmax.f32 %v7789_v1, %v7790_v11  ;;  %v7797_v55 = vrot.slane %v7796_v28, 4 }
 0x4a3   : > { %v6754_v50 = vsel %vm1665_vm9, %v6722_v44, %v6690_v36  ;;  %v6724_v39 = vsel %vm1535_vm7, %v15650_v19, %v6604_v30  ;;  %v7722_v38 = vrot.slane %v7721_v37, 2  ;;  %v7778_v12 = vrot.slane %v7777_v33, 2 }
 0x4a4   : > { %11162 = vmatprep.mubr.msk.bf16.mxu1 %vm6784_vm10, %v6754_v50  ;;  %v7729_v22 = vrot.slane %v7728_v40, 2  ;;  %v7741_v21 = vrot.slane %v7740_v15, 4  ;;  %v6985_v17 = vmax.f32 %v6867_v56, 0.0  ;;  %v7736_v62 = vrot.slane %v7735_v5, 2 }
 0x4a5   : > { %v7723_v43 = vmax.f32 %v7721_v37, %v7722_v38  ;;  %v7784_v9 = vmax.f32 %v7782_v20, %v7783_v60  ;;  %v6859_v45 = vadd.f32 %v14293_v47, %v14283_v46  ;;  %v7792_v35 = vrot.slane %v7791_v14, 2 }
 0x4a6   : > { %v6692_v52 = vpop.permute.xlu1 %6691  ;;  %v7730_v2 = vmax.f32 %v7728_v40, %v7729_v22  ;;  %v7742_v41 = vmax.f32 %v7740_v15, %v7741_v21  ;;  %v7798_v49 = vmax.f32 %v7796_v28, %v7797_v55  ;;  %v7779_v58 = vmax.f32 %v7777_v33, %v7778_v12 }
 0x4a7   : > { %v6756_v8 = vsel %vm1665_vm9, %v6724_v39, %v6692_v52  ;;  %v7724_v26 = vrot.slane %v7723_v43, 1  ;;  %v7097_v53 = vcombine.high %v6985_v17, %v6985_v17  ;;  %v7737_v7 = vmax.f32 %v7735_v5, %v7736_v62 }
 0x4a8   : > { %11163 = vmatmul.mubr.msk.bf16.gmra.mrb[24].mxu1 %vm6784_vm10, %v6756_v8  ;;  %v7743_v48 = vrot.slane %v7742_v41, 2  ;;  %v7104_v27 = vrot.slane %v6985_v17, %v12402_v13  ;;  %v7785_v18 = vrot.slane %v7784_v9, 2  ;;  %v7731_v61 = vrot.slane %v7730_v2, 1 }
 0x4a9   : > { %v7111_v31 = vrot.slane %v7097_v53, %v12402_v13  ;;  %v6983_v29 = vmax.f32 %v6859_v45, 0.0  ;;  %v7793_v54 = vmax.f32 %v7791_v14, %v7792_v35  ;;  %v7799_v25 = vrot.slane %v7798_v49, 2 }
 0x4aa   : > { %v7112_v32 = vcombine.high %v7104_v27, %v7104_v27  ;;  %v7803_v16 = vsel %vm7718_vm11, %v7104_v27, -inf  ;;  %v7780_v46 = vrot.slane %v7779_v58, 1  ;;  %v7725_v44 = vmax.f32 %v7723_v43, %v7724_v26 }
 0x4ab   : > { %v7744_v59 = vmax.f32 %v7742_v41, %v7743_v48  ;;  %v7113_v1 = vcombine.high %v7111_v31, %v7111_v31  ;;  %v7738_v10 = vrot.slane %v7737_v7, 1  ;;  %v7817_v36 = vsel %vm7718_vm11, %v7111_v31, -inf }
 0x4ac   : > { %v7810_v30 = vsel %vm7718_vm11, %v7112_v32, -inf  ;;  %v7063_v6 = vcombine.high %v6983_v29, %v6983_v29  ;;  %v14360_v42 = vmax.f32 %v7784_v9, %v7785_v18  ;;  %v7732_v3 = vmax.f32 %v7730_v2, %v7731_v61 }
 0x4ad   : > { %v7804_v23 = vrot.slane %v7803_v16, 4  ;;  %v7794_v50 = vrot.slane %v7793_v54, 1  ;;  %v14362_v20 = vmax.f32 %v7798_v49, %v7799_v25  ;;  %v7811_v11 = vrot.slane %v7810_v30, 4 }
 0x4ae   : > { %v7070_v37 = vrot.slane %v6983_v29, %v12402_v13  ;;  %v14365_v57 = vmax.f32 %v7779_v58, %v7780_v46  ;;  %v7745_v33 = vrot.slane %v7744_v59, 1  ;;  %v7818_v28 = vrot.slane %v7817_v36, 4 }
 0x4af   : > { %v7824_v34 = vsel %vm7718_vm11, %v7113_v1, -inf  ;;  %v7739_v56 = vmax.f32 %v7737_v7, %v7738_v10  ;;  %v8615_v19 = vpack.c.bf16 %v7725_v44, %v7725_v44  ;;  %v7077_v39 = vrot.slane %v7063_v6, %v12402_v13 }
 0x4b0   : > { %v7078_v52 = vcombine.high %v7070_v37, %v7070_v37  ;;  %v7787_v38 = vrot.slane %v14360_v42, 1  ;;  %v8616_v40 = vpack.c.bf16 %v7732_v3, %v7732_v3  ;;  %v7805_v15 = vmax.f32 %v7803_v16, %v7804_v23 }
 0x4b1   : > { %v7747_v8 = vsel %vm7718_vm11, %v7070_v37, -inf  ;;  %v7812_v60 = vmax.f32 %v7810_v30, %v7811_v11  ;;  %v7825_v5 = vrot.slane %v7824_v34, 4  ;;  %v7079_v14 = vcombine.high %v7077_v39, %v7077_v39 }
 0x4b2   : > { %v7748_v55 = vrot.slane %v7747_v8, 4  ;;  %v7746_v22 = vmax.f32 %v7744_v59, %v7745_v33  ;;  %v7819_v12 = vmax.f32 %v7817_v36, %v7818_v28  ;;  %v7754_v43 = vsel %vm7718_vm11, %v7078_v52, -inf }
 0x4b3   : > { %v7761_v21 = vsel %vm7718_vm11, %v7077_v39, -inf  ;;  %v8617_v17 = vpack.c.bf16 %v7739_v56, %v7739_v56  ;;  %v8871_v62 = vunpack.c.l.b16 %v8615_v19  ;;  %v7755_v2 = vrot.slane %v7754_v43, 4 }
 0x4b4   : > { %v7749_v9 = vmax.f32 %v7747_v8, %v7748_v55  ;;  %v8872_v41 = vunpack.c.l.b16 %v8616_v40  ;;  %v7806_v45 = vrot.slane %v7805_v15, 2  ;;  %v7762_v35 = vrot.slane %v7761_v21, 4 }
 0x4b5   : > { %v7768_v49 = vsel %vm7718_vm11, %v7079_v14, -inf  ;;  %v7813_v58 = vrot.slane %v7812_v60, 2  ;;  %v7826_v26 = vmax.f32 %v7824_v34, %v7825_v5  ;;  %v7756_v53 = vmax.f32 %v7754_v43, %v7755_v2 }
 0x4b6   : > { %v7750_v48 = vrot.slane %v7749_v9, 2  ;;  %v8618_v7 = vpack.c.bf16 %v7746_v22, %v7746_v22  ;;  %v7820_v27 = vrot.slane %v7819_v12, 2  ;;  %v7763_v18 = vmax.f32 %v7761_v21, %v7762_v35 }
 0x4b7   : > { %v7769_v61 = vrot.slane %v7768_v49, 4  ;;  %v7795_v31 = vmax.f32 %v7793_v54, %v7794_v50  ;;  %v8873_v29 = vunpack.c.l.b16 %v8617_v17  ;;  %v7757_v32 = vrot.slane %v7756_v53, 2 }
 0x4b8   : > { %v7751_v25 = vmax.f32 %v7749_v9, %v7750_v48  ;;  %v8999_v16 = vsel %vm6140_vm12, %v8872_v41, %v8871_v62  ;;  %v7807_v46 = vmax.f32 %v7805_v15, %v7806_v45  ;;  %v7764_v44 = vrot.slane %v7763_v18, 2 }
 0x4b9   : > { %v7770_v59 = vmax.f32 %v7768_v49, %v7769_v61  ;;  %v7814_v1 = vmax.f32 %v7812_v60, %v7813_v58  ;;  %v7827_v10 = vrot.slane %v7826_v26, 2  ;;  %v7758_v36 = vmax.f32 %v7756_v53, %v7757_v32 }
 0x4ba   : > { %v7752_v30 = vrot.slane %v7751_v25, 1  ;;  %v8874_v6 = vunpack.c.l.b16 %v8618_v7  ;;  %v7821_v3 = vmax.f32 %v7819_v12, %v7820_v27  ;;  %v7765_v23 = vmax.f32 %v7763_v18, %v7764_v44 }
 0x4bb   : > { %v7771_v11 = vrot.slane %v7770_v59, 2  ;;  %v7801_v37 = vrot.slane %v14362_v20, 1  ;;  %v9000_v54 = vsel %vm6142_vm13, %v8873_v29, %v8999_v16  ;;  %v7759_v33 = vrot.slane %v7758_v36, 1 }
 0x4bc   : > { %v7753_v50 = vmax.f32 %v7751_v25, %v7752_v30  ;;  %v7788_v28 = vmax.f32 %v14360_v42, %v7787_v38  ;;  %v7808_v34 = vrot.slane %v7807_v46, 1  ;;  %v7766_v56 = vrot.slane %v7765_v23, 1 }
 0x4bd   : > { %v7772_v19 = vmax.f32 %v7770_v59, %v7771_v11  ;;  %v7815_v39 = vrot.slane %v7814_v1, 1  ;;  %v7828_v52 = vmax.f32 %v7826_v26, %v7827_v10  ;;  %v7760_v40 = vmax.f32 %v7758_v36, %v7759_v33 }
 0x4be   : > { %v8619_v15 = vpack.c.bf16 %v7753_v50, %v7753_v50  ;;  %v7822_v8 = vrot.slane %v7821_v3, 1  ;;  %v7767_v60 = vmax.f32 %v7765_v23, %v7766_v56  ;;  %v9001_v14 = vsel %vm6144_vm14, %v8874_v6, %v9000_v54 }
 0x4bf   : > { %v7773_v5 = vrot.slane %v7772_v19, 1  ;;  %v7802_v55 = vmax.f32 %v14362_v20, %v7801_v37  ;;  %v8623_v22 = vpack.c.bf16 %v14365_v57, %v14365_v57  ;;  %v8620_v12 = vpack.c.bf16 %v7760_v40, %v7760_v40 }
 0x4c0   : > { %v8875_v43 = vunpack.c.l.b16 %v8619_v15  ;;  %v8624_v42 = vpack.c.bf16 %v7788_v28, %v7788_v28  ;;  %v7809_v38 = vmax.f32 %v7807_v46, %v7808_v34  ;;  %v8621_v17 = vpack.c.bf16 %v7767_v60, %v7767_v60 }
 0x4c1   : > { %v7774_v21 = vmax.f32 %v7772_v19, %v7773_v5  ;;  %v7816_v62 = vmax.f32 %v7814_v1, %v7815_v39  ;;  %v8876_v9 = vunpack.c.l.b16 %v8620_v12  ;;  %v7829_v41 = vrot.slane %v7828_v52, 1 }
 0x4c2   : > { %v9002_v2 = vsel %vm6146_vm15, %v8875_v43, %v9001_v14  ;;  %v8625_v45 = vpack.c.bf16 %v7795_v31, %v7795_v31  ;;  %v7823_v35 = vmax.f32 %v7821_v3, %v7822_v8  ;;  %v8877_v58 = vunpack.c.l.b16 %v8621_v17 }
 0x4c3   : > { %v8622_v49 = vpack.c.bf16 %v7774_v21, %v7774_v21  ;;  %v8626_v26 = vpack.c.bf16 %v7802_v55, %v7802_v55  ;;  %v9003_v20 = vsel %vm6148_vm1, %v8876_v9, %v9002_v2  ;;  %v8879_v48 = vunpack.c.l.b16 %v8623_v22 }
 0x4c4   : > { %v8627_v57 = vpack.c.bf16 %v7809_v38, %v7809_v38  ;;  %v9004_v7 = vsel %vm6150_vm5, %v8877_v58, %v9003_v20  ;;  %v8880_v27 = vunpack.c.l.b16 %v8624_v42  ;;  %v8628_v18 = vpack.c.bf16 %v7816_v62, %v7816_v62 }
 0x4c5   : > { %v8878_v53 = vunpack.c.l.b16 %v8622_v49  ;;  %v7830_v61 = vmax.f32 %v7828_v52, %v7829_v41  ;;  %v8881_v29 = vunpack.c.l.b16 %v8625_v45  ;;  %v8629_v25 = vpack.c.bf16 %v7823_v35, %v7823_v35 }
 0x4c6   : > { %v8882_v16 = vunpack.c.l.b16 %v8626_v26  ;;  %v8883_v46 = vunpack.c.l.b16 %v8627_v57  ;;  %v8884_v59 = vunpack.c.l.b16 %v8628_v18 }
 0x4c7   : > { %v9005_v32 = vsel %vm6152_vm4, %v8879_v48, %v8878_v53  ;;  %v10987_v10 = vpack.c.bf16 %v7830_v61, %v7830_v61  ;;  %v8885_v30 = vunpack.c.l.b16 %v8629_v25 }
 0x4c8   : > { %v9006_v31 = vsel %vm6140_vm12, %v8880_v27, %v9005_v32 }
 0x4c9   : > { %v9007_v44 = vsel %vm6142_vm13, %v8881_v29, %v9006_v31  ;;  %v9143_v11 = vsel %vm12825_vm8, %v10987_v10, 0 }
 0x4ca   : > { %v9008_v1 = vsel %vm6144_vm14, %v8882_v16, %v9007_v44  ;;  %v9159_v50 = vshll.u32 %v9143_v11, 16  ;;  %v9280_v52 = vrot.slane %v9143_v11, 1 }
 0x4cb   : > { %v9009_v36 = vsel %vm6146_vm15, %v8883_v46, %v9008_v1 }
 0x4cc   : > { %v9010_v6 = vsel %vm6148_vm1, %v8884_v59, %v9009_v36  ;;  %v9161_v56 = vrot.slane %v9159_v50, 1 }
 0x4cd   : > { %v9011_v3 = vsel %vm6150_vm5, %v8885_v30, %v9010_v6 }
 0x4ce   : > { %v9103_v23 = vpack.c.b16 %v9011_v3, %v9004_v7 }
 0x4d0   : > { %v14396_v37 = vsel %vm12825_vm8, 0, %v9103_v23 }
 0x4d1   : > { %v9154_v54 = vshll.u32 %v14396_v37, 16  ;;  %v9152_v33 = vshrl.u32 %v14396_v37, 16  ;;  %v9279_v39 = vrot.slane %v14396_v37, 1 }
 0x4d3   : > { %v9156_v28 = vrot.slane %v9154_v54, 1  ;;  %v9281_v60 = vsel %vm963_vm2, %v9279_v39, %v9280_v52 }
 0x4d5   : > { %v9157_v34 = vor.u32 %v9156_v28, %v9152_v33 }
 0x4d7   : > { %v9162_v19 = vsel %vm610_vm3, %v9157_v34, %v9161_v56 }
 0x4d8   : > { %9247 = vrot.lane.b32.xlu0 %v9162_v19, %s11375_s15 }
 0x4dc   : > { %9303 = vrot.lane.b32.xlu0 %v9281_v60, %s11380_s16 }
 0x4e0   : > { %v11148_v40 = vpop.f32.mrb[8].mxu1 }
 0x4e1   : > { %v6880_v15 = vadd.f32 %v11148_v40, %v14293_v47  ;;  %v6871_v8 = vpop.f32.mrb[9].mxu1 }
 0x4e2   : > { %v6872_v5 = vadd.f32 %v14293_v47, %v6871_v8  ;;  %v11149_v14 = vpop.f32.mrb[10].mxu1 }
 0x4e3   : > { %v6988_v55 = vmax.f32 %v6880_v15, 0.0  ;;  %v6874_v22 = vpop.f32.mrb[11].mxu1  ;;  %v6883_v25 = vadd.f32 %v11149_v14, %v14293_v47 }
 0x4e4   : > { %v6986_v12 = vmax.f32 %v6872_v5, 0.0  ;;  %v6875_v33 = vadd.f32 %v14293_v47, %v6874_v22 }
 0x4e5   : > { %v7148_v43 = vcombine.high %v6988_v55, %v6988_v55  ;;  %v7155_v42 = vrot.slane %v6988_v55, %v12402_v13  ;;  %v6989_v6 = vmax.f32 %v6883_v25, 0.0 }
 0x4e6   : > { %v7114_v38 = vcombine.high %v6986_v12, %v6986_v12  ;;  %v7121_v21 = vrot.slane %v6986_v12, %v12402_v13  ;;  %v6987_v60 = vmax.f32 %v6875_v33, 0.0 }
 0x4e7   : > { %v7162_v17 = vrot.slane %v7148_v43, %v12402_v13  ;;  %v7163_v62 = vcombine.high %v7155_v42, %v7155_v42  ;;  %v7887_v9 = vsel %vm7718_vm11, %v7155_v42, -inf  ;;  %v7165_v15 = vcombine.high %v6989_v6, %v6989_v6 }
 0x4e8   : > { %v7888_v2 = vrot.slane %v7887_v9, 4  ;;  %v7128_v41 = vrot.slane %v7114_v38, %v12402_v13  ;;  %v7129_v45 = vcombine.high %v7121_v21, %v7121_v21  ;;  %v7831_v35 = vsel %vm7718_vm11, %v7121_v21, -inf }
 0x4e9   : > { %v7894_v49 = vsel %vm7718_vm11, %v7163_v62, -inf  ;;  %v7901_v58 = vsel %vm7718_vm11, %v7162_v17, -inf  ;;  %v7832_v26 = vrot.slane %v7831_v35, 4  ;;  %v7164_v20 = vcombine.high %v7162_v17, %v7162_v17 }
 0x4ea   : > { %v7889_v48 = vmax.f32 %v7887_v9, %v7888_v2  ;;  %v7895_v57 = vrot.slane %v7894_v49, 4  ;;  %v7130_v53 = vcombine.high %v7128_v41, %v7128_v41  ;;  %v7838_v27 = vsel %vm7718_vm11, %v7129_v45, -inf }
 0x4eb   : > { %v7833_v7 = vmax.f32 %v7831_v35, %v7832_v26  ;;  %v7845_v18 = vsel %vm7718_vm11, %v7128_v41, -inf  ;;  %v7902_v29 = vrot.slane %v7901_v58, 4  ;;  %v7839_v16 = vrot.slane %v7838_v27, 4 }
 0x4ec   : > { %v7890_v61 = vrot.slane %v7889_v48, 2  ;;  %v7896_v32 = vmax.f32 %v7894_v49, %v7895_v57  ;;  %v7846_v31 = vrot.slane %v7845_v18, 4  ;;  %v7852_v46 = vsel %vm7718_vm11, %v7130_v53, -inf }
 0x4ed   : > { %v7908_v44 = vsel %vm7718_vm11, %v7164_v20, -inf  ;;  %v7834_v59 = vrot.slane %v7833_v7, 2  ;;  %v7840_v1 = vmax.f32 %v7838_v27, %v7839_v16  ;;  %v7853_v30 = vrot.slane %v7852_v46, 4 }
 0x4ee   : > { %v7847_v10 = vmax.f32 %v7845_v18, %v7846_v31  ;;  %v7903_v36 = vmax.f32 %v7901_v58, %v7902_v29  ;;  %v7891_v3 = vmax.f32 %v7889_v48, %v7890_v61  ;;  %v7897_v23 = vrot.slane %v7896_v32, 2 }
 0x4ef   : > { %v7909_v11 = vrot.slane %v7908_v44, 4  ;;  %v7841_v54 = vrot.slane %v7840_v1, 2  ;;  %v7835_v50 = vmax.f32 %v7833_v7, %v7834_v59  ;;  %v7854_v56 = vmax.f32 %v7852_v46, %v7853_v30 }
 0x4f0   : > { %v7848_v34 = vrot.slane %v7847_v10, 2  ;;  %v7904_v19 = vrot.slane %v7903_v36, 2  ;;  %v7892_v39 = vrot.slane %v7891_v3, 1  ;;  %v7898_v52 = vmax.f32 %v7896_v32, %v7897_v23 }
 0x4f1   : > { %v7842_v28 = vmax.f32 %v7840_v1, %v7841_v54  ;;  %v7910_v40 = vmax.f32 %v7908_v44, %v7909_v11  ;;  %v7836_v8 = vrot.slane %v7835_v50, 1  ;;  %v7855_v55 = vrot.slane %v7854_v56, 2 }
 0x4f2   : > { %v7849_v14 = vmax.f32 %v7847_v10, %v7848_v34  ;;  %v7905_v12 = vmax.f32 %v7903_v36, %v7904_v19  ;;  %v7172_v43 = vrot.slane %v6989_v6, %v12402_v13  ;;  %v14422_v42 = vmax.f32 %v7891_v3, %v7892_v39 }
 0x4f3   : > { %v7843_v5 = vrot.slane %v7842_v28, 1  ;;  %v7899_v38 = vrot.slane %v7898_v52, 1  ;;  %v7911_v22 = vrot.slane %v7910_v40, 2  ;;  %v7179_v21 = vrot.slane %v7165_v15, %v12402_v13 }
 0x4f4   : > { %v7837_v17 = vmax.f32 %v7835_v50, %v7836_v8  ;;  %v7180_v62 = vcombine.high %v7172_v43, %v7172_v43  ;;  %v7915_v9 = vsel %vm7718_vm11, %v7172_v43, -inf  ;;  %v7131_v2 = vcombine.high %v6987_v60, %v6987_v60 }
 0x4f5   : > { %v7844_v41 = vmax.f32 %v7842_v28, %v7843_v5  ;;  %v7850_v45 = vrot.slane %v7849_v14, 1  ;;  %v7856_v35 = vmax.f32 %v7854_v56, %v7855_v55  ;;  %v7181_v49 = vcombine.high %v7179_v21, %v7179_v21 }
 0x4f6   : > { %v7916_v58 = vrot.slane %v7915_v9, 4  ;;  %v7922_v26 = vsel %vm7718_vm11, %v7180_v62, -inf  ;;  %v7929_v20 = vsel %vm7718_vm11, %v7179_v21, -inf  ;;  %v7138_v48 = vrot.slane %v6987_v60, %v12402_v13 }
 0x4f7   : > { %v7906_v57 = vrot.slane %v7905_v12, 1  ;;  %v14429_v53 = vmax.f32 %v7910_v40, %v7911_v22  ;;  %v7923_v7 = vrot.slane %v7922_v26, 4  ;;  %v7930_v27 = vrot.slane %v7929_v20, 4 }
 0x4f8   : > { %v14431_v18 = vmax.f32 %v7898_v52, %v7899_v38  ;;  %v8631_v61 = vpack.c.bf16 %v7837_v17, %v7837_v17  ;;  %v7936_v29 = vsel %vm7718_vm11, %v7181_v49, -inf  ;;  %v7145_v25 = vrot.slane %v7131_v2, %v12402_v13 }
 0x4f9   : > { %v7851_v32 = vmax.f32 %v7849_v14, %v7850_v45  ;;  %v7857_v16 = vrot.slane %v7856_v35, 1  ;;  %v8632_v31 = vpack.c.bf16 %v7844_v41, %v7844_v41  ;;  %v7146_v46 = vcombine.high %v7138_v48, %v7138_v48 }
 0x4fa   : > { %v7917_v44 = vmax.f32 %v7915_v9, %v7916_v58  ;;  %v7147_v59 = vcombine.high %v7145_v25, %v7145_v25  ;;  %v7859_v1 = vsel %vm7718_vm11, %v7138_v48, -inf  ;;  %v7873_v10 = vsel %vm7718_vm11, %v7145_v25, -inf }
 0x4fb   : > { %v7924_v30 = vmax.f32 %v7922_v26, %v7923_v7  ;;  %v7931_v36 = vmax.f32 %v7929_v20, %v7930_v27  ;;  %v7937_v6 = vrot.slane %v7936_v29, 4  ;;  %v7860_v3 = vrot.slane %v7859_v1, 4 }
 0x4fc   : > { %v14437_v11 = vmax.f32 %v7905_v12, %v7906_v57  ;;  %v7866_v54 = vsel %vm7718_vm11, %v7146_v46, -inf  ;;  %v7874_v50 = vrot.slane %v7873_v10, 4  ;;  %v7880_v33 = vsel %vm7718_vm11, %v7147_v59, -inf }
 0x4fd   : > { %v7858_v28 = vmax.f32 %v7856_v35, %v7857_v16  ;;  %v8633_v34 = vpack.c.bf16 %v7851_v32, %v7851_v32  ;;  %v8887_v56 = vunpack.c.l.b16 %v8631_v61  ;;  %v8888_v19 = vunpack.c.l.b16 %v8632_v31 }
 0x4fe   : > { %v7918_v39 = vrot.slane %v7917_v44, 2  ;;  %v7861_v52 = vmax.f32 %v7859_v1, %v7860_v3  ;;  %v7867_v40 = vrot.slane %v7866_v54, 4  ;;  %v7875_v15 = vmax.f32 %v7873_v10, %v7874_v50 }
 0x4ff   : > { %v7925_v8 = vrot.slane %v7924_v30, 2  ;;  %v7932_v60 = vrot.slane %v7931_v36, 2  ;;  %v7938_v5 = vmax.f32 %v7936_v29, %v7937_v6  ;;  %v7881_v14 = vrot.slane %v7880_v33, 4 }
 0x500   : > { %v7862_v38 = vrot.slane %v7861_v52, 2  ;;  %v7868_v22 = vmax.f32 %v7866_v54, %v7867_v40  ;;  %v7876_v21 = vrot.slane %v7875_v15, 2  ;;  %v8634_v62 = vpack.c.bf16 %v7858_v28, %v7858_v28 }
 0x501   : > { %v8889_v9 = vunpack.c.l.b16 %v8633_v34  ;;  %v9012_v2 = vsel %vm6140_vm12, %v8888_v19, %v8887_v56  ;;  %v7919_v41 = vmax.f32 %v7917_v44, %v7918_v39  ;;  %v7926_v58 = vmax.f32 %v7924_v30, %v7925_v8 }
 0x502   : > { %v6606_v23 = vpop.permute.xlu0 %6605  ;;  %v7863_v45 = vmax.f32 %v7861_v52, %v7862_v38  ;;  %v7869_v35 = vrot.slane %v7868_v22, 2  ;;  %v7877_v49 = vmax.f32 %v7875_v15, %v7876_v21  ;;  %v7933_v26 = vmax.f32 %v7931_v36, %v7932_v60 }
 0x503   : > { %v6726_v55 = vsel %vm1535_vm7, %v14234_v0, %v6606_v23  ;;  %v7939_v0 = vrot.slane %v7938_v5, 2  ;;  %v7882_v20 = vmax.f32 %v7880_v33, %v7881_v14  ;;  %v7913_v25 = vrot.slane %v14429_v53, 1 }
 0x504   : > { %v7864_v7 = vrot.slane %v7863_v45, 1  ;;  %v7870_v27 = vmax.f32 %v7868_v22, %v7869_v35  ;;  %v7878_v61 = vrot.slane %v7877_v49, 1  ;;  %v8890_v32 = vunpack.c.l.b16 %v8634_v62 }
 0x505   : > { %v7883_v16 = vrot.slane %v7882_v20, 2  ;;  %v9013_v31 = vsel %vm6142_vm13, %v8889_v9, %v9012_v2  ;;  %v7920_v1 = vrot.slane %v7919_v41, 1  ;;  %v7927_v10 = vrot.slane %v7926_v58, 1 }
 0x506   : > { %v6608_v12 = vpop.permute.xlu1 %6607  ;;  %v6694_v43 = vpop.permute.xlu0 %6693  ;;  %v7865_v46 = vmax.f32 %v7863_v45, %v7864_v7  ;;  %v7871_v44 = vrot.slane %v7870_v27, 1  ;;  %v7879_v59 = vmax.f32 %v7877_v49, %v7878_v61  ;;  %v8639_v6 = vpack.c.bf16 %v14422_v42, %v14422_v42 }
 0x507   : > { %v6758_v17 = vsel %vm1665_vm9, %v6726_v55, %v6694_v43  ;;  %v6728_v48 = vsel %vm1535_vm7, %v14229_v4, %v6608_v12  ;;  %v7934_v4 = vrot.slane %v7933_v26, 1  ;;  %v7884_v30 = vmax.f32 %v7882_v20, %v7883_v16 }
 0x508   : > { %11166 = vmatprep.mubr.msk.bf16.mxu1 %vm6784_vm10, %v6758_v17  ;;  %v7940_v3 = vmax.f32 %v7938_v5, %v7939_v0  ;;  %v7872_v23 = vmax.f32 %v7870_v27, %v7871_v44  ;;  %v8635_v54 = vpack.c.bf16 %v7865_v46, %v7865_v46  ;;  %v7914_v33 = vmax.f32 %v14429_v53, %v7913_v25 }
 0x509   : > { %v7885_v28 = vrot.slane %v7884_v30, 1  ;;  %v8637_v34 = vpack.c.bf16 %v7879_v59, %v7879_v59  ;;  %v9014_v56 = vsel %vm6144_vm14, %v8890_v32, %v9013_v31  ;;  %v8640_v19 = vpack.c.bf16 %v14431_v18, %v14431_v18 }
 0x50a   : > { %v6696_v57 = vpop.permute.xlu1 %6695  ;;  %v8641_v39 = vpack.c.bf16 %v14437_v11, %v14437_v11  ;;  %v8636_v52 = vpack.c.bf16 %v7872_v23, %v7872_v23  ;;  %v8891_v40 = vunpack.c.l.b16 %v8635_v54  ;;  %v7921_v15 = vmax.f32 %v7919_v41, %v7920_v1 }
 0x50b   : > { %v6760_v29 = vsel %vm1665_vm9, %v6728_v48, %v6696_v57  ;;  %v7928_v42 = vmax.f32 %v7926_v58, %v7927_v10  ;;  %v7935_v8 = vmax.f32 %v7933_v26, %v7934_v4  ;;  %v7886_v60 = vmax.f32 %v7884_v30, %v7885_v28 }
 0x50c   : > { %11167 = vmatmul.mubr.msk.bf16.gmra.mrb[28].mxu1 %vm6784_vm10, %v6760_v29  ;;  %v8892_v14 = vunpack.c.l.b16 %v8636_v52  ;;  %v9015_v55 = vsel %vm6146_vm15, %v8891_v40, %v9014_v56  ;;  %v7941_v12 = vrot.slane %v7940_v3, 1  ;;  %v8893_v22 = vunpack.c.l.b16 %v8637_v34 }
 0x50d   : > { %v8638_v38 = vpack.c.bf16 %v7886_v60, %v7886_v60  ;;  %v8642_v17 = vpack.c.bf16 %v7914_v33, %v7914_v33  ;;  %v8895_v62 = vunpack.c.l.b16 %v8639_v6  ;;  %v8643_v9 = vpack.c.bf16 %v7921_v15, %v7921_v15 }
 0x50e   : > { %v6610_v36 = vpop.permute.xlu0 %6609  ;;  %v8644_v45 = vpack.c.bf16 %v7928_v42, %v7928_v42  ;;  %v7942_v35 = vmax.f32 %v7940_v3, %v7941_v12  ;;  %v8897_v49 = vunpack.c.l.b16 %v8641_v39  ;;  %v8645_v58 = vpack.c.bf16 %v7935_v8, %v7935_v8 }
 0x50f   : > { %v6612_v50 = vpop.permute.xlu1 %6611  ;;  %v6730_v5 = vsel %vm1535_vm7, %v14306_v51, %v6610_v36  ;;  %v9016_v51 = vsel %vm6148_vm1, %v8892_v14, %v9015_v55  ;;  %v8894_v2 = vunpack.c.l.b16 %v8638_v38  ;;  %v8898_v0 = vunpack.c.l.b16 %v8642_v17 }
 0x510   : > { %v6732_v18 = vsel %vm1535_vm7, %v14302_v63, %v6612_v50  ;;  %v9017_v41 = vsel %vm6150_vm5, %v8893_v22, %v9016_v51  ;;  %v8896_v63 = vunpack.c.l.b16 %v8640_v19  ;;  %v8899_v48 = vunpack.c.l.b16 %v8643_v9 }
 0x511   : > { %v9018_v26 = vsel %vm6152_vm4, %v8895_v62, %v8894_v2  ;;  %v8900_v7 = vunpack.c.l.b16 %v8644_v45  ;;  %v10988_v61 = vpack.c.bf16 %v7942_v35, %v7942_v35  ;;  %v8901_v29 = vunpack.c.l.b16 %v8645_v58 }
 0x512   : > { %v6698_v53 = vpop.permute.xlu0 %6697  ;;  %v9019_v20 = vsel %vm6140_vm12, %v8896_v63, %v9018_v26  ;;  %vm9335_vm7 = vcmask 261120  }
 0x513   : > { %v6762_v43 = vsel %vm1665_vm9, %v6730_v5, %v6698_v53  ;;  %v6700_v11 = vpop.permute.xlu1 %6699  ;;  %v9020_v57 = vsel %vm6142_vm13, %v8897_v49, %v9019_v20  ;;  %v9144_v46 = vsel %vm12825_vm8, %v10988_v61, 0 }
 0x514   : > { %v6764_v21 = vsel %vm1665_vm9, %v6732_v18, %v6700_v11  ;;  %11170 = vmatprep.mubr.msk.bf16.mxu1 %vm6784_vm10, %v6762_v43  ;;  %v9021_v27 = vsel %vm6144_vm14, %v8898_v0, %v9020_v57  ;;  %v9171_v1 = vshll.u32 %v9144_v46, 16  ;;  %v9283_v23 = vrot.slane %v9144_v46, 1 }
 0x515   : > { %11171 = vmatmul.mubr.msk.bf16.gmra.mrb[32].mxu1 %vm6784_vm10, %v6764_v21  ;;  %v9022_v25 = vsel %vm6146_vm15, %v8899_v48, %v9021_v27 }
 0x516   : > { %v9023_v32 = vsel %vm6148_vm1, %v8900_v7, %v9022_v25  ;;  %v9173_v36 = vrot.slane %v9171_v1, 1 }
 0x517   : > { %v9024_v16 = vsel %vm6150_vm5, %v8901_v29, %v9023_v32 }
 0x518   : > { %v9105_v31 = vpack.c.b16 %v9024_v16, %v9017_v41 }
 0x51a   : > { %v14482_v44 = vsel %vm12825_vm8, 0, %v9105_v31 }
 0x51b   : > { %v9166_v59 = vshll.u32 %v14482_v44, 16  ;;  %v9164_v10 = vshrl.u32 %v14482_v44, 16  ;;  %v9282_v3 = vrot.slane %v14482_v44, 1 }
 0x51d   : > { %v9168_v4 = vrot.slane %v9166_v59, 1  ;;  %v9284_v54 = vsel %vm963_vm2, %v9282_v3, %v9283_v23 }
 0x51f   : > { %v9169_v30 = vor.u32 %v9168_v4, %v9164_v10 }
 0x521   : > { %v9174_v6 = vsel %vm610_vm3, %v9169_v30, %v9173_v36 }
 0x522   : > { %9249 = vrot.lane.b32.xlu1 %v9174_v6, %s11375_s15 }
 0x526   : > { %9305 = vrot.lane.b32.xlu1 %v9284_v54, %s11380_s16 }
 0x554   : > { %v11152_v50 = vpop.f32.mrb[12].mxu1 }
 0x555   : > { %v6896_v33 = vadd.f32 %v11152_v50, %v14293_v47  ;;  %v6887_v28 = vpop.f32.mrb[13].mxu1 }
 0x556   : > { %v6888_v34 = vadd.f32 %v14293_v47, %v6887_v28  ;;  %v11153_v56 = vpop.f32.mrb[14].mxu1 }
 0x557   : > { %v6992_v19 = vmax.f32 %v6896_v33, 0.0  ;;  %v6890_v39 = vpop.f32.mrb[15].mxu1  ;;  %v6899_v14 = vadd.f32 %v11153_v56, %v14293_v47  ;;  %v14517_v33 = vld [vmem:[%s15555_s4] ss:$0 sm:$0xff] }
 0x558   : > { %v6990_v52 = vmax.f32 %v6888_v34, 0.0  ;;  %v6891_v28 = vadd.f32 %v14517_v33, %v6890_v39 }
 0x559   : > { %v7216_v40 = vcombine.high %v6992_v19, %v6992_v19  ;;  %v7223_v15 = vrot.slane %v6992_v19, %v12402_v13  ;;  %v6993_v4 = vmax.f32 %v6899_v14, 0.0 }
 0x55a   : > { %v7182_v42 = vcombine.high %v6990_v52, %v6990_v52  ;;  %v7189_v8 = vrot.slane %v6990_v52, %v12402_v13 }
 0x55b   : > { %v7230_v60 = vrot.slane %v7216_v40, %v12402_v13  ;;  %v7231_v5 = vcombine.high %v7223_v15, %v7223_v15  ;;  %v7999_v53 = vsel %vm7718_vm11, %v7223_v15, -inf  ;;  %v7240_v39 = vrot.slane %v6993_v4, %v12402_v13 }
 0x55c   : > { %v8000_v55 = vrot.slane %v7999_v53, 4  ;;  %v7196_v12 = vrot.slane %v7182_v42, %v12402_v13  ;;  %v7197_v18 = vcombine.high %v7189_v8, %v7189_v8  ;;  %v7943_v43 = vsel %vm7718_vm11, %v7189_v8, -inf }
 0x55d   : > { %v7232_v11 = vcombine.high %v7230_v60, %v7230_v60  ;;  %v8006_v38 = vsel %vm7718_vm11, %v7231_v5, -inf  ;;  %v8013_v22 = vsel %vm7718_vm11, %v7230_v60, -inf  ;;  %v7944_v21 = vrot.slane %v7943_v43, 4 }
 0x55e   : > { %v8001_v17 = vmax.f32 %v7999_v53, %v8000_v55  ;;  %v8007_v51 = vrot.slane %v8006_v38, 4  ;;  %v8014_v62 = vrot.slane %v8013_v22, 4  ;;  %v7198_v9 = vcombine.high %v7196_v12, %v7196_v12 }
 0x55f   : > { %v8020_v2 = vsel %vm7718_vm11, %v7232_v11, -inf  ;;  %v7945_v41 = vmax.f32 %v7943_v43, %v7944_v21  ;;  %v7950_v47 = vsel %vm7718_vm11, %v7197_v18, -inf  ;;  %v7957_v63 = vsel %vm7718_vm11, %v7196_v12, -inf }
 0x560   : > { %v8002_v45 = vrot.slane %v8001_v17, 2  ;;  %v8008_v35 = vmax.f32 %v8006_v38, %v8007_v51  ;;  %v8015_v49 = vmax.f32 %v8013_v22, %v8014_v62  ;;  %v8021_v58 = vrot.slane %v8020_v2, 4 }
 0x561   : > { %v7946_v26 = vrot.slane %v7945_v41, 2  ;;  %v7951_v0 = vrot.slane %v7950_v47, 4  ;;  %v7958_v20 = vrot.slane %v7957_v63, 4  ;;  %v7964_v48 = vsel %vm7718_vm11, %v7198_v9, -inf }
 0x562   : > { %v8003_v57 = vmax.f32 %v8001_v17, %v8002_v45  ;;  %v8009_v7 = vrot.slane %v8008_v35, 2  ;;  %v8016_v27 = vrot.slane %v8015_v49, 2  ;;  %v8022_v61 = vmax.f32 %v8020_v2, %v8021_v58  ;;  %v14506_v29 = vpop.f32.mrb[16].mxu1 }
 0x563   : > { %v7947_v25 = vmax.f32 %v7945_v41, %v7946_v26  ;;  %v7952_v32 = vmax.f32 %v7950_v47, %v7951_v0  ;;  %v7959_v16 = vmax.f32 %v7957_v63, %v7958_v20  ;;  %v7965_v31 = vrot.slane %v7964_v48, 4  ;;  %v14508_v46 = vpop.f32.mrb[17].mxu1 }
 0x564   : > { %v8010_v59 = vmax.f32 %v8008_v35, %v8009_v7  ;;  %v8017_v1 = vmax.f32 %v8015_v49, %v8016_v27  ;;  %v8023_v10 = vrot.slane %v8022_v61, 2  ;;  %v14510_v30 = vpop.f32.mrb[18].mxu1  ;;  %v8004_v36 = vrot.slane %v8003_v57, 1 }
 0x565   : > { %v7953_v6 = vrot.slane %v7952_v32, 2  ;;  %v7960_v3 = vrot.slane %v7959_v16, 2  ;;  %v7966_v23 = vmax.f32 %v7964_v48, %v7965_v31  ;;  %v14512_v54 = vpop.f32.mrb[19].mxu1  ;;  %v7948_v50 = vrot.slane %v7947_v25, 1 }
 0x566   : > { %v8011_v34 = vrot.slane %v8010_v59, 1  ;;  %v8024_v56 = vmax.f32 %v8022_v61, %v8023_v10  ;;  %v8018_v52 = vrot.slane %v8017_v1, 1  ;;  %v8005_v40 = vmax.f32 %v8003_v57, %v8004_v36 }
 0x567   : > { %v7954_v19 = vmax.f32 %v7952_v32, %v7953_v6  ;;  %v7961_v15 = vmax.f32 %v7959_v16, %v7960_v3  ;;  %v7967_v42 = vrot.slane %v7966_v23, 2  ;;  %v7233_v8 = vcombine.high %v6993_v4, %v6993_v4 }
 0x568   : > { %v7949_v60 = vmax.f32 %v7947_v25, %v7948_v50  ;;  %v6991_v5 = vmax.f32 %v6891_v28, 0.0  ;;  %v8012_v14 = vmax.f32 %v8010_v59, %v8011_v34  ;;  %v8025_v55 = vrot.slane %v8024_v56, 1 }
 0x569   : > { %v7955_v12 = vrot.slane %v7954_v19, 1  ;;  %v8019_v43 = vmax.f32 %v8017_v1, %v8018_v52  ;;  %v8655_v38 = vpack.c.bf16 %v8005_v40, %v8005_v40  ;;  %v7962_v22 = vrot.slane %v7961_v15, 1 }
 0x56a   : > { %v14520_v53 = vpop.f32.mrb[20].mxu1  ;;  %v7968_v21 = vmax.f32 %v7966_v23, %v7967_v42  ;;  %v7247_v17 = vrot.slane %v7233_v8, %v12402_v13  ;;  %v8647_v62 = vpack.c.bf16 %v7949_v60, %v7949_v60  ;;  %v7248_v9 = vcombine.high %v7240_v39, %v7240_v39 }
 0x56b   : > { %v14522_v18 = vpop.f32.mrb[21].mxu1  ;;  %v8027_v2 = vsel %vm7718_vm11, %v7240_v39, -inf  ;;  %v7199_v41 = vcombine.high %v6991_v5, %v6991_v5  ;;  %v8026_v47 = vmax.f32 %v8024_v56, %v8025_v55  ;;  %v8656_v63 = vpack.c.bf16 %v8012_v14, %v8012_v14 }
 0x56c   : > { %v14525_v11 = vpop.f32.mrb[22].mxu1  ;;  %v7956_v45 = vmax.f32 %v7954_v19, %v7955_v12  ;;  %v7249_v35 = vcombine.high %v7247_v17, %v7247_v17  ;;  %v8028_v49 = vrot.slane %v8027_v2, 4  ;;  %v8034_v58 = vsel %vm7718_vm11, %v7248_v9, -inf }
 0x56d   : > { %v14528_v51 = vpop.f32.mrb[23].mxu1  ;;  %v8041_v26 = vsel %vm7718_vm11, %v7247_v17, -inf  ;;  %v7206_v0 = vrot.slane %v6991_v5, %v12402_v13  ;;  %v8657_v20 = vpack.c.bf16 %v8019_v43, %v8019_v43  ;;  %v7969_v48 = vrot.slane %v7968_v21, 1 }
 0x56e   : > { %v8035_v57 = vrot.slane %v8034_v58, 4  ;;  %v8042_v7 = vrot.slane %v8041_v26, 4  ;;  %v7963_v27 = vmax.f32 %v7961_v15, %v7962_v22  ;;  %v8029_v61 = vmax.f32 %v8027_v2, %v8028_v49 }
 0x56f   : > { %v8048_v25 = vsel %vm7718_vm11, %v7249_v35, -inf  ;;  %v7213_v32 = vrot.slane %v7199_v41, %v12402_v13  ;;  %v14536_v16 = vunpack.c.l.b16 %v8655_v38  ;;  %v8648_v31 = vpack.c.bf16 %v7956_v45, %v7956_v45 }
 0x570   : > { %v8036_v59 = vmax.f32 %v8034_v58, %v8035_v57  ;;  %v7214_v1 = vcombine.high %v7206_v0, %v7206_v0  ;;  %v8903_v10 = vunpack.c.l.b16 %v8647_v62  ;;  %v8043_v4 = vmax.f32 %v8041_v26, %v8042_v7 }
 0x571   : > { %v7215_v36 = vcombine.high %v7213_v32, %v7213_v32  ;;  %v7971_v6 = vsel %vm7718_vm11, %v7206_v0, -inf  ;;  %v8658_v3 = vpack.c.bf16 %v8026_v47, %v8026_v47  ;;  %v7970_v23 = vmax.f32 %v7968_v21, %v7969_v48 }
 0x572   : > { %v8049_v50 = vrot.slane %v8048_v25, 4  ;;  %v7972_v28 = vrot.slane %v7971_v6, 4  ;;  %v8649_v34 = vpack.c.bf16 %v7963_v27, %v7963_v27  ;;  %v8030_v56 = vrot.slane %v8029_v61, 2 }
 0x573   : > { %v7978_v19 = vsel %vm7718_vm11, %v7214_v1, -inf  ;;  %v7992_v52 = vsel %vm7718_vm11, %v7215_v36, -inf  ;;  %v14541_v40 = vunpack.c.l.b16 %v8656_v63  ;;  %v8904_v15 = vunpack.c.l.b16 %v8648_v31 }
 0x574   : > { %v8037_v42 = vrot.slane %v8036_v59, 2  ;;  %v7973_v8 = vmax.f32 %v7971_v6, %v7972_v28  ;;  %v8044_v60 = vrot.slane %v8043_v4, 2  ;;  %v7979_v5 = vrot.slane %v7978_v19, 4 }
 0x575   : > { %v7985_v14 = vsel %vm7718_vm11, %v7213_v32, -inf  ;;  %v7993_v55 = vrot.slane %v7992_v52, 4  ;;  %v14544_v12 = vunpack.c.l.b16 %v8657_v20  ;;  %v8650_v43 = vpack.c.bf16 %v7970_v23, %v7970_v23 }
 0x576   : > { %v8050_v39 = vmax.f32 %v8048_v25, %v8049_v50  ;;  %v7974_v38 = vrot.slane %v7973_v8, 2  ;;  %v8905_v22 = vunpack.c.l.b16 %v8649_v34  ;;  %v14546_v21 = vmax.f32 %v8029_v61, %v8030_v56 }
 0x577   : > { %v7980_v17 = vmax.f32 %v7978_v19, %v7979_v5  ;;  %v7994_v62 = vmax.f32 %v7992_v52, %v7993_v55  ;;  %v9025_v9 = vsel %vm6140_vm12, %v8904_v15, %v8903_v10  ;;  %v14549_v2 = vmax.f32 %v8036_v59, %v8037_v42 }
 0x578   : > { %v7975_v41 = vmax.f32 %v7973_v8, %v7974_v38  ;;  %v7986_v47 = vrot.slane %v7985_v14, 4  ;;  %v14553_v45 = vunpack.c.l.b16 %v8658_v3  ;;  %v14555_v35 = vmax.f32 %v8043_v4, %v8044_v60 }
 0x579   : > { %v7981_v49 = vrot.slane %v7980_v17, 2  ;;  %v7995_v58 = vrot.slane %v7994_v62, 2  ;;  %v8906_v0 = vunpack.c.l.b16 %v8650_v43  ;;  %v8051_v20 = vrot.slane %v8050_v39, 2 }
 0x57a   : > { %v7976_v48 = vrot.slane %v7975_v41, 1  ;;  %v6912_v57 = vadd.f32 %v14517_v33, %v14506_v29  ;;  %v9026_v7 = vsel %vm6142_vm13, %v8905_v22, %v9025_v9  ;;  %v8032_v27 = vrot.slane %v14546_v21, 1 }
 0x57b   : > { %v14551_v63 = vpop.f32.mrb[24].mxu1  ;;  %v7982_v61 = vmax.f32 %v7980_v17, %v7981_v49  ;;  %v7996_v25 = vmax.f32 %v7994_v62, %v7995_v58  ;;  %v8039_v32 = vrot.slane %v14549_v2, 1  ;;  %v7987_v59 = vmax.f32 %v7985_v14, %v7986_v47 }
 0x57c   : > { %v14557_v26 = vpop.f32.mrb[25].mxu1  ;;  %v7977_v31 = vmax.f32 %v7975_v41, %v7976_v48  ;;  %v6996_v1 = vmax.f32 %v6912_v57, 0.0  ;;  %v8046_v10 = vrot.slane %v14555_v35, 1  ;;  %v6904_v6 = vadd.f32 %v14517_v33, %v14508_v46 }
 0x57d   : > { %v7983_v4 = vrot.slane %v7982_v61, 1  ;;  %v7997_v36 = vrot.slane %v7996_v25, 1  ;;  %v14567_v3 = vmax.f32 %v8050_v39, %v8051_v20  ;;  %v9027_v56 = vsel %vm6144_vm14, %v8906_v0, %v9026_v7  ;;  %v14573_v55 = vpop.f32.mrb[26].mxu1 }
 0x57e   : > { %v8651_v29 = vpack.c.bf16 %v7977_v31, %v7977_v31  ;;  %v7284_v23 = vcombine.high %v6996_v1, %v6996_v1  ;;  %v7291_v50 = vrot.slane %v6996_v1, %v12402_v13  ;;  %v6994_v19 = vmax.f32 %v6904_v6, 0.0 }
 0x57f   : > { %v7984_v28 = vmax.f32 %v7982_v61, %v7983_v4  ;;  %v7998_v34 = vmax.f32 %v7996_v25, %v7997_v36  ;;  %v7988_v60 = vrot.slane %v7987_v59, 2  ;;  %v14585_v61 = vpop.f32.mrb[27].mxu1  ;;  %v8033_v36 = vmax.f32 %v14546_v21, %v8032_v27 }
 0x580   : > { %v8907_v52 = vunpack.c.l.b16 %v8651_v29  ;;  %v7298_v15 = vrot.slane %v7284_v23, %v12402_v13  ;;  %v7299_v42 = vcombine.high %v7291_v50, %v7291_v50  ;;  %v8111_v8 = vsel %vm7718_vm11, %v7291_v50, -inf }
 0x581   : > { %v8652_v5 = vpack.c.bf16 %v7984_v28, %v7984_v28  ;;  %v8654_v46 = vpack.c.bf16 %v7998_v34, %v7998_v34  ;;  %v8112_v14 = vrot.slane %v8111_v8, 4  ;;  %v7250_v58 = vcombine.high %v6994_v19, %v6994_v19 }
 0x582   : > { %v9028_v43 = vsel %vm6146_vm15, %v8907_v52, %v9027_v56  ;;  %v7300_v39 = vcombine.high %v7298_v15, %v7298_v15  ;;  %v8118_v38 = vsel %vm7718_vm11, %v7299_v42, -inf  ;;  %v8125_v22 = vsel %vm7718_vm11, %v7298_v15, -inf }
 0x583   : > { %v8908_v17 = vunpack.c.l.b16 %v8652_v5  ;;  %v8910_v62 = vunpack.c.l.b16 %v8654_v46  ;;  %v8113_v9 = vmax.f32 %v8111_v8, %v8112_v14  ;;  %v8119_v41 = vrot.slane %v8118_v38, 4 }
 0x584   : > { %v8126_v47 = vrot.slane %v8125_v22, 4  ;;  %v8132_v49 = vsel %vm7718_vm11, %v7300_v39, -inf  ;;  %v7257_v0 = vrot.slane %v6994_v19, %v12402_v13  ;;  %v7264_v4 = vrot.slane %v7250_v58, %v12402_v13 }
 0x585   : > { %v14581_v20 = vsel %vm6148_vm1, %v8908_v17, %v9028_v43  ;;  %v9031_v48 = vsel %vm6152_vm4, %v14536_v16, %v8910_v62  ;;  %v8114_v57 = vrot.slane %v8113_v9, 2  ;;  %v8120_v7 = vmax.f32 %v8118_v38, %v8119_v41 }
 0x586   : > { %v9032_v25 = vsel %vm6140_vm12, %v14541_v40, %v9031_v48  ;;  %v8127_v31 = vmax.f32 %v8125_v22, %v8126_v47  ;;  %v8133_v1 = vrot.slane %v8132_v49, 4  ;;  %v7265_v23 = vcombine.high %v7257_v0, %v7257_v0 }
 0x587   : > { %v14593_v6 = vsel %vm6142_vm13, %v14544_v12, %v9032_v25  ;;  %v8121_v29 = vrot.slane %v8120_v7, 2  ;;  %v7989_v16 = vmax.f32 %v7987_v59, %v7988_v60  ;;  %v7266_v28 = vcombine.high %v7264_v4, %v7264_v4 }
 0x588   : > { %v8134_v50 = vmax.f32 %v8132_v49, %v8133_v1  ;;  %v8055_v34 = vsel %vm7718_vm11, %v7257_v0, -inf  ;;  %v8040_v56 = vmax.f32 %v14549_v2, %v8039_v32  ;;  %v8047_v40 = vmax.f32 %v14555_v35, %v8046_v10 }
 0x589   : > { %v8056_v19 = vrot.slane %v8055_v34, 4  ;;  %v8062_v52 = vsel %vm7718_vm11, %v7265_v23, -inf  ;;  %v8115_v15 = vmax.f32 %v8113_v9, %v8114_v57  ;;  %v8128_v21 = vrot.slane %v8127_v31, 2 }
 0x58a   : > { %v8063_v27 = vrot.slane %v8062_v52, 4  ;;  %v8069_v12 = vsel %vm7718_vm11, %v7264_v4, -inf  ;;  %v8659_v42 = vpack.c.bf16 %v8033_v36, %v8033_v36  ;;  %v8122_v8 = vmax.f32 %v8120_v7, %v8121_v29 }
 0x58b   : > { %v8057_v5 = vmax.f32 %v8055_v34, %v8056_v19  ;;  %v8070_v59 = vrot.slane %v8069_v12, 4  ;;  %v7990_v60 = vrot.slane %v7989_v16, 1  ;;  %v8135_v46 = vrot.slane %v8134_v50, 2 }
 0x58c   : > { %v8064_v14 = vmax.f32 %v8062_v52, %v8063_v27  ;;  %v8076_v43 = vsel %vm7718_vm11, %v7266_v28, -inf  ;;  %v8660_v2 = vpack.c.bf16 %v8040_v56, %v8040_v56  ;;  %v6915_v10 = vadd.f32 %v14517_v33, %v14510_v30 }
 0x58d   : > { %v8058_v32 = vrot.slane %v8057_v5, 2  ;;  %v8071_v35 = vmax.f32 %v8069_v12, %v8070_v59  ;;  %v8116_v39 = vrot.slane %v8115_v15, 1  ;;  %v8129_v38 = vmax.f32 %v8127_v31, %v8128_v21 }
 0x58e   : > { %v8065_v22 = vrot.slane %v8064_v14, 2  ;;  %v8077_v17 = vrot.slane %v8076_v43, 4  ;;  %v8661_v62 = vpack.c.bf16 %v8047_v40, %v8047_v40  ;;  %v8123_v9 = vrot.slane %v8122_v8, 1 }
 0x58f   : > { %v8059_v41 = vmax.f32 %v8057_v5, %v8058_v32  ;;  %v8072_v47 = vrot.slane %v8071_v35, 2  ;;  %v7991_v49 = vmax.f32 %v7989_v16, %v7990_v60  ;;  %v8136_v58 = vmax.f32 %v8134_v50, %v8135_v46 }
 0x590   : > { %v8066_v0 = vmax.f32 %v8064_v14, %v8065_v22  ;;  %v8078_v48 = vmax.f32 %v8076_v43, %v8077_v17  ;;  %v14603_v57 = vunpack.c.l.b16 %v8659_v42  ;;  %v14605_v7 = vunpack.c.l.b16 %v8660_v2 }
 0x591   : > { %v8073_v25 = vmax.f32 %v8071_v35, %v8072_v47  ;;  %v6997_v1 = vmax.f32 %v6915_v10, 0.0  ;;  %v8117_v4 = vmax.f32 %v8115_v15, %v8116_v39  ;;  %v8130_v30 = vrot.slane %v8129_v38, 1 }
 0x592   : > { %v8067_v36 = vrot.slane %v8066_v0, 1  ;;  %v8079_v31 = vrot.slane %v8078_v48, 2  ;;  %v8124_v29 = vmax.f32 %v8122_v8, %v8123_v9  ;;  %v8060_v23 = vrot.slane %v8059_v41, 1 }
 0x593   : > { %v7301_v28 = vcombine.high %v6997_v1, %v6997_v1  ;;  %v7308_v34 = vrot.slane %v6997_v1, %v12402_v13  ;;  %v14608_v56 = vunpack.c.l.b16 %v8661_v62  ;;  %v8653_v16 = vpack.c.bf16 %v7991_v49, %v7991_v49  ;;  %v11288_v1 = vld [vmem:[%s15556_s5] sm:$0xff]  }
 0x594   : > { %v8137_v50 = vrot.slane %v8136_v58, 1  ;;  %v6907_v40 = vadd.f32 %v14517_v33, %v14512_v54  ;;  %v8074_v19 = vrot.slane %v8073_v25, 1  ;;  %v8080_v52 = vmax.f32 %v8078_v48, %v8079_v31  ;;  %11174 = vmatprep.subr.bf16.mxu1 %v11288_v1 }
 0x595   : > { %v7315_v21 = vrot.slane %v7301_v28, %v12402_v13  ;;  %v7316_v15 = vcombine.high %v7308_v34, %v7308_v34  ;;  %v8671_v27 = vpack.c.bf16 %v8117_v4, %v8117_v4  ;;  %v8068_v12 = vmax.f32 %v8066_v0, %v8067_v36  ;;  %11175 = vmatpush3.bf16.msra.mxu1 %v11288_v1 }
 0x596   : > { %v8139_v42 = vsel %vm7718_vm11, %v7308_v34, -inf  ;;  %v6995_v8 = vmax.f32 %v6907_v40, 0.0  ;;  %v8131_v5 = vmax.f32 %v8129_v38, %v8130_v30  ;;  %v8672_v59 = vpack.c.bf16 %v8124_v29, %v8124_v29 }
 0x597   : > { %v8061_v60 = vmax.f32 %v8059_v41, %v8060_v23  ;;  %v8140_v46 = vrot.slane %v8139_v42, 4  ;;  %v8138_v14 = vmax.f32 %v8136_v58, %v8137_v50  ;;  %v7317_v43 = vcombine.high %v7315_v21, %v7315_v21 }
 0x598   : > { %v8146_v2 = vsel %vm7718_vm11, %v7316_v15, -inf  ;;  %v8153_v54 = vsel %vm7718_vm11, %v7315_v21, -inf  ;;  %v8075_v32 = vmax.f32 %v8073_v25, %v8074_v19  ;;  %v8081_v35 = vrot.slane %v8080_v52, 1 }
 0x599   : > { %v8141_v10 = vmax.f32 %v8139_v42, %v8140_v46  ;;  %v8147_v39 = vrot.slane %v8146_v2, 4  ;;  %v8909_v22 = vunpack.c.l.b16 %v8653_v16  ;;  %v14616_v17 = vunpack.c.l.b16 %v8671_v27 }
 0x59a   : > { %v8664_v62 = vpack.c.bf16 %v8068_v12, %v8068_v12  ;;  %v7267_v9 = vcombine.high %v6995_v8, %v6995_v8  ;;  %v8673_v47 = vpack.c.bf16 %v8131_v5, %v8131_v5  ;;  %v14618_v38 = vunpack.c.l.b16 %v8672_v59 }
 0x59b   : > { %v8663_v41 = vpack.c.bf16 %v8061_v60, %v8061_v60  ;;  %v8154_v49 = vrot.slane %v8153_v54, 4  ;;  %v8148_v58 = vmax.f32 %v8146_v2, %v8147_v39  ;;  %v8160_v0 = vsel %vm7718_vm11, %v7317_v43, -inf }
 0x59c   : > { %v7274_v48 = vrot.slane %v6995_v8, %v12402_v13  ;;  %v7281_v25 = vrot.slane %v7267_v9, %v12402_v13  ;;  %v8674_v4 = vpack.c.bf16 %v8138_v14, %v8138_v14  ;;  %v8082_v30 = vmax.f32 %v8080_v52, %v8081_v35 }
 0x59d   : > { %v8665_v36 = vpack.c.bf16 %v8075_v32, %v8075_v32  ;;  %v8142_v31 = vrot.slane %v8141_v10, 2  ;;  %v8920_v29 = vunpack.c.l.b16 %v8664_v62  ;;  %v14627_v16 = vunpack.c.l.b16 %v8673_v47 }
 0x59e   : > { %v7282_v23 = vcombine.high %v7274_v48, %v7274_v48  ;;  %v7283_v28 = vcombine.high %v7281_v25, %v7281_v25  ;;  %v8083_v34 = vsel %vm7718_vm11, %v7274_v48, -inf  ;;  %v8155_v50 = vmax.f32 %v8153_v54, %v8154_v49 }
 0x59f   : > { %v8161_v40 = vrot.slane %v8160_v0, 4  ;;  %v8084_v19 = vrot.slane %v8083_v34, 4  ;;  %v8919_v21 = vunpack.c.l.b16 %v8663_v41  ;;  %v8149_v15 = vrot.slane %v8148_v58, 2 }
 0x5a0   : > { %v8090_v27 = vsel %vm7718_vm11, %v7282_v23, -inf  ;;  %v8104_v52 = vsel %vm7718_vm11, %v7283_v28, -inf  ;;  %v8666_v12 = vpack.c.bf16 %v8082_v30, %v8082_v30  ;;  %v8921_v42 = vunpack.c.l.b16 %v8665_v36 }
 0x5a1   : > { %v8143_v8 = vmax.f32 %v8141_v10, %v8142_v31  ;;  %v8085_v5 = vmax.f32 %v8083_v34, %v8084_v19  ;;  %v9038_v59 = vsel %vm6140_vm12, %v8920_v29, %v8919_v21  ;;  %v8091_v60 = vrot.slane %v8090_v27, 4 }
 0x5a2   : > { %v8105_v46 = vrot.slane %v8104_v52, 4  ;;  %v8053_v14 = vrot.slane %v14567_v3, 1  ;;  %v8156_v43 = vrot.slane %v8155_v50, 2  ;;  %v8162_v2 = vmax.f32 %v8160_v0, %v8161_v40 }
 0x5a3   : > { %v8086_v54 = vrot.slane %v8085_v5, 2  ;;  %v8097_v32 = vsel %vm7718_vm11, %v7281_v25, -inf  ;;  %v14634_v35 = vunpack.c.l.b16 %v8674_v4  ;;  %v8150_v39 = vmax.f32 %v8148_v58, %v8149_v15 }
 0x5a4   : > { %v8092_v62 = vmax.f32 %v8090_v27, %v8091_v60  ;;  %v8106_v9 = vmax.f32 %v8104_v52, %v8105_v46  ;;  %v8922_v47 = vunpack.c.l.b16 %v8666_v12  ;;  %v9039_v10 = vsel %vm6142_vm13, %v8921_v42, %v9038_v59 }
 0x5a5   : > { %v8144_v41 = vrot.slane %v8143_v8, 1  ;;  %v8087_v49 = vmax.f32 %v8085_v5, %v8086_v54  ;;  %v8098_v1 = vrot.slane %v8097_v32, 4  ;;  %v8054_v36 = vmax.f32 %v14567_v3, %v8053_v14 }
 0x5a6   : > { %v8093_v48 = vrot.slane %v8092_v62, 2  ;;  %v8107_v30 = vrot.slane %v8106_v9, 2  ;;  %v14638_v31 = vmax.f32 %v8155_v50, %v8156_v43  ;;  %v8163_v0 = vrot.slane %v8162_v2, 2  ;;  %v11289_v50 = vld [vmem:[%s15556_s5 + $0x8] sm:$0xff]  }
 0x5a7   : > { %v8088_v29 = vrot.slane %v8087_v49, 1  ;;  %v9030_v25 = vsel %vm6150_vm5, %v8909_v22, %v14581_v20  ;;  %v8151_v58 = vrot.slane %v8150_v39, 1  ;;  %v9034_v28 = vsel %vm6144_vm14, %v14553_v45, %v14593_v6  ;;  %11176 = vmatprep.subr.bf16.mxu1 %v11289_v50 }
 0x5a8   : > { %v8094_v4 = vmax.f32 %v8092_v62, %v8093_v48  ;;  %v8108_v23 = vmax.f32 %v8106_v9, %v8107_v30  ;;  %v9035_v40 = vsel %vm6146_vm15, %v14603_v57, %v9034_v28  ;;  %v10989_v19 = vpack.c.bf16 %v8054_v36, %v8054_v36  ;;  %11177 = vmatpush3.bf16.msra.mxu1 %v11289_v50 }
 0x5a9   : > { %v8089_v34 = vmax.f32 %v8087_v49, %v8088_v29  ;;  %v6928_v3 = vadd.f32 %v14517_v33, %v14520_v53  ;;  %v14652_v22 = vmax.f32 %v8097_v32, %v8098_v1  ;;  %v9036_v15 = vsel %vm6148_vm1, %v14605_v7, %v9035_v40 }
 0x5aa   : > { %v8095_v20 = vrot.slane %v8094_v4, 1  ;;  %v8109_v21 = vrot.slane %v8108_v23, 1  ;;  %v9037_v6 = vsel %vm6150_vm5, %v14608_v56, %v9036_v15  ;;  %v9145_v57 = vsel %vm12825_vm8, %v10989_v19, 0 }
 0x5ab   : > { %v8667_v45 = vpack.c.bf16 %v8089_v34, %v8089_v34  ;;  %v7000_v27 = vmax.f32 %v6928_v3, 0.0  ;;  %v9040_v12 = vsel %vm6144_vm14, %v8922_v47, %v9039_v10  ;;  %v9107_v42 = vpack.c.b16 %v9037_v6, %v9030_v25 }
 0x5ac   : > { %v8096_v53 = vmax.f32 %v8094_v4, %v8095_v20  ;;  %v8110_v52 = vmax.f32 %v8108_v23, %v8109_v21  ;;  %v14661_v5 = vmax.f32 %v8143_v8, %v8144_v41  ;;  %v8158_v59 = vrot.slane %v14638_v31, 1 }
 0x5ad   : > { %v8923_v7 = vunpack.c.l.b16 %v8667_v45  ;;  %v7352_v60 = vcombine.high %v7000_v27, %v7000_v27  ;;  %v14666_v56 = vsel %vm12825_vm8, 0, %v9107_v42  ;;  %v9183_v43 = vshll.u32 %v9145_v57, 16  ;;  %v11290_v42 = vld [vmem:[%s15556_s5 + $0x10] sm:$0xff]  }
 0x5ae   : > { %v8668_v46 = vpack.c.bf16 %v8096_v53, %v8096_v53  ;;  %v8670_v14 = vpack.c.bf16 %v8110_v52, %v8110_v52  ;;  %v14668_v54 = vmax.f32 %v8150_v39, %v8151_v58  ;;  %v14670_v32 = vmax.f32 %v8162_v2, %v8163_v0  ;;  %11178 = vmatprep.subr.bf16.mxu1 %v11290_v42 }
 0x5af   : > { %v9041_v62 = vsel %vm6146_vm15, %v8923_v7, %v9040_v12  ;;  %v9178_v8 = vshll.u32 %v14666_v56, 16  ;;  %v8100_v9 = vrot.slane %v14652_v22, 2  ;;  %v9176_v41 = vshrl.u32 %v14666_v56, 16  ;;  %11179 = vmatpush3.bf16.msra.mxu1 %v11290_v42 }
 0x5b0   : > { %v8924_v47 = vunpack.c.l.b16 %v8668_v46  ;;  %v8926_v10 = vunpack.c.l.b16 %v8670_v14  ;;  %v7359_v48 = vrot.slane %v7000_v27, %v12402_v13  ;;  %v7366_v1 = vrot.slane %v7352_v60, %v12402_v13 }
 0x5b1   : > { %v9180_v49 = vrot.slane %v9178_v8, 1  ;;  %v6920_v39 = vadd.f32 %v14517_v33, %v14522_v18  ;;  %v9185_v36 = vrot.slane %v9183_v43, 1  ;;  %v9285_v0 = vrot.slane %v14666_v56, 1 }
 0x5b2   : > { %v14681_v2 = vsel %vm6148_vm1, %v8924_v47, %v9041_v62  ;;  %v9044_v30 = vsel %vm6152_vm4, %v14616_v17, %v8926_v10  ;;  %v7367_v58 = vcombine.high %v7359_v48, %v7359_v48  ;;  %v7368_v4 = vcombine.high %v7366_v1, %v7366_v1 }
 0x5b3   : > { %v9045_v29 = vsel %vm6140_vm12, %v14618_v38, %v9044_v30  ;;  %v9181_v25 = vor.u32 %v9180_v49, %v9176_v41  ;;  %v8223_v18 = vsel %vm7718_vm11, %v7359_v48, -inf  ;;  %v8237_v28 = vsel %vm7718_vm11, %v7366_v1, -inf }
 0x5b4   : > { %v14690_v23 = vsel %vm6142_vm13, %v14627_v16, %v9045_v29  ;;  %v6998_v34 = vmax.f32 %v6920_v39, 0.0  ;;  %v8224_v40 = vrot.slane %v8223_v18, 4  ;;  %v8230_v19 = vsel %vm7718_vm11, %v7367_v58, -inf }
 0x5b5   : > { %v9186_v17 = vsel %vm610_vm3, %v9181_v25, %v9185_v36  ;;  %v8238_v3 = vrot.slane %v8237_v28, 4  ;;  %v8231_v38 = vrot.slane %v8230_v19, 4  ;;  %v8244_v50 = vsel %vm7718_vm11, %v7368_v4, -inf }
 0x5b6   : > { %9251 = vrot.lane.b32.xlu0 %v9186_v17, %s11375_s15  ;;  %v7318_v20 = vcombine.high %v6998_v34, %v6998_v34  ;;  %v7325_v16 = vrot.slane %v6998_v34, %v12402_v13  ;;  %v9286_v21 = vrot.slane %v9145_v57, 1  ;;  %v8225_v15 = vmax.f32 %v8223_v18, %v8224_v40 }
 0x5b7   : > { %v8239_v45 = vmax.f32 %v8237_v28, %v8238_v3  ;;  %v8245_v6 = vrot.slane %v8244_v50, 4  ;;  %v8232_v27 = vmax.f32 %v8230_v19, %v8231_v38  ;;  %v8101_v7 = vmax.f32 %v14652_v22, %v8100_v9 }
 0x5b8   : > { %v7332_v53 = vrot.slane %v7318_v20, %v12402_v13  ;;  %v7333_v52 = vcombine.high %v7325_v16, %v7325_v16  ;;  %v8167_v12 = vsel %vm7718_vm11, %v7325_v16, -inf  ;;  %v9287_v60 = vsel %vm963_vm2, %v9285_v0, %v9286_v21 }
 0x5b9   : > { %v8246_v46 = vmax.f32 %v8244_v50, %v8245_v6  ;;  %v8168_v14 = vrot.slane %v8167_v12, 4  ;;  %v8159_v57 = vmax.f32 %v14638_v31, %v8158_v59  ;;  %v8675_v47 = vpack.c.bf16 %v14661_v5, %v14661_v5 }
 0x5ba   : > { %9307 = vrot.lane.b32.xlu0 %v9287_v60, %s11380_s16  ;;  %v7334_v43 = vcombine.high %v7332_v53, %v7332_v53  ;;  %v8174_v62 = vsel %vm7718_vm11, %v7333_v52, -inf  ;;  %v8181_v8 = vsel %vm7718_vm11, %v7332_v53, -inf  ;;  %v8226_v10 = vrot.slane %v8225_v15, 2 }
 0x5bb   : > { %v8240_v41 = vrot.slane %v8239_v45, 2  ;;  %v8169_v22 = vmax.f32 %v8167_v12, %v8168_v14  ;;  %v8233_v9 = vrot.slane %v8232_v27, 2  ;;  %v8175_v49 = vrot.slane %v8174_v62, 4 }
 0x5bc   : > { %v8182_v48 = vrot.slane %v8181_v8, 4  ;;  %v8188_v31 = vsel %vm7718_vm11, %v7334_v43, -inf  ;;  %v8102_v59 = vrot.slane %v8101_v7, 1  ;;  %v8247_v1 = vrot.slane %v8246_v46, 2 }
 0x5bd   : > { %v8170_v39 = vrot.slane %v8169_v22, 2  ;;  %v6931_v30 = vadd.f32 %v14517_v33, %v14525_v11  ;;  %v8676_v36 = vpack.c.bf16 %v14668_v54, %v14668_v54  ;;  %v8176_v0 = vmax.f32 %v8174_v62, %v8175_v49 }
 0x5be   : > { %v8183_v5 = vmax.f32 %v8181_v8, %v8182_v48  ;;  %v8189_v29 = vrot.slane %v8188_v31, 4  ;;  %v8677_v25 = vpack.c.bf16 %v8159_v57, %v8159_v57  ;;  %v8227_v58 = vmax.f32 %v8225_v15, %v8226_v10 }
 0x5bf   : > { %v8241_v4 = vmax.f32 %v8239_v45, %v8240_v41  ;;  %v8171_v18 = vmax.f32 %v8169_v22, %v8170_v39  ;;  %v8234_v28 = vmax.f32 %v8232_v27, %v8233_v9  ;;  %v8177_v34 = vrot.slane %v8176_v0, 2 }
 0x5c0   : > { %v8184_v17 = vrot.slane %v8183_v5, 2  ;;  %v8190_v40 = vmax.f32 %v8188_v31, %v8189_v29  ;;  %v14717_v19 = vunpack.c.l.b16 %v8675_v47  ;;  %v8103_v3 = vmax.f32 %v8101_v7, %v8102_v59 }
 0x5c1   : > { %v8248_v38 = vmax.f32 %v8246_v46, %v8247_v1  ;;  %v7001_v50 = vmax.f32 %v6931_v30, 0.0  ;;  %v8172_v11 = vrot.slane %v8171_v18, 1  ;;  %v8178_v20 = vmax.f32 %v8176_v0, %v8177_v34 }
 0x5c2   : > { %v8185_v16 = vmax.f32 %v8183_v5, %v8184_v17  ;;  %v8191_v54 = vrot.slane %v8190_v40, 2  ;;  %v14719_v21 = vunpack.c.l.b16 %v8676_v36  ;;  %v14721_v6 = vunpack.c.l.b16 %v8677_v25 }
 0x5c3   : > { %v8228_v15 = vrot.slane %v8227_v58, 1  ;;  %v8242_v45 = vrot.slane %v8241_v4, 1  ;;  %v8235_v53 = vrot.slane %v8234_v28, 1  ;;  %v8179_v27 = vrot.slane %v8178_v20, 1 }
 0x5c4   : > { %v8186_v52 = vrot.slane %v8185_v16, 1  ;;  %v8192_v12 = vmax.f32 %v8190_v40, %v8191_v54  ;;  %v8669_v42 = vpack.c.bf16 %v8103_v3, %v8103_v3  ;;  %v8249_v60 = vrot.slane %v8248_v38, 1 }
 0x5c5   : > { %v7369_v14 = vcombine.high %v7001_v50, %v7001_v50  ;;  %v7376_v7 = vrot.slane %v7001_v50, %v12402_v13  ;;  %v8173_v46 = vmax.f32 %v8171_v18, %v8172_v11  ;;  %v8180_v57 = vmax.f32 %v8178_v20, %v8179_v27 }
 0x5c6   : > { %v8193_v43 = vrot.slane %v8192_v12, 1  ;;  %v6923_v62 = vadd.f32 %v14517_v33, %v14528_v51  ;;  %v8229_v8 = vmax.f32 %v8227_v58, %v8228_v15  ;;  %v8236_v22 = vmax.f32 %v8234_v28, %v8235_v53 }
 0x5c7   : > { %v7383_v47 = vrot.slane %v7369_v14, %v12402_v13  ;;  %v7384_v10 = vcombine.high %v7376_v7, %v7376_v7  ;;  %v8251_v41 = vsel %vm7718_vm11, %v7376_v7, -inf  ;;  %v8243_v9 = vmax.f32 %v8241_v4, %v8242_v45 }
 0x5c8   : > { %v8187_v49 = vmax.f32 %v8185_v16, %v8186_v52  ;;  %v8252_v48 = vrot.slane %v8251_v41, 4  ;;  %v8250_v31 = vmax.f32 %v8248_v38, %v8249_v60  ;;  %v8680_v59 = vpack.c.bf16 %v8180_v57, %v8180_v57 }
 0x5c9   : > { %v7385_v1 = vcombine.high %v7383_v47, %v7383_v47  ;;  %v6999_v39 = vmax.f32 %v6923_v62, 0.0  ;;  %v8194_v30 = vmax.f32 %v8192_v12, %v8193_v43  ;;  %v8679_v36 = vpack.c.bf16 %v8173_v46, %v8173_v46 }
 0x5ca   : > { %v8258_v0 = vsel %vm7718_vm11, %v7384_v10, -inf  ;;  %v8265_v51 = vsel %vm7718_vm11, %v7383_v47, -inf  ;;  %v8925_v5 = vunpack.c.l.b16 %v8669_v42  ;;  %v8687_v29 = vpack.c.bf16 %v8229_v8, %v8229_v8 }
 0x5cb   : > { %v8253_v25 = vmax.f32 %v8251_v41, %v8252_v48  ;;  %v7335_v58 = vcombine.high %v6999_v39, %v6999_v39  ;;  %v8688_v18 = vpack.c.bf16 %v8236_v22, %v8236_v22  ;;  %v8689_v34 = vpack.c.bf16 %v8243_v9, %v8243_v9 }
 0x5cc   : > { %v8681_v28 = vpack.c.bf16 %v8187_v49, %v8187_v49  ;;  %v8272_v4 = vsel %vm7718_vm11, %v7385_v1, -inf  ;;  %v8936_v17 = vunpack.c.l.b16 %v8680_v59  ;;  %v8259_v40 = vrot.slane %v8258_v0, 4 }
 0x5cd   : > { %v8266_v3 = vrot.slane %v8265_v51, 4  ;;  %v7342_v38 = vrot.slane %v6999_v39, %v12402_v13  ;;  %v8690_v50 = vpack.c.bf16 %v8250_v31, %v8250_v31  ;;  %v8682_v11 = vpack.c.bf16 %v8194_v30, %v8194_v30 }
 0x5ce   : > { %v8935_v20 = vunpack.c.l.b16 %v8679_v36  ;;  %v7349_v16 = vrot.slane %v7335_v58, %v12402_v13  ;;  %v8254_v54 = vrot.slane %v8253_v25, 2  ;;  %v8273_v15 = vrot.slane %v8272_v4, 4 }
 0x5cf   : > { %v7350_v45 = vcombine.high %v7342_v38, %v7342_v38  ;;  %v8195_v53 = vsel %vm7718_vm11, %v7342_v38, -inf  ;;  %v14734_v27 = vunpack.c.l.b16 %v8687_v29  ;;  %v8937_v52 = vunpack.c.l.b16 %v8681_v28 }
 0x5d0   : > { %v7351_v12 = vcombine.high %v7349_v16, %v7349_v16  ;;  %v8196_v42 = vrot.slane %v8195_v53, 4  ;;  %v9051_v60 = vsel %vm6140_vm12, %v8936_v17, %v8935_v20  ;;  %v8260_v14 = vmax.f32 %v8258_v0, %v8259_v40 }
 0x5d1   : > { %v8267_v7 = vmax.f32 %v8265_v51, %v8266_v3  ;;  %v8202_v46 = vsel %vm7718_vm11, %v7350_v45, -inf  ;;  %v14738_v57 = vunpack.c.l.b16 %v8688_v18  ;;  %v14740_v43 = vunpack.c.l.b16 %v8689_v34 }
 0x5d2   : > { %v8197_v62 = vmax.f32 %v8195_v53, %v8196_v42  ;;  %v8203_v8 = vrot.slane %v8202_v46, 4  ;;  %v8938_v47 = vunpack.c.l.b16 %v8682_v11  ;;  %v8255_v10 = vmax.f32 %v8253_v25, %v8254_v54 }
 0x5d3   : > { %v8274_v41 = vmax.f32 %v8272_v4, %v8273_v15  ;;  %v8216_v22 = vsel %vm7718_vm11, %v7351_v12, -inf  ;;  %v9052_v9 = vsel %vm6142_vm13, %v8937_v52, %v9051_v60  ;;  %v14744_v59 = vunpack.c.l.b16 %v8690_v50 }
 0x5d4   : > { %v8198_v49 = vrot.slane %v8197_v62, 2  ;;  %v8204_v48 = vmax.f32 %v8202_v46, %v8203_v8  ;;  %v8217_v31 = vrot.slane %v8216_v22, 4  ;;  %v8261_v1 = vrot.slane %v8260_v14, 2 }
 0x5d5   : > { %v8268_v39 = vrot.slane %v8267_v7, 2  ;;  %v8165_v30 = vrot.slane %v14670_v32, 1  ;;  %v8209_v51 = vsel %vm7718_vm11, %v7349_v16, -inf  ;;  %v8256_v25 = vrot.slane %v8255_v10, 1 }
 0x5d6   : > { %v8199_v36 = vmax.f32 %v8197_v62, %v8198_v49  ;;  %v8205_v0 = vrot.slane %v8204_v48, 2  ;;  %v8218_v29 = vmax.f32 %v8216_v22, %v8217_v31  ;;  %v8275_v58 = vrot.slane %v8274_v41, 2 }
 0x5d7   : > { %v9053_v18 = vsel %vm6144_vm14, %v8938_v47, %v9052_v9  ;;  %v8166_v34 = vmax.f32 %v14670_v32, %v8165_v30  ;;  %v9043_v40 = vsel %vm6150_vm5, %v8925_v5, %v14681_v2  ;;  %v14752_v3 = vmax.f32 %v8260_v14, %v8261_v1 }
 0x5d8   : > { %v8200_v28 = vrot.slane %v8199_v36, 1  ;;  %v8206_v4 = vmax.f32 %v8204_v48, %v8205_v0  ;;  %v8219_v17 = vrot.slane %v8218_v29, 2  ;;  %v14754_v38 = vmax.f32 %v8267_v7, %v8268_v39 }
 0x5d9   : > { %v8210_v50 = vrot.slane %v8209_v51, 4  ;;  %v9047_v11 = vsel %vm6144_vm14, %v14634_v35, %v14690_v23  ;;  %v14761_v15 = vmax.f32 %v8255_v10, %v8256_v25  ;;  %v10990_v5 = vpack.c.bf16 %v8166_v34, %v8166_v34  ;;  %v14807_v34 = vld [vmem:[%s15555_s4] ss:$0 sm:$0xff] }
 0x5da   : > { %v8201_v20 = vmax.f32 %v8199_v36, %v8200_v28  ;;  %v8207_v16 = vrot.slane %v8206_v4, 1  ;;  %v8220_v54 = vmax.f32 %v8218_v29, %v8219_v17  ;;  %v9048_v32 = vsel %vm6146_vm15, %v14717_v19, %v9047_v11 }
 0x5db   : > { %v9049_v2 = vsel %vm6148_vm1, %v14719_v21, %v9048_v32  ;;  %v6944_v45 = vadd.f32 %v14517_v33, %v14551_v63  ;;  %v14771_v42 = vmax.f32 %v8209_v51, %v8210_v50  ;;  %v14775_v60 = vsel %vm12825_vm8, %v10990_v5, 0 }
 0x5dc   : > { %v8208_v53 = vmax.f32 %v8206_v4, %v8207_v16  ;;  %v8221_v52 = vrot.slane %v8220_v54, 1  ;;  %v8683_v12 = vpack.c.bf16 %v8201_v20, %v8201_v20  ;;  %v9050_v35 = vsel %vm6150_vm5, %v14721_v6, %v9049_v2 }
 0x5dd   : > { %v9109_v19 = vpack.c.b16 %v9050_v35, %v9043_v40  ;;  %v7004_v21 = vmax.f32 %v6944_v45, 0.0  ;;  %v14779_v7 = vmax.f32 %v8274_v41, %v8275_v58  ;;  %v8263_v6 = vrot.slane %v14752_v3, 1 }
 0x5de   : > { %v8222_v33 = vmax.f32 %v8220_v54, %v8221_v52  ;;  %v8684_v63 = vpack.c.bf16 %v8208_v53, %v8208_v53  ;;  %v8939_v46 = vunpack.c.l.b16 %v8683_v12  ;;  %v9195_v47 = vshll.u32 %v14775_v60, 16 }
 0x5df   : > { %v14769_v23 = vpop.f32.mrb[28].mxu1  ;;  %v14786_v8 = vsel %vm12825_vm8, 0, %v9109_v19  ;;  %v7420_v10 = vcombine.high %v7004_v21, %v7004_v21  ;;  %v8270_v9 = vrot.slane %v14754_v38, 1  ;;  %v8691_v31 = vpack.c.bf16 %v14761_v15, %v14761_v15 }
 0x5e0   : > { %v14777_v14 = vpop.f32.mrb[29].mxu1  ;;  %v8686_v41 = vpack.c.bf16 %v8222_v33, %v8222_v33  ;;  %v8940_v49 = vunpack.c.l.b16 %v8684_v63  ;;  %v9054_v48 = vsel %vm6146_vm15, %v8939_v46, %v9053_v18  ;;  %v8212_v1 = vrot.slane %v14771_v42, 2 }
 0x5e1   : > { %v14781_v62 = vpop.f32.mrb[30].mxu1  ;;  %v9188_v39 = vshrl.u32 %v14786_v8, 16  ;;  %v9190_v30 = vshll.u32 %v14786_v8, 16  ;;  %v7427_v51 = vrot.slane %v7004_v21, %v12402_v13  ;;  %v7434_v29 = vrot.slane %v7420_v10, %v12402_v13 }
 0x5e2   : > { %v14789_v22 = vpop.f32.mrb[31].mxu1  ;;  %v8942_v36 = vunpack.c.l.b16 %v8686_v41  ;;  %v14799_v0 = vsel %vm6148_vm1, %v8940_v49, %v9054_v48  ;;  %v9197_v58 = vrot.slane %v9195_v47, 1  ;;  %v9288_v18 = vrot.slane %v14786_v8, 1 }
 0x5e3   : > { %v9192_v25 = vrot.slane %v9190_v30, 1  ;;  %v6936_v28 = vadd.f32 %v14807_v34, %v14557_v26  ;;  %v7435_v17 = vcombine.high %v7427_v51, %v7427_v51  ;;  %v7436_v40 = vcombine.high %v7434_v29, %v7434_v29 }
 0x5e4   : > { %v9057_v4 = vsel %vm6152_vm4, %v14734_v27, %v8942_v36  ;;  %v8335_v50 = vsel %vm7718_vm11, %v7427_v51, -inf  ;;  %v8349_v54 = vsel %vm7718_vm11, %v7434_v29, -inf  ;;  %v8264_v35 = vmax.f32 %v14752_v3, %v8263_v6 }
 0x5e5   : > { %v9058_v11 = vsel %vm6140_vm12, %v14738_v57, %v9057_v4  ;;  %v9193_v20 = vor.u32 %v9192_v25, %v9188_v39  ;;  %v8336_v16 = vrot.slane %v8335_v50, 4  ;;  %v8342_v26 = vsel %vm7718_vm11, %v7435_v17, -inf }
 0x5e6   : > { %v14821_v15 = vsel %vm6142_vm13, %v14740_v43, %v9058_v11  ;;  %v8350_v27 = vrot.slane %v8349_v54, 4  ;;  %v8356_v2 = vsel %vm7718_vm11, %v7436_v40, -inf  ;;  %v8343_v53 = vrot.slane %v8342_v26, 4 }
 0x5e7   : > { %v9198_v45 = vsel %vm610_vm3, %v9193_v20, %v9197_v58  ;;  %v8337_v57 = vmax.f32 %v8335_v50, %v8336_v16  ;;  %v8357_v52 = vrot.slane %v8356_v2, 4  ;;  %v9289_v43 = vrot.slane %v14775_v60, 1 }
 0x5e8   : > { %v14817_v32 = vpop.f32.mrb[32].mxu1  ;;  %9253 = vrot.lane.b32.xlu1 %v9198_v45, %s11375_s15  ;;  %v8351_v19 = vmax.f32 %v8349_v54, %v8350_v27  ;;  %v7002_v21 = vmax.f32 %v6936_v28, 0.0  ;;  %v8344_v63 = vmax.f32 %v8342_v26, %v8343_v53  ;;  %v6947_v47 = vadd.f32 %v14807_v34, %v14573_v55 }
 0x5e9   : > { %v14825_v5 = vpop.f32.mrb[33].mxu1  ;;  %v8338_v33 = vrot.slane %v8337_v57, 2  ;;  %v8358_v46 = vmax.f32 %v8356_v2, %v8357_v52  ;;  %v14836_v10 = vmax.f32 %v14754_v38, %v8270_v9  ;;  %v14841_v6 = vunpack.c.l.b16 %v8691_v31 }
 0x5ea   : > { %v14828_v12 = vpop.f32.mrb[34].mxu1  ;;  %v8352_v41 = vrot.slane %v8351_v19, 2  ;;  %v7386_v49 = vcombine.high %v7002_v21, %v7002_v21  ;;  %v7393_v48 = vrot.slane %v7002_v21, %v12402_v13  ;;  %v8213_v60 = vmax.f32 %v14771_v42, %v8212_v1 }
 0x5eb   : > { %v14839_v3 = vpop.f32.mrb[35].mxu1  ;;  %v9290_v39 = vsel %vm963_vm2, %v9288_v18, %v9289_v43  ;;  %v8345_v30 = vrot.slane %v8344_v63, 2  ;;  %v8339_v36 = vmax.f32 %v8337_v57, %v8338_v33  ;;  %v8359_v29 = vrot.slane %v8358_v46, 2 }
 0x5ec   : > { %9309 = vrot.lane.b32.xlu1 %v9290_v39, %s11380_s16  ;;  %v7400_v55 = vrot.slane %v7386_v49, %v12402_v13  ;;  %v7401_v38 = vcombine.high %v7393_v48, %v7393_v48  ;;  %v8279_v9 = vsel %vm7718_vm11, %v7393_v48, -inf  ;;  %v8353_v51 = vmax.f32 %v8351_v19, %v8352_v41 }
 0x5ed   : > { %v8280_v25 = vrot.slane %v8279_v9, 4  ;;  %v7005_v58 = vmax.f32 %v6947_v47, 0.0  ;;  %v8692_v28 = vpack.c.bf16 %v8264_v35, %v8264_v35  ;;  %v8693_v1 = vpack.c.bf16 %v14836_v10, %v14836_v10 }
 0x5ee   : > { %v7402_v31 = vcombine.high %v7400_v55, %v7400_v55  ;;  %v8286_v4 = vsel %vm7718_vm11, %v7401_v38, -inf  ;;  %v8293_v42 = vsel %vm7718_vm11, %v7400_v55, -inf  ;;  %v8214_v18 = vrot.slane %v8213_v60, 1 }
 0x5ef   : > { %v8346_v17 = vmax.f32 %v8344_v63, %v8345_v30  ;;  %v8281_v40 = vmax.f32 %v8279_v9, %v8280_v25  ;;  %v8340_v50 = vrot.slane %v8339_v36, 1  ;;  %v8287_v11 = vrot.slane %v8286_v4, 4 }
 0x5f0   : > { %v8294_v20 = vrot.slane %v8293_v42, 4  ;;  %v8300_v16 = vsel %vm7718_vm11, %v7402_v31, -inf  ;;  %v8354_v54 = vrot.slane %v8353_v51, 1  ;;  %v8360_v26 = vmax.f32 %v8358_v46, %v8359_v29 }
 0x5f1   : > { %v8282_v27 = vrot.slane %v8281_v40, 2  ;;  %v7437_v2 = vcombine.high %v7005_v58, %v7005_v58  ;;  %v8288_v45 = vmax.f32 %v8286_v4, %v8287_v11  ;;  %v8301_v53 = vrot.slane %v8300_v16, 4 }
 0x5f2   : > { %v8295_v57 = vmax.f32 %v8293_v42, %v8294_v20  ;;  %v7444_v52 = vrot.slane %v7005_v58, %v12402_v13  ;;  %v14854_v35 = vunpack.c.l.b16 %v8692_v28  ;;  %v8215_v43 = vmax.f32 %v8213_v60, %v8214_v18 }
 0x5f3   : > { %v8347_v19 = vrot.slane %v8346_v17, 1  ;;  %v8283_v21 = vmax.f32 %v8281_v40, %v8282_v27  ;;  %v8341_v33 = vmax.f32 %v8339_v36, %v8340_v50  ;;  %v8289_v63 = vrot.slane %v8288_v45, 2 }
 0x5f4   : > { %v8296_v47 = vrot.slane %v8295_v57, 2  ;;  %v8302_v10 = vmax.f32 %v8300_v16, %v8301_v53  ;;  %v8355_v41 = vmax.f32 %v8353_v51, %v8354_v54  ;;  %v8361_v49 = vrot.slane %v8360_v26, 1 }
 0x5f5   : > { %v8284_v48 = vrot.slane %v8283_v21, 1  ;;  %v7451_v46 = vrot.slane %v7437_v2, %v12402_v13  ;;  %v8290_v39 = vmax.f32 %v8288_v45, %v8289_v63  ;;  %v7452_v38 = vcombine.high %v7444_v52, %v7444_v52  ;;  %v9248_v2 = vpop.permute.xlu0 %9247 }
 0x5f6   : > { %v8297_v30 = vmax.f32 %v8295_v57, %v8296_v47  ;;  %v8303_v55 = vrot.slane %v8302_v10, 2  ;;  %v8348_v9 = vmax.f32 %v8346_v17, %v8347_v19  ;;  %v8363_v25 = vsel %vm7718_vm11, %v7444_v52, -inf }
 0x5f7   : > { %v7453_v29 = vcombine.high %v7451_v46, %v7451_v46  ;;  %v8377_v60 = vsel %vm7718_vm11, %v7451_v46, -inf  ;;  %v8291_v58 = vrot.slane %v8290_v39, 1  ;;  %v8364_v31 = vrot.slane %v8363_v25, 4 }
 0x5f8   : > { %v8298_v36 = vrot.slane %v8297_v30, 1  ;;  %v8304_v28 = vmax.f32 %v8302_v10, %v8303_v55  ;;  %v8285_v4 = vmax.f32 %v8283_v21, %v8284_v48  ;;  %v8370_v51 = vsel %vm7718_vm11, %v7452_v38, -inf }
 0x5f9   : > { %v8378_v42 = vrot.slane %v8377_v60, 4  ;;  %v6939_v18 = vadd.f32 %v14807_v34, %v14585_v61  ;;  %v14862_v40 = vunpack.c.l.b16 %v8693_v1  ;;  %v8685_v50 = vpack.c.bf16 %v8215_v43, %v8215_v43 }
 0x5fa   : > { %v14864_v17 = vmax.f32 %v8360_v26, %v8361_v49  ;;  %v8292_v11 = vmax.f32 %v8290_v39, %v8291_v58  ;;  %v8299_v20 = vmax.f32 %v8297_v30, %v8298_v36  ;;  %v8305_v16 = vrot.slane %v8304_v28, 1 }
 0x5fb   : > { %v8365_v54 = vmax.f32 %v8363_v25, %v8364_v31  ;;  %v8384_v27 = vsel %vm7718_vm11, %v7453_v29, -inf  ;;  %v8703_v45 = vpack.c.bf16 %v8341_v33, %v8341_v33  ;;  %v8704_v57 = vpack.c.bf16 %v8348_v9, %v8348_v9 }
 0x5fc   : > { %v8705_v53 = vpack.c.bf16 %v8355_v41, %v8355_v41  ;;  %v8371_v52 = vrot.slane %v8370_v51, 4  ;;  %v8695_v19 = vpack.c.bf16 %v8285_v4, %v8285_v4  ;;  %v8696_v21 = vpack.c.bf16 %v8292_v11, %v8292_v11 }
 0x5fd   : > { %v8379_v63 = vmax.f32 %v8377_v60, %v8378_v42  ;;  %v7003_v61 = vmax.f32 %v6939_v18, 0.0  ;;  %v8941_v1 = vunpack.c.l.b16 %v8685_v50  ;;  %v8706_v26 = vpack.c.bf16 %v14864_v17, %v14864_v17 }
 0x5fe   : > { %v8385_v43 = vrot.slane %v8384_v27, 4  ;;  %v9320_v47 = vsel %vm1665_vm9, %v14396_v37, %v9248_v2  ;;  %v8306_v10 = vmax.f32 %v8304_v28, %v8305_v16  ;;  %v8697_v49 = vpack.c.bf16 %v8299_v20, %v8299_v20  ;;  %v9304_v2 = vpop.permute.xlu0 %9303 }
 0x5ff   : > { %v8366_v48 = vrot.slane %v8365_v54, 2  ;;  %v7403_v46 = vcombine.high %v7003_v61, %v7003_v61  ;;  %v14871_v33 = vunpack.c.l.b16 %v8703_v45  ;;  %v14873_v41 = vunpack.c.l.b16 %v8705_v53 }
 0x600   : > { %v8372_v39 = vmax.f32 %v8370_v51, %v8371_v52  ;;  %v7410_v30 = vrot.slane %v7003_v61, %v12402_v13  ;;  %v14876_v55 = vunpack.c.l.b16 %v8704_v57  ;;  %v8951_v38 = vunpack.c.l.b16 %v8695_v19 }
 0x601   : > { %v8952_v9 = vunpack.c.l.b16 %v8696_v21  ;;  %v8380_v29 = vrot.slane %v8379_v63, 2  ;;  %v14878_v25 = vmax.f32 %v8384_v27, %v8385_v43  ;;  %v7417_v37 = vrot.slane %v7403_v46, %v12402_v13 }
 0x602   : > { %v7418_v60 = vcombine.high %v7410_v30, %v7410_v30  ;;  %v8307_v58 = vsel %vm7718_vm11, %v7410_v30, -inf  ;;  %v8698_v36 = vpack.c.bf16 %v8306_v10, %v8306_v10  ;;  %v8953_v28 = vunpack.c.l.b16 %v8697_v49 }
 0x603   : > { %v8367_v31 = vmax.f32 %v8365_v54, %v8366_v48  ;;  %v8308_v4 = vrot.slane %v8307_v58, 4  ;;  %v8373_v42 = vrot.slane %v8372_v39, 2  ;;  %v7419_v51 = vcombine.high %v7417_v37, %v7417_v37 }
 0x604   : > { %v8314_v18 = vsel %vm7718_vm11, %v7418_v60, -inf  ;;  %v8321_v50 = vsel %vm7718_vm11, %v7417_v37, -inf  ;;  %v9064_v11 = vsel %vm6140_vm12, %v8952_v9, %v8951_v38  ;;  %v14885_v20 = vmax.f32 %v8379_v63, %v8380_v29 }
 0x605   : > { %v8309_v16 = vmax.f32 %v8307_v58, %v8308_v4  ;;  %v8315_v27 = vrot.slane %v8314_v18, 4  ;;  %v8387_v45 = vrot.slane %v14878_v25, 2  ;;  %v8322_v57 = vrot.slane %v8321_v50, 4 }
 0x606   : > { %v8328_v53 = vsel %vm7718_vm11, %v7419_v51, -inf  ;;  %v8954_v54 = vunpack.c.l.b16 %v8698_v36  ;;  %v8368_v52 = vrot.slane %v8367_v31, 1  ;;  %v9065_v61 = vsel %vm6142_vm13, %v8953_v28, %v9064_v11 }
 0x607   : > { %v8310_v19 = vrot.slane %v8309_v16, 2  ;;  %v8316_v21 = vmax.f32 %v8314_v18, %v8315_v27  ;;  %v8329_v43 = vrot.slane %v8328_v53, 4  ;;  %v9337_v10 = vsel %vm9335_vm7, %v9320_v47, %v9304_v2 }
 0x608   : > { %v14891_v63 = vmax.f32 %v8372_v39, %v8373_v42  ;;  %11180 = vmatprep.mubr.msk.bf16.mxu1 %vm9383_vm6, %v9337_v10  ;;  %v8277_v46 = vrot.slane %v14779_v7, 1  ;;  %v8323_v30 = vmax.f32 %v8321_v50, %v8322_v57  ;;  %v9056_v9 = vsel %vm6150_vm5, %v8941_v1, %v14799_v0 }
 0x609   : > { %v8311_v49 = vmax.f32 %v8309_v16, %v8310_v19  ;;  %v8317_v48 = vrot.slane %v8316_v21, 2  ;;  %v8330_v38 = vmax.f32 %v8328_v53, %v8329_v43  ;;  %v9060_v29 = vsel %vm6144_vm14, %v14744_v59, %v14821_v15 }
 0x60a   : > { %v8278_v39 = vmax.f32 %v14779_v7, %v8277_v46  ;;  %v9061_v60 = vsel %vm6146_vm15, %v14841_v6, %v9060_v29  ;;  %v8382_v58 = vrot.slane %v14885_v20, 1  ;;  %v6960_v0 = vadd.f32 %v14807_v34, %v14769_v23 }
 0x60b   : > { %v8312_v37 = vrot.slane %v8311_v49, 1  ;;  %v8318_v47 = vmax.f32 %v8316_v21, %v8317_v48  ;;  %v8331_v36 = vrot.slane %v8330_v38, 2  ;;  %v9062_v28 = vsel %vm6148_vm1, %v14854_v35, %v9061_v60 }
 0x60c   : > { %v9063_v59 = vsel %vm6150_vm5, %v14862_v40, %v9062_v28  ;;  %v10991_v15 = vpack.c.bf16 %v8278_v39, %v8278_v39  ;;  %v14910_v42 = vmax.f32 %v8367_v31, %v8368_v52  ;;  %v8324_v7 = vrot.slane %v8323_v30, 2 }
 0x60d   : > { %v8313_v1 = vmax.f32 %v8311_v49, %v8312_v37  ;;  %v8319_v4 = vrot.slane %v8318_v47, 1  ;;  %v8332_v51 = vmax.f32 %v8330_v38, %v8331_v36  ;;  %v9111_v6 = vpack.c.b16 %v9063_v59, %v9056_v9 }
 0x60e   : > { %v9066_v11 = vsel %vm6144_vm14, %v8954_v54, %v9065_v61  ;;  %v9147_v35 = vsel %vm12825_vm8, %v10991_v15, 0  ;;  %v7008_v40 = vmax.f32 %v6960_v0, 0.0  ;;  %v6952_v53 = vadd.f32 %v14807_v34, %v14777_v14 }
 0x60f   : > { %v8320_v18 = vmax.f32 %v8318_v47, %v8319_v4  ;;  %v8699_v50 = vpack.c.bf16 %v8313_v1, %v8313_v1  ;;  %v8333_v16 = vrot.slane %v8332_v51, 1  ;;  %v14917_v23 = vsel %vm12825_vm8, 0, %v9111_v6 }
 0x610   : > { %v9207_v27 = vshll.u32 %v9147_v35, 16  ;;  %v9202_v57 = vshll.u32 %v14917_v23, 16  ;;  %v14922_v52 = vmax.f32 %v8323_v30, %v8324_v7  ;;  %v9200_v19 = vshrl.u32 %v14917_v23, 16 }
 0x611   : > { %v8700_v2 = vpack.c.bf16 %v8320_v18, %v8320_v18  ;;  %v8955_v31 = vunpack.c.l.b16 %v8699_v50  ;;  %v8334_v54 = vmax.f32 %v8332_v51, %v8333_v16  ;;  %v9291_v21 = vrot.slane %v14917_v23, 1 }
 0x612   : > { %v9204_v10 = vrot.slane %v9202_v57, 1  ;;  %v9292_v49 = vrot.slane %v9147_v35, 1  ;;  %v9209_v46 = vrot.slane %v9207_v27, 1  ;;  %v7488_v38 = vcombine.high %v7008_v40, %v7008_v40 }
 0x613   : > { %v8956_v61 = vunpack.c.l.b16 %v8700_v2  ;;  %v9067_v43 = vsel %vm6146_vm15, %v8955_v31, %v9066_v11  ;;  %v8702_v48 = vpack.c.bf16 %v8334_v54, %v8334_v54  ;;  %v7495_v9 = vrot.slane %v7008_v40, %v12402_v13 }
 0x614   : > { %v9205_v14 = vor.u32 %v9204_v10, %v9200_v19  ;;  %v9293_v30 = vsel %vm963_vm2, %v9291_v21, %v9292_v49  ;;  %v7006_v37 = vmax.f32 %v6952_v53, 0.0  ;;  %v7502_v39 = vrot.slane %v7488_v38, %v12402_v13 }
 0x615   : > { %v14929_v29 = vsel %vm6148_vm1, %v8956_v61, %v9067_v43  ;;  %v8958_v47 = vunpack.c.l.b16 %v8702_v48  ;;  %v7503_v60 = vcombine.high %v7495_v9, %v7495_v9  ;;  %v8447_v36 = vsel %vm7718_vm11, %v7495_v9, -inf }
 0x616   : > { %v9210_v28 = vsel %vm610_vm3, %v9205_v14, %v9209_v46  ;;  %v8448_v0 = vrot.slane %v8447_v36, 4  ;;  %v7454_v1 = vcombine.high %v7006_v37, %v7006_v37  ;;  %v7461_v4 = vrot.slane %v7006_v37, %v12402_v13 }
 0x617   : > { %v9070_v59 = vsel %vm6152_vm4, %v14871_v33, %v8958_v47  ;;  %9255 = vrot.lane.b32.xlu0 %v9210_v28, %s11375_s15  ;;  %v7504_v15 = vcombine.high %v7502_v39, %v7502_v39  ;;  %v8454_v7 = vsel %vm7718_vm11, %v7503_v60, -inf  ;;  %v8461_v51 = vsel %vm7718_vm11, %v7502_v39, -inf }
 0x618   : > { %v9071_v6 = vsel %vm6140_vm12, %v14876_v55, %v9070_v59  ;;  %v8449_v18 = vmax.f32 %v8447_v36, %v8448_v0  ;;  %v8455_v50 = vrot.slane %v8454_v7, 4  ;;  %v8462_v11 = vrot.slane %v8461_v51, 4  ;;  %v9250_v36 = vpop.permute.xlu1 %9249 }
 0x619   : > { %v14945_v35 = vsel %vm6142_vm13, %v14873_v41, %v9071_v6  ;;  %v8468_v16 = vsel %vm7718_vm11, %v7504_v15, -inf  ;;  %v7468_v33 = vrot.slane %v7454_v1, %v12402_v13  ;;  %v7469_v27 = vcombine.high %v7461_v4, %v7461_v4 }
 0x61a   : > { %v8450_v40 = vrot.slane %v8449_v18, 2  ;;  %v8456_v2 = vmax.f32 %v8454_v7, %v8455_v50  ;;  %v8463_v31 = vmax.f32 %v8461_v51, %v8462_v11  ;;  %v8469_v57 = vrot.slane %v8468_v16, 4 }
 0x61b   : > { %9311 = vrot.lane.b32.xlu0 %v9293_v30, %s11380_s16  ;;  %v7470_v53 = vcombine.high %v7468_v33, %v7468_v33  ;;  %v8391_v55 = vsel %vm7718_vm11, %v7461_v4, -inf  ;;  %v8398_v54 = vsel %vm7718_vm11, %v7469_v27, -inf  ;;  %v8405_v19 = vsel %vm7718_vm11, %v7468_v33, -inf }
 0x61c   : > { %v8375_v41 = vrot.slane %v14891_v63, 1  ;;  %v8326_v21 = vrot.slane %v14922_v52, 1  ;;  %v8457_v61 = vrot.slane %v8456_v2, 2  ;;  %v8470_v43 = vmax.f32 %v8468_v16, %v8469_v57 }
 0x61d   : > { %v8392_v10 = vrot.slane %v8391_v55, 4  ;;  %v8399_v49 = vrot.slane %v8398_v54, 4  ;;  %v8406_v48 = vrot.slane %v8405_v19, 4  ;;  %v8412_v46 = vsel %vm7718_vm11, %v7470_v53, -inf  ;;  %v9306_v53 = vpop.permute.xlu1 %9305 }
 0x61e   : > { %v8383_v38 = vmax.f32 %v14885_v20, %v8382_v58  ;;  %v8451_v9 = vmax.f32 %v8449_v18, %v8450_v40  ;;  %v8464_v14 = vrot.slane %v8463_v31, 2  ;;  %v8471_v30 = vrot.slane %v8470_v43, 2 }
 0x61f   : > { %v8393_v37 = vmax.f32 %v8391_v55, %v8392_v10  ;;  %v8400_v47 = vmax.f32 %v8398_v54, %v8399_v49  ;;  %v8407_v39 = vmax.f32 %v8405_v19, %v8406_v48  ;;  %v8413_v60 = vrot.slane %v8412_v46, 4 }
 0x620   : > { %v8376_v28 = vmax.f32 %v14891_v63, %v8375_v41  ;;  %v8707_v0 = vpack.c.bf16 %v14910_v42, %v14910_v42  ;;  %v8327_v1 = vmax.f32 %v14922_v52, %v8326_v21  ;;  %v8458_v4 = vmax.f32 %v8456_v2, %v8457_v61 }
 0x621   : > { %v8394_v59 = vrot.slane %v8393_v37, 2  ;;  %v8401_v15 = vrot.slane %v8400_v47, 2  ;;  %v8408_v7 = vrot.slane %v8407_v39, 2  ;;  %v8414_v20 = vmax.f32 %v8412_v46, %v8413_v60 }
 0x622   : > { %v8709_v58 = vpack.c.bf16 %v8383_v38, %v8383_v38  ;;  %v8452_v51 = vrot.slane %v8451_v9, 1  ;;  %v8465_v6 = vmax.f32 %v8463_v31, %v8464_v14  ;;  %v8472_v18 = vmax.f32 %v8470_v43, %v8471_v30 }
 0x623   : > { %v8395_v50 = vmax.f32 %v8393_v37, %v8394_v59  ;;  %v8402_v11 = vmax.f32 %v8400_v47, %v8401_v15  ;;  %v8409_v16 = vmax.f32 %v8407_v39, %v8408_v7  ;;  %v8415_v33 = vrot.slane %v8414_v20, 2 }
 0x624   : > { %v8962_v63 = vunpack.c.l.b16 %v8706_v26  ;;  %v14969_v42 = vmax.f32 %v14878_v25, %v8387_v45  ;;  %v8708_v52 = vpack.c.bf16 %v8376_v28, %v8376_v28  ;;  %v8701_v27 = vpack.c.bf16 %v8327_v1, %v8327_v1 }
 0x625   : > { %v8459_v40 = vrot.slane %v8458_v4, 1  ;;  %v8396_v2 = vrot.slane %v8395_v50, 1  ;;  %v8403_v57 = vrot.slane %v8402_v11, 1  ;;  %v8416_v31 = vmax.f32 %v8414_v20, %v8415_v33 }
 0x626   : > { %v14971_v55 = vunpack.c.l.b16 %v8707_v0  ;;  %v14973_v54 = vunpack.c.l.b16 %v8709_v58  ;;  %v14975_v19 = vmax.f32 %v8451_v9, %v8452_v51  ;;  %v8410_v17 = vrot.slane %v8409_v16, 1 }
 0x627   : > { %v8466_v26 = vrot.slane %v8465_v6, 1  ;;  %v8473_v41 = vrot.slane %v8472_v18, 1  ;;  %v8404_v21 = vmax.f32 %v8402_v11, %v8403_v57  ;;  %v9322_v25 = vsel %vm1665_vm9, %v14482_v44, %v9250_v36 }
 0x628   : > { %v8957_v45 = vunpack.c.l.b16 %v8701_v27  ;;  %v6963_v61 = vadd.f32 %v14807_v34, %v14781_v62  ;;  %v6955_v43 = vadd.f32 %v14807_v34, %v14789_v22  ;;  %v9339_v10 = vsel %vm9335_vm7, %v9322_v25, %v9306_v53 }
 0x629   : > { %v14984_v49 = vunpack.c.l.b16 %v8708_v52  ;;  %v14986_v48 = vmax.f32 %v8458_v4, %v8459_v40  ;;  %v8397_v46 = vmax.f32 %v8395_v50, %v8396_v2  ;;  %v8417_v38 = vrot.slane %v8416_v31, 1  ;;  %11181 = vmatmul.mubr.msk.bf16.vlgmr.msra.gmra.mrb[36].mxu1 %vm9383_vm6, %v9339_v10 }
 0x62a   : > { %v8411_v9 = vmax.f32 %v8409_v16, %v8410_v17  ;;  %v7009_v14 = vmax.f32 %v6963_v61, 0.0  ;;  %v7007_v44 = vmax.f32 %v6955_v43, 0.0  ;;  %v14991_v30 = vsel %vm6150_vm5, %v8957_v45, %v14929_v29 }
 0x62b   : > { %v14993_v62 = vmax.f32 %v8465_v6, %v8466_v26  ;;  %v14995_v22 = vmax.f32 %v8472_v18, %v8473_v41  ;;  %v8719_v37 = vpack.c.bf16 %v14975_v19, %v14975_v19  ;;  %v8712_v47 = vpack.c.bf16 %v8404_v21, %v8404_v21 }
 0x62c   : > { %v7505_v39 = vcombine.high %v7009_v14, %v7009_v14  ;;  %v7512_v60 = vrot.slane %v7009_v14, %v12402_v13  ;;  %v7471_v36 = vcombine.high %v7007_v44, %v7007_v44  ;;  %v7478_v28 = vrot.slane %v7007_v44, %v12402_v13 }
 0x62d   : > { %v8720_v0 = vpack.c.bf16 %v14986_v48, %v14986_v48  ;;  %v8418_v1 = vmax.f32 %v8416_v31, %v8417_v38  ;;  %v8711_v29 = vpack.c.bf16 %v8397_v46, %v8397_v46  ;;  %v15005_v4 = vsel %vm6144_vm14, %v8962_v63, %v14945_v35 }
 0x62e   : > { %v8713_v59 = vpack.c.bf16 %v8411_v9, %v8411_v9  ;;  %v7519_v15 = vrot.slane %v7505_v39, %v12402_v13  ;;  %v7520_v7 = vcombine.high %v7512_v60, %v7512_v60  ;;  %v8475_v20 = vsel %vm7718_vm11, %v7512_v60, -inf }
 0x62f   : > { %v8476_v58 = vrot.slane %v8475_v20, 4  ;;  %v7485_v51 = vrot.slane %v7471_v36, %v12402_v13  ;;  %v7486_v6 = vcombine.high %v7478_v28, %v7478_v28  ;;  %v8419_v18 = vsel %vm7718_vm11, %v7478_v28, -inf }
 0x630   : > { %v8968_v50 = vunpack.c.l.b16 %v8712_v47  ;;  %v8482_v11 = vsel %vm7718_vm11, %v7520_v7, -inf  ;;  %v8489_v16 = vsel %vm7718_vm11, %v7519_v15, -inf  ;;  %v8420_v33 = vrot.slane %v8419_v18, 4 }
 0x631   : > { %v7521_v35 = vcombine.high %v7519_v15, %v7519_v15  ;;  %v8477_v63 = vmax.f32 %v8475_v20, %v8476_v58  ;;  %v8483_v52 = vrot.slane %v8482_v11, 4  ;;  %v7487_v27 = vcombine.high %v7485_v51, %v7485_v51 }
 0x632   : > { %v8490_v40 = vrot.slane %v8489_v16, 4  ;;  %v8421_v2 = vmax.f32 %v8419_v18, %v8420_v33  ;;  %v8426_v57 = vsel %vm7718_vm11, %v7486_v6, -inf  ;;  %v8433_v31 = vsel %vm7718_vm11, %v7485_v51, -inf }
 0x633   : > { %v8721_v53 = vpack.c.bf16 %v14993_v62, %v14993_v62  ;;  %v8967_v19 = vunpack.c.l.b16 %v8711_v29  ;;  %v8478_v17 = vrot.slane %v8477_v63, 2  ;;  %v8484_v26 = vmax.f32 %v8482_v11, %v8483_v52 }
 0x634   : > { %v8422_v41 = vrot.slane %v8421_v2, 2  ;;  %v8427_v21 = vrot.slane %v8426_v57, 4  ;;  %v8434_v25 = vrot.slane %v8433_v31, 4  ;;  %v8440_v45 = vsel %vm7718_vm11, %v7487_v27, -inf }
 0x635   : > { %v8714_v61 = vpack.c.bf16 %v8418_v1, %v8418_v1  ;;  %v8969_v43 = vunpack.c.l.b16 %v8713_v59  ;;  %v9077_v10 = vsel %vm6140_vm12, %v8968_v50, %v8967_v19  ;;  %v8496_v48 = vsel %vm7718_vm11, %v7521_v35, -inf }
 0x636   : > { %v8491_v46 = vmax.f32 %v8489_v16, %v8490_v40  ;;  %v8423_v38 = vmax.f32 %v8421_v2, %v8422_v41  ;;  %v8428_v9 = vmax.f32 %v8426_v57, %v8427_v21  ;;  %v8441_v14 = vrot.slane %v8440_v45, 4 }
 0x637   : > { %v8975_v44 = vunpack.c.l.b16 %v8719_v37  ;;  %v8479_v62 = vmax.f32 %v8477_v63, %v8478_v17  ;;  %v8485_v47 = vrot.slane %v8484_v26, 2  ;;  %v8389_v39 = vrot.slane %v14969_v42, 1 }
 0x638   : > { %v8424_v60 = vrot.slane %v8423_v38, 1  ;;  %v8429_v36 = vrot.slane %v8428_v9, 2  ;;  %v8435_v28 = vmax.f32 %v8433_v31, %v8434_v25  ;;  %v8442_v29 = vmax.f32 %v8440_v45, %v8441_v14 }
 0x639   : > { %v8722_v1 = vpack.c.bf16 %v14995_v22, %v14995_v22  ;;  %v8970_v59 = vunpack.c.l.b16 %v8714_v61  ;;  %v9078_v15 = vsel %vm6142_vm13, %v8969_v43, %v9077_v10  ;;  %v8497_v7 = vrot.slane %v8496_v48, 4 }
 0x63a   : > { %v8492_v20 = vrot.slane %v8491_v46, 2  ;;  %v8425_v58 = vmax.f32 %v8423_v38, %v8424_v60  ;;  %v8430_v51 = vmax.f32 %v8428_v9, %v8429_v36  ;;  %v8443_v6 = vrot.slane %v8442_v29, 2 }
 0x63b   : > { %v8976_v37 = vunpack.c.l.b16 %v8720_v0  ;;  %v8480_v18 = vrot.slane %v8479_v62, 1  ;;  %v8486_v50 = vmax.f32 %v8484_v26, %v8485_v47  ;;  %v8390_v11 = vmax.f32 %v14969_v42, %v8389_v39 }
 0x63c   : > { %v8431_v16 = vrot.slane %v8430_v51, 1  ;;  %v8436_v33 = vrot.slane %v8435_v28, 2  ;;  %v8444_v35 = vmax.f32 %v8442_v29, %v8443_v6  ;;  %v8715_v63 = vpack.c.bf16 %v8425_v58, %v8425_v58 }
 0x63d   : > { %v8977_v52 = vunpack.c.l.b16 %v8721_v53  ;;  %v15025_v27 = vmax.f32 %v8496_v48, %v8497_v7  ;;  %v9079_v40 = vsel %vm6144_vm14, %v8970_v59, %v9078_v15  ;;  %v9074_v2 = vsel %vm6146_vm15, %v14971_v55, %v15005_v4 }
 0x63e   : > { %v15031_v57 = vmax.f32 %v8491_v46, %v8492_v20  ;;  %v8432_v0 = vmax.f32 %v8430_v51, %v8431_v16  ;;  %v8445_v31 = vrot.slane %v8444_v35, 1  ;;  %v8971_v19 = vunpack.c.l.b16 %v8715_v63 }
 0x63f   : > { %v15033_v17 = vmax.f32 %v8479_v62, %v8480_v18  ;;  %v8487_v42 = vrot.slane %v8486_v50, 1  ;;  %v9075_v26 = vsel %vm6148_vm1, %v14984_v49, %v9074_v2  ;;  %v10992_v53 = vpack.c.bf16 %v8390_v11, %v8390_v11 }
 0x640   : > { %v15037_v41 = vmax.f32 %v8435_v28, %v8436_v33  ;;  %v8446_v21 = vmax.f32 %v8444_v35, %v8445_v31  ;;  %v8716_v25 = vpack.c.bf16 %v8432_v0, %v8432_v0  ;;  %v9080_v45 = vsel %vm6146_vm15, %v8971_v19, %v9079_v40 }
 0x641   : > { %v9076_v55 = vsel %vm6150_vm5, %v14973_v54, %v9075_v26  ;;  %v9148_v4 = vsel %vm12825_vm8, %v10992_v53, 0  ;;  %v6976_v61 = vadd.f32 %v14807_v34, %v14817_v32  ;;  %v6968_v43 = vadd.f32 %v14807_v34, %v14825_v5 }
 0x642   : > { %v8494_v49 = vrot.slane %v15031_v57, 1  ;;  %v8718_v10 = vpack.c.bf16 %v8446_v21, %v8446_v21  ;;  %v8972_v48 = vunpack.c.l.b16 %v8716_v25  ;;  %v9113_v46 = vpack.c.b16 %v9076_v55, %v14991_v30 }
 0x643   : > { %v15050_v38 = vmax.f32 %v8486_v50, %v8487_v42  ;;  %v9219_v9 = vshll.u32 %v9148_v4, 16  ;;  %v7012_v14 = vmax.f32 %v6976_v61, 0.0  ;;  %v7010_v54 = vmax.f32 %v6968_v43, 0.0 }
 0x644   : > { %v8438_v62 = vrot.slane %v15037_v41, 1  ;;  %v8974_v47 = vunpack.c.l.b16 %v8718_v10  ;;  %v15054_v39 = vsel %vm6148_vm1, %v8972_v48, %v9080_v45  ;;  %v15058_v32 = vsel %vm12825_vm8, 0, %v9113_v46 }
 0x645   : > { %v9212_v5 = vshrl.u32 %v15058_v32, 16  ;;  %v9214_v60 = vshll.u32 %v15058_v32, 16  ;;  %v9221_v30 = vrot.slane %v9219_v9, 1  ;;  %v9295_v36 = vrot.slane %v9148_v4, 1 }
 0x646   : > { %v9083_v28 = vsel %vm6152_vm4, %v8975_v44, %v8974_v47  ;;  %v7556_v29 = vcombine.high %v7012_v14, %v7012_v14  ;;  %v7563_v59 = vrot.slane %v7012_v14, %v12402_v13  ;;  %v7522_v15 = vcombine.high %v7010_v54, %v7010_v54 }
 0x647   : > { %v9084_v7 = vsel %vm6140_vm12, %v8976_v37, %v9083_v28  ;;  %v9216_v20 = vrot.slane %v9214_v60, 1  ;;  %v9294_v58 = vrot.slane %v15058_v32, 1  ;;  %v7529_v51 = vrot.slane %v7010_v54, %v12402_v13 }
 0x648   : > { %v15068_v6 = vsel %vm6142_vm13, %v8977_v52, %v9084_v7  ;;  %v7570_v18 = vrot.slane %v7556_v29, %v12402_v13  ;;  %v7571_v50 = vcombine.high %v7563_v59, %v7563_v59  ;;  %v8559_v11 = vsel %vm7718_vm11, %v7563_v59, -inf }
 0x649   : > { %v9217_v44 = vor.u32 %v9216_v20, %v9212_v5  ;;  %v8560_v16 = vrot.slane %v8559_v11, 4  ;;  %v7536_v33 = vrot.slane %v7522_v15, %v12402_v13  ;;  %v7537_v35 = vcombine.high %v7529_v51, %v7529_v51 }
 0x64a   : > { %v7572_v63 = vcombine.high %v7570_v18, %v7570_v18  ;;  %v8566_v37 = vsel %vm7718_vm11, %v7571_v50, -inf  ;;  %v8573_v40 = vsel %vm7718_vm11, %v7570_v18, -inf  ;;  %v8503_v2 = vsel %vm7718_vm11, %v7529_v51, -inf }
 0x64b   : > { %v9222_v52 = vsel %vm610_vm3, %v9217_v44, %v9221_v30  ;;  %v8561_v0 = vmax.f32 %v8559_v11, %v8560_v16  ;;  %v8567_v31 = vrot.slane %v8566_v37, 4  ;;  %v8574_v19 = vrot.slane %v8573_v40, 4 }
 0x64c   : > { %9257 = vrot.lane.b32.xlu1 %v9222_v52, %s11375_s15  ;;  %v8580_v42 = vsel %vm7718_vm11, %v7572_v63, -inf  ;;  %v7538_v26 = vcombine.high %v7536_v33, %v7536_v33  ;;  %v8504_v53 = vrot.slane %v8503_v2, 4  ;;  %v8510_v21 = vsel %vm7718_vm11, %v7537_v35, -inf }
 0x64d   : > { %v8562_v25 = vrot.slane %v8561_v0, 2  ;;  %v8568_v45 = vmax.f32 %v8566_v37, %v8567_v31  ;;  %v8575_v55 = vmax.f32 %v8573_v40, %v8574_v19  ;;  %v8581_v4 = vrot.slane %v8580_v42, 4 }
 0x64e   : > { %v8505_v61 = vmax.f32 %v8503_v2, %v8504_v53  ;;  %v8511_v43 = vrot.slane %v8510_v21, 4  ;;  %v8517_v10 = vsel %vm7718_vm11, %v7536_v33, -inf  ;;  %v8524_v48 = vsel %vm7718_vm11, %v7538_v26, -inf  ;;  %v9252_v33 = vpop.permute.xlu0 %9251 }
 0x64f   : > { %v8495_v46 = vmax.f32 %v15031_v57, %v8494_v49  ;;  %v9296_v9 = vsel %vm963_vm2, %v9294_v58, %v9295_v36  ;;  %v8569_v14 = vrot.slane %v8568_v45, 2  ;;  %v8576_v54 = vrot.slane %v8575_v55, 2 }
 0x650   : > { %9313 = vrot.lane.b32.xlu1 %v9296_v9, %s11380_s16  ;;  %v8506_v47 = vrot.slane %v8505_v61, 2  ;;  %v8512_v5 = vmax.f32 %v8510_v21, %v8511_v43  ;;  %v8518_v60 = vrot.slane %v8517_v10, 4  ;;  %v8525_v30 = vrot.slane %v8524_v48, 4 }
 0x651   : > { %v8499_v28 = vrot.slane %v15025_v27, 2  ;;  %v8439_v29 = vmax.f32 %v15037_v41, %v8438_v62  ;;  %v8563_v59 = vmax.f32 %v8561_v0, %v8562_v25  ;;  %v8582_v15 = vmax.f32 %v8580_v42, %v8581_v4 }
 0x652   : > { %v8507_v7 = vmax.f32 %v8505_v61, %v8506_v47  ;;  %v8513_v20 = vrot.slane %v8512_v5, 2  ;;  %v8519_v51 = vmax.f32 %v8517_v10, %v8518_v60  ;;  %v8526_v57 = vmax.f32 %v8524_v48, %v8525_v30  ;;  %v9308_v4 = vpop.permute.xlu0 %9307 }
 0x653   : > { %v8723_v49 = vpack.c.bf16 %v15033_v17, %v15033_v17  ;;  %v8724_v36 = vpack.c.bf16 %v15050_v38, %v15050_v38  ;;  %v8570_v58 = vmax.f32 %v8568_v45, %v8569_v14  ;;  %v8577_v18 = vmax.f32 %v8575_v55, %v8576_v54 }
 0x654   : > { %v8725_v50 = vpack.c.bf16 %v8495_v46, %v8495_v46  ;;  %v8514_v11 = vmax.f32 %v8512_v5, %v8513_v20  ;;  %v8520_v44 = vrot.slane %v8519_v51, 2  ;;  %v8527_v16 = vrot.slane %v8526_v57, 2 }
 0x655   : > { %v8717_v41 = vpack.c.bf16 %v8439_v29, %v8439_v29  ;;  %v8564_v62 = vrot.slane %v8563_v59, 1  ;;  %v8583_v35 = vrot.slane %v8582_v15, 2  ;;  %v6979_v63 = vadd.f32 %v14807_v34, %v14828_v12 }
 0x656   : > { %v8508_v37 = vrot.slane %v8507_v7, 1  ;;  %v8515_v40 = vrot.slane %v8514_v11, 1  ;;  %v8521_v2 = vmax.f32 %v8519_v51, %v8520_v44  ;;  %v8528_v17 = vmax.f32 %v8526_v57, %v8527_v16 }
 0x657   : > { %v15096_v38 = vunpack.c.l.b16 %v8722_v1  ;;  %v8571_v52 = vrot.slane %v8570_v58, 1  ;;  %v8578_v0 = vrot.slane %v8577_v18, 1  ;;  %v15099_v31 = vmax.f32 %v15025_v27, %v8499_v28 }
 0x658   : > { %v15101_v19 = vunpack.c.l.b16 %v8723_v49  ;;  %v8516_v42 = vmax.f32 %v8514_v11, %v8515_v40  ;;  %v8522_v26 = vrot.slane %v8521_v2, 1  ;;  %v15103_v53 = vunpack.c.l.b16 %v8724_v36 }
 0x659   : > { %v15105_v12 = vunpack.c.l.b16 %v8725_v50  ;;  %v15107_v21 = vunpack.c.l.b16 %v8717_v41  ;;  %v7013_v25 = vmax.f32 %v6979_v63, 0.0  ;;  %v15109_v45 = vmax.f32 %v8563_v59, %v8564_v62 }
 0x65a   : > { %v8584_v22 = vmax.f32 %v8582_v15, %v8583_v35  ;;  %v8509_v1 = vmax.f32 %v8507_v7, %v8508_v37  ;;  %v8529_v55 = vrot.slane %v8528_v17, 1  ;;  %v15111_v61 = vmax.f32 %v8570_v58, %v8571_v52 }
 0x65b   : > { %v15113_v27 = vmax.f32 %v8577_v18, %v8578_v0  ;;  %v7573_v43 = vcombine.high %v7013_v25, %v7013_v25  ;;  %v7580_v10 = vrot.slane %v7013_v25, %v12402_v13  ;;  %v8523_v48 = vmax.f32 %v8521_v2, %v8522_v26 }
 0x65c   : > { %v8728_v46 = vpack.c.bf16 %v8516_v42, %v8516_v42  ;;  %v9324_v9 = vsel %vm1665_vm9, %v14666_v56, %v9252_v33  ;;  %v6971_v14 = vadd.f32 %v14807_v34, %v14839_v3  ;;  %v8585_v30 = vrot.slane %v8584_v22, 1 }
 0x65d   : > { %v7587_v54 = vrot.slane %v7573_v43, %v12402_v13  ;;  %v7588_v47 = vcombine.high %v7580_v10, %v7580_v10  ;;  %v8587_v5 = vsel %vm7718_vm11, %v7580_v10, -inf  ;;  %v9341_v60 = vsel %vm9335_vm7, %v9324_v9, %v9308_v4 }
 0x65e   : > { %v8530_v28 = vmax.f32 %v8528_v17, %v8529_v55  ;;  %v8727_v29 = vpack.c.bf16 %v8509_v1, %v8509_v1  ;;  %v8588_v59 = vrot.slane %v8587_v5, 4  ;;  %11184 = vmatprep.mubr.msk.bf16.mxu1 %vm9383_vm6, %v9341_v60  ;;  %v7011_v20 = vmax.f32 %v6971_v14, 0.0  ;;  %v9254_v60 = vpop.permute.xlu1 %9253 }
 0x65f   : > { %v7589_v15 = vcombine.high %v7587_v54, %v7587_v54  ;;  %v8594_v7 = vsel %vm7718_vm11, %v7588_v47, -inf  ;;  %v8601_v56 = vsel %vm7718_vm11, %v7587_v54, -inf  ;;  %v8729_v34 = vpack.c.bf16 %v8523_v48, %v8523_v48 }
 0x660   : > { %v8984_v3 = vunpack.c.l.b16 %v8728_v46  ;;  %v8595_v51 = vrot.slane %v8594_v7, 4  ;;  %v8602_v57 = vrot.slane %v8601_v56, 4  ;;  %v8735_v49 = vpack.c.bf16 %v15109_v45, %v15109_v45 }
 0x661   : > { %v8608_v36 = vsel %vm7718_vm11, %v7589_v15, -inf  ;;  %v7539_v58 = vcombine.high %v7011_v20, %v7011_v20  ;;  %v7546_v18 = vrot.slane %v7011_v20, %v12402_v13  ;;  %v15130_v50 = vmax.f32 %v8584_v22, %v8585_v30 }
 0x662   : > { %v8983_v11 = vunpack.c.l.b16 %v8727_v29  ;;  %v8589_v44 = vmax.f32 %v8587_v5, %v8588_v59  ;;  %v8596_v16 = vmax.f32 %v8594_v7, %v8595_v51  ;;  %v8730_v33 = vpack.c.bf16 %v8530_v28, %v8530_v28 }
 0x663   : > { %v7553_v41 = vrot.slane %v7539_v58, %v12402_v13  ;;  %v7554_v62 = vcombine.high %v7546_v18, %v7546_v18  ;;  %v8531_v35 = vsel %vm7718_vm11, %v7546_v18, -inf  ;;  %v8985_v63 = vunpack.c.l.b16 %v8729_v34 }
 0x664   : > { %v9090_v37 = vsel %vm6140_vm12, %v8984_v3, %v8983_v11  ;;  %v8603_v40 = vmax.f32 %v8601_v56, %v8602_v57  ;;  %v8609_v2 = vrot.slane %v8608_v36, 4  ;;  %v8532_v52 = vrot.slane %v8531_v35, 4 }
 0x665   : > { %v7555_v17 = vcombine.high %v7553_v41, %v7553_v41  ;;  %v8538_v0 = vsel %vm7718_vm11, %v7554_v62, -inf  ;;  %v8545_v42 = vsel %vm7718_vm11, %v7553_v41, -inf  ;;  %v8736_v26 = vpack.c.bf16 %v15111_v61, %v15111_v61 }
 0x666   : > { %v8737_v25 = vpack.c.bf16 %v15113_v27, %v15113_v27  ;;  %v8590_v45 = vrot.slane %v8589_v44, 2  ;;  %v8597_v22 = vrot.slane %v8596_v16, 2  ;;  %v8533_v1 = vmax.f32 %v8531_v35, %v8532_v52 }
 0x667   : > { %v8539_v55 = vrot.slane %v8538_v0, 4  ;;  %v8546_v4 = vrot.slane %v8545_v42, 4  ;;  %v8552_v43 = vsel %vm7718_vm11, %v7555_v17, -inf  ;;  %v8986_v10 = vunpack.c.l.b16 %v8730_v33 }
 0x668   : > { %v9091_v48 = vsel %vm6142_vm13, %v8985_v63, %v9090_v37  ;;  %v8604_v46 = vrot.slane %v8603_v40, 2  ;;  %v8610_v9 = vmax.f32 %v8608_v36, %v8609_v2  ;;  %v8534_v14 = vrot.slane %v8533_v1, 2  ;;  %v9310_v37 = vpop.permute.xlu1 %9309 }
 0x669   : > { %v8540_v54 = vmax.f32 %v8538_v0, %v8539_v55  ;;  %v8547_v47 = vmax.f32 %v8545_v42, %v8546_v4  ;;  %v8553_v5 = vrot.slane %v8552_v43, 4  ;;  %v15143_v30 = vunpack.c.l.b16 %v8735_v49 }
 0x66a   : > { %v8591_v28 = vmax.f32 %v8589_v44, %v8590_v45  ;;  %v8598_v29 = vmax.f32 %v8596_v16, %v8597_v22  ;;  %v8501_v59 = vrot.slane %v15099_v31, 1  ;;  %v8535_v15 = vmax.f32 %v8533_v1, %v8534_v14 }
 0x66b   : > { %v8541_v7 = vrot.slane %v8540_v54, 2  ;;  %v8548_v56 = vrot.slane %v8547_v47, 2  ;;  %v8554_v20 = vmax.f32 %v8552_v43, %v8553_v5  ;;  %v8605_v34 = vmax.f32 %v8603_v40, %v8604_v46 }
 0x66c   : > { %v8611_v3 = vrot.slane %v8610_v9, 2  ;;  %v9092_v51 = vsel %vm6144_vm14, %v8986_v10, %v9091_v48  ;;  %v9082_v57 = vsel %vm6150_vm5, %v15107_v21, %v15054_v39  ;;  %v8536_v36 = vrot.slane %v8535_v15, 1 }
 0x66d   : > { %v8542_v58 = vmax.f32 %v8540_v54, %v8541_v7  ;;  %v8549_v49 = vmax.f32 %v8547_v47, %v8548_v56  ;;  %v8555_v18 = vrot.slane %v8554_v20, 2  ;;  %v8592_v11 = vrot.slane %v8591_v28, 1 }
 0x66e   : > { %v8599_v44 = vrot.slane %v8598_v29, 1  ;;  %v8502_v16 = vmax.f32 %v15099_v31, %v8501_v59  ;;  %v9086_v33 = vsel %vm6144_vm14, %v15096_v38, %v15068_v6  ;;  %v8537_v41 = vmax.f32 %v8535_v15, %v8536_v36 }
 0x66f   : > { %v8543_v62 = vrot.slane %v8542_v58, 1  ;;  %v8550_v35 = vrot.slane %v8549_v49, 1  ;;  %v8556_v63 = vmax.f32 %v8554_v20, %v8555_v18  ;;  %v8606_v40 = vrot.slane %v8605_v34, 1 }
 0x670   : > { %v8612_v2 = vmax.f32 %v8610_v9, %v8611_v3  ;;  %v9087_v39 = vsel %vm6146_vm15, %v15101_v19, %v9086_v33  ;;  %v9326_v21 = vsel %vm1665_vm9, %v14786_v8, %v9254_v60  ;;  %v8731_v0 = vpack.c.bf16 %v8537_v41, %v8537_v41 }
 0x671   : > { %v8544_v17 = vmax.f32 %v8542_v58, %v8543_v62  ;;  %v8551_v52 = vmax.f32 %v8549_v49, %v8550_v35  ;;  %v8557_v31 = vrot.slane %v8556_v63, 1  ;;  %v8593_v42 = vmax.f32 %v8591_v28, %v8592_v11 }
 0x672   : > { %v9088_v6 = vsel %vm6148_vm1, %v15103_v53, %v9087_v39  ;;  %v10993_v38 = vpack.c.bf16 %v8502_v16, %v8502_v16  ;;  %v9343_v45 = vsel %vm9335_vm7, %v9326_v21, %v9310_v37  ;;  %v8987_v4 = vunpack.c.l.b16 %v8731_v0 }
 0x673   : > { %v8558_v22 = vmax.f32 %v8556_v63, %v8557_v31  ;;  %v8732_v1 = vpack.c.bf16 %v8544_v17, %v8544_v17  ;;  %v8733_v55 = vpack.c.bf16 %v8551_v52, %v8551_v52  ;;  %11185 = vmatmul.mubr.msk.bf16.gmra.mrb[40].mxu1 %vm9383_vm6, %v9343_v45  ;;  %v8738_v8 = vpack.c.bf16 %v15130_v50, %v15130_v50 }
 0x674   : > { %v8600_v19 = vmax.f32 %v8598_v29, %v8599_v44  ;;  %v9089_v43 = vsel %vm6150_vm5, %v15105_v12, %v9088_v6  ;;  %v8613_v10 = vrot.slane %v8612_v2, 1  ;;  %v8607_v48 = vmax.f32 %v8605_v34, %v8606_v40 }
 0x675   : > { %v8734_v46 = vpack.c.bf16 %v8558_v22, %v8558_v22  ;;  %v8988_v53 = vunpack.c.l.b16 %v8732_v1  ;;  %v9093_v9 = vsel %vm6146_vm15, %v8987_v4, %v9092_v51  ;;  %v8992_v14 = vunpack.c.l.b16 %v8736_v26 }
 0x676   : > { %v8989_v54 = vunpack.c.l.b16 %v8733_v55  ;;  %v9115_v47 = vpack.c.b16 %v9089_v43, %v9082_v57  ;;  %v9149_v5 = vsel %vm12825_vm8, %v10993_v38, 0  ;;  %v8993_v50 = vunpack.c.l.b16 %v8737_v25 }
 0x677   : > { %v8739_v12 = vpack.c.bf16 %v8593_v42, %v8593_v42  ;;  %v8990_v60 = vunpack.c.l.b16 %v8734_v46  ;;  %v9094_v28 = vsel %vm6148_vm1, %v8988_v53, %v9093_v9  ;;  %v8740_v29 = vpack.c.bf16 %v8600_v19, %v8600_v19  ;;  %v15213_v53 = vld [vmem:[%s15557_s6] ss:$0 sm:$0xff] }
 0x678   : > { %v9141_v59 = vsel %vm12825_vm8, 0, %v9115_v47  ;;  %v8614_v15 = vmax.f32 %v8612_v2, %v8613_v10  ;;  %v9095_v61 = vsel %vm6150_vm5, %v8989_v54, %v9094_v28  ;;  %v8741_v26 = vpack.c.bf16 %v8607_v48, %v8607_v48 }
 0x679   : > { %v9096_v7 = vsel %vm6152_vm4, %v15143_v30, %v8990_v60  ;;  %v9226_v56 = vshll.u32 %v9141_v59, 16  ;;  %v9231_v20 = vshll.u32 %v9149_v5, 16  ;;  %v8994_v34 = vunpack.c.l.b16 %v8738_v8 }
 0x67a   : > { %v9097_v27 = vsel %vm6140_vm12, %v8992_v14, %v9096_v7  ;;  %v8995_v25 = vunpack.c.l.b16 %v8739_v12  ;;  %v9224_v51 = vshrl.u32 %v9141_v59, 16  ;;  %v8996_v36 = vunpack.c.l.b16 %v8740_v29 }
 0x67b   : > { %v9098_v3 = vsel %vm6142_vm13, %v8993_v50, %v9097_v27  ;;  %v9228_v57 = vrot.slane %v9226_v56, 1  ;;  %v10994_v49 = vpack.c.bf16 %v8614_v15, %v8614_v15  ;;  %v8997_v18 = vunpack.c.l.b16 %v8741_v26 }
 0x67c   : > { %v9099_v58 = vsel %vm6144_vm14, %v8994_v34, %v9098_v3  ;;  %v9233_v44 = vrot.slane %v9231_v20, 1  ;;  %v9297_v41 = vrot.slane %v9141_v59, 1  ;;  %v9298_v37 = vrot.slane %v9149_v5, 1 }
 0x67d   : > { %v9229_v11 = vor.u32 %v9228_v57, %v9224_v51  ;;  %v9100_v16 = vsel %vm6146_vm15, %v8995_v25, %v9099_v58  ;;  %v9150_v63 = vsel %vm12825_vm8, %v10994_v49, 0 }
 0x67e   : > { %v9101_v30 = vsel %vm6148_vm1, %v8996_v36, %v9100_v16  ;;  %v9299_v2 = vsel %vm963_vm2, %v9297_v41, %v9298_v37  ;;  %v9243_v21 = vshll.u32 %v9150_v63, 16  ;;  %v9301_v45 = vrot.slane %v9150_v63, 1 }
 0x67f   : > { %v9234_v33 = vsel %vm610_vm3, %v9229_v11, %v9233_v44  ;;  %v9102_v62 = vsel %vm6150_vm5, %v8997_v18, %v9101_v30 }
 0x680   : > { %9259 = vrot.lane.b32.xlu0 %v9234_v33, %s11375_s15  ;;  %v9117_v35 = vpack.c.b16 %v9102_v62, %v9095_v61  ;;  %v9245_v0 = vrot.slane %v9243_v21, 1 }
 0x682   : > { %v9142_v40 = vsel %vm12825_vm8, 0, %v9117_v35 }
 0x683   : > { %v9238_v39 = vshll.u32 %v9142_v40, 16  ;;  %v9236_v17 = vshrl.u32 %v9142_v40, 16  ;;  %v9300_v6 = vrot.slane %v9142_v40, 1 }
 0x684   : > { %9315 = vrot.lane.b32.xlu0 %v9299_v2, %s11380_s16 }
 0x685   : > { %v9240_v52 = vrot.slane %v9238_v39, 1  ;;  %v9302_v24 = vsel %vm963_vm2, %v9300_v6, %v9301_v45  ;;  %vm11383_vm2 = vmmov 0  }
 0x687   : > { %v9241_v31 = vor.u32 %v9240_v52, %v9236_v17 }
 0x689   : > { %v9246_v42 = vsel %vm610_vm3, %v9241_v31, %v9245_v0  ;;  %v9256_v38 = vpop.permute.xlu0 %9255  ;;  %vm10608_vm3 = vcmask 523264  }
 0x68a   : > { %9261 = vrot.lane.b32.xlu1 %v9246_v42, %s11375_s15  ;;  %v9328_v22 = vsel %vm1665_vm9, %v14917_v23, %v9256_v38 }
 0x68d   : > { %v9312_v1 = vpop.permute.xlu0 %9311 }
 0x68e   : > { %9317 = vrot.lane.b32.xlu1 %v9302_v24, %s11380_s16  ;;  %v9345_v55 = vsel %vm9335_vm7, %v9328_v22, %v9312_v1 }
 0x68f   : > { %11188 = vmatprep.mubr.msk.bf16.mxu1 %vm9383_vm6, %v9345_v55 }
 0x6be   : > { %v9258_v4 = vpop.permute.xlu1 %9257 }
 0x6bf   : > { %v9330_v8 = vsel %vm1665_vm9, %v15058_v32, %v9258_v4 }
 0x6c2   : > { %v9314_v19 = vpop.permute.xlu1 %9313 }
 0x6c3   : > { %v9347_v43 = vsel %vm9335_vm7, %v9330_v8, %v9314_v19 }
 0x6c4   : > { %11189 = vmatmul.mubr.msk.bf16.gmra.mrb[44].mxu1 %vm9383_vm6, %v9347_v43 }
 0x6f2   : > { %v9260_v10 = vpop.permute.xlu0 %9259 }
 0x6f3   : > { %v9332_v48 = vsel %vm1665_vm9, %v9141_v59, %v9260_v10 }
 0x6f6   : > { %v9316_v23 = vpop.permute.xlu0 %9315 }
 0x6f7   : > { %v9349_v46 = vsel %vm9335_vm7, %v9332_v48, %v9316_v23 }
 0x6f8   : > { %11192 = vmatprep.mubr.msk.bf16.mxu1 %vm9383_vm6, %v9349_v46 }
 0x6fc   : > { %v9262_v9 = vpop.permute.xlu1 %9261  ;;  %v11182_v32 = vpop.f32.mrb[36].mxu1 }
 0x6fd   : > { %v9443_v14 = vadd.f32 %v11182_v32, %v15213_v53  ;;  %v9434_v54 = vpop.f32.mrb[37].mxu1  ;;  %v9334_v28 = vsel %vm1665_vm9, %v9142_v40, %v9262_v9 }
 0x6fe   : > { %v9435_v47 = vadd.f32 %v15213_v53, %v9434_v54  ;;  %v11183_v5 = vpop.f32.mrb[38].mxu1 }
 0x6ff   : > { %v9499_v50 = vmax.f32 %v9443_v14, 0.0  ;;  %v9446_v12 = vadd.f32 %v11183_v5, %v15213_v53  ;;  %v9437_v60 = vpop.f32.mrb[39].mxu1 }
 0x700   : > { %v9318_v29 = vpop.permute.xlu1 %9317  ;;  %v9497_v59 = vmax.f32 %v9435_v47, 0.0  ;;  %v9438_v5 = vadd.f32 %v15213_v53, %v9437_v60 }
 0x701   : > { %v9351_v15 = vsel %vm9335_vm7, %v9334_v28, %v9318_v29  ;;  %v9563_v61 = vcombine.high %v9499_v50, %v9499_v50  ;;  %v9570_v26 = vrot.slane %v9499_v50, %v12402_v13  ;;  %v9500_v25 = vmax.f32 %v9446_v12, 0.0 }
 0x702   : > { %11193 = vmatmul.mubr.msk.bf16.gmra.mrb[48].mxu1 %vm9383_vm6, %v9351_v15  ;;  %v9529_v7 = vcombine.high %v9497_v59, %v9497_v59  ;;  %v9536_v56 = vrot.slane %v9497_v59, %v12402_v13  ;;  %v9498_v60 = vmax.f32 %v9438_v5, 0.0 }
 0x703   : > { %v9577_v20 = vrot.slane %v9563_v61, %v12402_v13  ;;  %v9578_v34 = vcombine.high %v9570_v26, %v9570_v26  ;;  %v9921_v27 = vsel %vm7718_vm11, %v9570_v26, -inf  ;;  %v9580_v23 = vcombine.high %v9500_v25, %v9500_v25 }
 0x704   : > { %v9922_v3 = vrot.slane %v9921_v27, 4  ;;  %v9543_v51 = vrot.slane %v9529_v7, %v12402_v13  ;;  %v9544_v57 = vcombine.high %v9536_v56, %v9536_v56  ;;  %v9865_v36 = vsel %vm7718_vm11, %v9536_v56, -inf }
 0x705   : > { %v9579_v58 = vcombine.high %v9577_v20, %v9577_v20  ;;  %v9928_v49 = vsel %vm7718_vm11, %v9578_v34, -inf  ;;  %v9935_v18 = vsel %vm7718_vm11, %v9577_v20, -inf  ;;  %v9866_v11 = vrot.slane %v9865_v36, 4 }
 0x706   : > { %v9923_v44 = vmax.f32 %v9921_v27, %v9922_v3  ;;  %v9929_v16 = vrot.slane %v9928_v49, 4  ;;  %v9936_v30 = vrot.slane %v9935_v18, 4  ;;  %v9545_v33 = vcombine.high %v9543_v51, %v9543_v51 }
 0x707   : > { %v9942_v41 = vsel %vm7718_vm11, %v9579_v58, -inf  ;;  %v9867_v62 = vmax.f32 %v9865_v36, %v9866_v11  ;;  %v9872_v35 = vsel %vm7718_vm11, %v9544_v57, -inf  ;;  %v9879_v63 = vsel %vm7718_vm11, %v9543_v51, -inf }
 0x708   : > { %v9924_v37 = vrot.slane %v9923_v44, 2  ;;  %v9930_v40 = vmax.f32 %v9928_v49, %v9929_v16  ;;  %v9937_v2 = vmax.f32 %v9935_v18, %v9936_v30  ;;  %v9943_v39 = vrot.slane %v9942_v41, 4 }
 0x709   : > { %v9868_v21 = vrot.slane %v9867_v62, 2  ;;  %v9873_v17 = vrot.slane %v9872_v35, 4  ;;  %v9880_v52 = vrot.slane %v9879_v63, 4  ;;  %v9886_v31 = vsel %vm7718_vm11, %v9545_v33, -inf }
 0x70a   : > { %v9925_v0 = vmax.f32 %v9923_v44, %v9924_v37  ;;  %v9931_v42 = vrot.slane %v9930_v40, 2  ;;  %v9938_v6 = vrot.slane %v9937_v2, 2  ;;  %v9944_v38 = vmax.f32 %v9942_v41, %v9943_v39 }
 0x70b   : > { %v9869_v45 = vmax.f32 %v9867_v62, %v9868_v21  ;;  %v9874_v24 = vmax.f32 %v9872_v35, %v9873_v17  ;;  %v9881_v22 = vmax.f32 %v9879_v63, %v9880_v52  ;;  %v9887_v1 = vrot.slane %v9886_v31, 4 }
 0x70c   : > { %v9926_v55 = vrot.slane %v9925_v0, 1  ;;  %v9932_v4 = vmax.f32 %v9930_v40, %v9931_v42  ;;  %v9939_v8 = vmax.f32 %v9937_v2, %v9938_v6  ;;  %v9945_v19 = vrot.slane %v9944_v38, 2 }
 0x70d   : > { %v9875_v43 = vrot.slane %v9874_v24, 2  ;;  %v9882_v10 = vrot.slane %v9881_v22, 2  ;;  %v9888_v48 = vmax.f32 %v9886_v31, %v9887_v1  ;;  %v9870_v28 = vrot.slane %v9869_v45, 1 }
 0x70e   : > { %v9933_v46 = vrot.slane %v9932_v4, 1  ;;  %v9940_v9 = vrot.slane %v9939_v8, 1  ;;  %v9946_v32 = vmax.f32 %v9944_v38, %v9945_v19  ;;  %v9927_v50 = vmax.f32 %v9925_v0, %v9926_v55 }
 0x70f   : > { %v9876_v14 = vmax.f32 %v9874_v24, %v9875_v43  ;;  %v9883_v54 = vmax.f32 %v9881_v22, %v9882_v10  ;;  %v9889_v47 = vrot.slane %v9888_v48, 2  ;;  %v9587_v29 = vrot.slane %v9500_v25, %v12402_v13 }
 0x710   : > { %v9934_v12 = vmax.f32 %v9932_v4, %v9933_v46  ;;  %v9947_v59 = vrot.slane %v9946_v32, 1  ;;  %v9594_v26 = vrot.slane %v9580_v23, %v12402_v13  ;;  %v9941_v7 = vmax.f32 %v9939_v8, %v9940_v9 }
 0x711   : > { %v9877_v15 = vrot.slane %v9876_v14, 1  ;;  %v9890_v61 = vmax.f32 %v9888_v48, %v9889_v47  ;;  %v9884_v56 = vrot.slane %v9883_v54, 1  ;;  %v9595_v20 = vcombine.high %v9587_v29, %v9587_v29 }
 0x712   : > { %v9949_v34 = vsel %vm7718_vm11, %v9587_v29, -inf  ;;  %v10384_v27 = vsel %vm6152_vm4, %v9934_v12, %v9927_v50  ;;  %v9596_v57 = vcombine.high %v9594_v26, %v9594_v26  ;;  %v9963_v25 = vsel %vm7718_vm11, %v9594_v26, -inf }
 0x713   : > { %v9878_v3 = vmax.f32 %v9876_v14, %v9877_v15  ;;  %v9891_v51 = vrot.slane %v9890_v61, 1  ;;  %v9950_v36 = vrot.slane %v9949_v34, 4  ;;  %v9956_v58 = vsel %vm7718_vm11, %v9595_v20, -inf }
 0x714   : > { %v9948_v49 = vmax.f32 %v9946_v32, %v9947_v59  ;;  %v9871_v18 = vmax.f32 %v9869_v45, %v9870_v28  ;;  %v9957_v11 = vrot.slane %v9956_v58, 4  ;;  %v9964_v44 = vrot.slane %v9963_v25, 4 }
 0x715   : > { %v10385_v16 = vsel %vm6140_vm12, %v9941_v7, %v10384_v27  ;;  %v9885_v30 = vmax.f32 %v9883_v54, %v9884_v56  ;;  %v9951_v33 = vmax.f32 %v9949_v34, %v9950_v36  ;;  %v9970_v41 = vsel %vm7718_vm11, %v9596_v57, -inf }
 0x716   : > { %v9958_v62 = vmax.f32 %v9956_v58, %v9957_v11  ;;  %v9965_v35 = vmax.f32 %v9963_v25, %v9964_v44  ;;  %v9971_v63 = vrot.slane %v9970_v41, 4  ;;  %v9546_v37 = vcombine.high %v9498_v60, %v9498_v60 }
 0x717   : > { %v9892_v40 = vmax.f32 %v9890_v61, %v9891_v51  ;;  %v10377_v2 = vsel %vm6152_vm4, %v9878_v3, %v9871_v18  ;;  %v9952_v39 = vrot.slane %v9951_v33, 2  ;;  %v9553_v21 = vrot.slane %v9498_v60, %v12402_v13 }
 0x718   : > { %v9959_v17 = vrot.slane %v9958_v62, 2  ;;  %v9966_v52 = vrot.slane %v9965_v35, 2  ;;  %v9972_v31 = vmax.f32 %v9970_v41, %v9971_v63  ;;  %v9560_v0 = vrot.slane %v9546_v37, %v12402_v13 }
 0x719   : > { %v9953_v42 = vmax.f32 %v9951_v33, %v9952_v39  ;;  %v10386_v6 = vsel %vm6142_vm13, %v9948_v49, %v10385_v16  ;;  %v9561_v38 = vcombine.high %v9553_v21, %v9553_v21  ;;  %v9893_v45 = vsel %vm7718_vm11, %v9553_v21, -inf }
 0x71a   : > { %v9960_v24 = vmax.f32 %v9958_v62, %v9959_v17  ;;  %v9967_v22 = vmax.f32 %v9965_v35, %v9966_v52  ;;  %v9973_v1 = vrot.slane %v9972_v31, 2  ;;  %v9562_v55 = vcombine.high %v9560_v0, %v9560_v0 }
 0x71b   : > { %v9954_v4 = vrot.slane %v9953_v42, 1  ;;  %v9894_v8 = vrot.slane %v9893_v45, 4  ;;  %v9900_v19 = vsel %vm7718_vm11, %v9561_v38, -inf  ;;  %v9907_v43 = vsel %vm7718_vm11, %v9560_v0, -inf }
 0x71c   : > { %v9961_v10 = vrot.slane %v9960_v24, 1  ;;  %v9968_v48 = vrot.slane %v9967_v22, 1  ;;  %v9974_v23 = vmax.f32 %v9972_v31, %v9973_v1  ;;  %v9901_v46 = vrot.slane %v9900_v19, 4 }
 0x71d   : > { %v9955_v9 = vmax.f32 %v9953_v42, %v9954_v4  ;;  %v9895_v32 = vmax.f32 %v9893_v45, %v9894_v8  ;;  %v9908_v14 = vrot.slane %v9907_v43, 4  ;;  %v9914_v54 = vsel %vm7718_vm11, %v9562_v55, -inf }
 0x71e   : > { %v9962_v47 = vmax.f32 %v9960_v24, %v9961_v10  ;;  %v9969_v5 = vmax.f32 %v9967_v22, %v9968_v48  ;;  %v9975_v50 = vrot.slane %v9974_v23, 1  ;;  %v9902_v12 = vmax.f32 %v9900_v19, %v9901_v46 }
 0x71f   : > { %v10387_v28 = vsel %vm6144_vm14, %v9955_v9, %v10386_v6  ;;  %v9896_v29 = vrot.slane %v9895_v32, 2  ;;  %v9909_v59 = vmax.f32 %v9907_v43, %v9908_v14  ;;  %v9915_v15 = vrot.slane %v9914_v54, 4 }
 0x720   : > { %v10378_v61 = vsel %vm6140_vm12, %v9885_v30, %v10377_v2  ;;  %v9976_v26 = vmax.f32 %v9974_v23, %v9975_v50  ;;  %v10388_v7 = vsel %vm6146_vm15, %v9962_v47, %v10387_v28  ;;  %v9903_v56 = vrot.slane %v9902_v12, 2 }
 0x721   : > { %v10389_v20 = vsel %vm6148_vm1, %v9969_v5, %v10388_v7  ;;  %v9897_v34 = vmax.f32 %v9895_v32, %v9896_v29  ;;  %v9910_v27 = vrot.slane %v9909_v59, 2  ;;  %v9916_v3 = vmax.f32 %v9914_v54, %v9915_v15 }
 0x722   : > { %v9904_v51 = vmax.f32 %v9902_v12, %v9903_v56  ;;  %v15255_v60 = vsel %vm6150_vm5, %v9976_v26, %v10389_v20  ;;  %v10379_v49 = vsel %vm6142_vm13, %v9892_v40, %v10378_v61 }
 0x723   : > { %v9898_v57 = vrot.slane %v9897_v34, 1  ;;  %v9911_v36 = vmax.f32 %v9909_v59, %v9910_v27  ;;  %v9917_v58 = vrot.slane %v9916_v3, 2 }
 0x724   : > { %v9905_v25 = vrot.slane %v9904_v51, 1 }
 0x725   : > { %v9899_v18 = vmax.f32 %v9897_v34, %v9898_v57  ;;  %v9912_v11 = vrot.slane %v9911_v36, 1  ;;  %v9918_v44 = vmax.f32 %v9916_v3, %v9917_v58 }
 0x726   : > { %v9906_v16 = vmax.f32 %v9904_v51, %v9905_v25 }
 0x727   : > { %v9913_v30 = vmax.f32 %v9911_v36, %v9912_v11  ;;  %v9919_v33 = vrot.slane %v9918_v44, 1  ;;  %v10380_v41 = vsel %vm6144_vm14, %v9899_v18, %v10379_v49 }
 0x728   : > { %v10381_v62 = vsel %vm6146_vm15, %v9906_v16, %v10380_v41 }
 0x729   : > { %v9920_v35 = vmax.f32 %v9918_v44, %v9919_v33  ;;  %v10382_v63 = vsel %vm6148_vm1, %v9913_v30, %v10381_v62 }
 0x72b   : > { %v15262_v37 = vsel %vm6150_vm5, %v9920_v35, %v10382_v63 }
 0x746   : > { %v11186_v2 = vpop.f32.mrb[40].mxu1 }
 0x747   : > { %v9459_v39 = vadd.f32 %v11186_v2, %v15213_v53  ;;  %v9450_v40 = vpop.f32.mrb[41].mxu1 }
 0x748   : > { %v9451_v21 = vadd.f32 %v15213_v53, %v9450_v40  ;;  %v11187_v17 = vpop.f32.mrb[42].mxu1 }
 0x749   : > { %v9503_v52 = vmax.f32 %v9459_v39, 0.0  ;;  %v9462_v31 = vadd.f32 %v11187_v17, %v15213_v53  ;;  %v9453_v0 = vpop.f32.mrb[43].mxu1 }
 0x74a   : > { %v9501_v42 = vmax.f32 %v9451_v21, 0.0  ;;  %v9454_v21 = vadd.f32 %v15213_v53, %v9453_v0 }
 0x74b   : > { %v9631_v6 = vcombine.high %v9503_v52, %v9503_v52  ;;  %v9638_v38 = vrot.slane %v9503_v52, %v12402_v13  ;;  %v9504_v4 = vmax.f32 %v9462_v31, 0.0 }
 0x74c   : > { %v9597_v45 = vcombine.high %v9501_v42, %v9501_v42  ;;  %v9604_v24 = vrot.slane %v9501_v42, %v12402_v13  ;;  %v9502_v0 = vmax.f32 %v9454_v21, 0.0 }
 0x74d   : > { %v9645_v22 = vrot.slane %v9631_v6, %v12402_v13  ;;  %v9646_v1 = vcombine.high %v9638_v38, %v9638_v38  ;;  %v10033_v55 = vsel %vm7718_vm11, %v9638_v38, -inf  ;;  %v9648_v41 = vcombine.high %v9504_v4, %v9504_v4 }
 0x74e   : > { %v10034_v8 = vrot.slane %v10033_v55, 4  ;;  %v9611_v19 = vrot.slane %v9597_v45, %v12402_v13  ;;  %v9612_v43 = vcombine.high %v9604_v24, %v9604_v24  ;;  %v9977_v10 = vsel %vm7718_vm11, %v9604_v24, -inf }
 0x74f   : > { %v9647_v48 = vcombine.high %v9645_v22, %v9645_v22  ;;  %v10040_v23 = vsel %vm7718_vm11, %v9646_v1, -inf  ;;  %v10047_v46 = vsel %vm7718_vm11, %v9645_v22, -inf  ;;  %v9978_v9 = vrot.slane %v9977_v10, 4 }
 0x750   : > { %v10035_v32 = vmax.f32 %v10033_v55, %v10034_v8  ;;  %v10041_v14 = vrot.slane %v10040_v23, 4  ;;  %v10048_v54 = vrot.slane %v10047_v46, 4  ;;  %v9613_v47 = vcombine.high %v9611_v19, %v9611_v19 }
 0x751   : > { %v10054_v5 = vsel %vm7718_vm11, %v9647_v48, -inf  ;;  %v9979_v50 = vmax.f32 %v9977_v10, %v9978_v9  ;;  %v9984_v12 = vsel %vm7718_vm11, %v9612_v43, -inf  ;;  %v9991_v28 = vsel %vm7718_vm11, %v9611_v19, -inf }
 0x752   : > { %v10036_v29 = vrot.slane %v10035_v32, 2  ;;  %v10042_v59 = vmax.f32 %v10040_v23, %v10041_v14  ;;  %v10049_v15 = vmax.f32 %v10047_v46, %v10048_v54  ;;  %v10055_v61 = vrot.slane %v10054_v5, 4 }
 0x753   : > { %v9980_v26 = vrot.slane %v9979_v50, 2  ;;  %v9985_v7 = vrot.slane %v9984_v12, 4  ;;  %v9992_v56 = vrot.slane %v9991_v28, 4  ;;  %v9998_v20 = vsel %vm7718_vm11, %v9613_v47, -inf }
 0x754   : > { %v10037_v34 = vmax.f32 %v10035_v32, %v10036_v29  ;;  %v10043_v27 = vrot.slane %v10042_v59, 2  ;;  %v10050_v3 = vrot.slane %v10049_v15, 2  ;;  %v10056_v51 = vmax.f32 %v10054_v5, %v10055_v61 }
 0x755   : > { %v9981_v57 = vmax.f32 %v9979_v50, %v9980_v26  ;;  %v9986_v36 = vmax.f32 %v9984_v12, %v9985_v7  ;;  %v9993_v58 = vmax.f32 %v9991_v28, %v9992_v56  ;;  %v9999_v25 = vrot.slane %v9998_v20, 4 }
 0x756   : > { %v10038_v49 = vrot.slane %v10037_v34, 1  ;;  %v10044_v18 = vmax.f32 %v10042_v59, %v10043_v27  ;;  %v10051_v11 = vmax.f32 %v10049_v15, %v10050_v3  ;;  %v10057_v44 = vrot.slane %v10056_v51, 2 }
 0x757   : > { %v9987_v16 = vrot.slane %v9986_v36, 2  ;;  %v9994_v30 = vrot.slane %v9993_v58, 2  ;;  %v10000_v33 = vmax.f32 %v9998_v20, %v9999_v25  ;;  %v9982_v31 = vrot.slane %v9981_v57, 1 }
 0x758   : > { %v10045_v62 = vrot.slane %v10044_v18, 1  ;;  %v10052_v35 = vrot.slane %v10051_v11, 1  ;;  %v10058_v63 = vmax.f32 %v10056_v51, %v10057_v44  ;;  %v10039_v17 = vmax.f32 %v10037_v34, %v10038_v49 }
 0x759   : > { %v9988_v2 = vmax.f32 %v9986_v36, %v9987_v16  ;;  %v9995_v39 = vmax.f32 %v9993_v58, %v9994_v30  ;;  %v10001_v40 = vrot.slane %v10000_v33, 2  ;;  %v9655_v42 = vrot.slane %v9504_v4, %v12402_v13 }
 0x75a   : > { %v10046_v52 = vmax.f32 %v10044_v18, %v10045_v62  ;;  %v10059_v6 = vrot.slane %v10058_v63, 1  ;;  %v9662_v24 = vrot.slane %v9648_v41, %v12402_v13  ;;  %v10053_v22 = vmax.f32 %v10051_v11, %v10052_v35 }
 0x75b   : > { %v9989_v38 = vrot.slane %v9988_v2, 1  ;;  %v10002_v45 = vmax.f32 %v10000_v33, %v10001_v40  ;;  %v9996_v1 = vrot.slane %v9995_v39, 1  ;;  %v9663_v55 = vcombine.high %v9655_v42, %v9655_v42 }
 0x75c   : > { %v10061_v8 = vsel %vm7718_vm11, %v9655_v42, -inf  ;;  %v10398_v19 = vsel %vm6152_vm4, %v10046_v52, %v10039_v17  ;;  %v9664_v48 = vcombine.high %v9662_v24, %v9662_v24  ;;  %v10075_v4 = vsel %vm7718_vm11, %v9662_v24, -inf }
 0x75d   : > { %v9990_v43 = vmax.f32 %v9988_v2, %v9989_v38  ;;  %v10003_v10 = vrot.slane %v10002_v45, 1  ;;  %v10062_v23 = vrot.slane %v10061_v8, 4  ;;  %v10068_v46 = vsel %vm7718_vm11, %v9663_v55, -inf }
 0x75e   : > { %v10060_v9 = vmax.f32 %v10058_v63, %v10059_v6  ;;  %v9983_v32 = vmax.f32 %v9981_v57, %v9982_v31  ;;  %v10069_v14 = vrot.slane %v10068_v46, 4  ;;  %v10076_v54 = vrot.slane %v10075_v4, 4 }
 0x75f   : > { %v10399_v47 = vsel %vm6140_vm12, %v10053_v22, %v10398_v19  ;;  %v9997_v5 = vmax.f32 %v9995_v39, %v9996_v1  ;;  %v10063_v50 = vmax.f32 %v10061_v8, %v10062_v23  ;;  %v10082_v12 = vsel %vm7718_vm11, %v9664_v48, -inf }
 0x760   : > { %v10070_v28 = vmax.f32 %v10068_v46, %v10069_v14  ;;  %v10077_v29 = vmax.f32 %v10075_v4, %v10076_v54  ;;  %v10083_v59 = vrot.slane %v10082_v12, 4  ;;  %v9614_v15 = vcombine.high %v9502_v0, %v9502_v0 }
 0x761   : > { %v10004_v61 = vmax.f32 %v10002_v45, %v10003_v10  ;;  %v10391_v26 = vsel %vm6152_vm4, %v9990_v43, %v9983_v32  ;;  %v10064_v7 = vrot.slane %v10063_v50, 2  ;;  %v9621_v56 = vrot.slane %v9502_v0, %v12402_v13 }
 0x762   : > { %v10071_v20 = vrot.slane %v10070_v28, 2  ;;  %v10078_v34 = vrot.slane %v10077_v29, 2  ;;  %v10084_v27 = vmax.f32 %v10082_v12, %v10083_v59  ;;  %v9628_v3 = vrot.slane %v9614_v15, %v12402_v13 }
 0x763   : > { %v10065_v51 = vmax.f32 %v10063_v50, %v10064_v7  ;;  %v10400_v57 = vsel %vm6142_vm13, %v10060_v9, %v10399_v47  ;;  %v9629_v36 = vcombine.high %v9621_v56, %v9621_v56  ;;  %v10005_v58 = vsel %vm7718_vm11, %v9621_v56, -inf }
 0x764   : > { %v10072_v25 = vmax.f32 %v10070_v28, %v10071_v20  ;;  %v10079_v49 = vmax.f32 %v10077_v29, %v10078_v34  ;;  %v10085_v18 = vrot.slane %v10084_v27, 2  ;;  %v9630_v11 = vcombine.high %v9628_v3, %v9628_v3 }
 0x765   : > { %v10066_v44 = vrot.slane %v10065_v51, 1  ;;  %v10006_v16 = vrot.slane %v10005_v58, 4  ;;  %v10012_v30 = vsel %vm7718_vm11, %v9629_v36, -inf  ;;  %v10019_v33 = vsel %vm7718_vm11, %v9628_v3, -inf }
 0x766   : > { %v10073_v41 = vrot.slane %v10072_v25, 1  ;;  %v10080_v62 = vrot.slane %v10079_v49, 1  ;;  %v10086_v35 = vmax.f32 %v10084_v27, %v10085_v18  ;;  %v10013_v63 = vrot.slane %v10012_v30, 4 }
 0x767   : > { %v10067_v2 = vmax.f32 %v10065_v51, %v10066_v44  ;;  %v10007_v39 = vmax.f32 %v10005_v58, %v10006_v16  ;;  %v10020_v40 = vrot.slane %v10019_v33, 4  ;;  %v10026_v21 = vsel %vm7718_vm11, %v9630_v11, -inf }
 0x768   : > { %v10074_v17 = vmax.f32 %v10072_v25, %v10073_v41  ;;  %v10081_v52 = vmax.f32 %v10079_v49, %v10080_v62  ;;  %v10087_v31 = vrot.slane %v10086_v35, 1  ;;  %v10014_v42 = vmax.f32 %v10012_v30, %v10013_v63  ;;  %v11291_v63 = vld [vmem:[%s15558_s7] sm:$0xff]  }
 0x769   : > { %v10401_v6 = vsel %vm6144_vm14, %v10067_v2, %v10400_v57  ;;  %v10008_v38 = vrot.slane %v10007_v39, 2  ;;  %v10021_v45 = vmax.f32 %v10019_v33, %v10020_v40  ;;  %v10027_v24 = vrot.slane %v10026_v21, 4 }
 0x76a   : > { %v10392_v22 = vsel %vm6140_vm12, %v9997_v5, %v10391_v26  ;;  %v10088_v1 = vmax.f32 %v10086_v35, %v10087_v31  ;;  %v10402_v55 = vsel %vm6146_vm15, %v10074_v17, %v10401_v6  ;;  %v10015_v8 = vrot.slane %v10014_v42, 2 }
 0x76b   : > { %v10403_v19 = vsel %vm6148_vm1, %v10081_v52, %v10402_v55  ;;  %v10009_v43 = vmax.f32 %v10007_v39, %v10008_v38  ;;  %v10022_v10 = vrot.slane %v10021_v45, 2  ;;  %v10028_v0 = vmax.f32 %v10026_v21, %v10027_v24 }
 0x76c   : > { %v10016_v48 = vmax.f32 %v10014_v42, %v10015_v8  ;;  %v10404_v23 = vsel %vm6150_vm5, %v10088_v1, %v10403_v19  ;;  %v10393_v54 = vsel %vm6142_vm13, %v10004_v61, %v10392_v22  ;;  %v11381_v40 = vmov 0.0   ;;  %v11292_v42 = vld [vmem:[%s15558_s7 + $0x8] sm:$0xff]  }
 0x76d   : > { %v10010_v46 = vrot.slane %v10009_v43, 1  ;;  %v10023_v4 = vmax.f32 %v10021_v45, %v10022_v10  ;;  %v10029_v9 = vrot.slane %v10028_v0, 2  ;;  %v10457_v32 = vcombine.low %v15255_v60, %v10404_v23  ;;  %11196 = vmatprep.subr.bf16.mxu1 %v11381_v40  ;;  %11212 = vmatprep.mubr.msk.bf16.mxu1 %vm11383_vm2, %v11381_v40 }
 0x76e   : > { %v10017_v14 = vrot.slane %v10016_v48, 1  ;;  %v10458_v47 = vcombine.high %v15255_v60, %v10404_v23  ;;  %11197 = vmatpush3.bf16.msra.mxu1 %v11291_v63 }
 0x76f   : > { %v10011_v5 = vmax.f32 %v10009_v43, %v10010_v46  ;;  %v10024_v50 = vrot.slane %v10023_v4, 1  ;;  %v10030_v12 = vmax.f32 %v10028_v0, %v10029_v9  ;;  %v15310_v61 = vrot.slane %v10457_v32, %v12402_v13  ;;  %11198 = vmatprep.subr.bf16.mxu1 %v11381_v40  ;;  %v11293_v9 = vld [vmem:[%s15558_s7 + $0x10] sm:$0xff]  }
 0x770   : > { %v10018_v28 = vmax.f32 %v10016_v48, %v10017_v14  ;;  %v15314_v27 = vrot.slane %v10458_v47, %v12402_v13 }
 0x771   : > { %v10025_v29 = vmax.f32 %v10023_v4, %v10024_v50  ;;  %v10031_v59 = vrot.slane %v10030_v12, 1  ;;  %v10394_v15 = vsel %vm6144_vm14, %v10011_v5, %v10393_v54 }
 0x772   : > { %v10395_v26 = vsel %vm6146_vm15, %v10018_v28, %v10394_v15  ;;  %11199 = vmatpush3.bf16.msra.mxu1 %v11292_v42 }
 0x773   : > { %v10032_v7 = vmax.f32 %v10030_v12, %v10031_v59  ;;  %v10396_v56 = vsel %vm6148_vm1, %v10025_v29, %v10395_v26  ;;  %11200 = vmatprep.subr.bf16.mxu1 %v11381_v40 }
 0x775   : > { %v10397_v20 = vsel %vm6150_vm5, %v10032_v7, %v10396_v56 }
 0x776   : > { %v10441_v34 = vcombine.low %v15262_v37, %v10397_v20  ;;  %v10442_v60 = vcombine.high %v15262_v37, %v10397_v20  ;;  %11201 = vmatpush3.bf16.msra.mxu1 %v11293_v9 }
 0x777   : > { %11202 = vmatprep.subr.bf16.mxu1 %v11381_v40 }
 0x778   : > { %v15317_v3 = vrot.slane %v10441_v34, %v12402_v13  ;;  %v15320_v51 = vrot.slane %v10442_v60, %v12402_v13  ;;  %v11294_v60 = vld [vmem:[%s15558_s7 + $0x18] sm:$0xff]  }
 0x77a   : > { %v10506_v57 = vcombine.high %v15317_v3, %v15310_v61  ;;  %v10505_v36 = vcombine.low %v15317_v3, %v15310_v61  ;;  %v10521_v58 = vcombine.low %v15320_v51, %v15314_v27  ;;  %v10522_v37 = vcombine.high %v15320_v51, %v15314_v27  ;;  %11203 = vmatpush3.bf16.msra.mxu1 %v11294_v60 }
 0x77b   : > { %11204 = vmatprep.subr.bf16.mxu1 %v11381_v40 }
 0x797   : > { %v11190_v25 = vpop.f32.mrb[44].mxu1 }
 0x798   : > { %v9475_v49 = vadd.f32 %v11190_v25, %v15213_v53  ;;  %v9466_v18 = vpop.f32.mrb[45].mxu1 }
 0x799   : > { %v9467_v11 = vadd.f32 %v15213_v53, %v9466_v18  ;;  %v11191_v44 = vpop.f32.mrb[46].mxu1 }
 0x79a   : > { %v9507_v16 = vmax.f32 %v9475_v49, 0.0  ;;  %v9478_v30 = vadd.f32 %v11191_v44, %v15213_v53  ;;  %v15333_v33 = vpop.f32.mrb[47].mxu1 }
 0x79b   : > { %v9505_v41 = vmax.f32 %v9467_v11, 0.0 }
 0x79c   : > { %v9699_v62 = vcombine.high %v9507_v16, %v9507_v16  ;;  %v9706_v35 = vrot.slane %v9507_v16, %v12402_v13  ;;  %v15343_v31 = vmax.f32 %v9478_v30, 0.0 }
 0x79d   : > { %v9665_v2 = vcombine.high %v9505_v41, %v9505_v41  ;;  %v9672_v39 = vrot.slane %v9505_v41, %v12402_v13 }
 0x79e   : > { %v9713_v21 = vrot.slane %v9699_v62, %v12402_v13  ;;  %v9714_v17 = vcombine.high %v9706_v35, %v9706_v35  ;;  %v10145_v52 = vsel %vm7718_vm11, %v9706_v35, -inf  ;;  %v9716_v41 = vcombine.high %v15343_v31, %v15343_v31 }
 0x79f   : > { %v10146_v6 = vrot.slane %v10145_v52, 4  ;;  %v9679_v38 = vrot.slane %v9665_v2, %v12402_v13  ;;  %v9680_v45 = vcombine.high %v9672_v39, %v9672_v39  ;;  %v10089_v24 = vsel %vm7718_vm11, %v9672_v39, -inf }
 0x7a0   : > { %v9715_v22 = vcombine.high %v9713_v21, %v9713_v21  ;;  %v10152_v1 = vsel %vm7718_vm11, %v9714_v17, -inf  ;;  %v10159_v55 = vsel %vm7718_vm11, %v9713_v21, -inf  ;;  %v10090_v8 = vrot.slane %v10089_v24, 4 }
 0x7a1   : > { %v10147_v19 = vmax.f32 %v10145_v52, %v10146_v6  ;;  %v10153_v43 = vrot.slane %v10152_v1, 4  ;;  %v10160_v10 = vrot.slane %v10159_v55, 4  ;;  %v9681_v0 = vcombine.high %v9679_v38, %v9679_v38  ;;  %v11295_v52 = vld [vmem:[%s15558_s7 + $0x20] sm:$0xff]  }
 0x7a2   : > { %v10166_v48 = vsel %vm7718_vm11, %v9715_v22, -inf  ;;  %v10091_v23 = vmax.f32 %v10089_v24, %v10090_v8  ;;  %v10096_v46 = vsel %vm7718_vm11, %v9680_v45, -inf  ;;  %v10103_v4 = vsel %vm7718_vm11, %v9679_v38, -inf  ;;  %11205 = vmatpush3.bf16.msra.mxu1 %v11295_v52 }
 0x7a3   : > { %v10148_v32 = vrot.slane %v10147_v19, 2  ;;  %v10154_v14 = vmax.f32 %v10152_v1, %v10153_v43  ;;  %v10161_v54 = vmax.f32 %v10159_v55, %v10160_v10  ;;  %v10167_v47 = vrot.slane %v10166_v48, 4  ;;  %11206 = vmatprep.subr.bf16.mxu1 %v11381_v40 }
 0x7a4   : > { %v10092_v5 = vrot.slane %v10091_v23, 2  ;;  %v10097_v50 = vrot.slane %v10096_v46, 4  ;;  %v10104_v12 = vrot.slane %v10103_v4, 4  ;;  %v10110_v28 = vsel %vm7718_vm11, %v9681_v0, -inf }
 0x7a5   : > { %v10149_v29 = vmax.f32 %v10147_v19, %v10148_v32  ;;  %v10155_v59 = vrot.slane %v10154_v14, 2  ;;  %v10162_v15 = vrot.slane %v10161_v54, 2  ;;  %v10168_v26 = vmax.f32 %v10166_v48, %v10167_v47 }
 0x7a6   : > { %v10093_v7 = vmax.f32 %v10091_v23, %v10092_v5  ;;  %v10098_v56 = vmax.f32 %v10096_v46, %v10097_v50  ;;  %v10105_v20 = vmax.f32 %v10103_v4, %v10104_v12  ;;  %v10111_v34 = vrot.slane %v10110_v28, 4 }
 0x7a7   : > { %v10150_v25 = vrot.slane %v10149_v29, 1  ;;  %v10156_v49 = vmax.f32 %v10154_v14, %v10155_v59  ;;  %v10163_v18 = vmax.f32 %v10161_v54, %v10162_v15  ;;  %v10169_v11 = vrot.slane %v10168_v26, 2 }
 0x7a8   : > { %v10099_v44 = vrot.slane %v10098_v56, 2  ;;  %v10106_v16 = vrot.slane %v10105_v20, 2  ;;  %v10112_v30 = vmax.f32 %v10110_v28, %v10111_v34  ;;  %v9470_v17 = vadd.f32 %v15213_v53, %v15333_v33 }
 0x7a9   : > { %v10157_v62 = vrot.slane %v10156_v49, 1  ;;  %v10164_v35 = vrot.slane %v10163_v18, 1  ;;  %v10170_v63 = vmax.f32 %v10168_v26, %v10169_v11  ;;  %v10151_v42 = vmax.f32 %v10149_v29, %v10150_v25 }
 0x7aa   : > { %v10100_v2 = vmax.f32 %v10098_v56, %v10099_v44  ;;  %v10107_v39 = vmax.f32 %v10105_v20, %v10106_v16  ;;  %v10113_v21 = vrot.slane %v10112_v30, 2  ;;  %v10094_v38 = vrot.slane %v10093_v7, 1 }
 0x7ab   : > { %v10158_v6 = vmax.f32 %v10156_v49, %v10157_v62  ;;  %v9723_v45 = vrot.slane %v15343_v31, %v12402_v13  ;;  %v10171_v24 = vrot.slane %v10170_v63, 1  ;;  %v9730_v55 = vrot.slane %v9716_v41, %v12402_v13 }
 0x7ac   : > { %v10101_v22 = vrot.slane %v10100_v2, 1  ;;  %v10114_v1 = vmax.f32 %v10112_v30, %v10113_v21  ;;  %v10165_v8 = vmax.f32 %v10163_v18, %v10164_v35  ;;  %v10108_v33 = vrot.slane %v10107_v39, 1 }
 0x7ad   : > { %v9731_v19 = vcombine.high %v9723_v45, %v9723_v45  ;;  %v10173_v43 = vsel %vm7718_vm11, %v9723_v45, -inf  ;;  %v10412_v10 = vsel %vm6152_vm4, %v10158_v6, %v10151_v42  ;;  %v9506_v23 = vmax.f32 %v9470_v17, 0.0 }
 0x7ae   : > { %v10102_v0 = vmax.f32 %v10100_v2, %v10101_v22  ;;  %v10115_v48 = vrot.slane %v10114_v1, 1  ;;  %v9732_v46 = vcombine.high %v9730_v55, %v9730_v55  ;;  %v10174_v31 = vrot.slane %v10173_v43, 4 }
 0x7af   : > { %v10180_v4 = vsel %vm7718_vm11, %v9731_v19, -inf  ;;  %v10187_v9 = vsel %vm7718_vm11, %v9730_v55, -inf  ;;  %v10172_v32 = vmax.f32 %v10170_v63, %v10171_v24  ;;  %v10095_v14 = vmax.f32 %v10093_v7, %v10094_v38 }
 0x7b0   : > { %v10181_v54 = vrot.slane %v10180_v4, 4  ;;  %v10188_v47 = vrot.slane %v10187_v9, 4  ;;  %v10413_v5 = vsel %vm6140_vm12, %v10165_v8, %v10412_v10  ;;  %v10109_v50 = vmax.f32 %v10107_v39, %v10108_v33 }
 0x7b1   : > { %v10175_v12 = vmax.f32 %v10173_v43, %v10174_v31  ;;  %v10194_v28 = vsel %vm7718_vm11, %v9732_v46, -inf  ;;  %v9682_v26 = vcombine.high %v9506_v23, %v9506_v23  ;;  %v10116_v56 = vmax.f32 %v10114_v1, %v10115_v48 }
 0x7b2   : > { %v10182_v29 = vmax.f32 %v10180_v4, %v10181_v54  ;;  %v10189_v59 = vmax.f32 %v10187_v9, %v10188_v47  ;;  %v10195_v15 = vrot.slane %v10194_v28, 4  ;;  %v10405_v20 = vsel %vm6152_vm4, %v10102_v0, %v10095_v14 }
 0x7b3   : > { %v10176_v34 = vrot.slane %v10175_v12, 2  ;;  %v9689_v60 = vrot.slane %v9506_v23, %v12402_v13  ;;  %v9696_v18 = vrot.slane %v9682_v26, %v12402_v13  ;;  %v10414_v44 = vsel %vm6142_vm13, %v10172_v32, %v10413_v5 }
 0x7b4   : > { %v10183_v25 = vrot.slane %v10182_v29, 2  ;;  %v10190_v7 = vrot.slane %v10189_v59, 2  ;;  %v10196_v49 = vmax.f32 %v10194_v28, %v10195_v15  ;;  %v10406_v23 = vsel %vm6140_vm12, %v10109_v50, %v10405_v20 }
 0x7b5   : > { %v10177_v11 = vmax.f32 %v10175_v12, %v10176_v34  ;;  %v9697_v16 = vcombine.high %v9689_v60, %v9689_v60  ;;  %v10117_v30 = vsel %vm7718_vm11, %v9689_v60, -inf  ;;  %v9698_v63 = vcombine.high %v9696_v18, %v9696_v18 }
 0x7b6   : > { %v10184_v41 = vmax.f32 %v10182_v29, %v10183_v25  ;;  %v10191_v62 = vmax.f32 %v10189_v59, %v10190_v7  ;;  %v10197_v35 = vrot.slane %v10196_v49, 2  ;;  %v10118_v39 = vrot.slane %v10117_v30, 4 }
 0x7b7   : > { %v10178_v2 = vrot.slane %v10177_v11, 1  ;;  %v10124_v21 = vsel %vm7718_vm11, %v9697_v16, -inf  ;;  %v10131_v17 = vsel %vm7718_vm11, %v9696_v18, -inf  ;;  %v10138_v1 = vsel %vm7718_vm11, %v9698_v63, -inf }
 0x7b8   : > { %v10185_v52 = vrot.slane %v10184_v41, 1  ;;  %v10192_v42 = vrot.slane %v10191_v62, 1  ;;  %v10198_v6 = vmax.f32 %v10196_v49, %v10197_v35  ;;  %v10125_v38 = vrot.slane %v10124_v21, 4 }
 0x7b9   : > { %v10179_v45 = vmax.f32 %v10177_v11, %v10178_v2  ;;  %v10119_v24 = vmax.f32 %v10117_v30, %v10118_v39  ;;  %v10132_v22 = vrot.slane %v10131_v17, 4  ;;  %v10139_v48 = vrot.slane %v10138_v1, 4 }
 0x7ba   : > { %v10186_v55 = vmax.f32 %v10184_v41, %v10185_v52  ;;  %v10193_v8 = vmax.f32 %v10191_v62, %v10192_v42  ;;  %v10199_v33 = vrot.slane %v10198_v6, 1  ;;  %v10126_v19 = vmax.f32 %v10124_v21, %v10125_v38  ;;  %v11310_v41 = vld [vmem:[%s15557_s6] ss:$0 sm:$0xff] }
 0x7bb   : > { %v10415_v43 = vsel %vm6144_vm14, %v10179_v45, %v10414_v44  ;;  %v10120_v10 = vrot.slane %v10119_v24, 2  ;;  %v10133_v0 = vmax.f32 %v10131_v17, %v10132_v22  ;;  %v10140_v54 = vmax.f32 %v10138_v1, %v10139_v48 }
 0x7bc   : > { %v10200_v46 = vmax.f32 %v10198_v6, %v10199_v33  ;;  %v10416_v31 = vsel %vm6146_vm15, %v10186_v55, %v10415_v43  ;;  %v10127_v4 = vrot.slane %v10126_v19, 2  ;;  %v10407_v15 = vsel %vm6142_vm13, %v10116_v56, %v10406_v23 }
 0x7bd   : > { %v10417_v9 = vsel %vm6148_vm1, %v10193_v8, %v10416_v31  ;;  %v10121_v32 = vmax.f32 %v10119_v24, %v10120_v10  ;;  %v10134_v14 = vrot.slane %v10133_v0, 2  ;;  %v10141_v29 = vrot.slane %v10140_v54, 2 }
 0x7be   : > { %v10128_v47 = vmax.f32 %v10126_v19, %v10127_v4  ;;  %v15396_v5 = vsel %vm6150_vm5, %v10200_v46, %v10417_v9 }
 0x7bf   : > { %v10122_v12 = vrot.slane %v10121_v32, 1  ;;  %v10135_v28 = vmax.f32 %v10133_v0, %v10134_v14  ;;  %v10142_v20 = vmax.f32 %v10140_v54, %v10141_v29 }
 0x7c0   : > { %v10129_v59 = vrot.slane %v10128_v47, 1 }
 0x7c1   : > { %v10123_v50 = vmax.f32 %v10121_v32, %v10122_v12  ;;  %v10136_v26 = vrot.slane %v10135_v28, 1  ;;  %v10143_v25 = vrot.slane %v10142_v20, 1 }
 0x7c2   : > { %v10130_v34 = vmax.f32 %v10128_v47, %v10129_v59 }
 0x7c3   : > { %v10137_v60 = vmax.f32 %v10135_v28, %v10136_v26  ;;  %v10408_v7 = vsel %vm6144_vm14, %v10123_v50, %v10407_v15  ;;  %v10144_v18 = vmax.f32 %v10142_v20, %v10143_v25 }
 0x7c4   : > { %v10409_v49 = vsel %vm6146_vm15, %v10130_v34, %v10408_v7 }
 0x7c5   : > { %v10410_v11 = vsel %vm6148_vm1, %v10137_v60, %v10409_v49 }
 0x7c6   : > { %v15403_v44 = vsel %vm6150_vm5, %v10144_v18, %v10410_v11 }
 0x7d5   : > { %v11194_v16 = vpop.f32.mrb[48].mxu1 }
 0x7d6   : > { %v9491_v30 = vadd.f32 %v11194_v16, %v15213_v53  ;;  %v9482_v56 = vpop.f32.mrb[49].mxu1 }
 0x7d7   : > { %v9483_v62 = vadd.f32 %v11310_v41, %v9482_v56  ;;  %v11195_v35 = vpop.f32.mrb[50].mxu1 }
 0x7d8   : > { %v9511_v63 = vmax.f32 %v9491_v30, 0.0  ;;  %v9494_v2 = vadd.f32 %v11310_v41, %v11195_v35  ;;  %v9485_v39 = vpop.f32.mrb[51].mxu1 }
 0x7d9   : > { %v9509_v21 = vmax.f32 %v9483_v62, 0.0 }
 0x7da   : > { %v9767_v17 = vcombine.high %v9511_v63, %v9511_v63  ;;  %v9774_v52 = vrot.slane %v9511_v63, %v12402_v13  ;;  %v9512_v24 = vmax.f32 %v9494_v2, 0.0 }
 0x7db   : > { %v9733_v42 = vcombine.high %v9509_v21, %v9509_v21  ;;  %v9740_v6 = vrot.slane %v9509_v21, %v12402_v13 }
 0x7dc   : > { %v9781_v38 = vrot.slane %v9767_v17, %v12402_v13  ;;  %v9782_v53 = vcombine.high %v9774_v52, %v9774_v52  ;;  %v10257_v45 = vsel %vm7718_vm11, %v9774_v52, -inf  ;;  %v9784_v63 = vcombine.high %v9512_v24, %v9512_v24 }
 0x7dd   : > { %v10258_v22 = vrot.slane %v10257_v45, 4  ;;  %v9747_v1 = vrot.slane %v9733_v42, %v12402_v13  ;;  %v9748_v55 = vcombine.high %v9740_v6, %v9740_v6  ;;  %v10201_v8 = vsel %vm7718_vm11, %v9740_v6, -inf }
 0x7de   : > { %v9783_v33 = vcombine.high %v9781_v38, %v9781_v38  ;;  %v10264_v19 = vsel %vm7718_vm11, %v9782_v53, -inf  ;;  %v10271_v43 = vsel %vm7718_vm11, %v9781_v38, -inf  ;;  %v10202_v10 = vrot.slane %v10201_v8, 4 }
 0x7df   : > { %v10259_v0 = vmax.f32 %v10257_v45, %v10258_v22  ;;  %v10265_v48 = vrot.slane %v10264_v19, 4  ;;  %v10272_v23 = vrot.slane %v10271_v43, 4  ;;  %v9749_v46 = vcombine.high %v9747_v1, %v9747_v1 }
 0x7e0   : > { %v10278_v31 = vsel %vm7718_vm11, %v9783_v33, -inf  ;;  %v10203_v4 = vmax.f32 %v10201_v8, %v10202_v10  ;;  %v10208_v9 = vsel %vm7718_vm11, %v9748_v55, -inf  ;;  %v10215_v32 = vsel %vm7718_vm11, %v9747_v1, -inf }
 0x7e1   : > { %v10260_v14 = vrot.slane %v10259_v0, 2  ;;  %v10266_v54 = vmax.f32 %v10264_v19, %v10265_v48  ;;  %v10273_v47 = vmax.f32 %v10271_v43, %v10272_v23  ;;  %v10279_v12 = vrot.slane %v10278_v31, 4 }
 0x7e2   : > { %v10204_v28 = vrot.slane %v10203_v4, 2  ;;  %v10209_v29 = vrot.slane %v10208_v9, 4  ;;  %v10216_v59 = vrot.slane %v10215_v32, 4  ;;  %v10222_v15 = vsel %vm7718_vm11, %v9749_v46, -inf }
 0x7e3   : > { %v10261_v50 = vmax.f32 %v10259_v0, %v10260_v14  ;;  %v10267_v26 = vrot.slane %v10266_v54, 2  ;;  %v10274_v20 = vrot.slane %v10273_v47, 2  ;;  %v10280_v34 = vmax.f32 %v10278_v31, %v10279_v12 }
 0x7e4   : > { %v10205_v60 = vmax.f32 %v10203_v4, %v10204_v28  ;;  %v10210_v25 = vmax.f32 %v10208_v9, %v10209_v29  ;;  %v10217_v7 = vmax.f32 %v10215_v32, %v10216_v59  ;;  %v10223_v49 = vrot.slane %v10222_v15, 4 }
 0x7e5   : > { %v10262_v18 = vrot.slane %v10261_v50, 1  ;;  %v10268_v11 = vmax.f32 %v10266_v54, %v10267_v26  ;;  %v10275_v16 = vmax.f32 %v10273_v47, %v10274_v20  ;;  %v10281_v30 = vrot.slane %v10280_v34, 2 }
 0x7e6   : > { %v10211_v56 = vrot.slane %v10210_v25, 2  ;;  %v10218_v62 = vrot.slane %v10217_v7, 2  ;;  %v10224_v35 = vmax.f32 %v10222_v15, %v10223_v49  ;;  %v9486_v38 = vadd.f32 %v11310_v41, %v9485_v39 }
 0x7e7   : > { %v10269_v2 = vrot.slane %v10268_v11, 1  ;;  %v10276_v21 = vrot.slane %v10275_v16, 1  ;;  %v10282_v17 = vmax.f32 %v10280_v34, %v10281_v30  ;;  %v10263_v53 = vmax.f32 %v10261_v50, %v10262_v18 }
 0x7e8   : > { %v10212_v52 = vmax.f32 %v10210_v25, %v10211_v56  ;;  %v10219_v42 = vmax.f32 %v10217_v7, %v10218_v62  ;;  %v10225_v6 = vrot.slane %v10224_v35, 2  ;;  %v10206_v22 = vrot.slane %v10205_v60, 1 }
 0x7e9   : > { %v10270_v45 = vmax.f32 %v10268_v11, %v10269_v2  ;;  %v9791_v1 = vrot.slane %v9512_v24, %v12402_v13  ;;  %v10283_v55 = vrot.slane %v10282_v17, 1  ;;  %v9798_v19 = vrot.slane %v9784_v63, %v12402_v13 }
 0x7ea   : > { %v10213_v8 = vrot.slane %v10212_v52, 1  ;;  %v10226_v33 = vmax.f32 %v10224_v35, %v10225_v6  ;;  %v10277_v43 = vmax.f32 %v10275_v16, %v10276_v21  ;;  %v10220_v10 = vrot.slane %v10219_v42, 1 }
 0x7eb   : > { %v9799_v0 = vcombine.high %v9791_v1, %v9791_v1  ;;  %v10285_v48 = vsel %vm7718_vm11, %v9791_v1, -inf  ;;  %v10426_v23 = vsel %vm6152_vm4, %v10270_v45, %v10263_v53  ;;  %v9510_v41 = vmax.f32 %v9486_v38, 0.0 }
 0x7ec   : > { %v10214_v46 = vmax.f32 %v10212_v52, %v10213_v8  ;;  %v10227_v31 = vrot.slane %v10226_v33, 1  ;;  %v9800_v39 = vcombine.high %v9798_v19, %v9798_v19  ;;  %v10286_v4 = vrot.slane %v10285_v48, 4 }
 0x7ed   : > { %v10292_v9 = vsel %vm7718_vm11, %v9799_v0, -inf  ;;  %v10299_v24 = vsel %vm7718_vm11, %v9798_v19, -inf  ;;  %v10284_v32 = vmax.f32 %v10282_v17, %v10283_v55  ;;  %v10207_v14 = vmax.f32 %v10205_v60, %v10206_v22 }
 0x7ee   : > { %v10293_v54 = vrot.slane %v10292_v9, 4  ;;  %v10300_v47 = vrot.slane %v10299_v24, 4  ;;  %v10427_v12 = vsel %vm6140_vm12, %v10277_v43, %v10426_v23  ;;  %v10221_v28 = vmax.f32 %v10219_v42, %v10220_v10 }
 0x7ef   : > { %v10287_v29 = vmax.f32 %v10285_v48, %v10286_v4  ;;  %v10306_v59 = vsel %vm7718_vm11, %v9800_v39, -inf  ;;  %v9750_v20 = vcombine.high %v9510_v41, %v9510_v41  ;;  %v10228_v34 = vmax.f32 %v10226_v33, %v10227_v31 }
 0x7f0   : > { %v10294_v15 = vmax.f32 %v10292_v9, %v10293_v54  ;;  %v10301_v50 = vmax.f32 %v10299_v24, %v10300_v47  ;;  %v10307_v26 = vrot.slane %v10306_v59, 4  ;;  %v10419_v25 = vsel %vm6152_vm4, %v10214_v46, %v10207_v14 }
 0x7f1   : > { %v10288_v7 = vrot.slane %v10287_v29, 2  ;;  %v9757_v49 = vrot.slane %v9510_v41, %v12402_v13  ;;  %v9764_v16 = vrot.slane %v9750_v20, %v12402_v13  ;;  %v10428_v56 = vsel %vm6142_vm13, %v10284_v32, %v10427_v12 }
 0x7f2   : > { %v10295_v18 = vrot.slane %v10294_v15, 2  ;;  %v10302_v60 = vrot.slane %v10301_v50, 2  ;;  %v10308_v11 = vmax.f32 %v10306_v59, %v10307_v26  ;;  %v10420_v39 = vsel %vm6140_vm12, %v10221_v28, %v10419_v25 }
 0x7f3   : > { %v10289_v30 = vmax.f32 %v10287_v29, %v10288_v7  ;;  %v9765_v62 = vcombine.high %v9757_v49, %v9757_v49  ;;  %v10229_v35 = vsel %vm7718_vm11, %v9757_v49, -inf  ;;  %v9766_v17 = vcombine.high %v9764_v16, %v9764_v16 }
 0x7f4   : > { %v10296_v63 = vmax.f32 %v10294_v15, %v10295_v18  ;;  %v10303_v2 = vmax.f32 %v10301_v50, %v10302_v60  ;;  %v10309_v21 = vrot.slane %v10308_v11, 2  ;;  %v10230_v42 = vrot.slane %v10229_v35, 4 }
 0x7f5   : > { %v10290_v52 = vrot.slane %v10289_v30, 1  ;;  %v10236_v6 = vsel %vm7718_vm11, %v9765_v62, -inf  ;;  %v10243_v38 = vsel %vm7718_vm11, %v9764_v16, -inf  ;;  %v10250_v19 = vsel %vm7718_vm11, %v9766_v17, -inf }
 0x7f6   : > { %v10297_v53 = vrot.slane %v10296_v63, 1  ;;  %v10304_v45 = vrot.slane %v10303_v2, 1  ;;  %v10310_v22 = vmax.f32 %v10308_v11, %v10309_v21  ;;  %v10237_v1 = vrot.slane %v10236_v6, 4 }
 0x7f7   : > { %v10291_v55 = vmax.f32 %v10289_v30, %v10290_v52  ;;  %v10231_v8 = vmax.f32 %v10229_v35, %v10230_v42  ;;  %v10244_v33 = vrot.slane %v10243_v38, 4  ;;  %v10251_v41 = vrot.slane %v10250_v19, 4 }
 0x7f8   : > { %v10298_v43 = vmax.f32 %v10296_v63, %v10297_v53  ;;  %v10305_v10 = vmax.f32 %v10303_v2, %v10304_v45  ;;  %v10311_v0 = vrot.slane %v10310_v22, 1  ;;  %v10238_v48 = vmax.f32 %v10236_v6, %v10237_v1  ;;  %v11297_v45 = vld [vmem:[%s15558_s7 + $0x30] sm:$0xff]  }
 0x7f9   : > { %v10429_v23 = vsel %vm6144_vm14, %v10291_v55, %v10428_v56  ;;  %v10232_v46 = vrot.slane %v10231_v8, 2  ;;  %v10245_v31 = vmax.f32 %v10243_v38, %v10244_v33  ;;  %v10252_v47 = vmax.f32 %v10250_v19, %v10251_v41  ;;  %v15651_v38 = vld [vmem:[#allocation5_spill] sm:$0xff] }
 0x7fa   : > { %v10312_v4 = vmax.f32 %v10310_v22, %v10311_v0  ;;  %v10430_v9 = vsel %vm6146_vm15, %v10298_v43, %v10429_v23  ;;  %v10239_v24 = vrot.slane %v10238_v48, 2  ;;  %v10421_v28 = vsel %vm6142_vm13, %v10228_v34, %v10420_v39 }
 0x7fb   : > { %v10431_v32 = vsel %vm6148_vm1, %v10305_v10, %v10430_v9  ;;  %v10233_v14 = vmax.f32 %v10231_v8, %v10232_v46  ;;  %v10246_v54 = vrot.slane %v10245_v31, 2  ;;  %v10253_v50 = vrot.slane %v10252_v47, 2 }
 0x7fc   : > { %v10240_v12 = vmax.f32 %v10238_v48, %v10239_v24  ;;  %v10432_v29 = vsel %vm6150_vm5, %v10312_v4, %v10431_v32  ;;  %v11382_v60 = vmov 1934713408   ;;  %vm10610_vm12 = vcmask 654336  }
 0x7fd   : > { %v10234_v59 = vrot.slane %v10233_v14, 1  ;;  %v10247_v15 = vmax.f32 %v10245_v31, %v10246_v54  ;;  %v10489_v26 = vcombine.low %v15396_v5, %v10432_v29  ;;  %v10490_v25 = vcombine.high %v15396_v5, %v10432_v29  ;;  %v11296_v5 = vld [vmem:[%s15558_s7 + $0x28] sm:$0xff]  }
 0x7fe   : > { %v10241_v20 = vrot.slane %v10240_v12, 1  ;;  %v10254_v18 = vmax.f32 %v10252_v47, %v10253_v50  ;;  %v10508_v11 = vunpack.c.l.s4 %v11382_v60  ;;  %11207 = vmatpush3.bf16.msra.mxu1 %v11296_v5  ;;  %vm10612_vm13 = vcmask 785408  }
 0x7ff   : > { %v10235_v7 = vmax.f32 %v10233_v14, %v10234_v59  ;;  %v10248_v49 = vrot.slane %v10247_v15, 1  ;;  %v10497_v52 = vrot.slane %v10489_v26, %v12402_v13  ;;  %v10504_v6 = vrot.slane %v10490_v25, %v12402_v13  ;;  %11208 = vmatprep.subr.bf16.mxu1 %v11381_v40  ;;  %v11299_v26 = vld [vmem:[%s15560_s9] sm:$0xff]  }
 0x800   : > { %v10242_v16 = vmax.f32 %v10240_v12, %v10241_v20  ;;  %v10255_v56 = vrot.slane %v10254_v18, 1  ;;  %v10509_v21 = vunpack.c.0.s8 %v10508_v11  ;;  %v10961_v25 = vld [vmem:[%s15559_s8] ss:$0 sm:$0xff] }
 0x801   : > { %v10249_v30 = vmax.f32 %v10247_v15, %v10248_v49  ;;  %v10422_v62 = vsel %vm6144_vm14, %v10235_v7, %v10421_v28  ;;  %vm10614_vm14 = vcmask 916480   ;;  %v11300_v28 = vld [vmem:[%s15560_s9 + $0x8] sm:$0xff]  }
 0x802   : > { %v10423_v35 = vsel %vm6146_vm15, %v10242_v16, %v10422_v62  ;;  %v10256_v63 = vmax.f32 %v10254_v18, %v10255_v56  ;;  %v10512_v53 = vsub.s32 %v10509_v21, %v15651_v38  ;;  %11209 = vmatpush3.bf16.msra.mxu1 %v11297_v45 }
 0x803   : > { %v10424_v2 = vsel %vm6148_vm1, %v10249_v30, %v10423_v35  ;;  %11210 = vmatprep.subr.bf16.mxu1 %v11381_v40 }
 0x804   : > { %v10425_v34 = vsel %vm6150_vm5, %v10256_v63, %v10424_v2  ;;  %v10513_v43 = vrot.slane %v10505_v36, %v10512_v53  ;;  %v10529_v10 = vrot.slane %v10521_v58, %v10512_v53 }
 0x805   : > { %v10473_v17 = vcombine.low %v15403_v44, %v10425_v34  ;;  %v10474_v42 = vcombine.high %v15403_v44, %v10425_v34  ;;  %v10520_v44 = vrot.slane %v10506_v57, %v10512_v53  ;;  %v10536_v57 = vrot.slane %v10522_v37, %v10512_v53 }
 0x807   : > { %v10481_v22 = vrot.slane %v10473_v17, %v12402_v13  ;;  %v10488_v1 = vrot.slane %v10474_v42, %v12402_v13  ;;  %v11298_v13 = vld [vmem:[%s15558_s7 + $0x38] sm:$0xff]  }
 0x808   : > { %11211 = vmatpush3.bf16.msra.mxu1 %v11298_v13 }
 0x809   : > { %v10538_v55 = vcombine.high %v10481_v22, %v10497_v52  ;;  %v10537_v8 = vcombine.low %v10481_v22, %v10497_v52  ;;  %v10553_v33 = vcombine.low %v10488_v1, %v10504_v6  ;;  %v10554_v19 = vcombine.high %v10488_v1, %v10504_v6  ;;  %11216 = vmatprep.subr.bf16.mxu1 %v11381_v40 }
 0x80b   : > { %v10552_v0 = vrot.slane %v10538_v55, %v10512_v53  ;;  %v10545_v48 = vrot.slane %v10537_v8, %v10512_v53  ;;  %v10561_v23 = vrot.slane %v10553_v33, %v10512_v53  ;;  %v10568_v46 = vrot.slane %v10554_v19, %v10512_v53 }
 0x80d   : > { %v10571_v31 = vcombine.low %v10520_v44, %v10552_v0  ;;  %v10570_v61 = vcombine.high %v10513_v43, %v10545_v48  ;;  %v10573_v3 = vcombine.low %v10529_v10, %v10561_v23  ;;  %v10572_v36 = vcombine.high %v10520_v44, %v10552_v0 }
 0x80e   : > { %v10575_v58 = vcombine.low %v10536_v57, %v10568_v46  ;;  %v10574_v41 = vcombine.high %v10529_v10, %v10561_v23  ;;  %v10576_v39 = vcombine.high %v10536_v57, %v10568_v46  ;;  %v10569_v4 = vcombine.low %v10513_v43, %v10545_v48 }
 0x80f   : > { %10582 = vrot.lane.b32.xlu1 %v10571_v31, %s11380_s16  ;;  %10578 = vrot.lane.b32.xlu0 %v10570_v61, %s11375_s15  ;;  %s10975_s15 = sshll.u32 %s11471_s21, 7  ;;  %s11389_s21 = smov [#allocation2]  }
 0x813   : > { %10590 = vrot.lane.b32.xlu1 %v10573_v3, %s11384_s13  ;;  %10586 = vrot.lane.b32.xlu0 %v10572_v36, %s11385_s14  ;;  %s15508_s13 = scalar_lea.hbm %s15562_s11, %s10975_s15 }
 0x817   : > { %10598 = vrot.lane.b32.xlu1 %v10575_v58, %s11386_s22  ;;  %10594 = vrot.lane.b32.xlu0 %v10574_v41, %s11387_s24  ;;  %s380_s24 = sand.u32 1, %s11365_s18  }
 0x818   : > { %s10799_s14 = scalar_lea.sflag [#allocation3], %s380_s24 }
 0x81b   : > { %10602 = vrot.lane.b32.xlu0 %v10576_v39, %s11388_s25  ;;  %s10875_s25 = sshll.u32 %s380_s24, 3 }
 0x81c   : > { %s382_s16 = scalar_lea.vmem [#allocation2], %s10875_s25  ;;  %s11315_s25 = sshll.u32 %s11389_s21, 4  ;;  %s11316_s25 = int_to_ptr.vmem [resolvable:$false] %s11315_s25 }
 0x81d   : > { %s10812_s29 = sshll.u32 %s382_s16, 4  ;;  %s11317_s30 = scalar_lea.vmem %s11316_s25, 256  ;;  %s15510_s29 = int_to_ptr.vmem [resolvable:$true] %s10812_s29 }
 0x81e   : > { %s11311_s22 = scalar_lea.vmem %s15510_s29, 128  ;;  %p11318_p0 = scmp.lt.s32.totalorder %s15510_s29, %s11316_s25 }
 0x81f   : > { %p11312_p11 = scmp.ne.s32.totalorder %s15510_s29, %s11311_s22  ;;  %p11319_p1 = scmp.lt.s32.totalorder %s11317_s30, %s11311_s22 }
 0x821   : > { %p11313_p12 = pnand %p11312_p11, %p11488_p5  ;;  %p11320_p2 = por %p11319_p1, %p11318_p0 }
 0x823   : > { %p11314_p13 = pneg %p11313_p12 }
 0x825   : > { %p11321_p3 = pnand %p11320_p2, %p11314_p13 }
 0x881   : > { %v10583_v27 = vpop.permute.xlu1 %10582  ;;  %v10579_v51 = vpop.permute.xlu0 %10578 }
 0x882   : > { %v10605_v37 = vsel %vm1665_vm9, %v10569_v4, %v10579_v51 }
 0x883   : > { %v10606_v32 = vsel %vm9335_vm7, %v10605_v37, %v10583_v27 }
 0x885   : > { %v10591_v9 = vpop.permute.xlu1 %10590  ;;  %v10587_v24 = vpop.permute.xlu0 %10586 }
 0x886   : > { %v10607_v14 = vsel %vm9383_vm6, %v10606_v32, %v10587_v24 }
 0x887   : > { %v10609_v47 = vsel %vm10608_vm3, %v10607_v14, %v10591_v9 }
 0x889   : > { %v10595_v54 = vpop.permute.xlu0 %10594  ;;  %v10599_v12 = vpop.permute.xlu1 %10598 }
 0x88a   : > { %v10611_v29 = vsel %vm10610_vm12, %v10609_v47, %v10595_v54 }
 0x88b   : > { %v10613_v15 = vsel %vm10612_vm13, %v10611_v29, %v10599_v12 }
 0x88d   : > { %v10603_v59 = vpop.permute.xlu0 %10602 }
 0x88e   : > { %v10615_v50 = vsel %vm10614_vm14, %v10613_v15, %v10603_v59 }
 0x88f   : > { %v10616_v20 = vpack.c.bf16 %v10615_v50, %v10615_v50 }
 0x891   : > { %11213 = vmatmul.mubr.bf16.vlgmr.msra.gmra.mrb[52].mxu1 %v10616_v20 }
 0x892   : > { %11217 = vmatpush3.bf16.msra.mxu1 %v11299_v26  ;;  %11220 = vmatprep.mubr.msk.bf16.mxu1 %vm11383_vm2, %v11381_v40 }
 0x893   : > { %11218 = vmatprep.subr.bf16.mxu1 %v11381_v40  ;;  %v10970_v40 = vld [vmem:[%s15561_s10] ss:$0 sm:$0xff] }
 0x896   : > { %11219 = vmatpush3.bf16.msra.mxu1 %v11300_v28 }
 0x964   : > { %v10722_v7 = vpop.f32.mrb[52].mxu1 }
 0x965   : > { %v10723_v49 = vadd.f32 %v10961_v25, %v10722_v7  ;;  %v11214_v18 = vpop.f32.mrb[53].mxu1 }
 0x966   : > { %v10725_v60 = vpop.f32.mrb[54].mxu1 }
 0x967   : > { %v10728_v11 = vmax.f32 %v10723_v49, 0.0  ;;  %v11215_v16 = vpop.f32.mrb[55].mxu1 }
 0x969   : > { %v10729_v30 = vpack.c.bf16 %v10728_v11, %v10728_v11 }
 0x96b   : > { %11221 = vmatmul.mubr.msk.bf16.vlgmr.msra.gmra.mrb[56].mxu1 %vm9335_vm7, %v10729_v30 }
 0xa3e   : > { %v10790_v56 = vpop.f32.mrb[56].mxu1 }
 0xa3f   : > { %v10791_v62 = vadd.f32 %v10970_v40, %v10790_v56  ;;  %v11222_v35 = vpop.f32.mrb[57].mxu1 }
 0xa40   : > { %v10793_v63 = vpop.f32.mrb[58].mxu1 }
 0xa41   : > { %11301 = vtanh.f32 %v10791_v62  ;;  %v11223_v2 = vpop.f32.mrb[59].mxu1 }
 0xa4b   : > { %v11302_v21 = vpop.eup %11301 }
 0xa4c   : > { %10797 = vst.msk [vmem:[%s382_s16] sm:$0xff] %vm9335_vm7, %v11302_v21 }
 0xa4d   : > { %11324 = shalt.err (!%p11321_p3)
}
 0xa4e   : > { %s11325_s24 = scalar_lea.hbm %s15508_s13, 128  ;;  %s11329_s12 = scalar_lea.hbm %s15562_s11, 512 }
 0xa4f   : > { %p11326_p4 = scmp.ne.s32.totalorder %s15508_s13, %s11325_s24  ;;  %p11330_p9 = scmp.lt.u32.totalorder %s15508_s13, %s15562_s11 }
 0xa50   : > { %p11331_p10 = scmp.lt.u32.totalorder %s11329_s12, %s11325_s24  ;;  %p11333_p12 = scmp.lt.u32.totalorder %s11325_s24, %s15508_s13 }
 0xa51   : > { %p11327_p7 = pnand %p11326_p4, %p11488_p5 }
 0xa52   : > { %p11332_p11 = por %p11331_p10, %p11330_p9 }
 0xa53   : > { %p11328_p8 = pneg %p11327_p7 }
 0xa54   : > { %p11334_p13 = por %p11333_p12, %p11332_p11 }
 0xa56   : > { %p11335_p0 = pnand %p11334_p13, %p11328_p8 }
 0xa58   : > { %11338 = shalt.err (!%p11335_p0)
}
 0xa59   : > { %11231 = dma.vmem_to_hbm [thread:$0]  (%p11488_p5), %s15510_s29, 128, %s15508_s13, %s10799_s14  }
 0xa5a PF: > { %p11237_p1 = scmp.ge.s32.totalorder %s11373_s20, 2  ;;  %s10824_s22 = sand.u32 1, %s11361_s17  }
 0xa5b   : > { %s10825_s30 = scalar_lea.sflag [#allocation3], %s10824_s22 }
 0xa5c   : > { %p11234_p2 = pnand %p11237_p1, %p11492_p6 }
 0xa5e   : > { %11356 = dma.done.wait (!%p11234_p2), %s10825_s30, 128  }
 0xa5f   : > { %11358 = vsyncadd (!%p11234_p2), %s10825_s30, 4294967168  ;;  %p21_p3 = scmp.ge.s32.totalorder %s11475_s23, 6   ;;  %s15652_s17 = smov %s11365_s18 }
 0xa60   : > { %s15653_s18 = smov %s11369_s19  ;;  %s15654_s19 = smov %s11486_s26 }
 0xa61   : > { %s15655_s20 = smov %s11475_s23  ;;  %23 = sbr.rel (!%p21_p3) target bundleno = 3 (0x3), region = 99 }
 0xa68   :  { %10830 = vsyncpa [#allocation3], 1 }
 0xa69   :  { %10832 = vsyncpa [#allocation3 + $0x1], 1 }

</bundles_post_ra>
